<compile_context>
chip_gen: v7x
topology: tpu7x:2x2x1
jax: 0.10.0
libtpu: 0.0.40
codegen_flags: <defaults>
</compile_context>

<pallas_src>
from functools import partial

import jax
import jax.numpy as jnp
from jax import lax
from jax.experimental import pallas as pl
from jax.experimental.pallas import tpu as pltpu


def actor_kernel(T, ci, xv_ref, w_ref, wts_ref, vecs_ref, p_ref):
    xv = xv_ref[...]                       # (bt, n, e)
    Wb = w_ref[...]                        # (bt, n, n)
    bt, n, e = xv.shape

    wts = wts_ref[...]                     # (3, e, e): [w1.T, w2.T, w3.T]
    w1t, w2t, w3t = wts[0], wts[1], wts[2]
    vecs = vecs_ref[...]                   # (5, e): [b1, b2, b3, b4, w4]
    b1 = vecs[0:1]                         # (1, e)
    b2 = vecs[1:2]
    b3 = vecs[2:3]
    b4r = vecs[3:4].reshape(1, 1, 1, e)
    w4r = vecs[4:5].reshape(1, 1, 1, e)

    xf = xv.reshape(bt * n, e)

    # s1 = theta1(xv): one batched-flat MXU matmul.
    s1 = jnp.dot(xf, w1t, preferred_element_type=jnp.float32) + b1     # (bt*n, e)

    # s3 = theta3( sum_i relu(theta4(W[:, i, j, None])) )
    # The (bt, ci, n, e) intermediate is bounded by the ci byte budget chosen
    # on the host.  TODO(synk): if the bundle dump shows a lane relayout on the
    # `[..., None] * w4r` broadcast, restructure to keep e on lanes throughout.
    n_chunks = -(-n // ci)
    if n_chunks == 1:
        t4 = jax.nn.relu(Wb[:, :, :, None] * w4r + b4r)                # (bt, n, n, e)
        s3_pre = jnp.sum(t4, axis=1)                                    # (bt, n, e)
    elif n % ci == 0 and n_chunks > 4:
        # Many chunks: fori_loop keeps a single chunk live (bounded vregs/VMEM).
        def chunk_body(c, acc):
            i0 = pl.multiple_of(c * ci, ci)
            wc = lax.dynamic_slice_in_dim(Wb, i0, ci, axis=1)           # (bt, ci, n)
            t4c = jax.nn.relu(wc[:, :, :, None] * w4r + b4r)
            return acc + jnp.sum(t4c, axis=1)
        s3_pre = lax.fori_loop(0, n_chunks, chunk_body,
                               jnp.zeros((bt, n, e), jnp.float32))
    else:
        s3_pre = jnp.zeros((bt, n, e), jnp.float32)
        for i0 in range(0, n, ci):
            c = min(ci, n - i0)
            t4c = jax.nn.relu(Wb[:, i0:i0 + c, :][:, :, :, None] * w4r + b4r)
            s3_pre = s3_pre + jnp.sum(t4c, axis=1)

    s3 = jnp.dot(s3_pre.reshape(bt * n, e), w3t,
                 preferred_element_type=jnp.float32) + b3               # (bt*n, e)

    # Loop-invariant part of the update.
    s13 = s1 + s3                                                       # (bt*n, e)

    # TODO(synk): at large n, adj duplicates the W block in VMEM; could reuse
    # the W buffer via a scratch or mask per-chunk inside the aggregation.
    adj = jnp.where(Wb > 0, 1.0, 0.0).astype(jnp.float32)               # (bt, n, n)

    if n <= 32:
        # Tiny per-batch matmuls waste the 128/256-wide MXU and pay MRF drain
        # on v5e/v6e; a VPU broadcast-sum is cheaper at this size.
        adj4 = adj[:, :, :, None]
        def aggregate(mu3):
            return jnp.sum(adj4 * mu3[:, None, :, :], axis=2)           # (bt, n, e)
    else:
        def aggregate(mu3):
            return jnp.einsum('bij,bje->bie', adj, mu3,
                              preferred_element_type=jnp.float32)

    # Peeled first iteration: mu starts at 0  =>  adj @ mu = 0  =>  s2 = b2.
    if T <= 0:
        mu = jnp.zeros((bt * n, e), jnp.float32)
    else:
        mu = jax.nn.relu(s13 + b2)                                      # (bt*n, e)
        for _ in range(T - 1):                                          # T static: unrolled
            agg = aggregate(mu.reshape(bt, n, e))
            s2 = jnp.dot(agg.reshape(bt * n, e), w2t,
                         preferred_element_type=jnp.float32) + b2
            mu = jax.nn.relu(s13 + s2)

    # softmax over the node axis (PyTorch dim=1), summed over embedding axis.
    mu3 = mu.reshape(bt, n, e)
    m = jnp.max(mu3, axis=1, keepdims=True)                             # (bt, 1, e)
    ex = jnp.exp(mu3 - m)
    # approx=False keeps agreement with the 1e-4 test tolerance; approx=True
    # (EUP slot, ~2^-12 rel err) is available if the accuracy budget allows.
    inv = pl.reciprocal(jnp.sum(ex, axis=1, keepdims=True), approx=False)
    soft_flat = (ex * inv).reshape(bt * n, e)                           # (bt*n, e)

    # Lane-dense flattened store: sum over e via ones(1,e) @ soft.T so the
    # result lands with (b*n) on lanes -> single unmasked row store.
    ones_e = jnp.ones((1, e), jnp.float32)
    p_row = jnp.dot(ones_e, soft_flat.T,
                    preferred_element_type=jnp.float32)                 # (1, bt*n)
    p_ref[...] = p_row.reshape(1, 1, bt * n)


def _chip_info():
    """Return (vmem_capacity_bytes, is_v7x_like) with conservative fallbacks."""
    kind = ""
    try:
        kind = jax.devices()[0].device_kind.lower()
    except Exception:
        pass
    is_v7 = "v7" in kind
    vmem = (64 << 20) if is_v7 else (128 << 20)
    try:
        vmem = int(pltpu.get_tpu_info().vmem_capacity_bytes)
    except Exception:
        pass
    return vmem, is_v7


def _resident_bytes(bb, n, e):
    # double-buffered xv/W input blocks + adj copy + ~6 (bb*n, e) f32 slabs
    return 4 * bb * (2 * (n * n + n * e) + n * n + 6 * n * e) + 8 * (3 * e * e + 5 * e)


def _pick_block_b(B, n, e, budget_bytes, multi_core):
    divs = [d for d in range(1, B + 1) if B % d == 0]
    fits = [d for d in divs if _resident_bytes(d, n, e) <= budget_bytes] or [1]
    if multi_core:
        # v7x: keep >= 2 grid steps (ideally an even count) so both TCs work.
        pool = ([d for d in fits if d < B and (B // d) % 2 == 0]
                or [d for d in fits if d < B] or fits)
    else:
        # v5e/v6e: one TensorCore -> fewest grid steps that fit VMEM.
        pool = fits
    # Prefer lane-dense flattened output blocks (block_b * n % 128 == 0).
    lane_dense = [d for d in pool if (d * n) % 128 == 0]
    return max(lane_dense or pool)


def actor_forward(xv, W, params, T, block_b=None):
    B, n, e = xv.shape
    assert W.shape == (B, n, n)
    w1, b1, w2, b2, w3, b3, w4, b4 = params

    vmem_cap, multi_core = _chip_info()
    # ~100 MiB scoped VMEM on 128-MiB chips, ~50 MiB on v7x (64 MiB physical).
    vmem_limit = int(min(100 << 20, vmem_cap * 0.78))
    budget = (vmem_limit * 3) // 4

    if block_b is None:
        block_b = _pick_block_b(B, n, e, budget, multi_core)
    assert B % block_b == 0
    grid_n = B // block_b

    # theta4 chunk size from a byte budget on the (bt, ci, n, e) intermediate.
    chunk_budget = max(1 << 20, vmem_limit // 8)
    ci = min(n, max(8, chunk_budget // max(1, block_b * n * e * 4)))
    ci = max(1, ci)

    # Host-side glue: pre-transpose matmul weights (no in-kernel .T) and stack
    # all parameters into two inputs (fewer in_specs / DMA streams).
    wts = jnp.stack([w1.T, w2.T, w3.T]).astype(jnp.float32)                 # (3, e, e)
    vecs = jnp.stack([b1, b2, b3, b4, w4.reshape(e)]).astype(jnp.float32)   # (5, e)

    out = pl.pallas_call(
        partial(actor_kernel, T, ci),
        out_shape=jax.ShapeDtypeStruct((grid_n, 1, block_b * n), jnp.float32),
        grid_spec=pltpu.PrefetchScalarGridSpec(
            num_scalar_prefetch=0,
            grid=(grid_n,),
            in_specs=[
                pl.BlockSpec((block_b, n, e), lambda g: (g, 0, 0)),   # xv chunk
                pl.BlockSpec((block_b, n, n), lambda g: (g, 0, 0)),   # W chunk
                pl.BlockSpec((3, e, e), lambda g: (0, 0, 0)),         # stacked W^T
                pl.BlockSpec((5, e), lambda g: (0, 0)),               # biases + w4
            ],
            out_specs=pl.BlockSpec((1, 1, block_b * n), lambda g: (g, 0, 0)),
        ),
        compiler_params=pltpu.CompilerParams(
            dimension_semantics=("parallel",),
            vmem_limit_bytes=vmem_limit),
    )(xv, W, wts, vecs)
    return out.reshape(B, n)


def actor_ref(xv, W, params, T):
    """Pure-JAX mirror of the PyTorch forward (for verification)."""
    w1, b1, w2, b2, w3, b3, w4, b4 = params
    lin = lambda x, w, b: jnp.matmul(x, w.T) + b
    B, n, e = xv.shape
    s1 = lin(xv, w1, b1)
    mu = jnp.zeros((1, n, e), jnp.float32)
    adj = jnp.where(W > 0, jnp.ones_like(W), jnp.zeros_like(W))
    s2 = lin(jnp.matmul(adj, mu), w2, b2)
    s3 = lin(jnp.sum(jax.nn.relu(lin(W[..., None], w4, b4)), axis=1), w3, b3)
    for _ in range(T):
        mu = jax.nn.relu(s1 + s2 + s3)
        s2 = lin(jnp.matmul(adj, mu), w2, b2)
    soft = jax.nn.softmax(mu, axis=1)
    return jnp.sum(soft, axis=2)


if __name__ == "__main__":
    B, n, e, T = 16, 8, 32, 3

    key = jax.random.PRNGKey(0)
    ks = jax.random.split(key, 10)

    # deterministic synthetic parameters (shapes as in Actor.__init__)
    w1 = jax.random.normal(ks[0], (e, e), jnp.float32) * 0.1
    b1 = jax.random.normal(ks[1], (e,), jnp.float32) * 0.1
    w2 = jax.random.normal(ks[2], (e, e), jnp.float32) * 0.1
    b2 = jax.random.normal(ks[3], (e,), jnp.float32) * 0.1
    w3 = jax.random.normal(ks[4], (e, e), jnp.float32) * 0.1
    b3 = jax.random.normal(ks[5], (e,), jnp.float32) * 0.1
    w4 = jax.random.normal(ks[6], (e, 1), jnp.float32) * 0.1
    b4 = jax.random.normal(ks[7], (e,), jnp.float32) * 0.1
    # theta5 / theta6 / theta7 exist in __init__ but are unused in forward.
    params = (w1, b1, w2, b2, w3, b3, w4, b4)

    xv = jax.random.normal(ks[8], (B, n, e), jnp.float32)
    W = jax.random.normal(ks[9], (B, n, n), jnp.float32)  # mixed signs -> nontrivial adj

    p = actor_forward(xv, W, params, T)
    p = jax.block_until_ready(p)

    p_ref = actor_ref(xv, W, params, T)
    assert p.shape == (B, n)
    assert jnp.allclose(p, p_ref, rtol=1e-4, atol=1e-4), \
        float(jnp.max(jnp.abs(p - p_ref)))

    print("KERNEL_OK")
</pallas_src>

<mosaic_0001>
module attributes {stable_mosaic.version = 11 : i64} {
  func.func @actor_kernel(%arg0: i32, %arg1: memref<16x8x32xf32, #tpu.memory_space<vmem>>, %arg2: memref<16x8x8xf32, #tpu.memory_space<vmem>>, %arg3: memref<3x32x32xf32, #tpu.memory_space<vmem>>, %arg4: memref<5x32xf32, #tpu.memory_space<vmem>>, %arg5: memref<1x1x128xf32, #tpu.memory_space<vmem>>) attributes {dimension_semantics = [#tpu.dimension_semantics<parallel>], iteration_bounds = array<i64: 1>, scalar_prefetch = 0 : i64, scratch_operands = 0 : i64, tpu.core_type = #tpu.core_type<tc>, window_params = [{transform_indices = @transform_0, window_bounds = array<i64: 16, 8, 32>}, {transform_indices = @transform_1, window_bounds = array<i64: 16, 8, 8>}, {pipeline_mode = #tpu.pipeline_mode<synchronous>, transform_indices = @transform_2, window_bounds = array<i64: 3, 32, 32>}, {pipeline_mode = #tpu.pipeline_mode<synchronous>, transform_indices = @transform_3, window_bounds = array<i64: 5, 32>}, {transform_indices = @transform_4, window_bounds = array<i64: 1, 1, 128>}]} {
    %c0 = arith.constant 0 : index
    %c0_0 = arith.constant 0 : index
    %c0_1 = arith.constant 0 : index
    %0 = vector.load %arg1[%c0, %c0_0, %c0_1] : memref<16x8x32xf32, #tpu.memory_space<vmem>>, vector<16x8x32xf32>
    %c0_2 = arith.constant 0 : index
    %c0_3 = arith.constant 0 : index
    %c0_4 = arith.constant 0 : index
    %1 = vector.load %arg2[%c0_2, %c0_3, %c0_4] : memref<16x8x8xf32, #tpu.memory_space<vmem>>, vector<16x8x8xf32>
    %c0_5 = arith.constant 0 : index
    %c0_6 = arith.constant 0 : index
    %c0_7 = arith.constant 0 : index
    %2 = vector.load %arg3[%c0_5, %c0_6, %c0_7] : memref<3x32x32xf32, #tpu.memory_space<vmem>>, vector<3x32x32xf32>
    %3 = vector.extract_strided_slice %2 {offsets = [0, 0, 0], sizes = [1, 32, 32], strides = [1, 1, 1]} : vector<3x32x32xf32> to vector<1x32x32xf32>
    %4 = vector.shape_cast %3 : vector<1x32x32xf32> to vector<32x32xf32>
    %5 = vector.extract_strided_slice %2 {offsets = [1, 0, 0], sizes = [1, 32, 32], strides = [1, 1, 1]} : vector<3x32x32xf32> to vector<1x32x32xf32>
    %6 = vector.shape_cast %5 : vector<1x32x32xf32> to vector<32x32xf32>
    %7 = vector.extract_strided_slice %2 {offsets = [2, 0, 0], sizes = [1, 32, 32], strides = [1, 1, 1]} : vector<3x32x32xf32> to vector<1x32x32xf32>
    %8 = vector.shape_cast %7 : vector<1x32x32xf32> to vector<32x32xf32>
    %c0_8 = arith.constant 0 : index
    %c0_9 = arith.constant 0 : index
    %9 = vector.load %arg4[%c0_8, %c0_9] : memref<5x32xf32, #tpu.memory_space<vmem>>, vector<5x32xf32>
    %10 = vector.extract_strided_slice %9 {offsets = [0, 0], sizes = [1, 32], strides = [1, 1]} : vector<5x32xf32> to vector<1x32xf32>
    %11 = vector.extract_strided_slice %9 {offsets = [1, 0], sizes = [1, 32], strides = [1, 1]} : vector<5x32xf32> to vector<1x32xf32>
    %12 = vector.extract_strided_slice %9 {offsets = [2, 0], sizes = [1, 32], strides = [1, 1]} : vector<5x32xf32> to vector<1x32xf32>
    %13 = vector.extract_strided_slice %9 {offsets = [3, 0], sizes = [1, 32], strides = [1, 1]} : vector<5x32xf32> to vector<1x32xf32>
    %14 = vector.shape_cast %13 : vector<1x32xf32> to vector<1x1x1x32xf32>
    %15 = vector.extract_strided_slice %9 {offsets = [4, 0], sizes = [1, 32], strides = [1, 1]} : vector<5x32xf32> to vector<1x32xf32>
    %16 = vector.shape_cast %15 : vector<1x32xf32> to vector<1x1x1x32xf32>
    %17 = vector.shape_cast %0 : vector<16x8x32xf32> to vector<128x32xf32>
    %cst = arith.constant dense<0.000000e+00> : vector<128x32xf32>
    %18 = tpu.matmul %17, %4, %cst {dimension_numbers = #tpu.dot_dimension_numbers<[1], [0], [0], [1], [0, 0, 1, 1], [], []>} : vector<128x32xf32>, vector<32x32xf32>, vector<128x32xf32> -> vector<128x32xf32>
    %19 = vector.broadcast %10 : vector<1x32xf32> to vector<128x32xf32>
    %20 = arith.addf %18, %19 : vector<128x32xf32>
    %21 = vector.shape_cast %1 : vector<16x8x8xf32> to vector<16x8x8x1xf32>
    %22 = vector.broadcast %21 : vector<16x8x8x1xf32> to vector<16x8x8x32xf32>
    %23 = vector.broadcast %16 : vector<1x1x1x32xf32> to vector<16x8x8x32xf32>
    %24 = arith.mulf %22, %23 : vector<16x8x8x32xf32>
    %25 = vector.broadcast %14 : vector<1x1x1x32xf32> to vector<16x8x8x32xf32>
    %26 = arith.addf %24, %25 : vector<16x8x8x32xf32>
    %cst_10 = arith.constant 0.000000e+00 : f32
    %27 = vector.broadcast %cst_10 : f32 to vector<16x8x8x32xf32>
    %28 = arith.maximumf %26, %27 : vector<16x8x8x32xf32>
    %cst_11 = arith.constant dense<0.000000e+00> : vector<16x8x32xf32>
    %29 = vector.multi_reduction <add>, %28, %cst_11 [1] : vector<16x8x8x32xf32> to vector<16x8x32xf32>
    %30 = vector.shape_cast %29 : vector<16x8x32xf32> to vector<128x32xf32>
    %cst_12 = arith.constant dense<0.000000e+00> : vector<128x32xf32>
    %31 = tpu.matmul %30, %8, %cst_12 {dimension_numbers = #tpu.dot_dimension_numbers<[1], [0], [0], [1], [0, 0, 1, 1], [], []>} : vector<128x32xf32>, vector<32x32xf32>, vector<128x32xf32> -> vector<128x32xf32>
    %32 = vector.broadcast %12 : vector<1x32xf32> to vector<128x32xf32>
    %33 = arith.addf %31, %32 : vector<128x32xf32>
    %34 = arith.addf %20, %33 : vector<128x32xf32>
    %cst_13 = arith.constant 0.000000e+00 : f32
    %35 = vector.broadcast %cst_13 : f32 to vector<16x8x8xf32>
    %36 = arith.cmpf ogt, %1, %35 : vector<16x8x8xf32>
    %cst_14 = arith.constant 1.000000e+00 : f32
    %cst_15 = arith.constant 0.000000e+00 : f32
    %37 = vector.broadcast %cst_14 : f32 to vector<16x8x8xf32>
    %38 = vector.broadcast %cst_15 : f32 to vector<16x8x8xf32>
    %39 = arith.select %36, %37, %38 : vector<16x8x8xi1>, vector<16x8x8xf32>
    %40 = vector.shape_cast %39 : vector<16x8x8xf32> to vector<16x8x8x1xf32>
    %41 = vector.broadcast %11 : vector<1x32xf32> to vector<128x32xf32>
    %42 = arith.addf %34, %41 : vector<128x32xf32>
    %cst_16 = arith.constant 0.000000e+00 : f32
    %43 = vector.broadcast %cst_16 : f32 to vector<128x32xf32>
    %44 = arith.maximumf %42, %43 : vector<128x32xf32>
    %45 = vector.shape_cast %44 : vector<128x32xf32> to vector<16x8x32xf32>
    %46 = vector.shape_cast %45 : vector<16x8x32xf32> to vector<16x1x8x32xf32>
    %47 = vector.broadcast %40 : vector<16x8x8x1xf32> to vector<16x8x8x32xf32>
    %48 = vector.broadcast %46 : vector<16x1x8x32xf32> to vector<16x8x8x32xf32>
    %49 = arith.mulf %47, %48 : vector<16x8x8x32xf32>
    %cst_17 = arith.constant dense<0.000000e+00> : vector<16x8x32xf32>
    %50 = vector.multi_reduction <add>, %49, %cst_17 [2] : vector<16x8x8x32xf32> to vector<16x8x32xf32>
    %51 = vector.shape_cast %50 : vector<16x8x32xf32> to vector<128x32xf32>
    %cst_18 = arith.constant dense<0.000000e+00> : vector<128x32xf32>
    %52 = tpu.matmul %51, %6, %cst_18 {dimension_numbers = #tpu.dot_dimension_numbers<[1], [0], [0], [1], [0, 0, 1, 1], [], []>} : vector<128x32xf32>, vector<32x32xf32>, vector<128x32xf32> -> vector<128x32xf32>
    %53 = vector.broadcast %11 : vector<1x32xf32> to vector<128x32xf32>
    %54 = arith.addf %52, %53 : vector<128x32xf32>
    %55 = arith.addf %34, %54 : vector<128x32xf32>
    %cst_19 = arith.constant 0.000000e+00 : f32
    %56 = vector.broadcast %cst_19 : f32 to vector<128x32xf32>
    %57 = arith.maximumf %55, %56 : vector<128x32xf32>
    %58 = vector.shape_cast %57 : vector<128x32xf32> to vector<16x8x32xf32>
    %59 = vector.shape_cast %58 : vector<16x8x32xf32> to vector<16x1x8x32xf32>
    %60 = vector.broadcast %40 : vector<16x8x8x1xf32> to vector<16x8x8x32xf32>
    %61 = vector.broadcast %59 : vector<16x1x8x32xf32> to vector<16x8x8x32xf32>
    %62 = arith.mulf %60, %61 : vector<16x8x8x32xf32>
    %cst_20 = arith.constant dense<0.000000e+00> : vector<16x8x32xf32>
    %63 = vector.multi_reduction <add>, %62, %cst_20 [2] : vector<16x8x8x32xf32> to vector<16x8x32xf32>
    %64 = vector.shape_cast %63 : vector<16x8x32xf32> to vector<128x32xf32>
    %cst_21 = arith.constant dense<0.000000e+00> : vector<128x32xf32>
    %65 = tpu.matmul %64, %6, %cst_21 {dimension_numbers = #tpu.dot_dimension_numbers<[1], [0], [0], [1], [0, 0, 1, 1], [], []>} : vector<128x32xf32>, vector<32x32xf32>, vector<128x32xf32> -> vector<128x32xf32>
    %66 = vector.broadcast %11 : vector<1x32xf32> to vector<128x32xf32>
    %67 = arith.addf %65, %66 : vector<128x32xf32>
    %68 = arith.addf %34, %67 : vector<128x32xf32>
    %cst_22 = arith.constant 0.000000e+00 : f32
    %69 = vector.broadcast %cst_22 : f32 to vector<128x32xf32>
    %70 = arith.maximumf %68, %69 : vector<128x32xf32>
    %71 = vector.shape_cast %70 : vector<128x32xf32> to vector<16x8x32xf32>
    %cst_23 = arith.constant dense<0xFF800000> : vector<16x32xf32>
    %72 = vector.multi_reduction <maximumf>, %71, %cst_23 [1] : vector<16x8x32xf32> to vector<16x32xf32>
    %73 = vector.shape_cast %72 : vector<16x32xf32> to vector<16x1x32xf32>
    %74 = vector.broadcast %73 : vector<16x1x32xf32> to vector<16x8x32xf32>
    %75 = arith.subf %71, %74 : vector<16x8x32xf32>
    %76 = math.exp %75 : vector<16x8x32xf32>
    %cst_24 = arith.constant dense<0.000000e+00> : vector<16x32xf32>
    %77 = vector.multi_reduction <add>, %76, %cst_24 [1] : vector<16x8x32xf32> to vector<16x32xf32>
    %78 = vector.shape_cast %77 : vector<16x32xf32> to vector<16x1x32xf32>
    %79 = tpu.reciprocal %78 : vector<16x1x32xf32> -> vector<16x1x32xf32>
    %80 = vector.broadcast %79 : vector<16x1x32xf32> to vector<16x8x32xf32>
    %81 = arith.mulf %76, %80 : vector<16x8x32xf32>
    %82 = vector.shape_cast %81 : vector<16x8x32xf32> to vector<128x32xf32>
    %cst_25 = arith.constant 1.000000e+00 : f32
    %83 = vector.broadcast %cst_25 : f32 to vector<1x32xf32>
    %84 = tpu.transpose %82, [1, 0] : vector<128x32xf32> -> vector<32x128xf32>
    %cst_26 = arith.constant dense<0.000000e+00> : vector<1x128xf32>
    %85 = tpu.matmul %83, %84, %cst_26 {dimension_numbers = #tpu.dot_dimension_numbers<[1], [0], [0], [1], [0, 0, 1, 1], [], []>} : vector<1x32xf32>, vector<32x128xf32>, vector<1x128xf32> -> vector<1x128xf32>
    %86 = vector.shape_cast %85 : vector<1x128xf32> to vector<1x1x128xf32>
    %c0_27 = arith.constant 0 : index
    %c0_28 = arith.constant 0 : index
    %c0_29 = arith.constant 0 : index
    %87 = vector.load %arg5[%c0_27, %c0_28, %c0_29] : memref<1x1x128xf32, #tpu.memory_space<vmem>>, vector<1x1x128xf32>
    tpu.vector_store %arg5[%c0_27, %c0_28, %c0_29], %86 {strides = array<i32>} : memref<1x1x128xf32, #tpu.memory_space<vmem>>, vector<1x1x128xf32>,
    return
  }
  func.func @transform_0(%arg0: i32) -> (i32, i32, i32) {
    %c0_i32 = arith.constant 0 : i32
    %c0_i32_0 = arith.constant 0 : i32
    %c0_i32_1 = arith.constant 0 : i32
    return %arg0, %c0_i32, %c0_i32_0 : i32, i32, i32
  }
  func.func @transform_1(%arg0: i32) -> (i32, i32, i32) {
    %c0_i32 = arith.constant 0 : i32
    %c0_i32_0 = arith.constant 0 : i32
    %c0_i32_1 = arith.constant 0 : i32
    return %arg0, %c0_i32, %c0_i32_0 : i32, i32, i32
  }
  func.func @transform_2(%arg0: i32) -> (i32, i32, i32) {
    %c0_i32 = arith.constant 0 : i32
    %c0_i32_0 = arith.constant 0 : i32
    %c0_i32_1 = arith.constant 0 : i32
    %c0_i32_2 = arith.constant 0 : i32
    return %c0_i32, %c0_i32_0, %c0_i32_1 : i32, i32, i32
  }
  func.func @transform_3(%arg0: i32) -> (i32, i32) {
    %c0_i32 = arith.constant 0 : i32
    %c0_i32_0 = arith.constant 0 : i32
    %c0_i32_1 = arith.constant 0 : i32
    return %c0_i32, %c0_i32_0 : i32, i32
  }
  func.func @transform_4(%arg0: i32) -> (i32, i32, i32) {
    %c0_i32 = arith.constant 0 : i32
    %c0_i32_0 = arith.constant 0 : i32
    %c0_i32_1 = arith.constant 0 : i32
    return %arg0, %c0_i32, %c0_i32_0 : i32, i32, i32
  }
}

</mosaic_0001>

<bundles_post_ra>
// kernel: tpu_custom_call.1
= control target key start
LH: loop header
LB: loop body
LE: loop exit
PB: predicated region body
PF: predicated region fallthrough
CT: control target
= control target key end

     0   :  { %9 = vsyncpa [#allocation3], 0  ;;  %s10508_s0 = inlined_call_operand.hbm [shape: f32[16,8,32], index: 0, kind: input, shape index: {}]   ;;  %s10509_s1 = inlined_call_operand.hbm [shape: f32[16,8,8], index: 1, kind: input, shape index: {}]   ;;  %s10510_s2 = inlined_call_operand.hbm [shape: f32[3,32,32], index: 2, kind: input, shape index: {}]   ;;  %s10511_s3 = inlined_call_operand.hbm [shape: f32[5,32], index: 3, kind: input, shape index: {}]   ;;  %s10512_s4 = inlined_call_operand.hbm [shape: f32[1,1,128], index: 4, kind: output, shape index: {}]  }
   0x1   :  { %10 = vsyncpa [#allocation6], 0 }
   0x2   :  { %11 = vsyncpa [#allocation9], 0 }
   0x3   :  { %12 = vsyncpa [#allocation4], 0  ;;  %s7082_s15 = smov [#allocation5]   ;;  %s7083_s17 = smov [#allocation2]  }
   0x4   :  { %s30_s16 = sshll.u32 %s7082_s15, 4  ;;  %s18_s18 = sshll.u32 %s7083_s17, 4  ;;  %s31_s16 = int_to_ptr.vmem [resolvable:$true] %s30_s16  ;;  %s7118_s18 = int_to_ptr.vmem [resolvable:$true] %s18_s18 }
   0x5   :  { %s6964_s21 = scalar_lea.hbm %s10509_s1, 2048 }
   0x6   :  { %p6965_p0 = scmp.ne.s32.totalorder %s10509_s1, %s6964_s21  ;;  %p6968_p1 = scmp.lt.u32.totalorder %s6964_s21, %s10509_s1 }
   0x8   :  { %p6970_p2 = pnand %p6968_p1, %p6965_p0 }
   0xa   :  { %6973 = shalt.err (!%p6970_p2)
}
   0xb   :  { %s6974_s26 = scalar_lea.vmem %s31_s16, 2048  ;;  %p6979_p4 = scmp.lt.s32.totalorder %s31_s16, %s31_s16 }
   0xc   :  { %p6975_p3 = scmp.ne.s32.totalorder %s31_s16, %s6974_s26  ;;  %p6980_p5 = scmp.lt.s32.totalorder %s6974_s26, %s6974_s26 }
   0xe   :  { %p6981_p6 = por %p6980_p5, %p6979_p4 }
  0x10   :  { %p6982_p7 = pnand %p6981_p6, %p6975_p3 }
  0x12   :  { %6985 = shalt.err (!%p6982_p7)
}
  0x13   :  { %s7084_s27 = smov 128   ;;  %s7085_s28 = smov 8  }
  0x14   :  { %36 = dma.hbm_to_vmem [thread:$0]  %s10509_s1, 2048, %s31_s16, [#allocation6], %s7084_s27, %s7084_s27, %s7085_s28  }
  0x15   :  { %s6986_s7 = scalar_lea.hbm %s10508_s0, 2048 }
  0x16   :  { %p6987_p8 = scmp.ne.s32.totalorder %s10508_s0, %s6986_s7  ;;  %p6990_p9 = scmp.lt.u32.totalorder %s6986_s7, %s10508_s0 }
  0x18   :  { %p6992_p10 = pnand %p6990_p9, %p6987_p8 }
  0x1a   :  { %6995 = shalt.err (!%p6992_p10)
}
  0x1b   :  { %s6996_s12 = scalar_lea.vmem %s7118_s18, 2048  ;;  %p7001_p12 = scmp.lt.s32.totalorder %s7118_s18, %s7118_s18 }
  0x1c   :  { %p6997_p11 = scmp.ne.s32.totalorder %s7118_s18, %s6996_s12  ;;  %p7002_p13 = scmp.lt.s32.totalorder %s6996_s12, %s6996_s12 }
  0x1e   :  { %p7003_p0 = por %p7002_p13, %p7001_p12 }
  0x20   :  { %p7004_p1 = pnand %p7003_p0, %p6997_p11 }
  0x22   :  { %7007 = shalt.err (!%p7004_p1)
}
  0x23   :  { %24 = dma.hbm_to_vmem [thread:$0]  %s10508_s0, 2048, %s7118_s18, [#allocation3], %s7084_s27, %s7084_s27, %s7085_s28  }
  0x24   :  { %s7086_s14 = smov [#allocation7]   ;;  %s7087_s16 = smov [#allocation8]  }
  0x25   :  { %s42_s15 = sshll.u32 %s7086_s14, 4  ;;  %s55_s17 = sshll.u32 %s7087_s16, 4  ;;  %s43_s15 = int_to_ptr.vmem [resolvable:$true] %s42_s15  ;;  %s56_s17 = int_to_ptr.vmem [resolvable:$true] %s55_s17 }
  0x26   :  { %s7008_s21 = scalar_lea.hbm %s10510_s2, 1536 }
  0x27   :  { %p7009_p2 = scmp.ne.s32.totalorder %s10510_s2, %s7008_s21  ;;  %p7012_p3 = scmp.lt.u32.totalorder %s7008_s21, %s10510_s2 }
  0x29   :  { %p7014_p4 = pnand %p7012_p3, %p7009_p2 }
  0x2b   :  { %7017 = shalt.err (!%p7014_p4)
}
  0x2c   :  { %s7018_s0 = scalar_lea.vmem %s43_s15, 1536  ;;  %p7023_p6 = scmp.lt.s32.totalorder %s43_s15, %s43_s15 }
  0x2d   :  { %p7019_p5 = scmp.ne.s32.totalorder %s43_s15, %s7018_s0  ;;  %p7024_p7 = scmp.lt.s32.totalorder %s7018_s0, %s7018_s0 }
  0x2f   :  { %p7025_p8 = por %p7024_p7, %p7023_p6 }
  0x31   :  { %p7026_p9 = pnand %p7025_p8, %p7019_p5 }
  0x33   :  { %7029 = shalt.err (!%p7026_p9)
}
  0x34   :  { %48 = dma.hbm_to_vmem [thread:$0]  %s10510_s2, 1536, %s43_s15, [#allocation6], %s7084_s27, %s7084_s27, %s7085_s28  }
  0x35   :  { %s7030_s5 = scalar_lea.hbm %s10511_s3, 128 }
  0x36   :  { %p7031_p10 = scmp.ne.s32.totalorder %s10511_s3, %s7030_s5  ;;  %p7034_p11 = scmp.lt.u32.totalorder %s7030_s5, %s10511_s3 }
  0x38   :  { %p7036_p12 = pnand %p7034_p11, %p7031_p10 }
  0x3a   :  { %7039 = shalt.err (!%p7036_p12)
}
  0x3b   :  { %s7040_s10 = scalar_lea.vmem %s56_s17, 128  ;;  %p7045_p0 = scmp.lt.s32.totalorder %s56_s17, %s56_s17 }
  0x3c   :  { %p7041_p13 = scmp.ne.s32.totalorder %s56_s17, %s7040_s10  ;;  %p7046_p1 = scmp.lt.s32.totalorder %s7040_s10, %s7040_s10 }
  0x3e   :  { %p7047_p2 = por %p7046_p1, %p7045_p0 }
  0x40   :  { %p7048_p3 = pnand %p7047_p2, %p7041_p13 }
  0x42   :  { %7051 = shalt.err (!%p7048_p3)
}
  0x43   :  { %58 = dma.hbm_to_vmem [thread:$0]  %s10511_s3, 128, %s56_s17, [#allocation9]  }
  0x44   :  { %7074 = dma.done.wait [#allocation3], 2048  }
  0x45   :  { %7075 = vsyncadd [#allocation3], 4294965248 }
  0x46   :  { %7076 = dma.done.wait [#allocation6], 3584  }
  0x47   :  { %7077 = vsyncadd [#allocation6], 4294963712 }
  0x48   :  { %7078 = dma.done.wait [#allocation9], 128  }
  0x49   :  { %7079 = vsyncadd [#allocation9], 4294967168  ;;  %v116_v0 = vlaneseq  ;;  %v7190_v4 = vld [vmem:[#allocation5 + $0x8] sm:$0xff]  ;;  %v7192_v5 = vld [vmem:[#allocation5] sm:$0xff]  ;;  %vm120_vm0 = vcmask 261120   ;;  %s7092_s3 = smov [#allocation10]  }
  0x4a   :  { %v7226_v20 = vld [vmem:[#allocation5 + $0x10] sm:$0xff]  ;;  %v103_v21 = vld [vmem:[#allocation7] sm:$0xff]  ;;  %v104_v22 = vld [vmem:[#allocation7 + $0x8] sm:$0xff]  ;;  %s6404_s28 = sshll.u32 %s7092_s3, 4  ;;  %s6405_s28 = int_to_ptr.vmem [resolvable:$true] %s6404_s28 }
  0x4b   :  { %v7182_v1 = vshrl.u32 %v116_v0, 7  ;;  %v105_v25 = vld [vmem:[#allocation7 + $0x10] sm:$0xff]  ;;  %v106_v26 = vld [vmem:[#allocation7 + $0x18] sm:$0xff]  ;;  %v6756_v27 = vpack.c.bf16 %v104_v22, %v103_v21  ;;  %v71_v32 = vld [vmem:[#allocation2] sm:$0xff]  ;;  %s7052_s11 = scalar_lea.vmem %s6405_s28, 16  ;;  %s7056_s12 = scalar_lea.vmem %s6405_s28, 32 }
  0x4c   :  { %v6760_v28 = vpack.c.bf16 %v106_v26, %v105_v25  ;;  %v7236_v31 = vld [vmem:[#allocation5 + $0x18] sm:$0xff]  ;;  %6601 = vmatprep.mubr.msk.f32.mxu0 %vm120_vm0, %v71_v32  ;;  %v72_v36 = vld [vmem:[#allocation2 + $0x8] sm:$0xff]  ;;  %v73_v37 = vld [vmem:[#allocation2 + $0x10] sm:$0xff]  ;;  %p7053_p4 = scmp.ne.s32.totalorder %s6405_s28, %s7052_s11  ;;  %p7057_p5 = scmp.lt.s32.totalorder %s6405_s28, %s6405_s28 }
  0x4d   :  { %v7185_v2 = vsub.s32 0, %v7182_v1  ;;  %v7188_v3 = vsub.s32 1, %v7182_v1  ;;  %v7203_v10 = vsub.s32 2, %v7182_v1  ;;  %v7206_v11 = vsub.s32 3, %v7182_v1  ;;  %6757 = vmatprep.subr.bf16.mxu0 %v6756_v27  ;;  %6820 = vmatprep.subr.bf16.mxu1 %v6756_v27  ;;  %v111_v40 = vld [vmem:[#allocation7 + $0x40] sm:$0xff]  ;;  %v112_v41 = vld [vmem:[#allocation7 + $0x48] sm:$0xff]  ;;  %p7058_p6 = scmp.lt.s32.totalorder %s7056_s12, %s7052_s11 }
  0x4e   :  { %v7213_v14 = vsub.s32 4, %v7182_v1  ;;  %v7224_v19 = vsub.s32 5, %v7182_v1  ;;  %6759 = vmatpush3.bf16.msra.mxu0 %v6756_v27  ;;  %6822 = vmatpush3.bf16.msra.mxu1 %v6756_v27  ;;  %v7244_v35 = vsub.s32 6, %v7182_v1  ;;  %v74_v42 = vld [vmem:[#allocation2 + $0x18] sm:$0xff]  ;;  %v6764_v43 = vpack.c.bf16 %v112_v41, %v111_v40  ;;  %v75_v44 = vld [vmem:[#allocation2 + $0x20] sm:$0xff]  ;;  %v113_v48 = vld [vmem:[#allocation7 + $0x50] sm:$0xff] }
  0x4f   :  { %v373_v6 = vrot.slane %v7190_v4, %v7185_v2  ;;  %v317_v7 = vrot.slane %v7192_v5, %v7185_v2  ;;  %v380_v8 = vrot.slane %v7190_v4, %v7188_v3  ;;  %v324_v9 = vrot.slane %v7192_v5, %v7188_v3  ;;  %6761 = vmatprep.subr.bf16.mxu0 %v6760_v28  ;;  %v114_v49 = vld [vmem:[#allocation7 + $0x58] sm:$0xff]  ;;  %v76_v50 = vld [vmem:[#allocation2 + $0x28] sm:$0xff]  ;;  %v77_v52 = vld [vmem:[#allocation2 + $0x30] sm:$0xff]  ;;  %p7059_p7 = por %p7058_p6, %p7057_p5 }
  0x50   :  { %v387_v12 = vrot.slane %v7190_v4, %v7203_v10  ;;  %v331_v13 = vrot.slane %v7192_v5, %v7203_v10  ;;  %v394_v15 = vrot.slane %v7190_v4, %v7206_v11  ;;  %v338_v16 = vrot.slane %v7192_v5, %v7206_v11  ;;  %6821 = vmatprep.subr.bf16.mxu1 %v6760_v28  ;;  %v78_v55 = vld [vmem:[#allocation2 + $0x38] sm:$0xff]  ;;  %v91_v60 = vld [vmem:[#allocation5 + $0x20] sm:$0xff]  ;;  %v7298_v21 = vld [vmem:[#allocation5 + $0x30] sm:$0xff] }
  0x51   :  { %375 = vbcast.lane.b32.xlu1 %v373_v6, 256  ;;  %319 = vbcast.lane.b32.xlu0 %v317_v7, 256  ;;  %v401_v17 = vrot.slane %v7190_v4, %v7213_v14  ;;  %v345_v18 = vrot.slane %v7192_v5, %v7213_v14  ;;  %v429_v23 = vrot.slane %v7226_v20, %v7185_v2  ;;  %v7257_v47 = vsub.s32 7, %v7182_v1  ;;  %v92_v1 = vld [vmem:[#allocation5 + $0x28] sm:$0xff]  ;;  %v7306_v25 = vld [vmem:[#allocation5 + $0x38] sm:$0xff]  ;;  %p7060_p8 = pnand %p7059_p7, %p7053_p4 }
  0x52   :  { %v352_v24 = vrot.slane %v7192_v5, %v7224_v19  ;;  %v408_v29 = vrot.slane %v7190_v4, %v7224_v19  ;;  %v436_v30 = vrot.slane %v7226_v20, %v7188_v3  ;;  %v492_v33 = vrot.slane %v7236_v31, %v7188_v3  ;;  %6763 = vmatpush3.bf16.msra.mxu0 %v6760_v28 }
  0x53   :  { %v485_v34 = vrot.slane %v7236_v31, %v7185_v2  ;;  %6823 = vmatpush3.bf16.msra.mxu1 %v6760_v28  ;;  %v443_v38 = vrot.slane %v7226_v20, %v7203_v10  ;;  %v359_v39 = vrot.slane %v7192_v5, %v7244_v35  ;;  %v499_v45 = vrot.slane %v7236_v31, %v7203_v10 }
  0x54   :  { %v415_v46 = vrot.slane %v7190_v4, %v7244_v35  ;;  %6765 = vmatprep.subr.bf16.mxu0 %v6764_v43  ;;  %v6768_v51 = vpack.c.bf16 %v114_v49, %v113_v48  ;;  %v450_v53 = vrot.slane %v7226_v20, %v7206_v11  ;;  %v366_v54 = vrot.slane %v7192_v5, %v7257_v47 }
  0x55   :  { %382 = vbcast.lane.b32.xlu1 %v380_v8, 256  ;;  %326 = vbcast.lane.b32.xlu0 %v324_v9, 256  ;;  %v506_v56 = vrot.slane %v7236_v31, %v7206_v11  ;;  %v422_v57 = vrot.slane %v7190_v4, %v7257_v47  ;;  %v513_v58 = vrot.slane %v7236_v31, %v7213_v14 }
  0x56   :  { %6602 = vmatmul.mubr.msk.f32.vlgmr.msra.gmra.mrb[0].mxu0 %vm120_vm0, %v72_v36  ;;  %v457_v59 = vrot.slane %v7226_v20, %v7213_v14  ;;  %v541_v61 = vrot.slane %v91_v60, %v7185_v2  ;;  %v464_v62 = vrot.slane %v7226_v20, %v7224_v19  ;;  %v520_v63 = vrot.slane %v7236_v31, %v7224_v19 }
  0x57   :  { %6604 = vmatprep.mubr.msk.f32.mxu0 %vm120_vm0, %v73_v37  ;;  %6767 = vmatpush3.bf16.msra.mxu0 %v6764_v43  ;;  %v548_v0 = vrot.slane %v91_v60, %v7188_v3  ;;  %v604_v4 = vrot.slane %v92_v1, %v7188_v3  ;;  %v597_v5 = vrot.slane %v92_v1, %v7185_v2 }
  0x58   :  { %6769 = vmatprep.subr.bf16.mxu0 %v6768_v51  ;;  %v555_v6 = vrot.slane %v91_v60, %v7203_v10  ;;  %v471_v7 = vrot.slane %v7226_v20, %v7244_v35  ;;  %v611_v8 = vrot.slane %v92_v1, %v7203_v10  ;;  %v527_v9 = vrot.slane %v7236_v31, %v7244_v35 }
  0x59   :  { %389 = vbcast.lane.b32.xlu1 %v387_v12, 256  ;;  %333 = vbcast.lane.b32.xlu0 %v331_v13, 256  ;;  %v562_v12 = vrot.slane %v91_v60, %v7206_v11  ;;  %v478_v13 = vrot.slane %v7226_v20, %v7257_v47  ;;  %v653_v20 = vrot.slane %v7298_v21, %v7185_v2 }
  0x5a   :  { %6605 = vmatmul.mubr.msk.f32.gmra.mrb[2].mxu0 %vm120_vm0, %v74_v42  ;;  %v576_v22 = vrot.slane %v91_v60, %v7224_v19  ;;  %v716_v26 = vrot.slane %v7306_v25, %v7188_v3  ;;  %v709_v27 = vrot.slane %v7306_v25, %v7185_v2  ;;  %v667_v28 = vrot.slane %v7298_v21, %v7203_v10 }
  0x5b   :  { %6607 = vmatprep.mubr.msk.f32.mxu0 %vm120_vm0, %v75_v44  ;;  %6771 = vmatpush3.bf16.msra.mxu0 %v6768_v51  ;;  %v674_v32 = vrot.slane %v7298_v21, %v7206_v11  ;;  %v646_v36 = vrot.slane %v92_v1, %v7257_v47  ;;  %v737_v37 = vrot.slane %v7306_v25, %v7213_v14 }
  0x5c   :  { %v688_v41 = vrot.slane %v7298_v21, %v7224_v19  ;;  %v744_v44 = vrot.slane %v7306_v25, %v7224_v19 }
  0x5d   :  { %396 = vbcast.lane.b32.xlu1 %v394_v15, 256  ;;  %340 = vbcast.lane.b32.xlu0 %v338_v16, 256  ;;  %v618_v15 = vrot.slane %v92_v1, %v7206_v11  ;;  %v534_v16 = vrot.slane %v7236_v31, %v7257_v47  ;;  %v639_v31 = vrot.slane %v92_v1, %v7244_v35 }
  0x5e   :  { %6608 = vmatmul.mubr.msk.f32.gmra.mrb[4].mxu0 %vm120_vm0, %v76_v50 }
  0x5f   :  { %6610 = vmatprep.mubr.msk.f32.mxu0 %vm120_vm0, %v77_v52 }
  0x61   :  { %403 = vbcast.lane.b32.xlu1 %v401_v17, 256  ;;  %347 = vbcast.lane.b32.xlu0 %v345_v18, 256  ;;  %v625_v17 = vrot.slane %v92_v1, %v7213_v14  ;;  %v569_v18 = vrot.slane %v91_v60, %v7213_v14 }
  0x62   :  { %6611 = vmatmul.mubr.msk.f32.gmra.mrb[6].mxu0 %vm120_vm0, %v78_v55  ;;  %v695_v55 = vrot.slane %v7298_v21, %v7244_v35 }
  0x65   :  { %431 = vbcast.lane.b32.xlu1 %v429_v23, 256  ;;  %354 = vbcast.lane.b32.xlu0 %v352_v24, 256  ;;  %v632_v23 = vrot.slane %v92_v1, %v7224_v19  ;;  %v660_v24 = vrot.slane %v7298_v21, %v7188_v3  ;;  %v702_v1 = vrot.slane %v7298_v21, %v7257_v47 }
  0x69   :  { %410 = vbcast.lane.b32.xlu1 %v408_v29, 256  ;;  %438 = vbcast.lane.b32.xlu0 %v436_v30, 256  ;;  %v583_v29 = vrot.slane %v91_v60, %v7244_v35  ;;  %v723_v30 = vrot.slane %v7306_v25, %v7203_v10 }
  0x6d   :  { %494 = vbcast.lane.b32.xlu1 %v492_v33, 256  ;;  %487 = vbcast.lane.b32.xlu0 %v485_v34, 256  ;;  %v590_v33 = vrot.slane %v91_v60, %v7257_v47  ;;  %v730_v34 = vrot.slane %v7306_v25, %v7206_v11  ;;  %v115_v60 = vld [vmem:[#allocation8] sm:$0x1f] }
  0x71   :  { %445 = vbcast.lane.b32.xlu1 %v443_v38, 256  ;;  %361 = vbcast.lane.b32.xlu0 %v359_v39, 256  ;;  %v681_v38 = vrot.slane %v7298_v21, %v7213_v14  ;;  %v7328_v39 = vld [vmem:[#allocation5 + $0x40] sm:$0xff] }
  0x72   :  { %v765_v40 = vrot.slane %v7328_v39, %v7185_v2 }
  0x75   :  { %501 = vbcast.lane.b32.xlu1 %v499_v45, 256  ;;  %417 = vbcast.lane.b32.xlu0 %v415_v46, 256  ;;  %v772_v45 = vrot.slane %v7328_v39, %v7188_v3  ;;  %v7338_v46 = vld [vmem:[#allocation5 + $0x48] sm:$0xff] }
  0x76   :  { %v828_v50 = vrot.slane %v7338_v46, %v7188_v3  ;;  %v821_v51 = vrot.slane %v7338_v46, %v7185_v2 }
  0x79   :  { %452 = vbcast.lane.b32.xlu1 %v450_v53, 256  ;;  %368 = vbcast.lane.b32.xlu0 %v366_v54, 256  ;;  %v779_v54 = vrot.slane %v7328_v39, %v7203_v10 }
  0x7d   :  { %508 = vbcast.lane.b32.xlu1 %v506_v56, 256  ;;  %424 = vbcast.lane.b32.xlu0 %v422_v57, 256 }
  0x81   :  { %515 = vbcast.lane.b32.xlu1 %v513_v58, 256  ;;  %459 = vbcast.lane.b32.xlu0 %v457_v59, 256  ;;  %v835_v58 = vrot.slane %v7338_v46, %v7203_v10  ;;  %v751_v59 = vrot.slane %v7306_v25, %v7244_v35 }
  0x85   :  { %543 = vbcast.lane.b32.xlu1 %v541_v61, 256  ;;  %466 = vbcast.lane.b32.xlu0 %v464_v62, 256 }
  0x89   :  { %522 = vbcast.lane.b32.xlu1 %v520_v63, 256  ;;  %550 = vbcast.lane.b32.xlu0 %v548_v0, 256  ;;  %v7353_v63 = vrot.slane %v115_v60, %v7213_v14  ;;  %v786_v0 = vrot.slane %v7328_v39, %v7206_v11 }
  0x8d   :  { %606 = vbcast.lane.b32.xlu1 %v604_v4, 256  ;;  %599 = vbcast.lane.b32.xlu0 %v597_v5, 256 }
  0x91   :  { %557 = vbcast.lane.b32.xlu1 %v555_v6, 256  ;;  %473 = vbcast.lane.b32.xlu0 %v471_v7, 256  ;;  %v7363_v7 = vrot.slane %v115_v60, %v7206_v11 }
  0x95   :  { %613 = vbcast.lane.b32.xlu1 %v611_v8, 256  ;;  %529 = vbcast.lane.b32.xlu0 %v527_v9, 256  ;;  %v842_v9 = vrot.slane %v7338_v46, %v7206_v11 }
  0x99   :  { %564 = vbcast.lane.b32.xlu1 %v562_v12, 256  ;;  %480 = vbcast.lane.b32.xlu0 %v478_v13, 256  ;;  %v758_v12 = vrot.slane %v7306_v25, %v7257_v47 }
  0x9d   :  { %620 = vbcast.lane.b32.xlu1 %v618_v15, 256  ;;  %536 = vbcast.lane.b32.xlu0 %v534_v16, 256 }
  0xa1   :  { %627 = vbcast.lane.b32.xlu1 %v625_v17, 256  ;;  %571 = vbcast.lane.b32.xlu0 %v569_v18, 256 }
  0xa5   :  { %655 = vbcast.lane.b32.xlu1 %v653_v20, 256  ;;  %578 = vbcast.lane.b32.xlu0 %v576_v22, 256  ;;  %v849_v20 = vrot.slane %v7338_v46, %v7213_v14  ;;  %v793_v22 = vrot.slane %v7328_v39, %v7213_v14 }
  0xa9   :  { %634 = vbcast.lane.b32.xlu1 %v632_v23, 256  ;;  %662 = vbcast.lane.b32.xlu0 %v660_v24, 256 }
  0xad   :  { %718 = vbcast.lane.b32.xlu1 %v716_v26, 256  ;;  %711 = vbcast.lane.b32.xlu0 %v709_v27, 256  ;;  %v7383_v26 = vld [vmem:[#allocation5 + $0x50] sm:$0xff] }
  0xb1   :  { %669 = vbcast.lane.b32.xlu1 %v667_v28, 256  ;;  %585 = vbcast.lane.b32.xlu0 %v583_v29, 256 }
  0xb5   :  { %725 = vbcast.lane.b32.xlu1 %v723_v30, 256  ;;  %641 = vbcast.lane.b32.xlu0 %v639_v31, 256 }
  0xb9   :  { %676 = vbcast.lane.b32.xlu1 %v674_v32, 256  ;;  %592 = vbcast.lane.b32.xlu0 %v590_v33, 256 }
  0xbd   :  { %732 = vbcast.lane.b32.xlu1 %v730_v34, 256  ;;  %648 = vbcast.lane.b32.xlu0 %v646_v36, 256 }
  0xc1   :  { %739 = vbcast.lane.b32.xlu1 %v737_v37, 256  ;;  %683 = vbcast.lane.b32.xlu0 %v681_v38, 256  ;;  %v877_v37 = vrot.slane %v7383_v26, %v7185_v2 }
  0xc3   :  { %v376_v42 = vpop.permute.xlu1 %375  ;;  %v320_v43 = vpop.permute.xlu0 %319 }
  0xc4   :  { %v1214_v8 = vmul.f32 %v7353_v63, %v320_v43  ;;  %v1222_v23 = vmul.f32 %v7353_v63, %v376_v42  ;;  %v800_v42 = vrot.slane %v7328_v39, %v7224_v19 }
  0xc5   :  { %767 = vbcast.lane.b32.xlu1 %v765_v40, 256  ;;  %690 = vbcast.lane.b32.xlu0 %v688_v41, 256 }
  0xc6   :  { %v1346_v24 = vadd.f32 %v7363_v7, %v1214_v8  ;;  %v1354_v38 = vadd.f32 %v7363_v7, %v1222_v23 }
  0xc7   :  { %v383_v48 = vpop.permute.xlu1 %382  ;;  %v327_v49 = vpop.permute.xlu0 %326 }
  0xc8   :  { %v1215_v4 = vmul.f32 %v7353_v63, %v327_v49  ;;  %v1223_v15 = vmul.f32 %v7353_v63, %v383_v48  ;;  %v1474_v40 = vmax.f32 %v1346_v24, 0.0 }
  0xc9   :  { %746 = vbcast.lane.b32.xlu1 %v744_v44, 256  ;;  %774 = vbcast.lane.b32.xlu0 %v772_v45, 256 }
  0xca   :  { %v1347_v16 = vadd.f32 %v7363_v7, %v1215_v4  ;;  %v1355_v29 = vadd.f32 %v7363_v7, %v1223_v15  ;;  %v1602_v60 = vsel %vm120_vm0, %v1474_v40, 0.0  ;;  %v891_v40 = vrot.slane %v7383_v26, %v7203_v10 }
  0xcb   :  { %v390_v52 = vpop.permute.xlu1 %389  ;;  %v334_v53 = vpop.permute.xlu0 %333 }
  0xcc   :  { %v1216_v13 = vmul.f32 %v7353_v63, %v334_v53  ;;  %v1224_v25 = vmul.f32 %v7353_v63, %v390_v52  ;;  %v1475_v30 = vmax.f32 %v1347_v16, 0.0  ;;  %v1483_v48 = vmax.f32 %v1355_v29, 0.0 }
  0xcd   :  { %830 = vbcast.lane.b32.xlu1 %v828_v50, 256  ;;  %823 = vbcast.lane.b32.xlu0 %v821_v51, 256  ;;  %v856_v53 = vrot.slane %v7338_v46, %v7224_v19 }
  0xce   :  { %v1348_v27 = vadd.f32 %v7363_v7, %v1216_v13  ;;  %v1356_v41 = vadd.f32 %v7363_v7, %v1224_v25  ;;  %v1603_v49 = vsel %vm120_vm0, %v1475_v30, 0.0  ;;  %v1618_v8 = vsel %vm120_vm0, %v1483_v48, 0.0 }
  0xcf   :  { %v397_v56 = vpop.permute.xlu1 %396  ;;  %v341_v57 = vpop.permute.xlu0 %340 }
  0xd0   :  { %v1217_v21 = vmul.f32 %v7353_v63, %v341_v57  ;;  %v1225_v31 = vmul.f32 %v7353_v63, %v397_v56  ;;  %v1476_v43 = vmax.f32 %v1348_v27, 0.0 }
  0xd1   :  { %781 = vbcast.lane.b32.xlu1 %v779_v54, 256  ;;  %697 = vbcast.lane.b32.xlu0 %v695_v55, 256 }
  0xd2   :  { %v1349_v34 = vadd.f32 %v7363_v7, %v1217_v21  ;;  %v1357_v50 = vadd.f32 %v7363_v7, %v1225_v31 }
  0xd3   :  { %v404_v61 = vpop.permute.xlu1 %403  ;;  %v348_v62 = vpop.permute.xlu0 %347 }
  0xd4   :  { %v1218_v28 = vmul.f32 %v7353_v63, %v348_v62  ;;  %v1226_v44 = vmul.f32 %v7353_v63, %v404_v61  ;;  %v1477_v54 = vmax.f32 %v1349_v34, 0.0  ;;  %v1484_v61 = vmax.f32 %v1356_v41, 0.0 }
  0xd5   :  { %837 = vbcast.lane.b32.xlu1 %v835_v58, 256  ;;  %753 = vbcast.lane.b32.xlu0 %v751_v59, 256  ;;  %v7412_v58 = vld [vmem:[#allocation5 + $0x58] sm:$0xff]  ;;  %v1482_v59 = vmax.f32 %v1354_v38, 0.0  ;;  %v884_v62 = vrot.slane %v7383_v26, %v7188_v3 }
  0xd6   :  { %v1350_v45 = vadd.f32 %v7363_v7, %v1218_v28  ;;  %v940_v16 = vrot.slane %v7412_v58, %v7188_v3  ;;  %v1620_v24 = vsel %vm120_vm0, %v1484_v61, 0.0  ;;  %v933_v27 = vrot.slane %v7412_v58, %v7185_v2 }
  0xd7   :  { %v7360_v5 = vpop.permute.xlu1 %431  ;;  %v355_v6 = vpop.permute.xlu0 %354  ;;  %v1617_v23 = vsel %vm120_vm0, %v1482_v59, 0.0 }
  0xd8   :  { %v1219_v36 = vmul.f32 %v7353_v63, %v355_v6  ;;  %v1478_v4 = vmax.f32 %v1350_v45, 0.0  ;;  %v1619_v34 = vadd.f32 %v1618_v8, %v1617_v23 }
  0xd9   :  { %788 = vbcast.lane.b32.xlu1 %v786_v0, 256  ;;  %704 = vbcast.lane.b32.xlu0 %v702_v1, 256  ;;  %v1605_v0 = vsel %vm120_vm0, %v1476_v43, 0.0  ;;  %v1358_v1 = vadd.f32 %v7363_v7, %v1226_v44 }
  0xda   :  { %v1351_v55 = vadd.f32 %v7363_v7, %v1219_v36  ;;  %v1609_v29 = vsel %vm120_vm0, %v1478_v4, 0.0  ;;  %v1621_v45 = vadd.f32 %v1620_v24, %v1619_v34  ;;  %v898_v24 = vrot.slane %v7383_v26, %v7206_v11 }
  0xdb   :  { %v411_v17 = vpop.permute.xlu1 %410  ;;  %v7373_v18 = vpop.permute.xlu0 %438  ;;  %v1486_v28 = vmax.f32 %v1358_v1, 0.0 }
  0xdc   :  { %v1227_v56 = vmul.f32 %v7353_v63, %v411_v17  ;;  %v1607_v17 = vsel %vm120_vm0, %v1477_v54, 0.0  ;;  %v1479_v21 = vmax.f32 %v1351_v55, 0.0 }
  0xdd   :  { %844 = vbcast.lane.b32.xlu1 %v842_v9, 256  ;;  %760 = vbcast.lane.b32.xlu0 %v758_v12, 256  ;;  %v1604_v9 = vadd.f32 %v1603_v49, %v1602_v60  ;;  %v1485_v12 = vmax.f32 %v1357_v50, 0.0  ;;  %v807_v49 = vrot.slane %v7328_v39, %v7244_v35  ;;  %v1624_v50 = vsel %vm120_vm0, %v1486_v28, 0.0 }
  0xdf   :  { %v7389_v32 = vpop.permute.xlu1 %494  ;;  %v7391_v33 = vpop.permute.xlu0 %487  ;;  %v1606_v25 = vadd.f32 %v1605_v0, %v1604_v9  ;;  %v1622_v41 = vsel %vm120_vm0, %v1485_v12, 0.0  ;;  %v947_v0 = vrot.slane %v7412_v58, %v7203_v10 }
  0xe0   :  { %v1623_v55 = vadd.f32 %v1622_v41, %v1621_v45  ;;  %v1239_v41 = vmul.f32 %v7353_v63, %v7389_v32  ;;  %v905_v32 = vrot.slane %v7383_v26, %v7213_v14 }
  0xe1   :  { %851 = vbcast.lane.b32.xlu1 %v849_v20, 256  ;;  %795 = vbcast.lane.b32.xlu0 %v793_v22, 256  ;;  %v1359_v20 = vadd.f32 %v7363_v7, %v1227_v56  ;;  %v1608_v36 = vadd.f32 %v1607_v17, %v1606_v25  ;;  %v814_v25 = vrot.slane %v7328_v39, %v7257_v47 }
  0xe2   :  { %v1625_v1 = vadd.f32 %v1624_v50, %v1623_v55  ;;  %v954_v39 = vrot.slane %v7412_v58, %v7206_v11  ;;  %v1371_v50 = vadd.f32 %v7363_v7, %v1239_v41 }
  0xe3   :  { %v7405_v51 = vpop.permute.xlu1 %445  ;;  %v362_v52 = vpop.permute.xlu0 %361  ;;  %v1487_v43 = vmax.f32 %v1359_v20, 0.0  ;;  %v1610_v48 = vadd.f32 %v1609_v29, %v1608_v36  ;;  %v1231_v29 = vmul.f32 %v7353_v63, %v7373_v18  ;;  %v1230_v36 = vmul.f32 %v7353_v63, %v7360_v5 }
  0xe4   :  { %v1220_v57 = vmul.f32 %v7353_v63, %v362_v52  ;;  %v1232_v18 = vmul.f32 %v7353_v63, %v7405_v51  ;;  %v1238_v5 = vmul.f32 %v7353_v63, %v7391_v33 }
  0xe5   :  { %879 = vbcast.lane.b32.xlu1 %v877_v37, 256  ;;  %802 = vbcast.lane.b32.xlu0 %v800_v42, 256  ;;  %v1611_v42 = vsel %vm120_vm0, %v1479_v21, 0.0  ;;  %v1626_v60 = vsel %vm120_vm0, %v1487_v43, 0.0  ;;  %v1362_v51 = vadd.f32 %v7363_v7, %v1230_v36 }
  0xe6   :  { %v1352_v6 = vadd.f32 %v7363_v7, %v1220_v57  ;;  %v1612_v56 = vadd.f32 %v1611_v42, %v1610_v48  ;;  %v1364_v33 = vadd.f32 %v7363_v7, %v1232_v18  ;;  %v7491_v48 = vld [vmem:[#allocation5 + $0x60] sm:$0xff] }
  0xe7   :  { %v7421_v13 = vpop.permute.xlu1 %501  ;;  %v418_v15 = vpop.permute.xlu0 %417 }
  0xe8   :  { %v1228_v22 = vmul.f32 %v7353_v63, %v418_v15  ;;  %v1480_v30 = vmax.f32 %v1352_v6, 0.0  ;;  %v863_v6 = vrot.slane %v7338_v46, %v7244_v35  ;;  %v1627_v15 = vadd.f32 %v1626_v60, %v1625_v1 }
  0xe9   :  { %858 = vbcast.lane.b32.xlu1 %v856_v53, 256  ;;  %886 = vbcast.lane.b32.xlu0 %v884_v62, 256  ;;  %v1240_v45 = vmul.f32 %v7353_v63, %v7421_v13 }
  0xea   :  { %v1360_v31 = vadd.f32 %v7363_v7, %v1228_v22  ;;  %v1613_v52 = vsel %vm120_vm0, %v1480_v30, 0.0  ;;  %v79_v22 = vld [vmem:[#allocation2 + $0x40] sm:$0xff] }
  0xeb   :  { %v453_v37 = vpop.permute.xlu1 %452  ;;  %v369_v38 = vpop.permute.xlu0 %368  ;;  %v1614_v4 = vadd.f32 %v1613_v52, %v1612_v56  ;;  %6613 = vmatprep.mubr.msk.f32.mxu1 %vm120_vm0, %v79_v22  ;;  %v1370_v52 = vadd.f32 %v7363_v7, %v1238_v5  ;;  %v1372_v60 = vadd.f32 %v7363_v7, %v1240_v45 }
  0xec   :  { %v1221_v44 = vmul.f32 %v7353_v63, %v369_v38  ;;  %v1488_v53 = vmax.f32 %v1360_v31, 0.0  ;;  %v870_v38 = vrot.slane %v7338_v46, %v7257_v47  ;;  %v1233_v42 = vmul.f32 %v7353_v63, %v453_v37 }
  0xed   :  { %942 = vbcast.lane.b32.xlu1 %v940_v16, 256  ;;  %935 = vbcast.lane.b32.xlu0 %v933_v27, 256  ;;  %v80_v27 = vld [vmem:[#allocation2 + $0x48] sm:$0xff]  ;;  %v961_v46 = vrot.slane %v7412_v58, %v7213_v14 }
  0xee   :  { %v1353_v54 = vadd.f32 %v7363_v7, %v1221_v44  ;;  %v1628_v8 = vsel %vm120_vm0, %v1488_v53, 0.0  ;;  %6614 = vmatmul.mubr.msk.f32.vlgmr.msra.gmra.mrb[0].mxu1 %vm120_vm0, %v80_v27  ;;  %v1365_v53 = vadd.f32 %v7363_v7, %v1233_v42 }
  0xef   :  { %v509_v57 = vpop.permute.xlu1 %508  ;;  %v425_v59 = vpop.permute.xlu0 %424  ;;  %v1629_v23 = vadd.f32 %v1628_v8, %v1627_v15  ;;  %v1498_v8 = vmax.f32 %v1370_v52, 0.0 }
  0xf0   :  { %v1481_v61 = vmax.f32 %v1353_v54, 0.0  ;;  %v1229_v62 = vmul.f32 %v7353_v63, %v425_v59  ;;  %v1241_v55 = vmul.f32 %v7353_v63, %v509_v57  ;;  %v1490_v59 = vmax.f32 %v1362_v51, 0.0 }
  0xf1   :  { %893 = vbcast.lane.b32.xlu1 %v891_v40, 256  ;;  %809 = vbcast.lane.b32.xlu0 %v807_v49, 256  ;;  %v1363_v40 = vadd.f32 %v7363_v7, %v1231_v29 }
  0xf2   :  { %v1615_v9 = vsel %vm120_vm0, %v1481_v61, 0.0  ;;  %v1361_v12 = vadd.f32 %v7363_v7, %v1229_v62  ;;  %v989_v61 = vrot.slane %v7491_v48, %v7185_v2  ;;  %v912_v62 = vrot.slane %v7383_v26, %v7224_v19 }
  0xf3   :  { %v1616_v16 = vadd.f32 %v1615_v9, %v1614_v4  ;;  %v516_v17 = vpop.permute.xlu1 %515  ;;  %v460_v21 = vpop.permute.xlu0 %459  ;;  %v1491_v49 = vmax.f32 %v1363_v40, 0.0  ;;  %v1493_v9 = vmax.f32 %v1365_v53, 0.0 }
  0xf4   :  { %v1489_v20 = vmax.f32 %v1361_v12, 0.0  ;;  %v1234_v37 = vmul.f32 %v7353_v63, %v460_v21  ;;  %v1242_v1 = vmul.f32 %v7353_v63, %v516_v17  ;;  %v1632_v17 = vsel %vm120_vm0, %v1490_v59, 0.0 }
  0xf5   :  { %949 = vbcast.lane.b32.xlu1 %v947_v0, 256  ;;  %865 = vbcast.lane.b32.xlu0 %v863_v6, 256  ;;  %v1492_v0 = vmax.f32 %v1364_v33, 0.0  ;;  %v1633_v57 = vsel %vm120_vm0, %v1491_v49, 0.0  ;;  %v1499_v6 = vmax.f32 %v1371_v50, 0.0  ;;  %v1637_v18 = vsel %vm120_vm0, %v1493_v9, 0.0 }
  0xf6   :  { %v1630_v28 = vsel %vm120_vm0, %v1489_v20, 0.0  ;;  %6633 = vmatprep.mubr.msk.f32.mxu0 %vm120_vm0, %v1616_v16  ;;  %v1366_v4 = vadd.f32 %v7363_v7, %v1234_v37  ;;  %v1373_v16 = vadd.f32 %v7363_v7, %v1241_v55  ;;  %v1634_v36 = vadd.f32 %v1633_v57, %v1632_v17 }
  0xf7   :  { %v1631_v30 = vadd.f32 %v1630_v28, %v1629_v23  ;;  %v7462_v31 = vpop.permute.xlu1 %543  ;;  %v467_v34 = vpop.permute.xlu0 %466  ;;  %v1500_v23 = vmax.f32 %v1372_v60, 0.0  ;;  %v1635_v27 = vsel %vm120_vm0, %v1492_v0, 0.0  ;;  %v1374_v28 = vadd.f32 %v7363_v7, %v1242_v1 }
  0xf8   :  { %v1235_v56 = vmul.f32 %v7353_v63, %v467_v34  ;;  %v1494_v29 = vmax.f32 %v1366_v4, 0.0  ;;  %v7524_v34 = vld [vmem:[#allocation5 + $0x68] sm:$0xff]  ;;  %v1501_v5 = vmax.f32 %v1373_v16, 0.0  ;;  %v1636_v51 = vadd.f32 %v1635_v27, %v1634_v36 }
  0xf9   :  { %900 = vbcast.lane.b32.xlu1 %v898_v24, 256  ;;  %816 = vbcast.lane.b32.xlu0 %v814_v25, 256  ;;  %v968_v24 = vrot.slane %v7412_v58, %v7224_v19  ;;  %v996_v25 = vrot.slane %v7491_v48, %v7188_v3  ;;  %v1650_v45 = vsel %vm120_vm0, %v1500_v23, 0.0  ;;  %v1045_v33 = vrot.slane %v7524_v34, %v7185_v2 }
  0xfa   :  { %6634 = vmatmul.mubr.msk.f32.vlgmr.msra.gmra.mrb[0].mxu0 %vm120_vm0, %v1631_v30  ;;  %v1367_v21 = vadd.f32 %v7363_v7, %v1235_v56  ;;  %v1502_v37 = vmax.f32 %v1374_v28, 0.0  ;;  %v1639_v49 = vsel %vm120_vm0, %v1494_v29, 0.0  ;;  %v1638_v55 = vadd.f32 %v1637_v18, %v1636_v51 }
  0xfb   :  { %v523_v43 = vpop.permute.xlu1 %522  ;;  %v7480_v44 = vpop.permute.xlu0 %550  ;;  %v1003_v60 = vrot.slane %v7491_v48, %v7203_v10  ;;  %v1059_v27 = vrot.slane %v7524_v34, %v7203_v10 }
  0xfc   :  { %v1243_v20 = vmul.f32 %v7353_v63, %v523_v43  ;;  %v1495_v42 = vmax.f32 %v1367_v21, 0.0  ;;  %v1640_v57 = vadd.f32 %v1639_v49, %v1638_v55  ;;  %v1247_v49 = vmul.f32 %v7353_v63, %v7480_v44 }
  0xfd   :  { %956 = vbcast.lane.b32.xlu1 %v954_v39, 256  ;;  %872 = vbcast.lane.b32.xlu0 %v870_v38, 256  ;;  %v1648_v39 = vsel %vm120_vm0, %v1499_v6, 0.0  ;;  %v1647_v38 = vsel %vm120_vm0, %v1498_v8, 0.0  ;;  %v919_v6 = vrot.slane %v7383_v26, %v7244_v35  ;;  %v1654_v8 = vsel %vm120_vm0, %v1502_v37, 0.0 }
  0xfe   :  { %v1375_v43 = vadd.f32 %v7363_v7, %v1243_v20  ;;  %v1649_v53 = vadd.f32 %v1648_v39, %v1647_v38  ;;  %v1246_v55 = vmul.f32 %v7353_v63, %v7462_v31 }
  0xff   :  { %v7496_v54 = vpop.permute.xlu1 %606  ;;  %v7498_v13 = vpop.permute.xlu0 %599 }
 0x100   :  { %v1503_v0 = vmax.f32 %v1375_v43, 0.0  ;;  %v1651_v4 = vadd.f32 %v1650_v45, %v1649_v53  ;;  %v1010_v45 = vrot.slane %v7491_v48, %v7206_v11  ;;  %v1254_v31 = vmul.f32 %v7353_v63, %v7498_v13 }
 0x101   :  { %963 = vbcast.lane.b32.xlu1 %v961_v46, 256  ;;  %907 = vbcast.lane.b32.xlu0 %v905_v32, 256  ;;  %v1052_v32 = vrot.slane %v7524_v34, %v7188_v3 }
 0x102   :  { %v1656_v23 = vsel %vm120_vm0, %v1503_v0, 0.0 }
 0x103   :  { %v7510_v12 = vpop.permute.xlu1 %557  ;;  %v474_v15 = vpop.permute.xlu0 %473 }
 0x104   :  { %v1236_v22 = vmul.f32 %v7353_v63, %v474_v15  ;;  %v1248_v44 = vmul.f32 %v7353_v63, %v7510_v12  ;;  %v1378_v12 = vadd.f32 %v7363_v7, %v1246_v55 }
 0x105   :  { %991 = vbcast.lane.b32.xlu1 %v989_v61, 256  ;;  %914 = vbcast.lane.b32.xlu0 %v912_v62, 256  ;;  %v1652_v61 = vsel %vm120_vm0, %v1501_v5, 0.0  ;;  %v1641_v62 = vsel %vm120_vm0, %v1495_v42, 0.0 }
 0x106   :  { %v1368_v30 = vadd.f32 %v7363_v7, %v1236_v22  ;;  %v1653_v21 = vadd.f32 %v1652_v61, %v1651_v4  ;;  %v1642_v20 = vadd.f32 %v1641_v62, %v1640_v57  ;;  %v1255_v61 = vmul.f32 %v7353_v63, %v7496_v54  ;;  %v7597_v57 = vld [vmem:[#allocation5 + $0x70] sm:$0xff] }
 0x107   :  { %v7529_v40 = vpop.permute.xlu1 %613  ;;  %v530_v41 = vpop.permute.xlu0 %529  ;;  %v1017_v54 = vrot.slane %v7491_v48, %v7213_v14  ;;  %v1380_v13 = vadd.f32 %v7363_v7, %v1248_v44 }
 0x108   :  { %v1244_v46 = vmul.f32 %v7353_v63, %v530_v41  ;;  %v1496_v50 = vmax.f32 %v1368_v30, 0.0  ;;  %v1655_v28 = vadd.f32 %v1654_v8, %v1653_v21  ;;  %v975_v30 = vrot.slane %v7412_v58, %v7244_v35 }
 0x109   :  { %970 = vbcast.lane.b32.xlu1 %v968_v24, 256  ;;  %998 = vbcast.lane.b32.xlu0 %v996_v25, 256  ;;  %v1256_v4 = vmul.f32 %v7353_v63, %v7529_v40  ;;  %v1387_v8 = vadd.f32 %v7363_v7, %v1255_v61 }
 0x10a   :  { %v1376_v52 = vadd.f32 %v7363_v7, %v1244_v46  ;;  %v1643_v9 = vsel %vm120_vm0, %v1496_v50, 0.0  ;;  %v1657_v18 = vadd.f32 %v1656_v23, %v1655_v28  ;;  %v81_v46 = vld [vmem:[#allocation2 + $0x50] sm:$0xff] }
 0x10b   :  { %v565_v56 = vpop.permute.xlu1 %564  ;;  %v481_v59 = vpop.permute.xlu0 %480  ;;  %v1644_v29 = vadd.f32 %v1643_v9, %v1642_v20  ;;  %6616 = vmatprep.mubr.msk.f32.mxu1 %vm120_vm0, %v81_v46  ;;  %v1386_v9 = vadd.f32 %v7363_v7, %v1254_v31  ;;  %v1388_v23 = vadd.f32 %v7363_v7, %v1256_v4 }
 0x10c   :  { %v1237_v1 = vmul.f32 %v7353_v63, %v481_v59  ;;  %v1504_v15 = vmax.f32 %v1376_v52, 0.0  ;;  %v982_v59 = vrot.slane %v7412_v58, %v7257_v47  ;;  %v1249_v62 = vmul.f32 %v7353_v63, %v565_v56 }
 0x10d   :  { %1054 = vbcast.lane.b32.xlu1 %v1052_v32, 256  ;;  %1047 = vbcast.lane.b32.xlu0 %v1045_v33, 256  ;;  %v926_v32 = vrot.slane %v7383_v26, %v7257_v47  ;;  %v82_v33 = vld [vmem:[#allocation2 + $0x58] sm:$0xff]  ;;  %v1066_v26 = vrot.slane %v7524_v34, %v7206_v11  ;;  %v1073_v58 = vrot.slane %v7524_v34, %v7213_v14 }
 0x10e   :  { %v1369_v16 = vadd.f32 %v7363_v7, %v1237_v1  ;;  %v1658_v36 = vsel %vm120_vm0, %v1504_v15, 0.0  ;;  %6617 = vmatmul.mubr.msk.f32.gmra.mrb[2].mxu1 %vm120_vm0, %v82_v33  ;;  %v1381_v15 = vadd.f32 %v7363_v7, %v1249_v62 }
 0x10f   :  { %v621_v22 = vpop.permute.xlu1 %620  ;;  %v537_v17 = vpop.permute.xlu0 %536  ;;  %v1659_v51 = vadd.f32 %v1658_v36, %v1657_v18  ;;  %v1514_v36 = vmax.f32 %v1386_v9, 0.0 }
 0x110   :  { %v1497_v24 = vmax.f32 %v1369_v16, 0.0  ;;  %v1245_v25 = vmul.f32 %v7353_v63, %v537_v17  ;;  %v1257_v21 = vmul.f32 %v7353_v63, %v621_v22  ;;  %v1506_v17 = vmax.f32 %v1378_v12, 0.0 }
 0x111   :  { %1005 = vbcast.lane.b32.xlu1 %v1003_v60, 256  ;;  %921 = vbcast.lane.b32.xlu0 %v919_v6, 256  ;;  %v1379_v60 = vadd.f32 %v7363_v7, %v1247_v49 }
 0x112   :  { %v1645_v39 = vsel %vm120_vm0, %v1497_v24, 0.0  ;;  %v1377_v38 = vadd.f32 %v7363_v7, %v1245_v25  ;;  %v1101_v24 = vrot.slane %v7597_v57, %v7185_v2  ;;  %v1024_v25 = vrot.slane %v7491_v48, %v7224_v19 }
 0x113   :  { %v1646_v41 = vadd.f32 %v1645_v39, %v1644_v29  ;;  %v628_v5 = vpop.permute.xlu1 %627  ;;  %v572_v42 = vpop.permute.xlu0 %571  ;;  %v1507_v6 = vmax.f32 %v1379_v60, 0.0  ;;  %v1509_v39 = vmax.f32 %v1381_v15, 0.0 }
 0x114   :  { %v1505_v43 = vmax.f32 %v1377_v38, 0.0  ;;  %v1250_v56 = vmul.f32 %v7353_v63, %v572_v42  ;;  %v1258_v28 = vmul.f32 %v7353_v63, %v628_v5  ;;  %v1662_v5 = vsel %vm120_vm0, %v1506_v17, 0.0 }
 0x115   :  { %1061 = vbcast.lane.b32.xlu1 %v1059_v27, 256  ;;  %977 = vbcast.lane.b32.xlu0 %v975_v30, 256  ;;  %v1508_v27 = vmax.f32 %v1380_v13, 0.0  ;;  %v1663_v22 = vsel %vm120_vm0, %v1507_v6, 0.0  ;;  %v1515_v30 = vmax.f32 %v1387_v8, 0.0  ;;  %v1667_v44 = vsel %vm120_vm0, %v1509_v39, 0.0 }
 0x116   :  { %v1660_v37 = vsel %vm120_vm0, %v1505_v43, 0.0  ;;  %6636 = vmatprep.mubr.msk.f32.mxu0 %vm120_vm0, %v1646_v41  ;;  %v1382_v29 = vadd.f32 %v7363_v7, %v1250_v56  ;;  %v1389_v41 = vadd.f32 %v7363_v7, %v1257_v21  ;;  %v1664_v55 = vadd.f32 %v1663_v22, %v1662_v5 }
 0x117   :  { %v1661_v50 = vadd.f32 %v1660_v37, %v1659_v51  ;;  %v7568_v52 = vpop.permute.xlu1 %655  ;;  %v579_v53 = vpop.permute.xlu0 %578  ;;  %v1516_v51 = vmax.f32 %v1388_v23, 0.0  ;;  %v1665_v33 = vsel %vm120_vm0, %v1508_v27, 0.0  ;;  %v1390_v37 = vadd.f32 %v7363_v7, %v1258_v28 }
 0x118   :  { %v1251_v20 = vmul.f32 %v7353_v63, %v579_v53  ;;  %v1510_v49 = vmax.f32 %v1382_v29, 0.0  ;;  %v7630_v53 = vld [vmem:[#allocation5 + $0x78] sm:$0xff]  ;;  %v1517_v31 = vmax.f32 %v1389_v41, 0.0  ;;  %v1666_v12 = vadd.f32 %v1665_v33, %v1664_v55 }
 0x119   :  { %1012 = vbcast.lane.b32.xlu1 %v1010_v45, 256  ;;  %928 = vbcast.lane.b32.xlu0 %v926_v32, 256  ;;  %v1080_v45 = vrot.slane %v7524_v34, %v7224_v19  ;;  %v1108_v32 = vrot.slane %v7597_v57, %v7188_v3  ;;  %v1680_v4 = vsel %vm120_vm0, %v1516_v51, 0.0  ;;  %v1157_v13 = vrot.slane %v7630_v53, %v7185_v2 }
 0x11a   :  { %6637 = vmatmul.mubr.msk.f32.gmra.mrb[2].mxu0 %vm120_vm0, %v1661_v50  ;;  %v1383_v42 = vadd.f32 %v7363_v7, %v1251_v20  ;;  %v1518_v56 = vmax.f32 %v1390_v37, 0.0  ;;  %v1669_v6 = vsel %vm120_vm0, %v1510_v49, 0.0  ;;  %v1668_v21 = vadd.f32 %v1667_v44, %v1666_v12 }
 0x11b   :  { %v635_v0 = vpop.permute.xlu1 %634  ;;  %v7586_v1 = vpop.permute.xlu0 %662  ;;  %v1115_v23 = vrot.slane %v7597_v57, %v7203_v10  ;;  %v1171_v33 = vrot.slane %v7630_v53, %v7203_v10 }
 0x11c   :  { %v1259_v43 = vmul.f32 %v7353_v63, %v635_v0  ;;  %v1511_v62 = vmax.f32 %v1383_v42, 0.0  ;;  %v1670_v22 = vadd.f32 %v1669_v6, %v1668_v21  ;;  %v1263_v6 = vmul.f32 %v7353_v63, %v7586_v1 }
 0x11d   :  { %1068 = vbcast.lane.b32.xlu1 %v1066_v26, 256  ;;  %984 = vbcast.lane.b32.xlu0 %v982_v59, 256  ;;  %v1678_v26 = vsel %vm120_vm0, %v1515_v30, 0.0  ;;  %v1677_v59 = vsel %vm120_vm0, %v1514_v36, 0.0  ;;  %v1031_v30 = vrot.slane %v7491_v48, %v7244_v35  ;;  %v1684_v36 = vsel %vm120_vm0, %v1518_v56, 0.0 }
 0x11e   :  { %v1391_v0 = vadd.f32 %v7363_v7, %v1259_v43  ;;  %v1679_v15 = vadd.f32 %v1678_v26, %v1677_v59  ;;  %v1262_v21 = vmul.f32 %v7353_v63, %v7568_v52 }
 0x11f   :  { %v7602_v16 = vpop.permute.xlu1 %718  ;;  %v7604_v40 = vpop.permute.xlu0 %711 }
 0x120   :  { %v1519_v27 = vmax.f32 %v1391_v0, 0.0  ;;  %v1681_v29 = vadd.f32 %v1680_v4, %v1679_v15  ;;  %v1122_v4 = vrot.slane %v7597_v57, %v7206_v11  ;;  %v1270_v52 = vmul.f32 %v7353_v63, %v7604_v40 }
 0x121   :  { %1075 = vbcast.lane.b32.xlu1 %v1073_v58, 256  ;;  %1019 = vbcast.lane.b32.xlu0 %v1017_v54, 256  ;;  %v1164_v54 = vrot.slane %v7630_v53, %v7188_v3 }
 0x122   :  { %v1686_v51 = vsel %vm120_vm0, %v1519_v27, 0.0 }
 0x123   :  { %v7616_v38 = vpop.permute.xlu1 %669  ;;  %v586_v18 = vpop.permute.xlu0 %585 }
 0x124   :  { %v1252_v46 = vmul.f32 %v7353_v63, %v586_v18  ;;  %v1264_v1 = vmul.f32 %v7353_v63, %v7616_v38  ;;  %v1394_v38 = vadd.f32 %v7363_v7, %v1262_v21 }
 0x125   :  { %1103 = vbcast.lane.b32.xlu1 %v1101_v24, 256  ;;  %1026 = vbcast.lane.b32.xlu0 %v1024_v25, 256  ;;  %v1682_v24 = vsel %vm120_vm0, %v1517_v31, 0.0  ;;  %v1671_v25 = vsel %vm120_vm0, %v1511_v62, 0.0 }
 0x126   :  { %v1384_v50 = vadd.f32 %v7363_v7, %v1252_v46  ;;  %v1683_v42 = vadd.f32 %v1682_v24, %v1681_v29  ;;  %v1672_v43 = vadd.f32 %v1671_v25, %v1670_v22  ;;  %v1271_v24 = vmul.f32 %v7353_v63, %v7602_v16 }
 0x127   :  { %v7635_v60 = vpop.permute.xlu1 %725  ;;  %v642_v61 = vpop.permute.xlu0 %641  ;;  %v1129_v16 = vrot.slane %v7597_v57, %v7213_v14  ;;  %v1396_v40 = vadd.f32 %v7363_v7, %v1264_v1  ;;  %v1192_v22 = vrot.slane %v7630_v53, %v7224_v19  ;;  %v86_v1 = vld [vmem:[#allocation2 + $0x78] sm:$0xff] }
 0x128   :  { %v1260_v58 = vmul.f32 %v7353_v63, %v642_v61  ;;  %v1512_v8 = vmax.f32 %v1384_v50, 0.0  ;;  %v1685_v37 = vadd.f32 %v1684_v36, %v1683_v42  ;;  %v1087_v50 = vrot.slane %v7524_v34, %v7244_v35 }
 0x129   :  { %1082 = vbcast.lane.b32.xlu1 %v1080_v45, 256  ;;  %1110 = vbcast.lane.b32.xlu0 %v1108_v32, 256  ;;  %v1272_v29 = vmul.f32 %v7353_v63, %v7635_v60  ;;  %v1403_v36 = vadd.f32 %v7363_v7, %v1271_v24 }
 0x12a   :  { %v1392_v9 = vadd.f32 %v7363_v7, %v1260_v58  ;;  %v1673_v39 = vsel %vm120_vm0, %v1512_v8, 0.0  ;;  %v1687_v44 = vadd.f32 %v1686_v51, %v1685_v37  ;;  %v83_v58 = vld [vmem:[#allocation2 + $0x60] sm:$0xff]  ;;  %v1199_v51 = vrot.slane %v7630_v53, %v7244_v35 }
 0x12b   :  { %v677_v20 = vpop.permute.xlu1 %676  ;;  %v593_v17 = vpop.permute.xlu0 %592  ;;  %v1674_v49 = vadd.f32 %v1673_v39, %v1672_v43  ;;  %6619 = vmatprep.mubr.msk.f32.mxu1 %vm120_vm0, %v83_v58  ;;  %v1402_v39 = vadd.f32 %v7363_v7, %v1270_v52  ;;  %v6947_v37 = vld [vmem:[#allocation5] sm:$0xff] }
 0x12c   :  { %v1253_v28 = vmul.f32 %v7353_v63, %v593_v17  ;;  %v1520_v18 = vmax.f32 %v1392_v9, 0.0  ;;  %v1094_v17 = vrot.slane %v7524_v34, %v7257_v47  ;;  %v1265_v25 = vmul.f32 %v7353_v63, %v677_v20 }
 0x12d   :  { %1166 = vbcast.lane.b32.xlu1 %v1164_v54, 256  ;;  %1159 = vbcast.lane.b32.xlu0 %v1157_v13, 256  ;;  %v1038_v54 = vrot.slane %v7491_v48, %v7257_v47  ;;  %v84_v13 = vld [vmem:[#allocation2 + $0x68] sm:$0xff]  ;;  %v1178_v48 = vrot.slane %v7630_v53, %v7206_v11  ;;  %v1185_v34 = vrot.slane %v7630_v53, %v7213_v14  ;;  %vm2055_vm1 = vcmp.gt.f32.partialorder %v6947_v37, 0.0 }
 0x12e   :  { %v1385_v41 = vadd.f32 %v7363_v7, %v1253_v28  ;;  %v1688_v55 = vsel %vm120_vm0, %v1520_v18, 0.0  ;;  %6620 = vmatmul.mubr.msk.f32.gmra.mrb[4].mxu1 %vm120_vm0, %v84_v13  ;;  %v1397_v18 = vadd.f32 %v7363_v7, %v1265_v25  ;;  %v1206_v13 = vrot.slane %v7630_v53, %v7257_v47 }
 0x12f   :  { %v733_v46 = vpop.permute.xlu1 %732  ;;  %v649_v5 = vpop.permute.xlu0 %648  ;;  %v1689_v12 = vadd.f32 %v1688_v55, %v1687_v44 }
 0x130   :  { %v1513_v45 = vmax.f32 %v1385_v41, 0.0  ;;  %v1261_v32 = vmul.f32 %v7353_v63, %v649_v5  ;;  %v1273_v42 = vmul.f32 %v7353_v63, %v733_v46  ;;  %v1136_v5 = vrot.slane %v7597_v57, %v7224_v19 }
 0x131   :  { %1117 = vbcast.lane.b32.xlu1 %v1115_v23, 256  ;;  %1033 = vbcast.lane.b32.xlu0 %v1031_v30, 256  ;;  %v1395_v23 = vadd.f32 %v7363_v7, %v1263_v6  ;;  %v1525_v44 = vmax.f32 %v1397_v18, 0.0 }
 0x132   :  { %v1675_v26 = vsel %vm120_vm0, %v1513_v45, 0.0  ;;  %v1393_v59 = vadd.f32 %v7363_v7, %v1261_v32  ;;  %v1522_v45 = vmax.f32 %v1394_v38, 0.0  ;;  %v1404_v32 = vadd.f32 %v7363_v7, %v1272_v29 }
 0x133   :  { %v1676_v61 = vadd.f32 %v1675_v26, %v1674_v49  ;;  %v740_v31 = vpop.permute.xlu1 %739  ;;  %v684_v62 = vpop.permute.xlu0 %683  ;;  %v1523_v30 = vmax.f32 %v1395_v23, 0.0  ;;  %v1524_v49 = vmax.f32 %v1396_v40, 0.0  ;;  %v1531_v26 = vmax.f32 %v1403_v36, 0.0 }
 0x134   :  { %v1521_v0 = vmax.f32 %v1393_v59, 0.0  ;;  %v1266_v20 = vmul.f32 %v7353_v63, %v684_v62  ;;  %v1274_v46 = vmul.f32 %v7353_v63, %v740_v31  ;;  %v1530_v59 = vmax.f32 %v1402_v39, 0.0 }
 0x135   :  { %1173 = vbcast.lane.b32.xlu1 %v1171_v33, 256  ;;  %1089 = vbcast.lane.b32.xlu0 %v1087_v50, 256  ;;  %v1143_v33 = vrot.slane %v7597_v57, %v7244_v35  ;;  %v1693_v55 = vsel %vm120_vm0, %v1523_v30, 0.0  ;;  %v1692_v31 = vsel %vm120_vm0, %v1522_v45, 0.0  ;;  %v1708_v24 = vsel %vm120_vm0, %v1531_v26, 0.0  ;;  %v6948_v30 = vld [vmem:[#allocation5 + $0x8] sm:$0xff] }
 0x136   :  { %v1690_v56 = vsel %vm120_vm0, %v1521_v0, 0.0  ;;  %6639 = vmatprep.mubr.msk.f32.mxu0 %vm120_vm0, %v1676_v61  ;;  %v1398_v50 = vadd.f32 %v7363_v7, %v1266_v20  ;;  %v1405_v0 = vadd.f32 %v7363_v7, %v1273_v42  ;;  %v1406_v21 = vadd.f32 %v7363_v7, %v1274_v46 }
 0x137   :  { %v1691_v8 = vadd.f32 %v1690_v56, %v1689_v12  ;;  %v7674_v9 = vpop.permute.xlu1 %767  ;;  %v691_v15 = vpop.permute.xlu0 %690  ;;  %v10513_v56 = vmov 0.0   ;;  %v1694_v23 = vadd.f32 %v1693_v55, %v1692_v31  ;;  %v1707_v53 = vsel %vm120_vm0, %v1530_v59, 0.0 }
 0x138   :  { %v1267_v43 = vmul.f32 %v7353_v63, %v691_v15  ;;  %v7735_v6 = vsel %vm2055_vm1, 1.0, %v10513_v56  ;;  %v1695_v15 = vsel %vm120_vm0, %v1524_v49, 0.0  ;;  %v1697_v52 = vsel %vm120_vm0, %v1525_v44, 0.0 }
 0x139   :  { %1124 = vbcast.lane.b32.xlu1 %v1122_v4, 256  ;;  %1040 = vbcast.lane.b32.xlu0 %v1038_v54, 256  ;;  %v1532_v54 = vmax.f32 %v1404_v32, 0.0  ;;  %v1696_v40 = vadd.f32 %v1695_v15, %v1694_v23  ;;  %vm2056_vm2 = vcmp.gt.f32.partialorder %v6948_v30, 0.0  ;;  %v1534_v36 = vmax.f32 %v1406_v21, 0.0 }
 0x13a   :  { %6640 = vmatmul.mubr.msk.f32.gmra.mrb[4].mxu0 %vm120_vm0, %v1691_v8  ;;  %v1399_v58 = vadd.f32 %v7363_v7, %v1267_v43  ;;  %v85_v8 = vld [vmem:[#allocation2 + $0x70] sm:$0xff]  ;;  %v1709_v43 = vadd.f32 %v1708_v24, %v1707_v53  ;;  %v2097_v37 = vrot.slane %v7735_v6, %v7188_v3  ;;  %v2090_v55 = vrot.slane %v7735_v6, %v7185_v2 }
 0x13b   :  { %v747_v27 = vpop.permute.xlu1 %746  ;;  %v7692_v28 = vpop.permute.xlu0 %774  ;;  %6622 = vmatprep.mubr.msk.f32.mxu1 %vm120_vm0, %v85_v8  ;;  %v1710_v20 = vsel %vm120_vm0, %v1532_v54, 0.0  ;;  %v7763_v26 = vsel %vm2056_vm2, 1.0, %v10513_v56  ;;  %v1714_v59 = vsel %vm120_vm0, %v1534_v36, 0.0  ;;  %v2104_v15 = vrot.slane %v7735_v6, %v7203_v10 }
 0x13c   :  { %v1275_v12 = vmul.f32 %v7353_v63, %v747_v27  ;;  %6623 = vmatmul.mubr.msk.f32.gmra.mrb[6].mxu1 %vm120_vm0, %v86_v1  ;;  %v1527_v38 = vmax.f32 %v1399_v58, 0.0  ;;  %v1711_v46 = vadd.f32 %v1710_v20, %v1709_v43  ;;  %v2160_v43 = vrot.slane %v7763_v26, %v7203_v10 }
 0x13d   :  { %1180 = vbcast.lane.b32.xlu1 %v1178_v48, 256  ;;  %1096 = vbcast.lane.b32.xlu0 %v1094_v17, 256  ;;  %v1526_v48 = vmax.f32 %v1398_v50, 0.0  ;;  %vm4171_vm1 = vcmask 1041409   ;;  %vm4173_vm2 = vcmask 1042434  }
 0x13e   :  { %v1407_v29 = vadd.f32 %v7363_v7, %v1275_v12 }
 0x13f   :  { %v7708_v60 = vpop.permute.xlu1 %830  ;;  %v7710_v41 = vpop.permute.xlu0 %823  ;;  %v1699_v39 = vsel %vm120_vm0, %v1526_v48, 0.0 }
 0x141   :  { %1187 = vbcast.lane.b32.xlu1 %v1185_v34, 256  ;;  %1131 = vbcast.lane.b32.xlu0 %v1129_v16, 256  ;;  %v1533_v34 = vmax.f32 %v1405_v0, 0.0 }
 0x143   :  { %v7724_v61 = vpop.permute.xlu1 %781  ;;  %v698_v62 = vpop.permute.xlu0 %697 }
 0x144   :  { %v1268_v4 = vmul.f32 %v7353_v63, %v698_v62 }
 0x145   :  { %1194 = vbcast.lane.b32.xlu1 %v1192_v22, 256  ;;  %1138 = vbcast.lane.b32.xlu0 %v1136_v5, 256  ;;  %v1150_v22 = vrot.slane %v7597_v57, %v7257_v47  ;;  %v1698_v5 = vadd.f32 %v1697_v52, %v1696_v40  ;;  %v1535_v57 = vmax.f32 %v1407_v29, 0.0  ;;  %v2153_v40 = vrot.slane %v7763_v26, %v7188_v3 }
 0x146   :  { %v1400_v17 = vadd.f32 %v7363_v7, %v1268_v4 }
 0x147   :  { %v7744_v25 = vpop.permute.xlu1 %837  ;;  %v754_v27 = vpop.permute.xlu0 %753  ;;  %v1700_v50 = vadd.f32 %v1699_v39, %v1698_v5  ;;  %v1716_v54 = vsel %vm120_vm0, %v1535_v57, 0.0  ;;  %v1280_v5 = vmul.f32 %v7353_v63, %v7724_v61  ;;  %v2125_v57 = vrot.slane %v7735_v6, %v7224_v19 }
 0x148   :  { %v1276_v16 = vmul.f32 %v7353_v63, %v754_v27  ;;  %v1528_v18 = vmax.f32 %v1400_v17, 0.0  ;;  %v2146_v17 = vrot.slane %v7763_v26, %v7185_v2 }
 0x149   :  { %1201 = vbcast.lane.b32.xlu1 %v1199_v51, 256  ;;  %1145 = vbcast.lane.b32.xlu0 %v1143_v33, 256  ;;  %v1712_v51 = vsel %vm120_vm0, %v1533_v34, 0.0  ;;  %v1701_v33 = vsel %vm120_vm0, %v1527_v38, 0.0 }
 0x14a   :  { %v1408_v42 = vadd.f32 %v7363_v7, %v1276_v16  ;;  %v1703_v44 = vsel %vm120_vm0, %v1528_v18, 0.0  ;;  %v1713_v58 = vadd.f32 %v1712_v51, %v1711_v46  ;;  %v1702_v12 = vadd.f32 %v1701_v33, %v1700_v50 }
 0x14b   :  { %v789_v45 = vpop.permute.xlu1 %788  ;;  %v705_v32 = vpop.permute.xlu0 %704  ;;  %v2111_v16 = vrot.slane %v7735_v6, %v7206_v11  ;;  %v1278_v18 = vmul.f32 %v7353_v63, %v7674_v9  ;;  %v1286_v9 = vmul.f32 %v7353_v63, %v7710_v41  ;;  %v1412_v41 = vadd.f32 %v7363_v7, %v1280_v5 }
 0x14c   :  { %v1269_v49 = vmul.f32 %v7353_v63, %v705_v32  ;;  %v1536_v62 = vmax.f32 %v1408_v42, 0.0  ;;  %v1715_v21 = vadd.f32 %v1714_v59, %v1713_v58  ;;  %v1704_v48 = vadd.f32 %v1703_v44, %v1702_v12 }
 0x14d   :  { %1208 = vbcast.lane.b32.xlu1 %v1206_v13, 256  ;;  %1152 = vbcast.lane.b32.xlu0 %v1150_v22, 256  ;;  %v1279_v22 = vmul.f32 %v7353_v63, %v7692_v28  ;;  %v2118_v42 = vrot.slane %v7735_v6, %v7213_v14  ;;  %v1287_v32 = vmul.f32 %v7353_v63, %v7708_v60 }
 0x14e   :  { %v1401_v0 = vadd.f32 %v7363_v7, %v1269_v49  ;;  %v1718_v1 = vsel %vm120_vm0, %v1536_v62, 0.0  ;;  %v1717_v53 = vadd.f32 %v1716_v54, %v1715_v21  ;;  %v1410_v61 = vadd.f32 %v7363_v7, %v1278_v18 }
 0x14f   :  { %v845_v4 = vpop.permute.xlu1 %844  ;;  %v761_v31 = vpop.permute.xlu0 %760  ;;  %v1411_v28 = vadd.f32 %v7363_v7, %v1279_v22  ;;  %v1288_v49 = vmul.f32 %v7353_v63, %v7744_v25  ;;  %v2167_v60 = vrot.slane %v7763_v26, %v7206_v11  ;;  %v1419_v50 = vadd.f32 %v7363_v7, %v1287_v32 }
 0x150   :  { %v1529_v13 = vmax.f32 %v1401_v0, 0.0  ;;  %v1277_v8 = vmul.f32 %v7353_v63, %v761_v31  ;;  %v1719_v29 = vadd.f32 %v1718_v1, %v1717_v53  ;;  %v1289_v25 = vmul.f32 %v7353_v63, %v845_v4 }
 0x151   :  { %2099 = vbcast.lane.b32.xlu1 %v2097_v37, 256  ;;  %2092 = vbcast.lane.b32.xlu0 %v2090_v55, 256  ;;  %v1281_v37 = vmul.f32 %v7353_v63, %v789_v45  ;;  %v1539_v46 = vmax.f32 %v1411_v28, 0.0  ;;  %v1418_v55 = vadd.f32 %v7363_v7, %v1286_v9  ;;  %v2132_v58 = vrot.slane %v7735_v6, %v7244_v35 }
 0x152   :  { %v1705_v23 = vsel %vm120_vm0, %v1529_v13, 0.0  ;;  %v1409_v24 = vadd.f32 %v7363_v7, %v1277_v8  ;;  %v2174_v12 = vrot.slane %v7763_v26, %v7213_v14  ;;  %v1538_v31 = vmax.f32 %v1410_v61, 0.0 }
 0x153   :  { %v1706_v52 = vadd.f32 %v1705_v23, %v1704_v48  ;;  %v852_v27 = vpop.permute.xlu1 %851  ;;  %v796_v34 = vpop.permute.xlu0 %795  ;;  %v1413_v59 = vadd.f32 %v7363_v7, %v1281_v37  ;;  %v1420_v54 = vadd.f32 %v7363_v7, %v1288_v49  ;;  %v2139_v13 = vrot.slane %v7735_v6, %v7257_v47  ;;  %v6949_v48 = vld [vmem:[#allocation5 + $0x10] sm:$0xff] }
 0x154   :  { %v1537_v38 = vmax.f32 %v1409_v24, 0.0  ;;  %v1282_v45 = vmul.f32 %v7353_v63, %v796_v34  ;;  %v2181_v8 = vrot.slane %v7763_v26, %v7224_v19  ;;  %v1540_v4 = vmax.f32 %v1412_v41, 0.0 }
 0x155   :  { %2148 = vbcast.lane.b32.xlu1 %v2146_v17, 256  ;;  %2106 = vbcast.lane.b32.xlu0 %v2104_v15, 256  ;;  %v1290_v15 = vmul.f32 %v7353_v63, %v852_v27  ;;  %vm2057_vm3 = vcmp.gt.f32.partialorder %v6949_v48, 0.0  ;;  %v1723_v17 = vsel %vm120_vm0, %v1539_v46, 0.0  ;;  %v1547_v1 = vmax.f32 %v1419_v50, 0.0 }
 0x156   :  { %v1720_v20 = vsel %vm120_vm0, %v1537_v38, 0.0  ;;  %6642 = vmatprep.mubr.msk.f32.mxu0 %vm120_vm0, %v1706_v52  ;;  %v1414_v21 = vadd.f32 %v7363_v7, %v1282_v45  ;;  %v1546_v23 = vmax.f32 %v1418_v55, 0.0  ;;  %v1541_v24 = vmax.f32 %v1413_v59, 0.0  ;;  %v6950_v45 = vld [vmem:[#allocation5 + $0x18] sm:$0xff] }
 0x157   :  { %v1721_v30 = vadd.f32 %v1720_v20, %v1719_v29  ;;  %v7785_v36 = vpop.permute.xlu1 %879  ;;  %v803_v39 = vpop.permute.xlu0 %802  ;;  %v1421_v6 = vadd.f32 %v7363_v7, %v1289_v25  ;;  %v1722_v29 = vsel %vm120_vm0, %v1538_v31, 0.0  ;;  %v7845_v20 = vsel %vm2057_vm3, 1.0, %v10513_v56 }
 0x158   :  { %v1283_v0 = vmul.f32 %v7353_v63, %v803_v39  ;;  %v1725_v22 = vsel %vm120_vm0, %v1540_v4, 0.0  ;;  %v1542_v39 = vmax.f32 %v1414_v21, 0.0  ;;  %v1737_v5 = vsel %vm120_vm0, %v1546_v23, 0.0 }
 0x159   :  { %2113 = vbcast.lane.b32.xlu1 %v2111_v16, 256  ;;  %2155 = vbcast.lane.b32.xlu0 %v2153_v40, 256  ;;  %v1548_v16 = vmax.f32 %v1420_v54, 0.0  ;;  %v2195_v40 = vrot.slane %v7763_v26, %v7257_v47  ;;  %v1727_v28 = vsel %vm120_vm0, %v1541_v24, 0.0  ;;  %v1549_v37 = vmax.f32 %v1421_v6, 0.0 }
 0x15a   :  { %6643 = vmatmul.mubr.msk.f32.gmra.mrb[6].mxu0 %vm120_vm0, %v1721_v30  ;;  %v1415_v34 = vadd.f32 %v7363_v7, %v1283_v0  ;;  %v1422_v30 = vadd.f32 %v7363_v7, %v1290_v15  ;;  %v2188_v41 = vrot.slane %v7763_v26, %v7244_v35  ;;  %vm2058_vm4 = vcmp.gt.f32.partialorder %v6950_v45, 0.0 }
 0x15b   :  { %v859_v51 = vpop.permute.xlu1 %858  ;;  %v7802_v33 = vpop.permute.xlu0 %886  ;;  %v1729_v50 = vsel %vm120_vm0, %v1542_v39, 0.0  ;;  %v2209_v31 = vrot.slane %v7845_v20, %v7188_v3  ;;  %v1742_v54 = vsel %vm120_vm0, %v1549_v37, 0.0  ;;  %v2202_v21 = vrot.slane %v7845_v20, %v7185_v2 }
 0x15c   :  { %v1291_v38 = vmul.f32 %v7353_v63, %v859_v51  ;;  %v1543_v51 = vmax.f32 %v1415_v34, 0.0  ;;  %v1550_v46 = vmax.f32 %v1422_v30, 0.0  ;;  %v7873_v48 = vsel %vm2058_vm4, 1.0, %v10513_v56 }
 0x15d   :  { %2120 = vbcast.lane.b32.xlu1 %v2118_v42, 256  ;;  %2162 = vbcast.lane.b32.xlu0 %v2160_v43, 256  ;;  %v1724_v42 = vadd.f32 %v1723_v17, %v1722_v29  ;;  %v1738_v43 = vsel %vm120_vm0, %v1547_v1, 0.0  ;;  %v107_v17 = vld [vmem:[#allocation7 + $0x20] sm:$0xff]  ;;  %v108_v1 = vld [vmem:[#allocation7 + $0x28] sm:$0xff]  ;;  %v2216_v39 = vrot.slane %v7845_v20, %v7203_v10  ;;  %v2265_v45 = vrot.slane %v7873_v48, %v7188_v3 }
 0x15e   :  { %v1739_v25 = vadd.f32 %v1738_v43, %v1737_v5  ;;  %v1731_v26 = vsel %vm120_vm0, %v1543_v51, 0.0  ;;  %v1744_v23 = vsel %vm120_vm0, %v1550_v46, 0.0  ;;  %v2258_v43 = vrot.slane %v7873_v48, %v7185_v2 }
 0x15f   :  { %v7816_v44 = vpop.permute.xlu1 %942  ;;  %v7818_v62 = vpop.permute.xlu0 %935  ;;  %v1726_v49 = vadd.f32 %v1725_v22, %v1724_v42  ;;  %vm4175_vm3 = vcmask 1043459   ;;  %vm4177_vm4 = vcmask 1044484  }
 0x161   :  { %2127 = vbcast.lane.b32.xlu1 %v2125_v57, 256  ;;  %2169 = vbcast.lane.b32.xlu0 %v2167_v60, 256  ;;  %v1423_v57 = vadd.f32 %v7363_v7, %v1291_v38  ;;  %v1740_v60 = vsel %vm120_vm0, %v1548_v16, 0.0  ;;  %v1728_v0 = vadd.f32 %v1727_v28, %v1726_v49  ;;  %v7880_v16 = vpack.c.bf16 %v108_v1, %v107_v17 }
 0x162   :  { %v1741_v4 = vadd.f32 %v1740_v60, %v1739_v25  ;;  %v2244_v1 = vrot.slane %v7845_v20, %v7244_v35 }
 0x163   :  { %v7834_v53 = vpop.permute.xlu1 %893  ;;  %v810_v52 = vpop.permute.xlu0 %809  ;;  %v1730_v15 = vadd.f32 %v1729_v50, %v1728_v0  ;;  %6773 = vmatprep.subr.bf16.mxu1 %v7880_v16  ;;  %v1295_v50 = vmul.f32 %v7353_v63, %v7802_v33  ;;  %v2230_v0 = vrot.slane %v7845_v20, %v7213_v14 }
 0x164   :  { %v1284_v27 = vmul.f32 %v7353_v63, %v810_v52  ;;  %v1743_v34 = vadd.f32 %v1742_v54, %v1741_v4  ;;  %6775 = vmatpush3.bf16.msra.mxu1 %v7880_v16  ;;  %v2237_v54 = vrot.slane %v7845_v20, %v7224_v19  ;;  %v1296_v33 = vmul.f32 %v7353_v63, %v7834_v53 }
 0x165   :  { %2134 = vbcast.lane.b32.xlu1 %v2132_v58, 256  ;;  %2176 = vbcast.lane.b32.xlu0 %v2174_v12, 256  ;;  %v1732_v38 = vadd.f32 %v1731_v26, %v1730_v15  ;;  %v2279_v26 = vrot.slane %v7873_v48, %v7206_v11  ;;  %v1303_v4 = vmul.f32 %v7353_v63, %v7816_v44 }
 0x166   :  { %v1416_v18 = vadd.f32 %v7363_v7, %v1284_v27  ;;  %v1302_v15 = vmul.f32 %v7353_v63, %v7818_v62  ;;  %v2293_v44 = vrot.slane %v7873_v48, %v7224_v19 }
 0x167   :  { %v7853_v32 = vpop.permute.xlu1 %949  ;;  %v866_v9 = vpop.permute.xlu0 %865 }
 0x168   :  { %v1292_v61 = vmul.f32 %v7353_v63, %v866_v9  ;;  %v1544_v55 = vmax.f32 %v1416_v18, 0.0  ;;  %v1745_v18 = vadd.f32 %v1744_v23, %v1743_v34  ;;  %v2286_v23 = vrot.slane %v7873_v48, %v7213_v14 }
 0x169   :  { %2141 = vbcast.lane.b32.xlu1 %v2139_v13, 256  ;;  %2183 = vbcast.lane.b32.xlu0 %v2181_v8, 256  ;;  %v1551_v13 = vmax.f32 %v1423_v57, 0.0  ;;  %v1428_v34 = vadd.f32 %v7363_v7, %v1296_v33 }
 0x16a   :  { %v1424_v59 = vadd.f32 %v7363_v7, %v1292_v61  ;;  %v1733_v24 = vsel %vm120_vm0, %v1544_v55, 0.0 }
 0x16b   :  { %v7862_v58 = vpop.permute.xlu1 %900  ;;  %v817_v12 = vpop.permute.xlu0 %816  ;;  %v1734_v42 = vadd.f32 %v1733_v24, %v1732_v38  ;;  %v2251_v24 = vrot.slane %v7845_v20, %v7257_v47 }
 0x16c   :  { %v1285_v8 = vmul.f32 %v7353_v63, %v817_v12  ;;  %v1552_v52 = vmax.f32 %v1424_v59, 0.0  ;;  %v1294_v12 = vmul.f32 %v7353_v63, %v7785_v36  ;;  %v1427_v36 = vadd.f32 %v7363_v7, %v1295_v50 }
 0x16d   :  { %2197 = vbcast.lane.b32.xlu1 %v2195_v40, 256  ;;  %2190 = vbcast.lane.b32.xlu0 %v2188_v41, 256  ;;  %v1746_v40 = vsel %vm120_vm0, %v1551_v13, 0.0  ;;  %v2223_v41 = vrot.slane %v7845_v20, %v7206_v11  ;;  %v6951_v13 = vld [vmem:[#allocation5 + $0x20] sm:$0xff]  ;;  %v1297_v53 = vmul.f32 %v7353_v63, %v7862_v58  ;;  %v1304_v58 = vmul.f32 %v7353_v63, %v7853_v32 }
 0x16e   :  { %v1417_v6 = vadd.f32 %v7363_v7, %v1285_v8  ;;  %v1748_v5 = vsel %vm120_vm0, %v1552_v52, 0.0  ;;  %v1747_v37 = vadd.f32 %v1746_v40, %v1745_v18  ;;  %vm2059_vm5 = vcmp.gt.f32.partialorder %v6951_v13, 0.0  ;;  %v6952_v8 = vld [vmem:[#allocation5 + $0x28] sm:$0xff] }
 0x16f   :  { %v7878_v27 = vpop.permute.xlu1 %956  ;;  %v873_v29 = vpop.permute.xlu0 %872  ;;  %vm2060_vm6 = vcmp.gt.f32.partialorder %v6952_v8, 0.0  ;;  %v1426_v62 = vadd.f32 %v7363_v7, %v1294_v12  ;;  %v2307_v52 = vrot.slane %v7873_v48, %v7257_v47  ;;  %v1555_v32 = vmax.f32 %v1427_v36, 0.0 }
 0x170   :  { %v1545_v22 = vmax.f32 %v1417_v6, 0.0  ;;  %v1293_v30 = vmul.f32 %v7353_v63, %v873_v29  ;;  %v1749_v60 = vadd.f32 %v1748_v5, %v1747_v37  ;;  %v7942_v6 = vsel %vm2059_vm5, 1.0, %v10513_v56  ;;  %v109_v37 = vld [vmem:[#allocation7 + $0x30] sm:$0xff] }
 0x171   :  { %2211 = vbcast.lane.b32.xlu1 %v2209_v31, 256  ;;  %2204 = vbcast.lane.b32.xlu0 %v2202_v21, 256  ;;  %v2272_v31 = vrot.slane %v7873_v48, %v7203_v10  ;;  %v2300_v29 = vrot.slane %v7873_v48, %v7244_v35  ;;  %v7950_v40 = vsel %vm2060_vm6, 1.0, %v10513_v56  ;;  %vm4179_vm5 = vcmask 1045509  }
 0x172   :  { %v1735_v28 = vsel %vm120_vm0, %v1545_v22, 0.0  ;;  %v1425_v9 = vadd.f32 %v7363_v7, %v1293_v30  ;;  %v1435_v22 = vadd.f32 %v7363_v7, %v1303_v4  ;;  %v1434_v30 = vadd.f32 %v7363_v7, %v1302_v15 }
 0x173   :  { %v1736_v51 = vadd.f32 %v1735_v28, %v1734_v42  ;;  %v7892_v57 = vpop.permute.xlu1 %963  ;;  %v908_v61 = vpop.permute.xlu0 %907  ;;  %v2321_v28 = vrot.slane %v7942_v6, %v7188_v3  ;;  %v2370_v50 = vrot.slane %v7950_v40, %v7185_v2  ;;  %v2335_v4 = vrot.slane %v7942_v6, %v7206_v11 }
 0x174   :  { %v1553_v49 = vmax.f32 %v1425_v9, 0.0  ;;  %v1298_v38 = vmul.f32 %v7353_v63, %v908_v61  ;;  %v2314_v9 = vrot.slane %v7942_v6, %v7185_v2  ;;  %v1554_v61 = vmax.f32 %v1426_v62, 0.0 }
 0x175   :  { %2260 = vbcast.lane.b32.xlu1 %v2258_v43, 256  ;;  %2218 = vbcast.lane.b32.xlu0 %v2216_v39, 256  ;;  %v1429_v39 = vadd.f32 %v7363_v7, %v1297_v53  ;;  %v1305_v43 = vmul.f32 %v7353_v63, %v7878_v27  ;;  %v1556_v27 = vmax.f32 %v1428_v34, 0.0  ;;  %v2377_v15 = vrot.slane %v7950_v40, %v7188_v3 }
 0x176   :  { %v1750_v46 = vsel %vm120_vm0, %v1553_v49, 0.0  ;;  %6645 = vmatprep.mubr.msk.f32.mxu0 %vm120_vm0, %v1736_v51  ;;  %v110_v51 = vld [vmem:[#allocation7 + $0x38] sm:$0xff]  ;;  %v1436_v49 = vadd.f32 %v7363_v7, %v1304_v58  ;;  %v1752_v8 = vsel %vm120_vm0, %v1554_v61, 0.0  ;;  %v2342_v61 = vrot.slane %v7942_v6, %v7213_v14 }
 0x177   :  { %v1751_v55 = vadd.f32 %v1750_v46, %v1749_v60  ;;  %v7903_v59 = vpop.permute.xlu1 %991  ;;  %v915_v25 = vpop.permute.xlu0 %914  ;;  %v2328_v60 = vrot.slane %v7942_v6, %v7203_v10  ;;  %v1430_v46 = vadd.f32 %v7363_v7, %v1298_v38  ;;  %v1557_v12 = vmax.f32 %v1429_v39, 0.0 }
 0x178   :  { %v1299_v5 = vmul.f32 %v7353_v63, %v915_v25  ;;  %v1563_v25 = vmax.f32 %v1435_v22, 0.0  ;;  %v1437_v33 = vadd.f32 %v7363_v7, %v1305_v43  ;;  %v1564_v36 = vmax.f32 %v1436_v49, 0.0 }
 0x179   :  { %2225 = vbcast.lane.b32.xlu1 %v2223_v41, 256  ;;  %2267 = vbcast.lane.b32.xlu0 %v2265_v45, 256  ;;  %v7969_v41 = vpack.c.bf16 %v110_v51, %v109_v37  ;;  %v1306_v45 = vmul.f32 %v7353_v63, %v7892_v57  ;;  %v1755_v53 = vsel %vm120_vm0, %v1556_v27, 0.0  ;;  %v2384_v49 = vrot.slane %v7950_v40, %v7203_v10 }
 0x17a   :  { %6646 = vmatmul.mubr.msk.f32.gmra.mrb[8].mxu0 %vm120_vm0, %v1751_v55  ;;  %v1753_v55 = vsel %vm120_vm0, %v1555_v32, 0.0  ;;  %v1768_v38 = vsel %vm120_vm0, %v1563_v25, 0.0  ;;  %v1770_v51 = vsel %vm120_vm0, %v1564_v36, 0.0  ;;  %v2356_v36 = vrot.slane %v7942_v6, %v7244_v35 }
 0x17b   :  { %v971_v21 = vpop.permute.xlu1 %970  ;;  %v7925_v17 = vpop.permute.xlu0 %998  ;;  %6777 = vmatprep.subr.bf16.mxu1 %v7969_v41  ;;  %v1438_v62 = vadd.f32 %v7363_v7, %v1306_v45  ;;  %v1754_v34 = vadd.f32 %v1753_v55, %v1752_v8  ;;  %v2398_v48 = vrot.slane %v7950_v40, %v7213_v14  ;;  %vm4181_vm6 = vcmask 1046534  }
 0x17c   :  { %v1307_v57 = vmul.f32 %v7353_v63, %v971_v21  ;;  %6779 = vmatpush3.bf16.msra.mxu1 %v7969_v41  ;;  %v1558_v21 = vmax.f32 %v1430_v46, 0.0 }
 0x17d   :  { %2232 = vbcast.lane.b32.xlu1 %v2230_v0, 256  ;;  %2274 = vbcast.lane.b32.xlu0 %v2272_v31, 256  ;;  %v1562_v0 = vmax.f32 %v1434_v30, 0.0  ;;  %v1565_v30 = vmax.f32 %v1437_v33, 0.0  ;;  %v1756_v37 = vadd.f32 %v1755_v53, %v1754_v34  ;;  %v1566_v27 = vmax.f32 %v1438_v62, 0.0  ;;  %v6953_v53 = vld [vmem:[#allocation5 + $0x30] sm:$0xff] }
 0x17e   :  { %6781 = vmatprep.subr.bf16.mxu1 %v7880_v16  ;;  %v1439_v43 = vadd.f32 %v7363_v7, %v1307_v57  ;;  %v1759_v45 = vsel %vm120_vm0, %v1558_v21, 0.0  ;;  %vm2061_vm7 = vcmp.gt.f32.partialorder %v6953_v53, 0.0 }
 0x17f   :  { %v7955_v18 = vpop.permute.xlu1 %1054  ;;  %v7957_v42 = vpop.permute.xlu0 %1047  ;;  %v1774_v62 = vsel %vm120_vm0, %v1566_v27, 0.0  ;;  %v8052_v27 = vsel %vm2061_vm7, 1.0, %v10513_v56  ;;  %vm4183_vm7 = vcmask 1047559  }
 0x181   :  { %2239 = vbcast.lane.b32.xlu1 %v2237_v54, 256  ;;  %2281 = vbcast.lane.b32.xlu0 %v2279_v26, 256  ;;  %v1431_v26 = vadd.f32 %v7363_v7, %v1299_v5 }
 0x183   :  { %v7977_v31 = vpop.permute.xlu1 %1005  ;;  %v922_v54 = vpop.permute.xlu0 %921  ;;  %v1559_v39 = vmax.f32 %v1431_v26, 0.0  ;;  %v1567_v26 = vmax.f32 %v1439_v43, 0.0  ;;  %v2363_v43 = vrot.slane %v7942_v6, %v7257_v47 }
 0x184   :  { %v1300_v13 = vmul.f32 %v7353_v63, %v922_v54  ;;  %v1772_v54 = vsel %vm120_vm0, %v1565_v30, 0.0 }
 0x185   :  { %2246 = vbcast.lane.b32.xlu1 %v2244_v1, 256  ;;  %2288 = vbcast.lane.b32.xlu0 %v2286_v23, 256  ;;  %v1767_v1 = vsel %vm120_vm0, %v1562_v0, 0.0  ;;  %v1757_v23 = vsel %vm120_vm0, %v1557_v12, 0.0  ;;  %v2391_v12 = vrot.slane %v7950_v40, %v7206_v11  ;;  %v1761_v33 = vsel %vm120_vm0, %v1559_v39, 0.0 }
 0x186   :  { %v1432_v58 = vadd.f32 %v7363_v7, %v1300_v13  ;;  %v1769_v25 = vadd.f32 %v1768_v38, %v1767_v1  ;;  %v1758_v0 = vadd.f32 %v1757_v23, %v1756_v37 }
 0x187   :  { %v7997_v32 = vpop.permute.xlu1 %1061  ;;  %v978_v22 = vpop.permute.xlu0 %977 }
 0x188   :  { %v1308_v5 = vmul.f32 %v7353_v63, %v978_v22  ;;  %v1560_v46 = vmax.f32 %v1432_v58, 0.0  ;;  %v1771_v13 = vadd.f32 %v1770_v51, %v1769_v25  ;;  %v1760_v8 = vadd.f32 %v1759_v45, %v1758_v0 }
 0x189   :  { %2253 = vbcast.lane.b32.xlu1 %v2251_v24, 256  ;;  %2295 = vbcast.lane.b32.xlu0 %v2293_v44, 256  ;;  %v2349_v44 = vrot.slane %v7942_v6, %v7224_v19  ;;  %v1776_v22 = vsel %vm120_vm0, %v1567_v26, 0.0  ;;  %v2405_v51 = vrot.slane %v7950_v40, %v7224_v19 }
 0x18a   :  { %v1440_v55 = vadd.f32 %v7363_v7, %v1308_v5  ;;  %v1763_v21 = vsel %vm120_vm0, %v1560_v46, 0.0  ;;  %v1773_v38 = vadd.f32 %v1772_v54, %v1771_v13  ;;  %v1762_v1 = vadd.f32 %v1761_v33, %v1760_v8 }
 0x18b   :  { %v8014_v20 = vpop.permute.xlu1 %1012  ;;  %v929_v24 = vpop.permute.xlu0 %928  ;;  %v2419_v54 = vrot.slane %v7950_v40, %v7257_v47  ;;  %v2412_v33 = vrot.slane %v7950_v40, %v7244_v35  ;;  %v2426_v13 = vrot.slane %v8052_v27, %v7185_v2  ;;  %v2440_v8 = vrot.slane %v8052_v27, %v7203_v10 }
 0x18c   :  { %v1301_v57 = vmul.f32 %v7353_v63, %v929_v24  ;;  %v1568_v58 = vmax.f32 %v1440_v55, 0.0  ;;  %v1775_v5 = vadd.f32 %v1774_v62, %v1773_v38  ;;  %v1764_v37 = vadd.f32 %v1763_v21, %v1762_v1 }
 0x18d   :  { %2309 = vbcast.lane.b32.xlu1 %v2307_v52, 256  ;;  %2302 = vbcast.lane.b32.xlu0 %v2300_v29, 256  ;;  %v6954_v29 = vld [vmem:[#allocation5 + $0x38] sm:$0xff]  ;;  %v2447_v21 = vrot.slane %v8052_v27, %v7206_v11 }
 0x18e   :  { %v1433_v34 = vadd.f32 %v7363_v7, %v1301_v57  ;;  %vm2062_vm8 = vcmp.gt.f32.partialorder %v6954_v29, 0.0  ;;  %v1778_v45 = vsel %vm120_vm0, %v1568_v58, 0.0  ;;  %v2433_v57 = vrot.slane %v8052_v27, %v7188_v3 }
 0x18f   :  { %v8034_v23 = vpop.permute.xlu1 %1068  ;;  %v985_v52 = vpop.permute.xlu0 %984  ;;  %v8058_v25 = vsel %vm2062_vm8, 1.0, %v10513_v56  ;;  %v1311_v58 = vmul.f32 %v7353_v63, %v7925_v17 }
 0x190   :  { %v1561_v30 = vmax.f32 %v1433_v34, 0.0  ;;  %v1309_v39 = vmul.f32 %v7353_v63, %v985_v52  ;;  %v2482_v62 = vrot.slane %v8058_v25, %v7185_v2  ;;  %v1319_v34 = vmul.f32 %v7353_v63, %v7955_v18 }
 0x191   :  { %2323 = vbcast.lane.b32.xlu1 %v2321_v28, 256  ;;  %2316 = vbcast.lane.b32.xlu0 %v2314_v9, 256  ;;  %v1777_v28 = vadd.f32 %v1776_v22, %v1775_v5  ;;  %v1310_v22 = vmul.f32 %v7353_v63, %v7903_v59 }
 0x192   :  { %v1765_v46 = vsel %vm120_vm0, %v1561_v30, 0.0  ;;  %v1441_v55 = vadd.f32 %v7363_v7, %v1309_v39  ;;  %v6955_v39 = vld [vmem:[#allocation8] sm:$0x1f] }
 0x193   :  { %v1766_v0 = vadd.f32 %v1765_v46, %v1764_v37  ;;  %v8060_v24 = vpop.permute.xlu1 %1075  ;;  %v1020_v9 = vpop.permute.xlu0 %1019  ;;  %v1779_v53 = vadd.f32 %v1778_v45, %v1777_v28  ;;  %v8103_v5 = vrot.slane %v6955_v39, %v7185_v2  ;;  %v1312_v37 = vmul.f32 %v7353_v63, %v7977_v31  ;;  %v6956_v46 = vld [vmem:[#allocation5 + $0x40] sm:$0xff] }
 0x194   :  { %v1569_v26 = vmax.f32 %v1441_v55, 0.0  ;;  %v1320_v45 = vmul.f32 %v7353_v63, %v7997_v32  ;;  %vm2063_vm9 = vcmp.gt.f32.partialorder %v6956_v46, 0.0  ;;  %v1443_v55 = vadd.f32 %v7363_v7, %v1311_v58 }
 0x195   :  { %2372 = vbcast.lane.b32.xlu1 %v2370_v50, 256  ;;  %2330 = vbcast.lane.b32.xlu0 %v2328_v60, 256  ;;  %v2489_v50 = vrot.slane %v8058_v25, %v7188_v3  ;;  %v1318_v60 = vmul.f32 %v7353_v63, %v7957_v42  ;;  %v8106_v42 = vrot.slane %v6955_v39, %v7203_v10 }
 0x196   :  { %v1780_v38 = vsel %vm120_vm0, %v1569_v26, 0.0  ;;  %6648 = vmatprep.mubr.msk.f32.mxu0 %vm120_vm0, %v1766_v0  ;;  %v1451_v31 = vadd.f32 %v7363_v7, %v1319_v34  ;;  %v1313_v32 = vmul.f32 %v7353_v63, %v8014_v20  ;;  %v1442_v20 = vadd.f32 %v7363_v7, %v1310_v22  ;;  %v6957_v22 = vld [vmem:[#allocation5 + $0x48] sm:$0xff] }
 0x197   :  { %v1781_v1 = vadd.f32 %v1780_v38, %v1779_v53  ;;  %v8092_v52 = vpop.permute.xlu1 %1103  ;;  %v1027_v29 = vpop.permute.xlu0 %1026  ;;  %v1450_v28 = vadd.f32 %v7363_v7, %v1318_v60  ;;  %v8141_v38 = vadd.f32 %v8106_v42, %v8103_v5  ;;  %v1444_v60 = vadd.f32 %v7363_v7, %v1312_v37 }
 0x198   :  { %v1314_v46 = vmul.f32 %v7353_v63, %v1020_v9  ;;  %vm2064_vm10 = vcmp.gt.f32.partialorder %v6957_v22, 0.0  ;;  %v1571_v34 = vmax.f32 %v1443_v55, 0.0  ;;  %v1579_v58 = vmax.f32 %v1451_v31, 0.0 }
 0x199   :  { %2337 = vbcast.lane.b32.xlu1 %v2335_v4, 256  ;;  %2379 = vbcast.lane.b32.xlu0 %v2377_v15, 256  ;;  %v1321_v15 = vmul.f32 %v7353_v63, %v8034_v23  ;;  %v8144_v23 = vsel %vm2063_vm9, 1.0, %v10513_v56  ;;  %v1445_v53 = vadd.f32 %v7363_v7, %v1313_v32  ;;  %v1322_v4 = vmul.f32 %v7353_v63, %v8060_v24  ;;  %vm10417_vm9 = vmpackc.low %vm120_vm0, %vm120_vm0 }
 0x19a   :  { %6649 = vmatmul.mubr.msk.f32.gmra.mrb[10].mxu0 %vm120_vm0, %v1781_v1  ;;  %v1452_v1 = vadd.f32 %v7363_v7, %v1320_v45  ;;  %v1578_v45 = vmax.f32 %v1450_v28, 0.0  ;;  %v1315_v55 = vmul.f32 %v7353_v63, %v1027_v29  ;;  %v8167_v31 = vrot.slane %v6955_v39, %v7188_v3 }
 0x19b   :  { %v1083_v0 = vpop.permute.xlu1 %1082  ;;  %v8130_v26 = vpop.permute.xlu0 %1110  ;;  %v1453_v9 = vadd.f32 %v7363_v7, %v1321_v15  ;;  %v8172_v28 = vsel %vm2064_vm10, 1.0, %v10513_v56  ;;  %v1570_v15 = vmax.f32 %v1442_v20, 0.0  ;;  %v1572_v22 = vmax.f32 %v1444_v60, 0.0 }
 0x19c   :  { %10660 = vst [vmem:[#allocation15_spill] sm:$0xff] %v8167_v31  ;;  %v1580_v24 = vmax.f32 %v1452_v1, 0.0  ;;  %v1446_v37 = vadd.f32 %v7363_v7, %v1314_v46  ;;  %v1783_v29 = vsel %vm120_vm0, %v1571_v34, 0.0  ;;  %v1798_v39 = vsel %vm120_vm0, %v1579_v58, 0.0 }
 0x19d   :  { %2344 = vbcast.lane.b32.xlu1 %v2342_v61, 256  ;;  %2386 = vbcast.lane.b32.xlu0 %v2384_v49, 256  ;;  %v1573_v32 = vmax.f32 %v1445_v53, 0.0  ;;  %v1797_v60 = vsel %vm120_vm0, %v1578_v45, 0.0  ;;  %v1581_v1 = vmax.f32 %v1453_v9, 0.0  ;;  %v1454_v46 = vadd.f32 %v7363_v7, %v1322_v4 }
 0x19e   :  { %v1323_v49 = vmul.f32 %v7353_v63, %v1083_v0  ;;  %v1447_v30 = vadd.f32 %v7363_v7, %v1315_v55  ;;  %v1782_v34 = vsel %vm120_vm0, %v1570_v15, 0.0  ;;  %v1785_v45 = vsel %vm120_vm0, %v1572_v22, 0.0 }
 0x19f   :  { %v1167_v61 = vpop.permute.xlu1 %1166  ;;  %v8161_v59 = vpop.permute.xlu0 %1159  ;;  %v1800_v4 = vsel %vm120_vm0, %v1580_v24, 0.0  ;;  %v1574_v9 = vmax.f32 %v1446_v37, 0.0  ;;  %v1799_v0 = vadd.f32 %v1798_v39, %v1797_v60  ;;  %v1787_v55 = vsel %vm120_vm0, %v1573_v32, 0.0 }
 0x1a0   :  { %v1802_v15 = vsel %vm120_vm0, %v1581_v1, 0.0  ;;  %v1582_v22 = vmax.f32 %v1454_v46, 0.0  ;;  %v1326_v37 = vmul.f32 %v7353_v63, %v8092_v52  ;;  %v1455_v24 = vadd.f32 %v7363_v7, %v1323_v49 }
 0x1a1   :  { %2351 = vbcast.lane.b32.xlu1 %v2349_v44, 256  ;;  %2393 = vbcast.lane.b32.xlu0 %v2391_v12, 256  ;;  %v1801_v18 = vadd.f32 %v1800_v4, %v1799_v0  ;;  %v1575_v17 = vmax.f32 %v1447_v30, 0.0  ;;  %v1327_v32 = vmul.f32 %v7353_v63, %v8130_v26  ;;  %v2559_v52 = vrot.slane %v8144_v23, %v7206_v11 }
 0x1a2   :  { %v2601_v30 = vrot.slane %v8172_v28, %v7188_v3  ;;  %v1804_v26 = vsel %vm120_vm0, %v1582_v22, 0.0  ;;  %v8226_v6 = vadd.f32 %v7363_v7, %v1326_v37  ;;  %v1335_v46 = vmul.f32 %v7353_v63, %v1167_v61 }
 0x1a3   :  { %v1118_v44 = vpop.permute.xlu1 %1117  ;;  %v1034_v56 = vpop.permute.xlu0 %1033  ;;  %v1803_v39 = vadd.f32 %v1802_v15, %v1801_v18  ;;  %vm7090_vm10 = vmmov 0  }
 0x1a4   :  { %v1316_v12 = vmul.f32 %v7353_v63, %v1034_v56  ;;  %v1784_v56 = vadd.f32 %v1783_v29, %v1782_v34  ;;  %v1789_v29 = vsel %vm120_vm0, %v1574_v9, 0.0  ;;  %v1328_v4 = vmul.f32 %v7353_v63, %v1118_v44 }
 0x1a5   :  { %2358 = vbcast.lane.b32.xlu1 %v2356_v36, 256  ;;  %2400 = vbcast.lane.b32.xlu0 %v2398_v48, 256  ;;  %v1467_v44 = vadd.f32 %v7363_v7, %v1335_v46 }
 0x1a6   :  { %v1448_v53 = vadd.f32 %v7363_v7, %v1316_v12  ;;  %v1786_v20 = vadd.f32 %v1785_v45, %v1784_v56  ;;  %v1791_v45 = vsel %vm120_vm0, %v1575_v17, 0.0  ;;  %v1805_v17 = vadd.f32 %v1804_v26, %v1803_v39 }
 0x1a7   :  { %v1174_v58 = vpop.permute.xlu1 %1173  ;;  %v1090_v36 = vpop.permute.xlu0 %1089 }
 0x1a8   :  { %v1324_v48 = vmul.f32 %v7353_v63, %v1090_v36  ;;  %v1788_v49 = vadd.f32 %v1787_v55, %v1786_v20  ;;  %v1576_v60 = vmax.f32 %v1448_v53, 0.0  ;;  %v1334_v20 = vmul.f32 %v7353_v63, %v8161_v59 }
 0x1a9   :  { %2365 = vbcast.lane.b32.xlu1 %v2363_v43, 256  ;;  %2407 = vbcast.lane.b32.xlu0 %v2405_v51, 256  ;;  %v1583_v43 = vmax.f32 %v1455_v24, 0.0  ;;  %v1459_v53 = vadd.f32 %v7363_v7, %v1327_v32  ;;  %v1336_v9 = vmul.f32 %v7353_v63, %v1174_v58  ;;  %v1460_v36 = vadd.f32 %v7363_v7, %v1328_v4 }
 0x1aa   :  { %v1456_v1 = vadd.f32 %v7363_v7, %v1324_v48  ;;  %v1790_v34 = vadd.f32 %v1789_v29, %v1788_v49  ;;  %v1793_v61 = vsel %vm120_vm0, %v1576_v60, 0.0 }
 0x1ab   :  { %v1125_v51 = vpop.permute.xlu1 %1124  ;;  %v1041_v12 = vpop.permute.xlu0 %1040  ;;  %v1806_v55 = vsel %vm120_vm0, %v1583_v43, 0.0  ;;  %v1587_v24 = vmax.f32 %v1459_v53, 0.0  ;;  %v1468_v29 = vadd.f32 %v7363_v7, %v1336_v9 }
 0x1ac   :  { %v1317_v18 = vmul.f32 %v7353_v63, %v1041_v12  ;;  %v1584_v59 = vmax.f32 %v1456_v1, 0.0  ;;  %v1792_v0 = vadd.f32 %v1791_v45, %v1790_v34  ;;  %v1329_v58 = vmul.f32 %v7353_v63, %v1125_v51 }
 0x1ad   :  { %2421 = vbcast.lane.b32.xlu1 %v2419_v54, 256  ;;  %2414 = vbcast.lane.b32.xlu0 %v2412_v33, 256  ;;  %v1466_v54 = vadd.f32 %v7363_v7, %v1334_v20  ;;  %v1807_v32 = vadd.f32 %v1806_v55, %v1805_v17  ;;  %v1595_v1 = vmax.f32 %v1467_v44, 0.0  ;;  %v1586_v20 = vmax.f32 %v8226_v6, 0.0 }
 0x1ae   :  { %v1449_v56 = vadd.f32 %v7363_v7, %v1317_v18  ;;  %v1794_v48 = vadd.f32 %v1793_v61, %v1792_v0  ;;  %v1808_v49 = vsel %vm120_vm0, %v1584_v59, 0.0  ;;  %v1461_v26 = vadd.f32 %v7363_v7, %v1329_v58 }
 0x1af   :  { %v1181_v15 = vpop.permute.xlu1 %1180  ;;  %v1097_v22 = vpop.permute.xlu0 %1096  ;;  %v1588_v18 = vmax.f32 %v1460_v36, 0.0  ;;  %v1596_v53 = vmax.f32 %v1468_v29, 0.0  ;;  %v1809_v4 = vadd.f32 %v1808_v49, %v1807_v32  ;;  %v2566_v6 = vrot.slane %v8144_v23, %v7213_v14 }
 0x1b0   :  { %v1577_v37 = vmax.f32 %v1449_v56, 0.0  ;;  %v1337_v40 = vmul.f32 %v7353_v63, %v1181_v15  ;;  %v1325_v33 = vmul.f32 %v7353_v63, %v1097_v22  ;;  %v1813_v59 = vsel %vm120_vm0, %v1587_v24, 0.0 }
 0x1b1   :  { %2435 = vbcast.lane.b32.xlu1 %v2433_v57, 256  ;;  %2428 = vbcast.lane.b32.xlu0 %v2426_v13, 256  ;;  %v1594_v57 = vmax.f32 %v1466_v54, 0.0  ;;  %v1589_v56 = vmax.f32 %v1461_v26, 0.0  ;;  %v1812_v54 = vsel %vm120_vm0, %v1586_v20, 0.0 }
 0x1b2   :  { %v1795_v39 = vsel %vm120_vm0, %v1577_v37, 0.0  ;;  %v1457_v60 = vadd.f32 %v7363_v7, %v1325_v33  ;;  %v1469_v46 = vadd.f32 %v7363_v7, %v1337_v40  ;;  %v1815_v37 = vsel %vm120_vm0, %v1588_v18, 0.0 }
 0x1b3   :  { %v1796_v43 = vadd.f32 %v1795_v39, %v1794_v48  ;;  %v1188_v51 = vpop.permute.xlu1 %1187  ;;  %v1132_v12 = vpop.permute.xlu0 %1131  ;;  %v1827_v58 = vsel %vm120_vm0, %v1594_v57, 0.0  ;;  %v1830_v40 = vsel %vm120_vm0, %v1596_v53, 0.0  ;;  %v1814_v32 = vadd.f32 %v1813_v59, %v1812_v54 }
 0x1b4   :  { %v1585_v34 = vmax.f32 %v1457_v60, 0.0  ;;  %v1338_v45 = vmul.f32 %v7353_v63, %v1188_v51  ;;  %v1330_v13 = vmul.f32 %v7353_v63, %v1132_v12  ;;  %v1597_v0 = vmax.f32 %v1469_v46, 0.0 }
 0x1b5   :  { %2484 = vbcast.lane.b32.xlu1 %v2482_v62, 256  ;;  %2442 = vbcast.lane.b32.xlu0 %v2440_v8, 256  ;;  %v1828_v8 = vsel %vm120_vm0, %v1595_v1, 0.0  ;;  %v1817_v39 = vsel %vm120_vm0, %v1589_v56, 0.0  ;;  %v1816_v51 = vadd.f32 %v1815_v37, %v1814_v32  ;;  %v10661_v57 = vrot.slane %v8052_v27, %v7213_v14  ;;  %v6958_v37 = vld [vmem:[#allocation5 + $0x50] sm:$0xff] }
 0x1b6   :  { %v1810_v9 = vsel %vm120_vm0, %v1585_v34, 0.0  ;;  %v1470_v17 = vadd.f32 %v7363_v7, %v1338_v45  ;;  %v1462_v61 = vadd.f32 %v7363_v7, %v1330_v13  ;;  %6651 = vmatprep.mubr.msk.f32.mxu0 %vm120_vm0, %v1796_v43  ;;  %v1829_v49 = vadd.f32 %v1828_v8, %v1827_v58 }
 0x1b7   :  { %v1811_v62 = vadd.f32 %v1810_v9, %v1809_v4  ;;  %v1195_v55 = vpop.permute.xlu1 %1194  ;;  %v1139_v44 = vpop.permute.xlu0 %1138  ;;  %v10662_v34 = vrot.slane %v8058_v25, %v7203_v10  ;;  %v1818_v4 = vadd.f32 %v1817_v39, %v1816_v51  ;;  %vm2065_vm11 = vcmp.gt.f32.partialorder %v6958_v37, 0.0 }
 0x1b8   :  { %v1339_v15 = vmul.f32 %v7353_v63, %v1195_v55  ;;  %v1331_v22 = vmul.f32 %v7353_v63, %v1139_v44  ;;  %v1598_v24 = vmax.f32 %v1470_v17, 0.0  ;;  %v1590_v36 = vmax.f32 %v1462_v61, 0.0 }
 0x1b9   :  { %2449 = vbcast.lane.b32.xlu1 %v2447_v21, 256  ;;  %2491 = vbcast.lane.b32.xlu0 %v2489_v50, 256  ;;  %v1832_v21 = vsel %vm120_vm0, %v1597_v0, 0.0  ;;  %v1831_v12 = vadd.f32 %v1830_v40, %v1829_v49  ;;  %v10668_v51 = vrot.slane %v8058_v25, %v7213_v14 }
 0x1ba   :  { %v1471_v48 = vadd.f32 %v7363_v7, %v1339_v15  ;;  %v1463_v29 = vadd.f32 %v7363_v7, %v1331_v22  ;;  %6652 = vmatmul.mubr.msk.f32.gmra.mrb[12].mxu0 %vm120_vm0, %v1811_v62  ;;  %v1834_v13 = vsel %vm120_vm0, %v1598_v24, 0.0  ;;  %v1819_v20 = vsel %vm120_vm0, %v1590_v36, 0.0 }
 0x1bb   :  { %v1202_v60 = vpop.permute.xlu1 %1201  ;;  %v1146_v1 = vpop.permute.xlu0 %1145  ;;  %v1833_v9 = vadd.f32 %v1832_v21, %v1831_v12  ;;  %v1820_v58 = vadd.f32 %v1819_v20, %v1818_v4  ;;  %v10663_v15 = vrot.slane %v8052_v27, %v7224_v19  ;;  %v10664_v22 = vrot.slane %v8058_v25, %v7206_v11  ;;  %v6959_v21 = vld [vmem:[#allocation5 + $0x58] sm:$0xff] }
 0x1bc   :  { %v1599_v50 = vmax.f32 %v1471_v48, 0.0  ;;  %v1591_v26 = vmax.f32 %v1463_v29, 0.0  ;;  %v1340_v43 = vmul.f32 %v7353_v63, %v1202_v60  ;;  %v1332_v46 = vmul.f32 %v7353_v63, %v1146_v1 }
 0x1bd   :  { %2456 = vbcast.lane.b32.xlu1 %v10661_v57, 256  ;;  %2498 = vbcast.lane.b32.xlu0 %v10662_v34, 256  ;;  %v1835_v8 = vadd.f32 %v1834_v13, %v1833_v9  ;;  %vm2066_vm12 = vcmp.gt.f32.partialorder %v6959_v21, 0.0  ;;  %v10669_v57 = vmov 0.0  }
 0x1be   :  { %v1472_v18 = vadd.f32 %v7363_v7, %v1340_v43  ;;  %v1464_v53 = vadd.f32 %v7363_v7, %v1332_v46  ;;  %v1836_v17 = vsel %vm120_vm0, %v1599_v50, 0.0  ;;  %v1821_v61 = vsel %vm120_vm0, %v1591_v26, 0.0 }
 0x1bf   :  { %v1209_v59 = vpop.permute.xlu1 %1208  ;;  %v1153_v56 = vpop.permute.xlu0 %1152  ;;  %v1837_v48 = vadd.f32 %v1836_v17, %v1835_v8  ;;  %v1822_v29 = vadd.f32 %v1821_v61, %v1820_v58  ;;  %v10667_v46 = vrot.slane %v8052_v27, %v7244_v35  ;;  %v8349_v34 = vsel %vm2065_vm11, 1.0, %v10669_v57 }
 0x1c0   :  { %v1600_v0 = vmax.f32 %v1472_v18, 0.0  ;;  %v1592_v62 = vmax.f32 %v1464_v53, 0.0  ;;  %v1341_v55 = vmul.f32 %v7353_v63, %v1209_v59  ;;  %v1333_v44 = vmul.f32 %v7353_v63, %v1153_v56  ;;  %v6960_v56 = vld [vmem:[#allocation5 + $0x60] sm:$0xff] }
 0x1c1   :  { %2463 = vbcast.lane.b32.xlu1 %v10663_v15, 256  ;;  %2505 = vbcast.lane.b32.xlu0 %v10664_v22, 256  ;;  %v8356_v53 = vsel %vm2066_vm12, 1.0, %v10669_v57  ;;  %vm2067_vm13 = vcmp.gt.f32.partialorder %v6960_v56, 0.0  ;;  %v10672_v8 = vrot.slane %v8052_v27, %v7257_v47  ;;  %v10673_v58 = vrot.slane %v8058_v25, %v7224_v19 }
 0x1c2   :  { %v1838_v40 = vsel %vm120_vm0, %v1600_v0, 0.0  ;;  %v1823_v24 = vsel %vm120_vm0, %v1592_v62, 0.0  ;;  %v1473_v63 = vadd.f32 %v7363_v7, %v1341_v55  ;;  %v1465_v36 = vadd.f32 %v7363_v7, %v1333_v44  ;;  %v6961_v44 = vld [vmem:[#allocation5 + $0x68] sm:$0xff] }
 0x1c3   :  { %v8329_v32 = vpop.permute.xlu1 %2099  ;;  %v8331_v49 = vpop.permute.xlu0 %2092  ;;  %v1839_v7 = vadd.f32 %v1838_v40, %v1837_v48  ;;  %v1824_v43 = vadd.f32 %v1823_v24, %v1822_v29  ;;  %vm2068_vm14 = vcmp.gt.f32.partialorder %v6961_v44, 0.0  ;;  %v10682_v44 = vrot.slane %v8144_v23, %v7188_v3 }
 0x1c4   :  { %10665 = vst [vmem:[#allocation16_spill] sm:$0xff] %v8329_v32  ;;  %10666 = vst [vmem:[#allocation17_spill] sm:$0xff] %v8331_v49  ;;  %v1601_v60 = vmax.f32 %v1473_v63, 0.0  ;;  %v1593_v1 = vmax.f32 %v1465_v36, 0.0  ;;  %v8390_v63 = vsel %vm2067_vm13, 1.0, %v10669_v57  ;;  %v10687_v24 = vrot.slane %v8144_v23, %v7203_v10 }
 0x1c5   :  { %2470 = vbcast.lane.b32.xlu1 %v10667_v46, 256  ;;  %2512 = vbcast.lane.b32.xlu0 %v10668_v51, 256 }
 0x1c6   :  { %v1840_v13 = vsel %vm120_vm0, %v1601_v60, 0.0  ;;  %v1825_v20 = vsel %vm120_vm0, %v1593_v1, 0.0  ;;  %v8405_v1 = vsel %vm2068_vm14, 1.0, %v10669_v57 }
 0x1c7   :  { %v1841_v4 = vadd.f32 %v1840_v13, %v1839_v7  ;;  %v1826_v9 = vadd.f32 %v1825_v20, %v1824_v43  ;;  %v8358_v17 = vpop.permute.xlu1 %2148  ;;  %v8360_v61 = vpop.permute.xlu0 %2106  ;;  %v10676_v20 = vrot.slane %v8058_v25, %v7257_v47  ;;  %v10686_v7 = vrot.slane %v8172_v28, %v7185_v2 }
 0x1c8   :  { %10670 = vst [vmem:[#allocation18_spill] sm:$0xff] %v8358_v17  ;;  %10671 = vst [vmem:[#allocation19_spill] sm:$0xff] %v8360_v61 }
 0x1c9   :  { %2477 = vbcast.lane.b32.xlu1 %v10672_v8, 256  ;;  %2519 = vbcast.lane.b32.xlu0 %v10673_v58, 256 }
 0x1ca   :  { %6654 = vmatprep.mubr.msk.f32.mxu0 %vm120_vm0, %v1826_v9 }
 0x1cb   :  { %6655 = vmatmul.mubr.msk.f32.gmra.mrb[14].mxu0 %vm120_vm0, %v1841_v4  ;;  %v8393_v36 = vpop.permute.xlu1 %2113  ;;  %v8395_v48 = vpop.permute.xlu0 %2155  ;;  %v10677_v4 = vrot.slane %v8058_v25, %v7244_v35 }
 0x1cc   :  { %10674 = vst [vmem:[#allocation20_spill] sm:$0xff] %v8393_v36  ;;  %10675 = vst [vmem:[#allocation21_spill] sm:$0xff] %v8395_v48 }
 0x1cd   :  { %v6635_v13 = vpop.f32.mrb[0].mxu0  ;;  %2533 = vbcast.lane.b32.xlu1 %v10676_v20, 256  ;;  %2526 = vbcast.lane.b32.xlu0 %v10677_v4, 256  ;;  %v6962_v20 = vld [vmem:[#allocation5 + $0x70] sm:$0xff] }
 0x1ce   :  { %v8428_v8 = vadd.f32 %v8141_v38, %v6635_v13  ;;  %v1960_v58 = vpop.f32.mrb[1].mxu0  ;;  %vm2069_vm15 = vcmp.gt.f32.partialorder %v6962_v20, 0.0  ;;  %v10683_v20 = vrot.slane %v8144_v23, %v7185_v2 }
 0x1cf   :  { %v8437_v9 = vadd.f32 %v8141_v38, %v1960_v58  ;;  %v8439_v56 = vpop.permute.xlu1 %2120  ;;  %v8441_v51 = vpop.permute.xlu0 %2162  ;;  %v8454_v46 = vsel %vm2069_vm15, 1.0, %v10669_v57 }
 0x1d0   :  { %10678 = vst [vmem:[#allocation22_spill] sm:$0xff] %v8428_v8  ;;  %10680 = vst [vmem:[#allocation24_spill] sm:$0xff] %v8439_v56  ;;  %v2988_v25 = vadd.f32 %v8428_v8, %v8167_v31 }
 0x1d1   :  { %10679 = vst [vmem:[#allocation23_spill] sm:$0xff] %v8437_v9  ;;  %10681 = vst [vmem:[#allocation25_spill] sm:$0xff] %v8441_v51  ;;  %v2987_v13 = vadd.f32 %v8437_v9, %v8167_v31  ;;  %2547 = vbcast.lane.b32.xlu1 %v10682_v44, 256  ;;  %2540 = vbcast.lane.b32.xlu0 %v10683_v20, 256 }
 0x1d2   :  { %v8468_v43 = vmax.f32 %v2988_v25, 0.0 }
 0x1d3   :  { %v8476_v21 = vmax.f32 %v2987_v13, 0.0  ;;  %v8478_v20 = vpop.permute.xlu1 %2127  ;;  %v8480_v29 = vpop.permute.xlu0 %2169 }
 0x1d4   :  { %10684 = vst [vmem:[#allocation26_spill] sm:$0xff] %v8478_v20  ;;  %10685 = vst [vmem:[#allocation27_spill] sm:$0xff] %v8480_v29  ;;  %v3027_v60 = vmul.f32 %v8468_v43, %v8358_v17  ;;  %v3028_v13 = vmul.f32 %v8468_v43, %v8395_v48  ;;  %v3029_v44 = vmul.f32 %v8468_v43, %v8441_v51 }
 0x1d5   :  { %v3030_v4 = vmul.f32 %v8468_v43, %v8480_v29  ;;  %v3023_v58 = vmul.f32 %v8476_v21, %v8439_v56  ;;  %v3024_v25 = vmul.f32 %v8476_v21, %v8478_v20  ;;  %2596 = vbcast.lane.b32.xlu1 %v10686_v7, 256  ;;  %2554 = vbcast.lane.b32.xlu0 %v10687_v24, 256 }
 0x1d6   :  { %v8508_v27 = vmul.f32 %v8476_v21, %v8331_v49  ;;  %v3203_v40 = vsel %vm120_vm0, %v3027_v60, 0.0  ;;  %v3210_v37 = vsel %vm120_vm0, %v3028_v13, 0.0  ;;  %v3217_v22 = vsel %vm120_vm0, %v3029_v44, 0.0 }
 0x1d7   :  { %v3224_v55 = vsel %vm120_vm0, %v3030_v4, 0.0  ;;  %v3175_v15 = vsel %vm120_vm0, %v3023_v58, 0.0  ;;  %v3204_v62 = vrot.slane %v3203_v40, 4  ;;  %v3211_v7 = vrot.slane %v3210_v37, 4  ;;  %v8515_v59 = vpop.permute.xlu1 %2134  ;;  %v8517_v24 = vpop.permute.xlu0 %2176 }
 0x1d8   :  { %v3218_v0 = vrot.slane %v3217_v22, 4  ;;  %10688 = vst [vmem:[#allocation28_spill] sm:$0xff] %v8515_v59  ;;  %10689 = vst [vmem:[#allocation29_spill] sm:$0xff] %v8517_v24  ;;  %v3176_v18 = vrot.slane %v3175_v15, 4  ;;  %v3182_v12 = vsel %vm120_vm0, %v3024_v25, 0.0  ;;  %v3225_v60 = vrot.slane %v3224_v55, 4 }
 0x1d9   :  { %v3025_v13 = vmul.f32 %v8476_v21, %v8515_v59  ;;  %v3205_v44 = vadd.f32 %v3204_v62, %v3203_v40  ;;  %v3212_v4 = vadd.f32 %v3211_v7, %v3210_v37  ;;  %v3183_v58 = vrot.slane %v3182_v12, 4  ;;  %2561 = vbcast.lane.b32.xlu1 %v2559_v52, 256  ;;  %2603 = vbcast.lane.b32.xlu0 %v2601_v30, 256 }
 0x1da   :  { %v3219_v26 = vadd.f32 %v3218_v0, %v3217_v22  ;;  %v3177_v50 = vadd.f32 %v3176_v18, %v3175_v15  ;;  %v3226_v25 = vadd.f32 %v3225_v60, %v3224_v55  ;;  %v3031_v54 = vmul.f32 %v8468_v43, %v8517_v24 }
 0x1db   :  { %v3189_v39 = vsel %vm120_vm0, %v3025_v13, 0.0  ;;  %v3206_v62 = vrot.slane %v3205_v44, 2  ;;  %v3213_v37 = vrot.slane %v3212_v4, 2  ;;  %v3184_v22 = vadd.f32 %v3183_v58, %v3182_v12  ;;  %v8531_v40 = vpop.permute.xlu1 %2141  ;;  %v8533_v7 = vpop.permute.xlu0 %2183 }
 0x1dc   :  { %v3220_v0 = vrot.slane %v3219_v26, 2  ;;  %10690 = vst [vmem:[#allocation30_spill] sm:$0xff] %v8531_v40  ;;  %10691 = vst [vmem:[#allocation31_spill] sm:$0xff] %v8533_v7  ;;  %v3178_v52 = vrot.slane %v3177_v50, 2  ;;  %v3227_v45 = vrot.slane %v3226_v25, 2  ;;  %v3190_v33 = vrot.slane %v3189_v39, 4 }
 0x1dd   :  { %v3231_v30 = vsel %vm120_vm0, %v3031_v54, 0.0  ;;  %v3207_v18 = vadd.f32 %v3206_v62, %v3205_v44  ;;  %v3214_v55 = vadd.f32 %v3213_v37, %v3212_v4  ;;  %v3185_v60 = vrot.slane %v3184_v22, 2  ;;  %2568 = vbcast.lane.b32.xlu1 %v2566_v6, 256 }
 0x1de   :  { %v3221_v15 = vadd.f32 %v3220_v0, %v3219_v26  ;;  %v10692_v12 = vrot.slane %v8172_v28, %v7203_v10  ;;  %v3179_v13 = vadd.f32 %v3178_v52, %v3177_v50  ;;  %v3228_v58 = vadd.f32 %v3227_v45, %v3226_v25 }
 0x1df   :  { %v3191_v24 = vadd.f32 %v3190_v33, %v3189_v39  ;;  %v3232_v29 = vrot.slane %v3231_v30, 4  ;;  %v3208_v51 = vrot.slane %v3207_v18, 1  ;;  %v3215_v48 = vrot.slane %v3214_v55, 1  ;;  %v8542_v44 = vpop.permute.xlu1 %2197  ;;  %v8544_v26 = vpop.permute.xlu0 %2190 }
 0x1e0   :  { %2610 = vbcast.lane.b32.xlu0 %v10692_v12, 256  ;;  %v3222_v17 = vrot.slane %v3221_v15, 1  ;;  %v3186_v54 = vadd.f32 %v3185_v60, %v3184_v22  ;;  %10693 = vst [vmem:[#allocation32_spill] sm:$0xff] %v8542_v44  ;;  %10694 = vst [vmem:[#allocation33_spill] sm:$0xff] %v8544_v26  ;;  %v3180_v4 = vrot.slane %v3179_v13, 1  ;;  %v3229_v62 = vrot.slane %v3228_v58, 1 }
 0x1e1   :  { %v3192_v6 = vrot.slane %v3191_v24, 2  ;;  %v3233_v37 = vadd.f32 %v3232_v29, %v3231_v30  ;;  %v3209_v0 = vadd.f32 %v3208_v51, %v3207_v18  ;;  %v3216_v59 = vadd.f32 %v3215_v48, %v3214_v55  ;;  %v8556_v60 = vpop.f32.mrb[0].mxu1 }
 0x1e2   :  { %v3223_v12 = vadd.f32 %v3222_v17, %v3221_v15  ;;  %v3187_v50 = vrot.slane %v3186_v54, 1  ;;  %v10695_v33 = vrot.slane %v8144_v23, %v7224_v19  ;;  %v10696_v45 = vrot.slane %v8172_v28, %v7206_v11 }
 0x1e3   :  { %v8552_v39 = vadd.f32 %v3180_v4, %v3179_v13  ;;  %v3230_v25 = vadd.f32 %v3229_v62, %v3228_v58  ;;  %v8554_v22 = vadd.f32 %v3192_v6, %v3191_v24  ;;  %v3234_v52 = vrot.slane %v3233_v37, 2  ;;  %v8565_v30 = vpop.permute.xlu1 %2211  ;;  %v8567_v18 = vpop.permute.xlu0 %2204 }
 0x1e4   :  { %2575 = vbcast.lane.b32.xlu1 %v10695_v33, 256  ;;  %2617 = vbcast.lane.b32.xlu0 %v10696_v45, 256  ;;  %v4185_v48 = vsel %vm4171_vm1, %v3216_v59, %v3209_v0  ;;  %v8559_v17 = vadd.f32 %v3187_v50, %v3186_v54  ;;  %v3026_v29 = vmul.f32 %v8476_v21, %v8531_v40  ;;  %v8573_v13 = vpop.f32.mrb[1].mxu1 }
 0x1e5   :  { %v3032_v51 = vmul.f32 %v8468_v43, %v8533_v7  ;;  %10697 = vst [vmem:[#allocation34_spill] sm:$0xff] %v8565_v30  ;;  %10698 = vst [vmem:[#allocation35_spill] sm:$0xff] %v8567_v18  ;;  %v4186_v24 = vsel %vm4173_vm2, %v3223_v12, %v4185_v48  ;;  %v3235_v15 = vadd.f32 %v3234_v52, %v3233_v37 }
 0x1e6   :  { %v3034_v59 = vmul.f32 %v8468_v43, %v8542_v44  ;;  %v4187_v58 = vsel %vm4175_vm3, %v3230_v25, %v4186_v24  ;;  %v3196_v54 = vsel %vm120_vm0, %v3026_v29, 0.0  ;;  %v3033_v62 = vmul.f32 %v8468_v43, %v8544_v26 }
 0x1e7   :  { %v3238_v4 = vsel %vm120_vm0, %v3032_v51, 0.0  ;;  %v10699_v6 = vrot.slane %v8144_v23, %v7244_v35  ;;  %v10700_v37 = vrot.slane %v8172_v28, %v7213_v14  ;;  %v3236_v0 = vrot.slane %v3235_v15, 1  ;;  %v8588_v52 = vpop.permute.xlu1 %2260  ;;  %v8590_v48 = vpop.permute.xlu0 %2218 }
 0x1e8   :  { %v3197_v12 = vrot.slane %v3196_v54, 4  ;;  %v3239_v50 = vrot.slane %v3238_v4, 4  ;;  %v3252_v33 = vsel %vm120_vm0, %v3034_v59, 0.0  ;;  %v3245_v25 = vsel %vm120_vm0, %v3033_v62, 0.0  ;;  %10701 = vst [vmem:[#allocation36_spill] sm:$0xff] %v8588_v52  ;;  %10702 = vst [vmem:[#allocation37_spill] sm:$0xff] %v8590_v48 }
 0x1e9   :  { %2582 = vbcast.lane.b32.xlu1 %v10699_v6, 256  ;;  %2624 = vbcast.lane.b32.xlu0 %v10700_v37, 256  ;;  %v3253_v45 = vrot.slane %v3252_v33, 4  ;;  %v3020_v43 = vmul.f32 %v8476_v21, %v8329_v32  ;;  %v3021_v29 = vmul.f32 %v8476_v21, %v8360_v61  ;;  %v3237_v51 = vadd.f32 %v3236_v0, %v3235_v15 }
 0x1ea   :  { %v3198_v24 = vadd.f32 %v3197_v12, %v3196_v54  ;;  %v3240_v6 = vadd.f32 %v3239_v50, %v3238_v4  ;;  %v3246_v37 = vrot.slane %v3245_v25, 4  ;;  %v10703_v59 = vrot.slane %v8144_v23, %v7257_v47 }
 0x1eb   :  { %v3254_v55 = vadd.f32 %v3253_v45, %v3252_v33  ;;  %v10704_v62 = vrot.slane %v8172_v28, %v7224_v19  ;;  %v3022_v44 = vmul.f32 %v8476_v21, %v8393_v36  ;;  %v3147_v26 = vsel %vm120_vm0, %v8508_v27, 0.0  ;;  %v8608_v23 = vpop.permute.xlu1 %2225  ;;  %v8610_v33 = vpop.permute.xlu0 %2267 }
 0x1ec   :  { %v3154_v15 = vsel %vm120_vm0, %v3020_v43, 0.0  ;;  %v4188_v54 = vsel %vm4177_vm4, %v3237_v51, %v4187_v58  ;;  %v3199_v4 = vrot.slane %v3198_v24, 2  ;;  %v3241_v0 = vrot.slane %v3240_v6, 2  ;;  %10705 = vst [vmem:[#allocation38_spill] sm:$0xff] %v8608_v23  ;;  %10706 = vst [vmem:[#allocation39_spill] sm:$0xff] %v8610_v33 }
 0x1ed   :  { %2589 = vbcast.lane.b32.xlu1 %v10703_v59, 256  ;;  %2631 = vbcast.lane.b32.xlu0 %v10704_v62, 256  ;;  %v3247_v12 = vadd.f32 %v3246_v37, %v3245_v25  ;;  %v3255_v50 = vrot.slane %v3254_v55, 2  ;;  %v3148_v45 = vrot.slane %v3147_v26, 4  ;;  %v3155_v59 = vrot.slane %v3154_v15, 4  ;;  %v6638_v20 = vpop.f32.mrb[2].mxu0 }
 0x1ee   :  { %v3161_v62 = vsel %vm120_vm0, %v3021_v29, 0.0  ;;  %v3200_v21 = vadd.f32 %v3199_v4, %v3198_v24  ;;  %v3242_v7 = vadd.f32 %v3241_v0, %v3240_v6  ;;  %v3168_v25 = vsel %vm120_vm0, %v3022_v44, 0.0 }
 0x1ef   :  { %v3248_v27 = vrot.slane %v3247_v12, 2  ;;  %v3162_v40 = vrot.slane %v3161_v62, 4  ;;  %v3256_v43 = vadd.f32 %v3255_v50, %v3254_v55  ;;  %v3149_v58 = vadd.f32 %v3148_v45, %v3147_v26  ;;  %v1970_v26 = vpop.f32.mrb[3].mxu0  ;;  %v8623_v50 = vpop.permute.xlu1 %2232 }
 0x1f0   :  { %v3156_v51 = vadd.f32 %v3155_v59, %v3154_v15  ;;  %v10707_v37 = vrot.slane %v8172_v28, %v7257_v47  ;;  %v10708_v56 = vrot.slane %v8172_v28, %v7244_v35  ;;  %v3243_v29 = vrot.slane %v3242_v7, 1  ;;  %10710 = vst [vmem:[#allocation41_spill] sm:$0xff] %v8623_v50  ;;  %v8625_v45 = vpop.permute.xlu0 %2274 }
 0x1f1   :  { %v3249_v24 = vadd.f32 %v3248_v27, %v3247_v12  ;;  %v8621_v6 = vadd.f32 %v8141_v38, %v6638_v20  ;;  %v3163_v55 = vadd.f32 %v3162_v40, %v3161_v62  ;;  %v3257_v15 = vrot.slane %v3256_v43, 1  ;;  %10711 = vst [vmem:[#allocation42_spill] sm:$0xff] %v8625_v45 }
 0x1f2   :  { %2645 = vbcast.lane.b32.xlu1 %v10707_v37, 256  ;;  %2638 = vbcast.lane.b32.xlu0 %v10708_v56, 256  ;;  %v3150_v4 = vrot.slane %v3149_v58, 2  ;;  %v3157_v44 = vrot.slane %v3156_v51, 2  ;;  %v3169_v0 = vrot.slane %v3168_v25, 4  ;;  %v3244_v59 = vadd.f32 %v3243_v29, %v3242_v7 }
 0x1f3   :  { %10709 = vst [vmem:[#allocation40_spill] sm:$0xff] %v8621_v6  ;;  %v3250_v37 = vrot.slane %v3249_v24, 1  ;;  %v2990_v28 = vadd.f32 %v8621_v6, %v8167_v31  ;;  %v3164_v56 = vrot.slane %v3163_v55, 2  ;;  %v3258_v12 = vadd.f32 %v3257_v15, %v3256_v43  ;;  %v8640_v15 = vpop.permute.xlu1 %2239 }
 0x1f4   :  { %v3151_v20 = vadd.f32 %v3150_v4, %v3149_v58  ;;  %v3158_v27 = vadd.f32 %v3157_v44, %v3156_v51  ;;  %v3170_v40 = vadd.f32 %v3169_v0, %v3168_v25  ;;  %v10712_v62 = vrot.slane %v8349_v34, %v7188_v3  ;;  %10715 = vst [vmem:[#allocation43_spill] sm:$0xff] %v8640_v15  ;;  %v8642_v4 = vpop.permute.xlu0 %2281 }
 0x1f5   :  { %v3251_v36 = vadd.f32 %v3250_v37, %v3249_v24  ;;  %v8632_v61 = vmax.f32 %v2990_v28, 0.0  ;;  %v3165_v32 = vadd.f32 %v3164_v56, %v3163_v55  ;;  %v10713_v7 = vrot.slane %v8554_v22, 1  ;;  %10716 = vst [vmem:[#allocation44_spill] sm:$0xff] %v8642_v4 }
 0x1f6   :  { %2659 = vbcast.lane.b32.xlu1 %v10712_v62, 256  ;;  %v10714_v6 = vrot.slane %v8349_v34, %v7185_v2  ;;  %v3152_v43 = vrot.slane %v3151_v20, 1  ;;  %v3159_v58 = vrot.slane %v3158_v27, 1  ;;  %v3171_v51 = vrot.slane %v3170_v40, 2 }
 0x1f7   :  { %v3195_v29 = vadd.f32 %v10713_v7, %v8554_v22  ;;  %v3201_v25 = vrot.slane %v3200_v21, 1  ;;  %v3166_v24 = vrot.slane %v3165_v32, 1  ;;  %v8645_v44 = vadd.f32 %v8141_v38, %v1970_v26 }
 0x1f8   :  { %2652 = vbcast.lane.b32.xlu0 %v10714_v6, 256  ;;  %v3045_v55 = vmul.f32 %v8632_v61, %v8625_v45  ;;  %v4189_v22 = vsel %vm4179_vm5, %v3244_v59, %v4188_v54  ;;  %v3153_v0 = vadd.f32 %v3152_v43, %v3151_v20  ;;  %v3160_v37 = vadd.f32 %v3159_v58, %v3158_v27  ;;  %v8662_v27 = vpop.permute.xlu1 %2246 }
 0x1f9   :  { %10717 = vst [vmem:[#allocation45_spill] sm:$0xff] %v8645_v44  ;;  %v3172_v6 = vadd.f32 %v3171_v51, %v3170_v40  ;;  %v3202_v28 = vadd.f32 %v3201_v25, %v3200_v21  ;;  %v10718_v56 = vrot.slane %v8356_v53, %v7185_v2  ;;  %v3167_v62 = vadd.f32 %v3166_v24, %v3165_v32  ;;  %v8664_v32 = vpop.permute.xlu0 %2288 }
 0x1fa   :  { %v2989_v7 = vadd.f32 %v8645_v44, %v8167_v31  ;;  %v3329_v26 = vsel %vm120_vm0, %v3045_v55, 0.0  ;;  %v4190_v49 = vsel %vm4181_vm6, %v3251_v36, %v4189_v22  ;;  %v10719_v45 = vrot.slane %v8349_v34, %v7203_v10  ;;  %10720 = vst [vmem:[#allocation46_spill] sm:$0xff] %v8662_v27  ;;  %10721 = vst [vmem:[#allocation47_spill] sm:$0xff] %v8664_v32 }
 0x1fb   :  { %2708 = vbcast.lane.b32.xlu1 %v10718_v56, 256  ;;  %v3173_v54 = vrot.slane %v3172_v6, 1  ;;  %v4172_v59 = vsel %vm4171_vm1, %v3160_v37, %v3153_v0  ;;  %v3330_v21 = vrot.slane %v3329_v26, 4  ;;  %v4191_v20 = vsel %vm4183_vm7, %v3258_v12, %v4190_v49 }
 0x1fc   :  { %2666 = vbcast.lane.b32.xlu0 %v10719_v45, 256  ;;  %v4174_v40 = vsel %vm4173_vm2, %v3167_v62, %v4172_v59  ;;  %v8667_v43 = vmax.f32 %v2989_v7, 0.0  ;;  %v3046_v36 = vmul.f32 %v8632_v61, %v8642_v4  ;;  %v3047_v45 = vmul.f32 %v8632_v61, %v8664_v32 }
 0x1fd   :  { %v3174_v58 = vadd.f32 %v3173_v54, %v3172_v6  ;;  %v3331_v51 = vadd.f32 %v3330_v21, %v3329_v26  ;;  %v10722_v25 = vrot.slane %v8349_v34, %v7206_v11  ;;  %v8678_v49 = vmul.f32 %v8632_v61, %v8588_v52  ;;  %v8696_v26 = vpop.permute.xlu1 %2253  ;;  %v8698_v54 = vpop.permute.xlu0 %2295 }
 0x1fe   :  { %v8682_v12 = vmul.f32 %v8632_v61, %v8610_v33  ;;  %v3039_v24 = vmul.f32 %v8667_v43, %v8623_v50  ;;  %v3040_v55 = vmul.f32 %v8667_v43, %v8640_v15  ;;  %v3336_v22 = vsel %vm120_vm0, %v3046_v36, 0.0  ;;  %10724 = vst [vmem:[#allocation48_spill] sm:$0xff] %v8696_v26  ;;  %10725 = vst [vmem:[#allocation49_spill] sm:$0xff] %v8698_v54 }
 0x1ff   :  { %2673 = vbcast.lane.b32.xlu1 %v10722_v25, 256  ;;  %v3041_v0 = vmul.f32 %v8667_v43, %v8662_v27  ;;  %v10723_v37 = vrot.slane %v8356_v53, %v7188_v3  ;;  %v4176_v6 = vsel %vm4175_vm3, %v3174_v58, %v4174_v40  ;;  %v3332_v56 = vrot.slane %v3331_v51, 2 }
 0x200   :  { %v3337_v62 = vrot.slane %v3336_v22, 4  ;;  %v3343_v7 = vsel %vm120_vm0, %v3047_v45, 0.0  ;;  %v4178_v59 = vsel %vm4177_vm4, %v8552_v39, %v4176_v6  ;;  %v3287_v21 = vsel %vm120_vm0, %v3039_v24, 0.0 }
 0x201   :  { %2715 = vbcast.lane.b32.xlu0 %v10723_v37, 256  ;;  %v3294_v36 = vsel %vm120_vm0, %v3040_v55, 0.0  ;;  %v3301_v25 = vsel %vm120_vm0, %v3041_v0, 0.0  ;;  %v4180_v40 = vsel %vm4179_vm5, %v8559_v17, %v4178_v59  ;;  %v3288_v58 = vrot.slane %v3287_v21, 4 }
 0x202   :  { %v3333_v37 = vadd.f32 %v3332_v56, %v3331_v51  ;;  %v3295_v27 = vrot.slane %v3294_v36, 4  ;;  %v10726_v45 = vrot.slane %v8349_v34, %v7213_v14  ;;  %v4182_v15 = vsel %vm4181_vm6, %v3195_v29, %v4180_v40  ;;  %v8715_v51 = vpop.permute.xlu1 %2309  ;;  %v8717_v56 = vpop.permute.xlu0 %2302 }
 0x203   :  { %v3338_v50 = vadd.f32 %v3337_v62, %v3336_v22  ;;  %v3302_v39 = vrot.slane %v3301_v25, 4  ;;  %v3344_v6 = vrot.slane %v3343_v7, 4  ;;  %v10727_v24 = vrot.slane %v8356_v53, %v7203_v10  ;;  %10728 = vst [vmem:[#allocation50_spill] sm:$0xff] %v8715_v51  ;;  %10729 = vst [vmem:[#allocation51_spill] sm:$0xff] %v8717_v56 }
 0x204   :  { %2680 = vbcast.lane.b32.xlu1 %v10726_v45, 256  ;;  %v4184_v55 = vsel %vm4183_vm7, %v3202_v28, %v4182_v15  ;;  %v3289_v0 = vadd.f32 %v3288_v58, %v3287_v21  ;;  %v3334_v17 = vrot.slane %v3333_v37, 1  ;;  %v3296_v59 = vadd.f32 %v3295_v27, %v3294_v36 }
 0x205   :  { %2722 = vbcast.lane.b32.xlu0 %v10727_v24, 256  ;;  %6665 = vmatprep.mubr.msk.f32.mxu1 %vm120_vm0, %v4184_v55  ;;  %v3339_v45 = vrot.slane %v3338_v50, 2  ;;  %v3303_v29 = vadd.f32 %v3302_v39, %v3301_v25  ;;  %v3345_v22 = vadd.f32 %v3344_v6, %v3343_v7  ;;  %v3042_v62 = vmul.f32 %v8667_v43, %v8696_v26 }
 0x206   :  { %v3290_v40 = vrot.slane %v3289_v0, 2  ;;  %v8722_v32 = vadd.f32 %v3334_v17, %v3333_v37  ;;  %6666 = vmatmul.mubr.msk.f32.vlgmr.msra.gmra.mrb[8].mxu1 %vm120_vm0, %v4191_v20  ;;  %v3297_v15 = vrot.slane %v3296_v59, 2  ;;  %v3048_v28 = vmul.f32 %v8632_v61, %v8698_v54  ;;  %v8736_v24 = vpop.permute.xlu1 %2323  ;;  %v8738_v55 = vpop.permute.xlu0 %2316 }
 0x207   :  { %v10730_v27 = vrot.slane %v8349_v34, %v7224_v19  ;;  %v3340_v21 = vadd.f32 %v3339_v45, %v3338_v50  ;;  %v3304_v36 = vrot.slane %v3303_v29, 2  ;;  %v3346_v25 = vrot.slane %v3345_v22, 2  ;;  %6783 = vmatpush3.bf16.msra.mxu1 %v7880_v16  ;;  %10732 = vst [vmem:[#allocation52_spill] sm:$0xff] %v8736_v24  ;;  %10733 = vst [vmem:[#allocation53_spill] sm:$0xff] %v8738_v55 }
 0x208   :  { %v3308_v7 = vsel %vm120_vm0, %v3042_v62, 0.0  ;;  %v10731_v58 = vrot.slane %v8356_v53, %v7206_v11  ;;  %v3291_v20 = vadd.f32 %v3290_v40, %v3289_v0  ;;  %v3298_v37 = vadd.f32 %v3297_v15, %v3296_v59  ;;  %6785 = vmatprep.subr.bf16.mxu1 %v7969_v41 }
 0x209   :  { %2687 = vbcast.lane.b32.xlu1 %v10730_v27, 256  ;;  %v3309_v39 = vrot.slane %v3308_v7, 4  ;;  %v3350_v6 = vsel %vm120_vm0, %v3048_v28, 0.0  ;;  %v3341_v50 = vrot.slane %v3340_v21, 1  ;;  %v3305_v17 = vadd.f32 %v3304_v36, %v3303_v29 }
 0x20a   :  { %2729 = vbcast.lane.b32.xlu0 %v10731_v58, 256  ;;  %v3347_v45 = vadd.f32 %v3346_v25, %v3345_v22  ;;  %v3351_v62 = vrot.slane %v3350_v6, 4  ;;  %v3292_v27 = vrot.slane %v3291_v20, 1  ;;  %v3299_v54 = vrot.slane %v3298_v37, 1 }
 0x20b   :  { %v3310_v58 = vadd.f32 %v3309_v39, %v3308_v7  ;;  %v3050_v16 = vmul.f32 %v8632_v61, %v8715_v51  ;;  %v10734_v0 = vrot.slane %v8349_v34, %v7244_v35  ;;  %v8746_v59 = vadd.f32 %v3341_v50, %v3340_v21  ;;  %6787 = vmatpush3.bf16.msra.mxu1 %v7969_v41  ;;  %v8757_v39 = vpop.permute.xlu1 %2372  ;;  %v8759_v21 = vpop.permute.xlu0 %2330 }
 0x20c   :  { %v3306_v40 = vrot.slane %v3305_v17, 1  ;;  %v3348_v15 = vrot.slane %v3347_v45, 1  ;;  %v3352_v28 = vadd.f32 %v3351_v62, %v3350_v6  ;;  %v10735_v29 = vrot.slane %v8356_v53, %v7213_v14  ;;  %10736 = vst [vmem:[#allocation54_spill] sm:$0xff] %v8757_v39  ;;  %10737 = vst [vmem:[#allocation55_spill] sm:$0xff] %v8759_v21 }
 0x20d   :  { %2694 = vbcast.lane.b32.xlu1 %v10734_v0, 256  ;;  %v8752_v22 = vadd.f32 %v3292_v27, %v3291_v20  ;;  %v8754_v36 = vadd.f32 %v3299_v54, %v3298_v37  ;;  %v3311_v25 = vrot.slane %v3310_v58, 2  ;;  %v3364_v7 = vsel %vm120_vm0, %v3050_v16, 0.0  ;;  %v6641_v26 = vpop.f32.mrb[4].mxu0 }
 0x20e   :  { %2736 = vbcast.lane.b32.xlu0 %v10735_v29, 256  ;;  %v8761_v50 = vadd.f32 %v3348_v15, %v3347_v45  ;;  %v3353_v6 = vrot.slane %v3352_v28, 2  ;;  %v3365_v62 = vrot.slane %v3364_v7, 4  ;;  %v3049_v0 = vmul.f32 %v8632_v61, %v8717_v56 }
 0x20f   :  { %v3312_v29 = vadd.f32 %v3311_v25, %v3310_v58  ;;  %v10738_v41 = vrot.slane %v8349_v34, %v7257_v47  ;;  %v3035_v54 = vmul.f32 %v8667_v43, %v8567_v18  ;;  %v3036_v20 = vmul.f32 %v8667_v43, %v8565_v30  ;;  %v8780_v58 = vpop.f32.mrb[2].mxu1  ;;  %v8782_v25 = vpop.permute.xlu1 %2337 }
 0x210   :  { %v3037_v37 = vmul.f32 %v8667_v43, %v8590_v48  ;;  %v3354_v45 = vadd.f32 %v3353_v6, %v3352_v28  ;;  %v3366_v27 = vadd.f32 %v3365_v62, %v3364_v7  ;;  %v3357_v16 = vsel %vm120_vm0, %v3049_v0, 0.0  ;;  %10740 = vst [vmem:[#allocation56_spill] sm:$0xff] %v8780_v58  ;;  %10741 = vst [vmem:[#allocation57_spill] sm:$0xff] %v8782_v25  ;;  %v8789_v56 = vpop.f32.mrb[3].mxu1 }
 0x211   :  { %2701 = vbcast.lane.b32.xlu1 %v10738_v41, 256  ;;  %v10739_v61 = vrot.slane %v8356_v53, %v7224_v19  ;;  %v3038_v34 = vmul.f32 %v8667_v43, %v8608_v23  ;;  %v3358_v15 = vrot.slane %v3357_v16, 4  ;;  %v8784_v41 = vpop.permute.xlu0 %2379  ;;  %v3259_v51 = vsel %vm120_vm0, %v3035_v54, 0.0  ;;  %10743 = vst [vmem:[#allocation59_spill] sm:$0xff] %v8789_v56 }
 0x212   :  { %10742 = vst [vmem:[#allocation58_spill] sm:$0xff] %v8784_v41  ;;  %v3266_v28 = vsel %vm120_vm0, %v3036_v20, 0.0  ;;  %v3273_v7 = vsel %vm120_vm0, %v3037_v37, 0.0  ;;  %v3355_v6 = vrot.slane %v3354_v45, 1  ;;  %v3367_v62 = vrot.slane %v3366_v27, 2 }
 0x213   :  { %2743 = vbcast.lane.b32.xlu0 %v10739_v61, 256  ;;  %v3260_v0 = vrot.slane %v3259_v51, 4  ;;  %v3267_v61 = vrot.slane %v3266_v28, 4  ;;  %v3359_v43 = vadd.f32 %v3358_v15, %v3357_v16  ;;  %v3274_v23 = vrot.slane %v3273_v7, 4  ;;  %v1980_v15 = vpop.f32.mrb[5].mxu0  ;;  %v8807_v52 = vpop.permute.xlu1 %2344 }
 0x214   :  { %v3280_v48 = vsel %vm120_vm0, %v3038_v34, 0.0  ;;  %v8792_v30 = vadd.f32 %v3306_v40, %v3305_v17  ;;  %v10744_v54 = vrot.slane %v8356_v53, %v7257_v47  ;;  %v8797_v20 = vadd.f32 %v3355_v6, %v3354_v45  ;;  %10747 = vst [vmem:[#allocation61_spill] sm:$0xff] %v8807_v52 }
 0x215   :  { %v8799_v37 = vadd.f32 %v3367_v62, %v3366_v27  ;;  %v8802_v18 = vadd.f32 %v8141_v38, %v6641_v26  ;;  %v3261_v4 = vadd.f32 %v3260_v0, %v3259_v51  ;;  %v10746_v16 = vrot.slane %v8356_v53, %v7244_v35 }
 0x216   :  { %2757 = vbcast.lane.b32.xlu1 %v10744_v54, 256  ;;  %v3360_v34 = vrot.slane %v3359_v43, 2  ;;  %v3268_v17 = vadd.f32 %v3267_v61, %v3266_v28  ;;  %v3275_v40 = vadd.f32 %v3274_v23, %v3273_v7  ;;  %v3281_v33 = vrot.slane %v3280_v48, 4  ;;  %v8809_v54 = vpop.permute.xlu0 %2386 }
 0x217   :  { %10745 = vst [vmem:[#allocation60_spill] sm:$0xff] %v8802_v18  ;;  %2750 = vbcast.lane.b32.xlu0 %v10746_v16, 256  ;;  %10748 = vst [vmem:[#allocation62_spill] sm:$0xff] %v8809_v54  ;;  %v2992_v26 = vadd.f32 %v8802_v18, %v8167_v31  ;;  %v3262_v27 = vrot.slane %v3261_v4, 2  ;;  %v3313_v51 = vrot.slane %v3312_v29, 1  ;;  %v10749_v28 = vrot.slane %v8390_v63, %v7188_v3 }
 0x218   :  { %v3361_v6 = vadd.f32 %v3360_v34, %v3359_v43  ;;  %v3269_v62 = vrot.slane %v3268_v17, 2  ;;  %v3276_v53 = vrot.slane %v3275_v40, 2  ;;  %v3282_v0 = vadd.f32 %v3281_v33, %v3280_v48  ;;  %v8827_v33 = vpop.permute.xlu1 %2351 }
 0x219   :  { %v8817_v23 = vmax.f32 %v2992_v26, 0.0  ;;  %v3263_v7 = vadd.f32 %v3262_v27, %v3261_v4  ;;  %v8819_v61 = vadd.f32 %v3313_v51, %v3312_v29  ;;  %v8822_v16 = vadd.f32 %v8141_v38, %v1980_v15  ;;  %10752 = vst [vmem:[#allocation64_spill] sm:$0xff] %v8827_v33 }
 0x21a   :  { %2771 = vbcast.lane.b32.xlu1 %v10749_v28, 256  ;;  %v10751_v45 = vrot.slane %v8390_v63, %v7185_v2  ;;  %v3362_v43 = vrot.slane %v3361_v6, 1  ;;  %v3270_v34 = vadd.f32 %v3269_v62, %v3268_v17  ;;  %v3277_v18 = vadd.f32 %v3276_v53, %v3275_v40  ;;  %v8829_v44 = vpop.permute.xlu0 %2393 }
 0x21b   :  { %10750 = vst [vmem:[#allocation63_spill] sm:$0xff] %v8822_v16  ;;  %v3283_v48 = vrot.slane %v3282_v0, 2  ;;  %10753 = vst [vmem:[#allocation65_spill] sm:$0xff] %v8829_v44  ;;  %v3264_v26 = vrot.slane %v3263_v7, 1  ;;  %v2991_v4 = vadd.f32 %v8822_v16, %v8167_v31  ;;  %v3059_v29 = vmul.f32 %v8817_v23, %v8757_v39 }
 0x21c   :  { %2764 = vbcast.lane.b32.xlu0 %v10751_v45, 256  ;;  %v3060_v15 = vmul.f32 %v8817_v23, %v8784_v41  ;;  %v8837_v27 = vadd.f32 %v3362_v43, %v3361_v6  ;;  %v3271_v45 = vrot.slane %v3270_v34, 1  ;;  %v3278_v17 = vrot.slane %v3277_v18, 1 }
 0x21d   :  { %v3284_v40 = vadd.f32 %v3283_v48, %v3282_v0  ;;  %v10754_v51 = vrot.slane %v8405_v1, %v7185_v2  ;;  %v3265_v62 = vadd.f32 %v3264_v26, %v3263_v7  ;;  %v8842_v53 = vmax.f32 %v2991_v4, 0.0  ;;  %v8850_v48 = vpop.permute.xlu1 %2358 }
 0x21e   :  { %v3061_v28 = vmul.f32 %v8817_v23, %v8809_v54  ;;  %v3427_v39 = vsel %vm120_vm0, %v3059_v29, 0.0  ;;  %v10755_v41 = vrot.slane %v8390_v63, %v7203_v10  ;;  %v3272_v6 = vadd.f32 %v3271_v45, %v3270_v34  ;;  %10756 = vst [vmem:[#allocation66_spill] sm:$0xff] %v8850_v48  ;;  %v8852_v9 = vpop.permute.xlu0 %2400 }
 0x21f   :  { %2820 = vbcast.lane.b32.xlu1 %v10754_v51, 256  ;;  %v3279_v43 = vadd.f32 %v3278_v17, %v3277_v18  ;;  %v3285_v16 = vrot.slane %v3284_v40, 1  ;;  %v3428_v0 = vrot.slane %v3427_v39, 4  ;;  %10757 = vst [vmem:[#allocation67_spill] sm:$0xff] %v8852_v9  ;;  %v3055_v7 = vmul.f32 %v8842_v53, %v8807_v52 }
 0x220   :  { %2778 = vbcast.lane.b32.xlu0 %v10755_v41, 256  ;;  %v3434_v26 = vsel %vm120_vm0, %v3060_v15, 0.0  ;;  %v3441_v4 = vsel %vm120_vm0, %v3061_v28, 0.0  ;;  %v3315_v29 = vsel %vm120_vm0, %v8678_v49, 0.0  ;;  %v4192_v41 = vsel %vm4171_vm1, %v3272_v6, %v3265_v62 }
 0x221   :  { %v3286_v51 = vadd.f32 %v3285_v16, %v3284_v40  ;;  %v3429_v18 = vadd.f32 %v3428_v0, %v3427_v39  ;;  %v3435_v34 = vrot.slane %v3434_v26, 4  ;;  %v10758_v45 = vrot.slane %v8390_v63, %v7206_v11  ;;  %v8870_v62 = vpop.permute.xlu1 %2365 }
 0x222   :  { %v4193_v17 = vsel %vm4173_vm2, %v3279_v43, %v4192_v41  ;;  %v3399_v52 = vsel %vm120_vm0, %v3055_v7, 0.0  ;;  %v3442_v54 = vrot.slane %v3441_v4, 4  ;;  %v3316_v15 = vrot.slane %v3315_v29, 4  ;;  %10760 = vst [vmem:[#allocation68_spill] sm:$0xff] %v8870_v62  ;;  %v8872_v6 = vpop.permute.xlu0 %2407 }
 0x223   :  { %2785 = vbcast.lane.b32.xlu1 %v10758_v45, 256  ;;  %v10759_v28 = vrot.slane %v8405_v1, %v7188_v3  ;;  %v4194_v49 = vsel %vm4175_vm3, %v3286_v51, %v4193_v17  ;;  %v3400_v16 = vrot.slane %v3399_v52, 4  ;;  %v3430_v40 = vrot.slane %v3429_v18, 2  ;;  %10761 = vst [vmem:[#allocation69_spill] sm:$0xff] %v8872_v6 }
 0x224   :  { %v3436_v39 = vadd.f32 %v3435_v34, %v3434_v26  ;;  %v4195_v43 = vsel %vm4177_vm4, %v8752_v22, %v4194_v49  ;;  %v3443_v0 = vadd.f32 %v3442_v54, %v3441_v4  ;;  %v3317_v7 = vadd.f32 %v3316_v15, %v3315_v29 }
 0x225   :  { %2827 = vbcast.lane.b32.xlu0 %v10759_v28, 256  ;;  %v3322_v41 = vsel %vm120_vm0, %v8682_v12, 0.0  ;;  %v4196_v45 = vsel %vm4179_vm5, %v8754_v36, %v4195_v43  ;;  %v3401_v28 = vadd.f32 %v3400_v16, %v3399_v52  ;;  %v3431_v51 = vadd.f32 %v3430_v40, %v3429_v18  ;;  %v8890_v18 = vpop.permute.xlu1 %2421 }
 0x226   :  { %v3437_v17 = vrot.slane %v3436_v39, 2  ;;  %v10762_v26 = vrot.slane %v8390_v63, %v7213_v14  ;;  %v4197_v34 = vsel %vm4181_vm6, %v8792_v30, %v4196_v45  ;;  %v3444_v8 = vrot.slane %v3443_v0, 2  ;;  %10764 = vst [vmem:[#allocation70_spill] sm:$0xff] %v8890_v18  ;;  %v8892_v15 = vpop.permute.xlu0 %2414 }
 0x227   :  { %v3318_v22 = vrot.slane %v3317_v7, 2  ;;  %v3323_v54 = vrot.slane %v3322_v41, 4  ;;  %v10763_v4 = vrot.slane %v8405_v1, %v7203_v10  ;;  %v4198_v12 = vsel %vm4183_vm7, %v8819_v61, %v4197_v34  ;;  %10765 = vst [vmem:[#allocation71_spill] sm:$0xff] %v8892_v15 }
 0x228   :  { %2792 = vbcast.lane.b32.xlu1 %v10762_v26, 256  ;;  %v3402_v52 = vrot.slane %v3401_v28, 2  ;;  %v3432_v36 = vrot.slane %v3431_v51, 1  ;;  %v3438_v29 = vadd.f32 %v3437_v17, %v3436_v39  ;;  %6668 = vmatprep.mubr.msk.f32.mxu1 %vm120_vm0, %v4198_v12  ;;  %v3445_v30 = vadd.f32 %v3444_v8, %v3443_v0 }
 0x229   :  { %2834 = vbcast.lane.b32.xlu0 %v10763_v4, 256  ;;  %v3319_v49 = vadd.f32 %v3318_v22, %v3317_v7  ;;  %v3324_v16 = vadd.f32 %v3323_v54, %v3322_v41  ;;  %v10766_v40 = vrot.slane %v8799_v37, 1  ;;  %v3056_v39 = vmul.f32 %v8842_v53, %v8827_v33  ;;  %v8913_v22 = vpop.permute.xlu1 %2435 }
 0x22a   :  { %v3403_v45 = vadd.f32 %v3402_v52, %v3401_v28  ;;  %v3433_v26 = vadd.f32 %v3432_v36, %v3431_v51  ;;  %v3439_v61 = vrot.slane %v3438_v29, 1  ;;  %v10767_v17 = vrot.slane %v8390_v63, %v7224_v19  ;;  %10769 = vst [vmem:[#allocation72_spill] sm:$0xff] %v8913_v22  ;;  %v8915_v54 = vpop.permute.xlu0 %2428 }
 0x22b   :  { %v8898_v43 = vadd.f32 %v10766_v40, %v8799_v37  ;;  %v3446_v34 = vrot.slane %v3445_v30, 1  ;;  %v3320_v4 = vrot.slane %v3319_v49, 1  ;;  %v3325_v8 = vrot.slane %v3324_v16, 2  ;;  %10770 = vst [vmem:[#allocation73_spill] sm:$0xff] %v8915_v54 }
 0x22c   :  { %2799 = vbcast.lane.b32.xlu1 %v10767_v17, 256  ;;  %v3062_v0 = vmul.f32 %v8817_v23, %v8829_v44  ;;  %v10768_v37 = vrot.slane %v8405_v1, %v7206_v11  ;;  %v3404_v7 = vrot.slane %v3403_v45, 1  ;;  %v3440_v41 = vadd.f32 %v3439_v61, %v3438_v29 }
 0x22d   :  { %v3406_v28 = vsel %vm120_vm0, %v3056_v39, 0.0  ;;  %v3057_v51 = vmul.f32 %v8842_v53, %v8850_v48  ;;  %v3447_v12 = vadd.f32 %v3446_v34, %v3445_v30  ;;  %v3321_v52 = vadd.f32 %v3320_v4, %v3319_v49 }
 0x22e   :  { %2841 = vbcast.lane.b32.xlu0 %v10768_v37, 256  ;;  %v3326_v36 = vadd.f32 %v3325_v8, %v3324_v16  ;;  %v3407_v40 = vrot.slane %v3406_v28, 4  ;;  %v8917_v17 = vadd.f32 %v3404_v7, %v3403_v45  ;;  %v4213_v44 = vsel %vm4171_vm1, %v3440_v41, %v3433_v26  ;;  %v8937_v8 = vpop.permute.xlu1 %2484 }
 0x22f   :  { %v3448_v37 = vsel %vm120_vm0, %v3062_v0, 0.0  ;;  %v3413_v29 = vsel %vm120_vm0, %v3057_v51, 0.0  ;;  %v10771_v61 = vrot.slane %v8390_v63, %v7244_v35  ;;  %v8926_v39 = vsel %vm4173_vm2, %v3447_v12, %v4213_v44  ;;  %10773 = vst [vmem:[#allocation74_spill] sm:$0xff] %v8937_v8  ;;  %v8939_v44 = vpop.permute.xlu0 %2442 }
 0x230   :  { %v3327_v48 = vrot.slane %v3326_v36, 1  ;;  %v3408_v30 = vadd.f32 %v3407_v40, %v3406_v28  ;;  %v3449_v49 = vrot.slane %v3448_v37, 4  ;;  %v10772_v16 = vrot.slane %v8405_v1, %v7213_v14  ;;  %10774 = vst [vmem:[#allocation75_spill] sm:$0xff] %v8939_v44 }
 0x231   :  { %2806 = vbcast.lane.b32.xlu1 %v10771_v61, 256  ;;  %v3414_v45 = vrot.slane %v3413_v29, 4  ;;  %v3063_v26 = vmul.f32 %v8817_v23, %v8852_v9  ;;  %v3058_v34 = vmul.f32 %v8842_v53, %v8870_v62  ;;  %v3064_v4 = vmul.f32 %v8817_v23, %v8872_v6 }
 0x232   :  { %2848 = vbcast.lane.b32.xlu0 %v10772_v16, 256  ;;  %v3328_v0 = vadd.f32 %v3327_v48, %v3326_v36  ;;  %v3409_v7 = vrot.slane %v3408_v30, 2  ;;  %v3450_v41 = vadd.f32 %v3449_v49, %v3448_v37  ;;  %v3066_v28 = vmul.f32 %v8817_v23, %v8890_v18 }
 0x233   :  { %v3415_v51 = vadd.f32 %v3414_v45, %v3413_v29  ;;  %v3455_v12 = vsel %vm120_vm0, %v3063_v26, 0.0  ;;  %v3420_v40 = vsel %vm120_vm0, %v3058_v34, 0.0  ;;  %v3462_v61 = vsel %vm120_vm0, %v3064_v4, 0.0  ;;  %v8955_v34 = vpop.permute.xlu1 %2449  ;;  %v8957_v4 = vpop.permute.xlu0 %2491 }
 0x234   :  { %v10775_v16 = vrot.slane %v8390_v63, %v7257_v47  ;;  %v4199_v6 = vsel %vm4171_vm1, %v3328_v0, %v3321_v52  ;;  %v3410_v9 = vadd.f32 %v3409_v7, %v3408_v30  ;;  %v3451_v48 = vrot.slane %v3450_v41, 2  ;;  %10777 = vst [vmem:[#allocation76_spill] sm:$0xff] %v8955_v34  ;;  %10778 = vst [vmem:[#allocation77_spill] sm:$0xff] %v8957_v4 }
 0x235   :  { %v3456_v36 = vrot.slane %v3455_v12, 4  ;;  %v10776_v37 = vrot.slane %v8405_v1, %v7224_v19  ;;  %v4200_v29 = vsel %vm4173_vm2, %v8722_v32, %v4199_v6  ;;  %v3416_v49 = vrot.slane %v3415_v51, 2  ;;  %v6644_v32 = vpop.f32.mrb[6].mxu0 }
 0x236   :  { %2813 = vbcast.lane.b32.xlu1 %v10775_v16, 256  ;;  %v3421_v45 = vrot.slane %v3420_v40, 4  ;;  %v3463_v26 = vrot.slane %v3462_v61, 4  ;;  %v4201_v63 = vsel %vm4175_vm3, %v8746_v59, %v4200_v29  ;;  %v3411_v52 = vrot.slane %v3410_v9, 1 }
 0x237   :  { %2855 = vbcast.lane.b32.xlu0 %v10776_v37, 256  ;;  %v3452_v30 = vadd.f32 %v3451_v48, %v3450_v41  ;;  %v3457_v0 = vadd.f32 %v3456_v36, %v3455_v12  ;;  %v4202_v7 = vsel %vm4177_vm4, %v8761_v50, %v4201_v63  ;;  %v3417_v16 = vadd.f32 %v3416_v49, %v3415_v51  ;;  %v1990_v50 = vpop.f32.mrb[7].mxu0  ;;  %v8975_v48 = vpop.permute.xlu1 %2456 }
 0x238   :  { %v3422_v37 = vadd.f32 %v3421_v45, %v3420_v40  ;;  %v3464_v18 = vadd.f32 %v3463_v26, %v3462_v61  ;;  %v10779_v6 = vrot.slane %v8405_v1, %v7257_v47  ;;  %v4203_v62 = vsel %vm4179_vm5, %v8797_v20, %v4202_v7  ;;  %10781 = vst [vmem:[#allocation78_spill] sm:$0xff] %v8975_v48  ;;  %v8977_v36 = vpop.permute.xlu0 %2498  ;;  %v8984_v45 = vpop.f32.mrb[4].mxu1 }
 0x239   :  { %v8968_v33 = vadd.f32 %v3411_v52, %v3410_v9  ;;  %v3453_v59 = vrot.slane %v3452_v30, 1  ;;  %v3458_v29 = vrot.slane %v3457_v0, 2  ;;  %v10780_v41 = vrot.slane %v8405_v1, %v7244_v35  ;;  %10782 = vst [vmem:[#allocation79_spill] sm:$0xff] %v8977_v36  ;;  %10783 = vst [vmem:[#allocation80_spill] sm:$0xff] %v8984_v45  ;;  %v8992_v7 = vpop.f32.mrb[5].mxu1 }
 0x23a   :  { %2869 = vbcast.lane.b32.xlu1 %v10779_v6, 256  ;;  %v4204_v51 = vsel %vm4181_vm6, %v8837_v27, %v4203_v62  ;;  %v3418_v12 = vrot.slane %v3417_v16, 1  ;;  %v3423_v40 = vrot.slane %v3422_v37, 2  ;;  %v3465_v61 = vrot.slane %v3464_v18, 2  ;;  %10785 = vst [vmem:[#allocation81_spill] sm:$0xff] %v8992_v7 }
 0x23b   :  { %2862 = vbcast.lane.b32.xlu0 %v10780_v41, 256  ;;  %v4205_v9 = vsel %vm4183_vm7, %v8898_v43, %v4204_v51  ;;  %v8981_v20 = vadd.f32 %v3453_v59, %v3452_v30  ;;  %v3459_v49 = vadd.f32 %v3458_v29, %v3457_v0  ;;  %v3476_v1 = vsel %vm120_vm0, %v3066_v28, 0.0  ;;  %v9006_v29 = vpop.permute.xlu1 %2463 }
 0x23c   :  { %6669 = vmatmul.mubr.msk.f32.gmra.mrb[10].mxu1 %vm120_vm0, %v4205_v9  ;;  %v8987_v27 = vadd.f32 %v3418_v12, %v3417_v16  ;;  %v3424_v62 = vadd.f32 %v3423_v40, %v3422_v37  ;;  %v3466_v26 = vadd.f32 %v3465_v61, %v3464_v18  ;;  %v3477_v63 = vrot.slane %v3476_v1, 4  ;;  %10788 = vst [vmem:[#allocation83_spill] sm:$0xff] %v9006_v29  ;;  %v9008_v41 = vpop.permute.xlu0 %2505 }
 0x23d   :  { %v10784_v52 = vrot.slane %v8454_v46, %v7188_v3  ;;  %v3460_v43 = vrot.slane %v3459_v49, 1  ;;  %v3065_v30 = vmul.f32 %v8817_v23, %v8892_v15  ;;  %v8997_v28 = vadd.f32 %v8141_v38, %v6644_v32  ;;  %10789 = vst [vmem:[#allocation84_spill] sm:$0xff] %v9008_v41 }
 0x23e   :  { %v3051_v0 = vmul.f32 %v8842_v53, %v8738_v55  ;;  %v10787_v18 = vrot.slane %v8454_v46, %v7185_v2  ;;  %v3425_v16 = vrot.slane %v3424_v62, 1  ;;  %v3467_v37 = vrot.slane %v3466_v26, 1 }
 0x23f   :  { %2883 = vbcast.lane.b32.xlu1 %v10784_v52, 256  ;;  %10786 = vst [vmem:[#allocation82_spill] sm:$0xff] %v8997_v28  ;;  %v3478_v6 = vadd.f32 %v3477_v63, %v3476_v1  ;;  %v3052_v59 = vmul.f32 %v8842_v53, %v8736_v24  ;;  %v9010_v23 = vadd.f32 %v3460_v43, %v3459_v49  ;;  %v3469_v32 = vsel %vm120_vm0, %v3065_v30, 0.0 }
 0x240   :  { %2876 = vbcast.lane.b32.xlu0 %v10787_v18, 256  ;;  %v2994_v51 = vadd.f32 %v8997_v28, %v8167_v31  ;;  %v3053_v12 = vmul.f32 %v8842_v53, %v8759_v21  ;;  %v9017_v40 = vadd.f32 %v3467_v37, %v3466_v26  ;;  %v3470_v9 = vrot.slane %v3469_v32, 4  ;;  %v9028_v26 = vpop.permute.xlu1 %2470  ;;  %v9030_v37 = vpop.permute.xlu0 %2512 }
 0x241   :  { %v3479_v61 = vrot.slane %v3478_v6, 2  ;;  %v3054_v1 = vmul.f32 %v8842_v53, %v8782_v25  ;;  %v3371_v49 = vsel %vm120_vm0, %v3051_v0, 0.0  ;;  %v3378_v52 = vsel %vm120_vm0, %v3052_v59, 0.0  ;;  %10790 = vst [vmem:[#allocation85_spill] sm:$0xff] %v9028_v26  ;;  %10791 = vst [vmem:[#allocation86_spill] sm:$0xff] %v9030_v37 }
 0x242   :  { %v9021_v63 = vmax.f32 %v2994_v51, 0.0  ;;  %v3385_v43 = vsel %vm120_vm0, %v3053_v12, 0.0  ;;  %v3471_v18 = vadd.f32 %v3470_v9, %v3469_v32  ;;  %v3372_v28 = vrot.slane %v3371_v49, 4 }
 0x243   :  { %v9026_v30 = vadd.f32 %v3479_v61, %v3478_v6  ;;  %v3379_v15 = vrot.slane %v3378_v52, 4  ;;  %v3386_v21 = vrot.slane %v3385_v43, 4  ;;  %v3392_v53 = vsel %vm120_vm0, %v3054_v1, 0.0 }
 0x244   :  { %v9033_v51 = vadd.f32 %v3425_v16, %v3424_v62  ;;  %v9036_v0 = vadd.f32 %v8141_v38, %v1990_v50  ;;  %v3472_v12 = vrot.slane %v3471_v18, 2  ;;  %v3373_v6 = vadd.f32 %v3372_v28, %v3371_v49  ;;  %v9045_v50 = vpop.permute.xlu1 %2477  ;;  %v9047_v16 = vpop.permute.xlu0 %2519 }
 0x245   :  { %v3481_v59 = vrot.slane %v9026_v30, 1  ;;  %v3380_v61 = vadd.f32 %v3379_v15, %v3378_v52  ;;  %v3387_v32 = vadd.f32 %v3386_v21, %v3385_v43  ;;  %v3393_v9 = vrot.slane %v3392_v53, 4  ;;  %10793 = vst [vmem:[#allocation88_spill] sm:$0xff] %v9045_v50  ;;  %10794 = vst [vmem:[#allocation89_spill] sm:$0xff] %v9047_v16 }
 0x246   :  { %10792 = vst [vmem:[#allocation87_spill] sm:$0xff] %v9036_v0  ;;  %v2993_v25 = vadd.f32 %v9036_v0, %v8167_v31  ;;  %v3075_v24 = vmul.f32 %v9021_v63, %v8937_v8  ;;  %v3473_v55 = vadd.f32 %v3472_v12, %v3471_v18  ;;  %v3374_v1 = vrot.slane %v3373_v6, 2 }
 0x247   :  { %v3381_v62 = vrot.slane %v3380_v61, 2  ;;  %v3076_v38 = vmul.f32 %v9021_v63, %v8957_v4  ;;  %v3388_v28 = vrot.slane %v3387_v32, 2  ;;  %v3394_v15 = vadd.f32 %v3393_v9, %v3392_v53 }
 0x248   :  { %v9049_v21 = vmax.f32 %v2993_v25, 0.0  ;;  %v3077_v49 = vmul.f32 %v9021_v63, %v8977_v36  ;;  %v3474_v52 = vrot.slane %v3473_v55, 1  ;;  %v3375_v43 = vadd.f32 %v3374_v1, %v3373_v6  ;;  %v9057_v53 = vpop.permute.xlu1 %2533  ;;  %v9059_v9 = vpop.permute.xlu0 %2526 }
 0x249   :  { %v3382_v8 = vadd.f32 %v3381_v62, %v3380_v61  ;;  %v3539_v18 = vsel %vm120_vm0, %v3075_v24, 0.0  ;;  %v3389_v12 = vadd.f32 %v3388_v28, %v3387_v32  ;;  %v3395_v0 = vrot.slane %v3394_v15, 2  ;;  %10795 = vst [vmem:[#allocation90_spill] sm:$0xff] %v9057_v53  ;;  %10796 = vst [vmem:[#allocation91_spill] sm:$0xff] %v9059_v9 }
 0x24a   :  { %v3071_v4 = vmul.f32 %v9049_v21, %v8975_v48  ;;  %v3540_v7 = vrot.slane %v3539_v18, 4  ;;  %v3475_v45 = vadd.f32 %v3474_v52, %v3473_v55  ;;  %v3376_v56 = vrot.slane %v3375_v43, 1 }
 0x24b   :  { %v3383_v58 = vrot.slane %v3382_v8, 1  ;;  %v3546_v25 = vsel %vm120_vm0, %v3076_v38, 0.0  ;;  %v3390_v36 = vrot.slane %v3389_v12, 1  ;;  %v3396_v6 = vadd.f32 %v3395_v0, %v3394_v15 }
 0x24c   :  { %v3511_v61 = vsel %vm120_vm0, %v3071_v4, 0.0  ;;  %v3541_v24 = vadd.f32 %v3540_v7, %v3539_v18  ;;  %v3377_v32 = vadd.f32 %v3376_v56, %v3375_v43  ;;  %v3547_v28 = vrot.slane %v3546_v25, 4  ;;  %v9064_v54 = vpop.permute.xlu1 %2547  ;;  %v9066_v0 = vpop.permute.xlu0 %2540 }
 0x24d   :  { %v3384_v1 = vadd.f32 %v3383_v58, %v3382_v8  ;;  %v3512_v62 = vrot.slane %v3511_v61, 4  ;;  %v3391_v48 = vadd.f32 %v3390_v36, %v3389_v12  ;;  %v3397_v31 = vrot.slane %v3396_v6, 1  ;;  %10797 = vst [vmem:[#allocation92_spill] sm:$0xff] %v9064_v54 }
 0x24e   :  { %v3542_v55 = vrot.slane %v3541_v24, 2  ;;  %v3553_v52 = vsel %vm120_vm0, %v3077_v49, 0.0  ;;  %v3548_v44 = vadd.f32 %v3547_v28, %v3546_v25  ;;  %v3482_v8 = vadd.f32 %v3481_v59, %v9026_v30 }
 0x24f   :  { %v4206_v38 = vsel %vm4171_vm1, %v3384_v1, %v3377_v32  ;;  %v3513_v34 = vadd.f32 %v3512_v62, %v3511_v61  ;;  %v3554_v22 = vrot.slane %v3553_v52, 4  ;;  %v3398_v4 = vadd.f32 %v3397_v31, %v3396_v6 }
 0x250   :  { %v4207_v56 = vsel %vm4173_vm2, %v3391_v48, %v4206_v38  ;;  %v3543_v58 = vadd.f32 %v3542_v55, %v3541_v24  ;;  %v3549_v7 = vrot.slane %v3548_v44, 2  ;;  %v4215_v49 = vsel %vm4175_vm3, %v8981_v20, %v8926_v39  ;;  %v9082_v6 = vpop.permute.xlu0 %2554 }
 0x251   :  { %v3514_v36 = vrot.slane %v3513_v34, 2  ;;  %v3555_v15 = vadd.f32 %v3554_v22, %v3553_v52  ;;  %v4208_v43 = vsel %vm4175_vm3, %v3398_v4, %v4207_v56  ;;  %v4216_v12 = vsel %vm4177_vm4, %v9010_v23, %v4215_v49  ;;  %v9080_v22 = vpop.permute.xlu1 %2596  ;;  %10799 = vst [vmem:[#allocation94_spill] sm:$0xff] %v9082_v6  ;;  %v6963_v4 = vld [vmem:[#allocation5 + $0x78] sm:$0xff] }
 0x252   :  { %v3544_v18 = vrot.slane %v3543_v58, 1  ;;  %v3072_v31 = vmul.f32 %v9049_v21, %v9006_v29  ;;  %v4209_v48 = vsel %vm4177_vm4, %v8917_v17, %v4208_v43  ;;  %v3550_v59 = vadd.f32 %v3549_v7, %v3548_v44  ;;  %10798 = vst [vmem:[#allocation93_spill] sm:$0xff] %v9080_v22 }
 0x253   :  { %v3515_v30 = vadd.f32 %v3514_v36, %v3513_v34  ;;  %v3556_v25 = vrot.slane %v3555_v15, 2  ;;  %v4210_v39 = vsel %vm4179_vm5, %v8968_v33, %v4209_v48  ;;  %v4217_v23 = vsel %vm4179_vm5, %v9017_v40, %v4216_v12 }
 0x254   :  { %v3545_v20 = vadd.f32 %v3544_v18, %v3543_v58  ;;  %v3518_v61 = vsel %vm120_vm0, %v3072_v31, 0.0  ;;  %v4211_v24 = vsel %vm4181_vm6, %v8987_v27, %v4210_v39  ;;  %v3551_v34 = vrot.slane %v3550_v59, 1  ;;  %v9102_v38 = vpop.permute.xlu0 %2603 }
 0x255   :  { %v3516_v17 = vrot.slane %v3515_v30, 1  ;;  %v3557_v44 = vadd.f32 %v3556_v25, %v3555_v15  ;;  %v4212_v32 = vsel %vm4183_vm7, %v9033_v51, %v4211_v24  ;;  %v4218_v1 = vsel %vm4181_vm6, %v3475_v45, %v4217_v23  ;;  %v9100_v52 = vpop.permute.xlu1 %2561  ;;  %10801 = vst [vmem:[#allocation96_spill] sm:$0xff] %v9102_v38  ;;  %v9112_v15 = vpop.f32.mrb[8].mxu0 }
 0x256   :  { %v3519_v62 = vrot.slane %v3518_v61, 4  ;;  %v3078_v33 = vmul.f32 %v9021_v63, %v9008_v41  ;;  %6671 = vmatprep.mubr.msk.f32.mxu1 %vm120_vm0, %v4212_v32  ;;  %v3552_v28 = vadd.f32 %v3551_v34, %v3550_v59  ;;  %v4219_v27 = vsel %vm4183_vm7, %v3482_v8, %v4218_v1  ;;  %10800 = vst [vmem:[#allocation95_spill] sm:$0xff] %v9100_v52  ;;  %v9120_v31 = vpop.f32.mrb[9].mxu0 }
 0x257   :  { %v9097_v40 = vadd.f32 %v3516_v17, %v3515_v30  ;;  %v3558_v55 = vrot.slane %v3557_v44, 1  ;;  %6672 = vmatmul.mubr.msk.f32.gmra.mrb[12].mxu1 %vm120_vm0, %v4219_v27  ;;  %vm2070_vm8 = vcmp.gt.f32.partialorder %v6963_v4, 0.0  ;;  %v2888_v56 = vrot.slane %v8454_v46, %v7203_v10  ;;  %v9137_v17 = vpop.f32.mrb[6].mxu1 }
 0x258   :  { %v3520_v51 = vadd.f32 %v3519_v62, %v3518_v61  ;;  %v3560_v45 = vsel %vm120_vm0, %v3078_v33, 0.0  ;;  %v4227_v36 = vsel %vm4171_vm1, %v3552_v28, %v3545_v20  ;;  %v9110_v8 = vsel %vm2070_vm8, 1.0, %v10669_v57  ;;  %v9131_v39 = vpop.permute.xlu0 %2610  ;;  %v9141_v1 = vpop.f32.mrb[7].mxu1 }
 0x259   :  { %v3559_v58 = vadd.f32 %v3558_v55, %v3557_v44  ;;  %v3561_v7 = vrot.slane %v3560_v45, 4  ;;  %v2930_v43 = vrot.slane %v9110_v8, %v7185_v2  ;;  %2890 = vbcast.lane.b32.xlu0 %v2888_v56, 256  ;;  %v3073_v18 = vmul.f32 %v9049_v21, %v9028_v26  ;;  %v9129_v2 = vpop.permute.xlu1 %2568  ;;  %10803 = vst [vmem:[#allocation98_spill] sm:$0xff] %v9131_v39 }
 0x25a   :  { %v3521_v49 = vrot.slane %v3520_v51, 2  ;;  %v3079_v12 = vmul.f32 %v9021_v63, %v9030_v37  ;;  %v2895_v59 = vrot.slane %v8454_v46, %v7206_v11  ;;  %v2937_v25 = vrot.slane %v9110_v8, %v7188_v3  ;;  %10802 = vst [vmem:[#allocation97_spill] sm:$0xff] %v9129_v2 }
 0x25b   :  { %v9123_v48 = vsel %vm4173_vm2, %v3559_v58, %v4227_v36  ;;  %v3562_v30 = vadd.f32 %v3561_v7, %v3560_v45  ;;  %2932 = vbcast.lane.b32.xlu1 %v2930_v43, 256  ;;  %v3525_v23 = vsel %vm120_vm0, %v3073_v18, 0.0  ;;  %v3074_v24 = vmul.f32 %v9049_v21, %v9045_v50 }
 0x25c   :  { %v3522_v20 = vadd.f32 %v3521_v49, %v3520_v51  ;;  %v3567_v61 = vsel %vm120_vm0, %v3079_v12, 0.0  ;;  %v3526_v44 = vrot.slane %v3525_v23, 4  ;;  %v3080_v3 = vmul.f32 %v9021_v63, %v9047_v16  ;;  %v9150_v58 = vpop.permute.xlu0 %2617 }
 0x25d   :  { %v3563_v34 = vrot.slane %v3562_v30, 2  ;;  %v3568_v32 = vrot.slane %v3567_v61, 4  ;;  %2939 = vbcast.lane.b32.xlu0 %v2937_v25, 256  ;;  %v3532_v33 = vsel %vm120_vm0, %v3074_v24, 0.0  ;;  %v2902_v28 = vrot.slane %v8454_v46, %v7213_v14  ;;  %v9148_v56 = vpop.permute.xlu1 %2575  ;;  %10805 = vst [vmem:[#allocation100_spill] sm:$0xff] %v9150_v58 }
 0x25e   :  { %v3523_v62 = vrot.slane %v3522_v20, 1  ;;  %v2944_v55 = vrot.slane %v9110_v8, %v7203_v10  ;;  %v3527_v51 = vadd.f32 %v3526_v44, %v3525_v23  ;;  %v3533_v4 = vrot.slane %v3532_v33, 4  ;;  %10804 = vst [vmem:[#allocation99_spill] sm:$0xff] %v9148_v56 }
 0x25f   :  { %v3564_v27 = vadd.f32 %v3563_v34, %v3562_v30  ;;  %v3569_v45 = vadd.f32 %v3568_v32, %v3567_v61  ;;  %2897 = vbcast.lane.b32.xlu1 %v2895_v59, 256  ;;  %v3574_v7 = vsel %vm120_vm0, %v3080_v3, 0.0  ;;  %v3082_v49 = vmul.f32 %v9021_v63, %v9057_v53 }
 0x260   :  { %v9152_v36 = vadd.f32 %v3523_v62, %v3522_v20  ;;  %v3081_v43 = vmul.f32 %v9021_v63, %v9059_v9  ;;  %v3528_v18 = vrot.slane %v3527_v51, 2  ;;  %v3534_v30 = vadd.f32 %v3533_v4, %v3532_v33  ;;  %v9167_v63 = vpop.permute.xlu0 %2624 }
 0x261   :  { %v3565_v10 = vrot.slane %v3564_v27, 1  ;;  %v3570_v12 = vrot.slane %v3569_v45, 2  ;;  %v3575_v25 = vrot.slane %v3574_v7, 4  ;;  %2946 = vbcast.lane.b32.xlu0 %v2944_v55, 256  ;;  %v3588_v23 = vsel %vm120_vm0, %v3082_v49, 0.0  ;;  %v9165_v32 = vpop.permute.xlu1 %2582  ;;  %10807 = vst [vmem:[#allocation102_spill] sm:$0xff] %v9167_v63 }
 0x262   :  { %v3581_v20 = vsel %vm120_vm0, %v3081_v43, 0.0  ;;  %v2909_v59 = vrot.slane %v8454_v46, %v7224_v19  ;;  %v3529_v24 = vadd.f32 %v3528_v18, %v3527_v51  ;;  %v3535_v44 = vrot.slane %v3534_v30, 2  ;;  %10806 = vst [vmem:[#allocation101_spill] sm:$0xff] %v9165_v32 }
 0x263   :  { %v9163_v61 = vadd.f32 %v3565_v10, %v3564_v27  ;;  %v3571_v34 = vadd.f32 %v3570_v12, %v3569_v45  ;;  %v3576_v3 = vadd.f32 %v3575_v25, %v3574_v7  ;;  %2904 = vbcast.lane.b32.xlu1 %v2902_v28, 256  ;;  %v3589_v62 = vrot.slane %v3588_v23, 4 }
 0x264   :  { %v3582_v33 = vrot.slane %v3581_v20, 4  ;;  %v2951_v55 = vrot.slane %v9110_v8, %v7206_v11  ;;  %v3530_v4 = vrot.slane %v3529_v24, 1  ;;  %v3536_v43 = vadd.f32 %v3535_v44, %v3534_v30  ;;  %v9183_v30 = vpop.permute.xlu0 %2631 }
 0x265   :  { %v3572_v49 = vrot.slane %v3571_v34, 1  ;;  %v2916_v27 = vrot.slane %v8454_v46, %v7244_v35  ;;  %v3577_v51 = vrot.slane %v3576_v3, 2  ;;  %v3590_v45 = vadd.f32 %v3589_v62, %v3588_v23  ;;  %v9181_v25 = vpop.permute.xlu1 %2589  ;;  %10809 = vst [vmem:[#allocation104_spill] sm:$0xff] %v9183_v30 }
 0x266   :  { %v3583_v10 = vadd.f32 %v3582_v33, %v3581_v20  ;;  %2953 = vbcast.lane.b32.xlu0 %v2951_v55, 256  ;;  %v2958_v18 = vrot.slane %v9110_v8, %v7213_v14  ;;  %v9175_v7 = vadd.f32 %v3530_v4, %v3529_v24  ;;  %v3537_v12 = vrot.slane %v3536_v43, 1  ;;  %10808 = vst [vmem:[#allocation103_spill] sm:$0xff] %v9181_v25 }
 0x267   :  { %v9177_v28 = vadd.f32 %v3572_v49, %v3571_v34  ;;  %v281_v11 = vadd.f32 %v8556_v60, %v8103_v5  ;;  %v3578_v44 = vadd.f32 %v3577_v51, %v3576_v3  ;;  %v3591_v57 = vrot.slane %v3590_v45, 2  ;;  %2911 = vbcast.lane.b32.xlu1 %v2909_v59, 256  ;;  %v10810_v60 = vld [vmem:[#allocation73_spill] sm:$0xff]  ;;  %v10811_v59 = vld [vmem:[#allocation72_spill] sm:$0xff] }
 0x268   :  { %v3584_v23 = vrot.slane %v3583_v10, 2  ;;  %v2923_v20 = vrot.slane %v8454_v46, %v7257_v47  ;;  %v2965_v14 = vrot.slane %v9110_v8, %v7224_v19  ;;  %v276_v24 = vadd.f32 %v8573_v13, %v8103_v5  ;;  %v10812_v19 = vld [vmem:[#allocation75_spill] sm:$0xff]  ;;  %v10813_v13 = vld [vmem:[#allocation76_spill] sm:$0xff]  ;;  %v9216_v16 = vpop.permute.xlu0 %2638 }
 0x269   :  { %v6841_v34 = vadd.f32 %v8106_v42, %v281_v11  ;;  %v3067_v62 = vmul.f32 %v9049_v21, %v10810_v60  ;;  %v3579_v33 = vrot.slane %v3578_v44, 1  ;;  %v9194_v55 = vadd.f32 %v3591_v57, %v3590_v45  ;;  %v9206_v53 = vpop.permute.xlu1 %2645  ;;  %10816 = vst [vmem:[#allocation72_spill] sm:$0xff] %v9216_v16 }
 0x26a   :  { %v3585_v3 = vadd.f32 %v3584_v23, %v3583_v10  ;;  %2960 = vbcast.lane.b32.xlu0 %v2958_v18, 256  ;;  %v3068_v4 = vmul.f32 %v9049_v21, %v10811_v59  ;;  %v3069_v49 = vmul.f32 %v9049_v21, %v10812_v19  ;;  %v3070_v51 = vmul.f32 %v9049_v21, %v10813_v13  ;;  %v10815_v23 = vld [vmem:[#allocation15_spill] sm:$0xff] }
 0x26b   :  { %v9199_v46 = vadd.f32 %v6841_v34, %v9112_v15  ;;  %v3483_v11 = vsel %vm120_vm0, %v3067_v62, 0.0  ;;  %10814 = vst [vmem:[#allocation73_spill] sm:$0xff] %v9206_v53  ;;  %v9208_v57 = vadd.f32 %v3579_v33, %v3578_v44  ;;  %v3593_v45 = vrot.slane %v9194_v55, 1  ;;  %2918 = vbcast.lane.b32.xlu1 %v2916_v27, 256 }
 0x26c   :  { %v3586_v10 = vrot.slane %v3585_v3, 1  ;;  %v3484_v18 = vrot.slane %v3483_v11, 4  ;;  %v3490_v34 = vsel %vm120_vm0, %v3068_v4, 0.0  ;;  %v3497_v9 = vsel %vm120_vm0, %v3069_v49, 0.0 }
 0x26d   :  { %v2996_v15 = vadd.f32 %v9199_v46, %v10815_v23  ;;  %v3504_v21 = vsel %vm120_vm0, %v3070_v51, 0.0  ;;  %v3491_v33 = vrot.slane %v3490_v34, 4  ;;  %v3498_v37 = vrot.slane %v3497_v9, 4 }
 0x26e   :  { %v9218_v62 = vadd.f32 %v3586_v10, %v3585_v3  ;;  %2967 = vbcast.lane.b32.xlu0 %v2965_v14, 256  ;;  %v3485_v44 = vadd.f32 %v3484_v18, %v3483_v11  ;;  %v3505_v27 = vrot.slane %v3504_v21, 4  ;;  %v9222_v50 = vadd.f32 %v3537_v12, %v3536_v43  ;;  %v9233_v12 = vpop.permute.xlu1 %2659 }
 0x26f   :  { %v9220_v41 = vmax.f32 %v2996_v15, 0.0  ;;  %v2979_v4 = vrot.slane %v9110_v8, %v7257_v47  ;;  %2925 = vbcast.lane.b32.xlu1 %v2923_v20, 256  ;;  %v3492_v26 = vadd.f32 %v3491_v33, %v3490_v34  ;;  %v3499_v51 = vadd.f32 %v3498_v37, %v3497_v9  ;;  %10817 = vst [vmem:[#allocation75_spill] sm:$0xff] %v9233_v12  ;;  %v9242_v15 = vpop.permute.xlu0 %2652 }
 0x270   :  { %v3486_v49 = vrot.slane %v3485_v44, 2  ;;  %v2972_v3 = vrot.slane %v9110_v8, %v7244_v35  ;;  %v3506_v10 = vadd.f32 %v3505_v27, %v3504_v21  ;;  %v6844_v14 = vadd.f32 %v8106_v42, %v276_v24  ;;  %10818 = vst [vmem:[#allocation15_spill] sm:$0xff] %v9242_v15 }
 0x271   :  { %v3091_v11 = vmul.f32 %v9220_v41, %v9080_v22  ;;  %v3092_v43 = vmul.f32 %v9220_v41, %v9102_v38  ;;  %v3493_v47 = vrot.slane %v3492_v26, 2  ;;  %v3500_v20 = vrot.slane %v3499_v51, 2 }
 0x272   :  { %v3487_v18 = vadd.f32 %v3486_v49, %v3485_v44  ;;  %2974 = vbcast.lane.b32.xlu0 %v2972_v3, 256  ;;  %v3093_v37 = vmul.f32 %v9220_v41, %v9131_v39  ;;  %v3507_v9 = vrot.slane %v3506_v10, 2  ;;  %v9238_v35 = vadd.f32 %v6844_v14, %v9120_v31 }
 0x273   :  { %v3651_v8 = vsel %vm120_vm0, %v3091_v11, 0.0  ;;  %v3658_v24 = vsel %vm120_vm0, %v3092_v43, 0.0  ;;  %v3494_v21 = vadd.f32 %v3493_v47, %v3492_v26  ;;  %v3501_v33 = vadd.f32 %v3500_v20, %v3499_v51  ;;  %2981 = vbcast.lane.b32.xlu1 %v2979_v4, 256  ;;  %v9249_v26 = vpop.permute.xlu1 %2708 }
 0x274   :  { %v3488_v34 = vrot.slane %v3487_v18, 1  ;;  %v3652_v44 = vrot.slane %v3651_v8, 4  ;;  %v3508_v27 = vadd.f32 %v3507_v9, %v3506_v10  ;;  %v2995_v49 = vadd.f32 %v9238_v35, %v10815_v23  ;;  %10819 = vst [vmem:[#allocation105_spill] sm:$0xff] %v9249_v26 }
 0x275   :  { %v3659_v3 = vrot.slane %v3658_v24, 4  ;;  %v3665_v39 = vsel %vm120_vm0, %v3093_v37, 0.0  ;;  %v3495_v14 = vrot.slane %v3494_v21, 1  ;;  %v3502_v38 = vrot.slane %v3501_v33, 1 }
 0x276   :  { %v3489_v31 = vadd.f32 %v3488_v34, %v3487_v18  ;;  %v3653_v11 = vadd.f32 %v3652_v44, %v3651_v8  ;;  %v3509_v22 = vrot.slane %v3508_v27, 1  ;;  %v9247_v43 = vmax.f32 %v2995_v49, 0.0  ;;  %v9254_v34 = vpop.permute.xlu0 %2666  ;;  %v9256_v8 = vpop.f32.mrb[10].mxu0 }
 0x277   :  { %v3660_v29 = vadd.f32 %v3659_v3, %v3658_v24  ;;  %v3666_v13 = vrot.slane %v3665_v39, 4  ;;  %v3496_v4 = vadd.f32 %v3495_v14, %v3494_v21  ;;  %v3503_v51 = vadd.f32 %v3502_v38, %v3501_v33  ;;  %10820 = vst [vmem:[#allocation106_spill] sm:$0xff] %v9254_v34 }
 0x278   :  { %v3654_v10 = vrot.slane %v3653_v11, 2  ;;  %v3594_v47 = vadd.f32 %v3593_v45, %v9194_v55  ;;  %v3510_v20 = vadd.f32 %v3509_v22, %v3508_v27  ;;  %v3087_v37 = vmul.f32 %v9247_v43, %v9129_v2  ;;  %v9264_v22 = vpop.f32.mrb[11].mxu0 }
 0x279   :  { %v3661_v18 = vrot.slane %v3660_v29, 2  ;;  %v3667_v9 = vadd.f32 %v3666_v13, %v3665_v39  ;;  %v4220_v24 = vsel %vm4171_vm1, %v3496_v4, %v3489_v31  ;;  %v4229_v38 = vsel %vm4175_vm3, %v9163_v61, %v9123_v48 }
 0x27a   :  { %v3655_v44 = vadd.f32 %v3654_v10, %v3653_v11  ;;  %v3088_v55 = vmul.f32 %v9247_v43, %v9148_v56  ;;  %v4221_v45 = vsel %vm4173_vm2, %v3503_v51, %v4220_v24  ;;  %v3623_v39 = vsel %vm120_vm0, %v3087_v37, 0.0  ;;  %v9275_v11 = vpop.permute.xlu1 %2673 }
 0x27b   :  { %v3662_v13 = vadd.f32 %v3661_v18, %v3660_v29  ;;  %v3668_v21 = vrot.slane %v3667_v9, 2  ;;  %v4222_v33 = vsel %vm4175_vm3, %v3510_v20, %v4221_v45  ;;  %v3624_v27 = vrot.slane %v3623_v39, 4  ;;  %10821 = vst [vmem:[#allocation107_spill] sm:$0xff] %v9275_v11  ;;  %v9284_v18 = vpop.permute.xlu0 %2715 }
 0x27c   :  { %v3656_v49 = vrot.slane %v3655_v44, 1  ;;  %v4230_v3 = vsel %vm4177_vm4, %v9177_v28, %v4229_v38  ;;  %v4223_v48 = vsel %vm4177_vm4, %v9097_v40, %v4222_v33  ;;  %10822 = vst [vmem:[#allocation108_spill] sm:$0xff] %v9284_v18  ;;  %v3094_v24 = vmul.f32 %v9220_v41, %v9150_v58 }
 0x27d   :  { %v3663_v61 = vrot.slane %v3662_v13, 1  ;;  %v3669_v31 = vadd.f32 %v3668_v21, %v3667_v9  ;;  %v4231_v14 = vsel %vm4179_vm5, %v9208_v57, %v4230_v3  ;;  %v4224_v29 = vsel %vm4179_vm5, %v9152_v36, %v4223_v48 }
 0x27e   :  { %v3625_v4 = vadd.f32 %v3624_v27, %v3623_v39  ;;  %v3657_v51 = vadd.f32 %v3656_v49, %v3655_v44  ;;  %v4232_v10 = vsel %vm4181_vm6, %v9218_v62, %v4231_v14  ;;  %v4225_v28 = vsel %vm4181_vm6, %v9175_v7, %v4224_v29  ;;  %v9305_v27 = vpop.permute.xlu1 %2680 }
 0x27f   :  { %v3664_v20 = vadd.f32 %v3663_v61, %v3662_v13  ;;  %v3670_v40 = vrot.slane %v3669_v31, 1  ;;  %v4233_v37 = vsel %vm4183_vm7, %v3594_v47, %v4232_v10  ;;  %v4226_v57 = vsel %vm4183_vm7, %v9222_v50, %v4225_v28  ;;  %10823 = vst [vmem:[#allocation109_spill] sm:$0xff] %v9305_v27 }
 0x280   :  { %v3626_v9 = vrot.slane %v3625_v4, 2  ;;  %v3630_v36 = vsel %vm120_vm0, %v3088_v55, 0.0  ;;  %6674 = vmatprep.mubr.msk.f32.mxu1 %vm120_vm0, %v4226_v57  ;;  %v3089_v47 = vmul.f32 %v9247_v43, %v9165_v32  ;;  %v3672_v50 = vsel %vm120_vm0, %v3094_v24, 0.0 }
 0x281   :  { %v3671_v62 = vadd.f32 %v3670_v40, %v3669_v31  ;;  %v4241_v7 = vsel %vm4171_vm1, %v3664_v20, %v3657_v51  ;;  %v3631_v44 = vrot.slane %v3630_v36, 4  ;;  %6675 = vmatmul.mubr.msk.f32.gmra.mrb[14].mxu1 %vm120_vm0, %v4233_v37  ;;  %v3095_v55 = vmul.f32 %v9220_v41, %v9167_v63  ;;  %v9309_v51 = vpop.permute.xlu0 %2722 }
 0x282   :  { %v3627_v38 = vadd.f32 %v3626_v9, %v3625_v4  ;;  %v3090_v45 = vmul.f32 %v9247_v43, %v9181_v25  ;;  %v3673_v21 = vrot.slane %v3672_v50, 4  ;;  %v3637_v33 = vsel %vm120_vm0, %v3089_v47, 0.0  ;;  %10824 = vst [vmem:[#allocation110_spill] sm:$0xff] %v9309_v51 }
 0x283   :  { %v9302_v39 = vsel %vm4173_vm2, %v3671_v62, %v4241_v7  ;;  %v3632_v13 = vadd.f32 %v3631_v44, %v3630_v36  ;;  %v3638_v3 = vrot.slane %v3637_v33, 4  ;;  %v3679_v48 = vsel %vm120_vm0, %v3095_v55, 0.0 }
 0x284   :  { %v3628_v49 = vrot.slane %v3627_v38, 1  ;;  %v3644_v61 = vsel %vm120_vm0, %v3090_v45, 0.0  ;;  %v3674_v14 = vadd.f32 %v3673_v21, %v3672_v50  ;;  %v3680_v29 = vrot.slane %v3679_v48, 4  ;;  %v9321_v45 = vpop.permute.xlu1 %2687 }
 0x285   :  { %v3633_v31 = vrot.slane %v3632_v13, 2  ;;  %v3645_v4 = vrot.slane %v3644_v61, 4  ;;  %v3639_v28 = vadd.f32 %v3638_v3, %v3637_v33  ;;  %v3096_v20 = vmul.f32 %v9220_v41, %v9183_v30  ;;  %10825 = vst [vmem:[#allocation111_spill] sm:$0xff] %v9321_v45 }
 0x286   :  { %v9311_v10 = vadd.f32 %v3628_v49, %v3627_v38  ;;  %v3098_v40 = vmul.f32 %v9220_v41, %v9206_v53  ;;  %v3675_v57 = vrot.slane %v3674_v14, 2  ;;  %v3681_v9 = vadd.f32 %v3680_v29, %v3679_v48  ;;  %v9326_v29 = vpop.permute.xlu0 %2729 }
 0x287   :  { %v3634_v37 = vadd.f32 %v3633_v31, %v3632_v13  ;;  %v3646_v36 = vadd.f32 %v3645_v4, %v3644_v61  ;;  %v3640_v24 = vrot.slane %v3639_v28, 2  ;;  %v3686_v62 = vsel %vm120_vm0, %v3096_v20, 0.0 }
 0x288   :  { %v3700_v7 = vsel %vm120_vm0, %v3098_v40, 0.0  ;;  %v3097_v44 = vmul.f32 %v9220_v41, %v9216_v16  ;;  %v3676_v38 = vadd.f32 %v3675_v57, %v3674_v14  ;;  %v3682_v50 = vrot.slane %v3681_v9, 2 }
 0x289   :  { %v3635_v47 = vrot.slane %v3634_v37, 1  ;;  %v3647_v55 = vrot.slane %v3646_v36, 2  ;;  %v3641_v21 = vadd.f32 %v3640_v24, %v3639_v28  ;;  %v3687_v33 = vrot.slane %v3686_v62, 4  ;;  %v10826_v28 = vld [vmem:[#allocation56_spill] sm:$0xff] }
 0x28a   :  { %v3701_v13 = vrot.slane %v3700_v7, 4  ;;  %v3693_v49 = vsel %vm120_vm0, %v3097_v44, 0.0  ;;  %v3677_v48 = vrot.slane %v3676_v38, 1  ;;  %v3683_v61 = vadd.f32 %v3682_v50, %v3681_v9 }
 0x28b   :  { %v9324_v3 = vadd.f32 %v3635_v47, %v3634_v37  ;;  %v3648_v31 = vadd.f32 %v3647_v55, %v3646_v36  ;;  %v3642_v4 = vrot.slane %v3641_v21, 1  ;;  %v3688_v41 = vadd.f32 %v3687_v33, %v3686_v62  ;;  %v10827_v36 = vld [vmem:[#allocation59_spill] sm:$0xff] }
 0x28c   :  { %v3702_v20 = vadd.f32 %v3701_v13, %v3700_v7  ;;  %v3694_v14 = vrot.slane %v3693_v49, 4  ;;  %v9328_v40 = vadd.f32 %v3677_v48, %v3676_v38  ;;  %v3684_v57 = vrot.slane %v3683_v61, 1  ;;  %v9341_v38 = vpop.permute.xlu1 %2694 }
 0x28d   :  { %v3649_v53 = vrot.slane %v3648_v31, 1  ;;  %v291_v24 = vadd.f32 %v10826_v28, %v8103_v5  ;;  %v9332_v16 = vadd.f32 %v3642_v4, %v3641_v21  ;;  %v3689_v37 = vrot.slane %v3688_v41, 2  ;;  %10828 = vst [vmem:[#allocation56_spill] sm:$0xff] %v9341_v38 }
 0x28e   :  { %v3703_v44 = vrot.slane %v3702_v20, 2  ;;  %v3695_v47 = vadd.f32 %v3694_v14, %v3693_v49  ;;  %v9334_v9 = vadd.f32 %v3684_v57, %v3683_v61  ;;  %v286_v50 = vadd.f32 %v10827_v36, %v8103_v5  ;;  %v9355_v14 = vpop.permute.xlu0 %2736 }
 0x28f   :  { %v6847_v62 = vadd.f32 %v8106_v42, %v291_v24  ;;  %v3083_v7 = vmul.f32 %v9247_v43, %v9066_v0  ;;  %v3690_v55 = vadd.f32 %v3689_v37, %v3688_v41  ;;  %v3084_v13 = vmul.f32 %v9247_v43, %v9064_v54 }
 0x290   :  { %v9343_v33 = vadd.f32 %v3703_v44, %v3702_v20  ;;  %v3696_v21 = vrot.slane %v3695_v47, 2  ;;  %v3085_v48 = vmul.f32 %v9247_v43, %v9082_v6  ;;  %v3086_v61 = vmul.f32 %v9247_v43, %v9100_v52 }
 0x291   :  { %v9348_v49 = vadd.f32 %v6847_v62, %v9256_v8  ;;  %v3595_v4 = vsel %vm120_vm0, %v3083_v7, 0.0  ;;  %v3691_v41 = vrot.slane %v3690_v55, 1  ;;  %v3602_v8 = vsel %vm120_vm0, %v3084_v13, 0.0 }
 0x292   :  { %v3705_v20 = vrot.slane %v9343_v33, 1  ;;  %v3697_v57 = vadd.f32 %v3696_v21, %v3695_v47  ;;  %v3596_v28 = vrot.slane %v3595_v4, 4  ;;  %v3609_v37 = vsel %vm120_vm0, %v3085_v48, 0.0  ;;  %v9369_v21 = vpop.permute.xlu1 %2701 }
 0x293   :  { %10829 = vst [vmem:[#allocation59_spill] sm:$0xff] %v9348_v49  ;;  %v2998_v24 = vadd.f32 %v9348_v49, %v10815_v23  ;;  %v3616_v44 = vsel %vm120_vm0, %v3086_v61, 0.0  ;;  %v9363_v36 = vadd.f32 %v3691_v41, %v3690_v55  ;;  %v3603_v7 = vrot.slane %v3602_v8, 4  ;;  %10830 = vst [vmem:[#allocation112_spill] sm:$0xff] %v9369_v21 }
 0x294   :  { %v3698_v43 = vrot.slane %v3697_v57, 1  ;;  %v3597_v62 = vadd.f32 %v3596_v28, %v3595_v4  ;;  %v3610_v63 = vrot.slane %v3609_v37, 4  ;;  %v3617_v58 = vrot.slane %v3616_v44, 4  ;;  %v9378_v28 = vpop.permute.xlu0 %2743 }
 0x295   :  { %v9365_v30 = vmax.f32 %v2998_v24, 0.0  ;;  %v9367_v47 = vadd.f32 %v3649_v53, %v3648_v31  ;;  %v3604_v25 = vadd.f32 %v3603_v7, %v3602_v8  ;;  %v6850_v48 = vadd.f32 %v8106_v42, %v286_v50  ;;  %10831 = vst [vmem:[#allocation113_spill] sm:$0xff] %v9378_v28 }
 0x296   :  { %v9371_v49 = vadd.f32 %v3698_v43, %v3697_v57  ;;  %v3598_v13 = vrot.slane %v3597_v62, 2  ;;  %v3611_v61 = vadd.f32 %v3610_v63, %v3609_v37  ;;  %v3618_v55 = vadd.f32 %v3617_v58, %v3616_v44  ;;  %v9387_v37 = vpop.f32.mrb[12].mxu0 }
 0x297   :  { %v3107_v4 = vmul.f32 %v9365_v30, %v9249_v26  ;;  %v3108_v41 = vmul.f32 %v9365_v30, %v9284_v18  ;;  %v3605_v31 = vrot.slane %v3604_v25, 2  ;;  %v9381_v24 = vadd.f32 %v6850_v48, %v9264_v22  ;;  %v9394_v26 = vpop.permute.xlu1 %2757 }
 0x298   :  { %v3599_v53 = vadd.f32 %v3598_v13, %v3597_v62  ;;  %v3109_v57 = vmul.f32 %v9365_v30, %v9309_v51  ;;  %v3612_v8 = vrot.slane %v3611_v61, 2  ;;  %v3619_v50 = vrot.slane %v3618_v55, 2  ;;  %v9391_v13 = vpop.f32.mrb[13].mxu0  ;;  %10833 = vst [vmem:[#allocation115_spill] sm:$0xff] %v9394_v26 }
 0x299   :  { %10832 = vst [vmem:[#allocation114_spill] sm:$0xff] %v9381_v24  ;;  %v3763_v58 = vsel %vm120_vm0, %v3107_v4, 0.0  ;;  %v3770_v63 = vsel %vm120_vm0, %v3108_v41, 0.0  ;;  %v3606_v43 = vadd.f32 %v3605_v31, %v3604_v25  ;;  %v2997_v62 = vadd.f32 %v9381_v24, %v10815_v23  ;;  %v9398_v24 = vpop.permute.xlu0 %2750 }
 0x29a   :  { %v3600_v44 = vrot.slane %v3599_v53, 1  ;;  %v3764_v7 = vrot.slane %v3763_v58, 4  ;;  %v3613_v22 = vadd.f32 %v3612_v8, %v3611_v61  ;;  %v3620_v48 = vadd.f32 %v3619_v50, %v3618_v55  ;;  %10834 = vst [vmem:[#allocation116_spill] sm:$0xff] %v9398_v24 }
 0x29b   :  { %v3771_v18 = vrot.slane %v3770_v63, 4  ;;  %v3777_v51 = vsel %vm120_vm0, %v3109_v57, 0.0  ;;  %v3607_v32 = vrot.slane %v3606_v43, 1  ;;  %v9396_v41 = vmax.f32 %v2997_v62, 0.0  ;;  %v9409_v54 = vpop.permute.xlu1 %2771 }
 0x29c   :  { %v3601_v4 = vadd.f32 %v3600_v44, %v3599_v53  ;;  %v3765_v56 = vadd.f32 %v3764_v7, %v3763_v58  ;;  %v3614_v2 = vrot.slane %v3613_v22, 1  ;;  %v3621_v25 = vrot.slane %v3620_v48, 1 }
 0x29d   :  { %v3772_v31 = vadd.f32 %v3771_v18, %v3770_v63  ;;  %v3778_v52 = vrot.slane %v3777_v51, 4  ;;  %v3608_v6 = vadd.f32 %v3607_v32, %v3606_v43  ;;  %v3103_v61 = vmul.f32 %v9396_v41, %v9305_v27 }
 0x29e   :  { %v3766_v55 = vrot.slane %v3765_v56, 2  ;;  %v3706_v57 = vadd.f32 %v3705_v20, %v9343_v33  ;;  %v3615_v8 = vadd.f32 %v3614_v2, %v3613_v22  ;;  %v3622_v50 = vadd.f32 %v3621_v25, %v3620_v48  ;;  %v9418_v20 = vpop.permute.xlu0 %2764 }
 0x29f   :  { %v3773_v53 = vrot.slane %v3772_v31, 2  ;;  %v3779_v44 = vadd.f32 %v3778_v52, %v3777_v51  ;;  %v4234_v62 = vsel %vm4171_vm1, %v3608_v6, %v3601_v4  ;;  %v3735_v58 = vsel %vm120_vm0, %v3103_v61, 0.0 }
 0x2a0   :  { %v3767_v7 = vadd.f32 %v3766_v55, %v3765_v56  ;;  %v4243_v18 = vsel %vm4175_vm3, %v9328_v40, %v9302_v39  ;;  %v4235_v32 = vsel %vm4173_vm2, %v3615_v8, %v4234_v62  ;;  %v3736_v63 = vrot.slane %v3735_v58, 4 }
 0x2a1   :  { %v3774_v43 = vadd.f32 %v3773_v53, %v3772_v31  ;;  %v3780_v27 = vrot.slane %v3779_v44, 2  ;;  %v4236_v2 = vsel %vm4175_vm3, %v3622_v50, %v4235_v32  ;;  %v4244_v6 = vsel %vm4177_vm4, %v9334_v9, %v4243_v18 }
 0x2a2   :  { %v3768_v33 = vrot.slane %v3767_v7, 1  ;;  %v3104_v52 = vmul.f32 %v9396_v41, %v9321_v45  ;;  %v4237_v56 = vsel %vm4177_vm4, %v9311_v10, %v4236_v2  ;;  %v3737_v39 = vadd.f32 %v3736_v63, %v3735_v58  ;;  %v9449_v63 = vpop.permute.xlu0 %2778 }
 0x2a3   :  { %v3775_v51 = vrot.slane %v3774_v43, 1  ;;  %v3781_v40 = vadd.f32 %v3780_v27, %v3779_v44  ;;  %v4238_v22 = vsel %vm4179_vm5, %v9324_v3, %v4237_v56  ;;  %v4245_v4 = vsel %vm4179_vm5, %v9363_v36, %v4244_v6  ;;  %v9436_v44 = vpop.permute.xlu1 %2820 }
 0x2a4   :  { %v3769_v48 = vadd.f32 %v3768_v33, %v3767_v7  ;;  %v3742_v9 = vsel %vm120_vm0, %v3104_v52, 0.0  ;;  %v4239_v25 = vsel %vm4181_vm6, %v9332_v16, %v4238_v22  ;;  %v3738_v31 = vrot.slane %v3737_v39, 2  ;;  %10835 = vst [vmem:[#allocation117_spill] sm:$0xff] %v9436_v44  ;;  %v9455_v52 = vpop.f32.mrb[14].mxu0 }
 0x2a5   :  { %v3776_v61 = vadd.f32 %v3775_v51, %v3774_v43  ;;  %v3782_v10 = vrot.slane %v3781_v40, 1  ;;  %v4240_v27 = vsel %vm4183_vm7, %v9367_v47, %v4239_v25  ;;  %v4246_v55 = vsel %vm4181_vm6, %v9371_v49, %v4245_v4  ;;  %v9459_v22 = vpop.f32.mrb[15].mxu0 }
 0x2a6   :  { %v3743_v8 = vrot.slane %v3742_v9, 4  ;;  %v3110_v3 = vmul.f32 %v9365_v30, %v9326_v29  ;;  %6677 = vmatprep.mubr.msk.f32.mxu1 %vm120_vm0, %v4240_v27  ;;  %v3739_v36 = vadd.f32 %v3738_v31, %v3737_v39  ;;  %v4247_v16 = vsel %vm4183_vm7, %v3706_v57, %v4246_v55 }
 0x2a7   :  { %v3783_v50 = vadd.f32 %v3782_v10, %v3781_v40  ;;  %v4255_v53 = vsel %vm4171_vm1, %v3776_v61, %v3769_v48  ;;  %6678 = vmatmul.mubr.msk.f32.gmra.mrb[16].mxu1 %vm120_vm0, %v4247_v16  ;;  %v3105_v49 = vmul.f32 %v9396_v41, %v9341_v38  ;;  %v3111_v58 = vmul.f32 %v9365_v30, %v9355_v14  ;;  %v9465_v55 = vpop.permute.xlu1 %2785 }
 0x2a8   :  { %v3744_v47 = vadd.f32 %v3743_v8, %v3742_v9  ;;  %v3784_v62 = vsel %vm120_vm0, %v3110_v3, 0.0  ;;  %v3740_v7 = vrot.slane %v3739_v36, 1  ;;  %v3106_v57 = vmul.f32 %v9396_v41, %v9369_v21 }
 0x2a9   :  { %v9445_v18 = vsel %vm4173_vm2, %v3783_v50, %v4255_v53  ;;  %v3785_v32 = vrot.slane %v3784_v62, 4  ;;  %v3749_v2 = vsel %vm120_vm0, %v3105_v49, 0.0  ;;  %v3791_v33 = vsel %vm120_vm0, %v3111_v58, 0.0  ;;  %v9470_v49 = vpop.permute.xlu0 %2827 }
 0x2aa   :  { %v3745_v43 = vrot.slane %v3744_v47, 2  ;;  %v3112_v6 = vmul.f32 %v9365_v30, %v9378_v28  ;;  %v9457_v56 = vadd.f32 %v3740_v7, %v3739_v36  ;;  %v3750_v51 = vrot.slane %v3749_v2, 4  ;;  %10836 = vst [vmem:[#allocation118_spill] sm:$0xff] %v9470_v49 }
 0x2ab   :  { %v3786_v39 = vadd.f32 %v3785_v32, %v3784_v62  ;;  %v3792_v40 = vrot.slane %v3791_v33, 4  ;;  %v3756_v4 = vsel %vm120_vm0, %v3106_v57, 0.0  ;;  %v3114_v25 = vmul.f32 %v9365_v30, %v9394_v26 }
 0x2ac   :  { %v3746_v48 = vadd.f32 %v3745_v43, %v3744_v47  ;;  %v3798_v9 = vsel %vm120_vm0, %v3112_v6, 0.0  ;;  %v3751_v61 = vadd.f32 %v3750_v51, %v3749_v2  ;;  %v3757_v27 = vrot.slane %v3756_v4, 4 }
 0x2ad   :  { %v3787_v31 = vrot.slane %v3786_v39, 2  ;;  %v3793_v10 = vadd.f32 %v3792_v40, %v3791_v33  ;;  %v3799_v3 = vrot.slane %v3798_v9, 4  ;;  %v3812_v36 = vsel %vm120_vm0, %v3114_v25, 0.0 }
 0x2ae   :  { %v3747_v8 = vrot.slane %v3746_v48, 1  ;;  %v3113_v50 = vmul.f32 %v9365_v30, %v9398_v24  ;;  %v3752_v16 = vrot.slane %v3751_v61, 2  ;;  %v3758_v62 = vadd.f32 %v3757_v27, %v3756_v4  ;;  %v10837_v30 = vld [vmem:[#allocation80_spill] sm:$0xff] }
 0x2af   :  { %v3788_v53 = vadd.f32 %v3787_v31, %v3786_v39  ;;  %v3794_v47 = vrot.slane %v3793_v10, 2  ;;  %v3800_v7 = vadd.f32 %v3799_v3, %v3798_v9  ;;  %v3813_v32 = vrot.slane %v3812_v36, 4 }
 0x2b0   :  { %v9472_v58 = vadd.f32 %v3747_v8, %v3746_v48  ;;  %v3805_v57 = vsel %vm120_vm0, %v3113_v50, 0.0  ;;  %v3753_v2 = vadd.f32 %v3752_v16, %v3751_v61  ;;  %v3759_v6 = vrot.slane %v3758_v62, 2  ;;  %v9479_v8 = vpop.permute.xlu1 %2792  ;;  %v10838_v61 = vld [vmem:[#allocation81_spill] sm:$0xff] }
 0x2b1   :  { %v3789_v43 = vrot.slane %v3788_v53, 1  ;;  %v3795_v33 = vadd.f32 %v3794_v47, %v3793_v10  ;;  %v3801_v51 = vrot.slane %v3800_v7, 2  ;;  %v3814_v40 = vadd.f32 %v3813_v32, %v3812_v36 }
 0x2b2   :  { %v3806_v25 = vrot.slane %v3805_v57, 4  ;;  %v301_v39 = vadd.f32 %v10837_v30, %v8103_v5  ;;  %v3754_v4 = vrot.slane %v3753_v2, 1  ;;  %v3760_v48 = vadd.f32 %v3759_v6, %v3758_v62 }
 0x2b3   :  { %v9477_v31 = vadd.f32 %v3789_v43, %v3788_v53  ;;  %v3796_v27 = vrot.slane %v3795_v33, 1  ;;  %v3802_v9 = vadd.f32 %v3801_v51, %v3800_v7  ;;  %v3815_v3 = vrot.slane %v3814_v40, 2  ;;  %v9488_v53 = vpop.permute.xlu0 %2834 }
 0x2b4   :  { %v3807_v50 = vadd.f32 %v3806_v25, %v3805_v57  ;;  %v296_v10 = vadd.f32 %v10838_v61, %v8103_v5  ;;  %v9483_v16 = vadd.f32 %v3754_v4, %v3753_v2  ;;  %v3761_v47 = vrot.slane %v3760_v48, 1  ;;  %10839 = vst [vmem:[#allocation80_spill] sm:$0xff] %v9488_v53  ;;  %v9511_v61 = vpop.permute.xlu1 %2799 }
 0x2b5   :  { %v9485_v36 = vadd.f32 %v3796_v27, %v3795_v33  ;;  %v6853_v32 = vadd.f32 %v8106_v42, %v301_v39  ;;  %v3803_v43 = vrot.slane %v3802_v9, 1  ;;  %v9490_v30 = vadd.f32 %v3815_v3, %v3814_v40 }
 0x2b6   :  { %v3808_v62 = vrot.slane %v3807_v50, 2  ;;  %v3099_v7 = vmul.f32 %v9396_v41, %v9242_v15  ;;  %v3100_v2 = vmul.f32 %v9396_v41, %v9233_v12  ;;  %v3101_v33 = vmul.f32 %v9396_v41, %v9254_v34 }
 0x2b7   :  { %v9495_v57 = vadd.f32 %v6853_v32, %v9387_v37  ;;  %v3102_v6 = vmul.f32 %v9396_v41, %v9275_v11  ;;  %v9503_v51 = vadd.f32 %v3803_v43, %v3802_v9  ;;  %v3817_v40 = vrot.slane %v9490_v30, 1  ;;  %v9518_v24 = vpop.permute.xlu0 %2841 }
 0x2b8   :  { %v3809_v25 = vadd.f32 %v3808_v62, %v3807_v50  ;;  %v3707_v39 = vsel %vm120_vm0, %v3099_v7, 0.0  ;;  %v3714_v27 = vsel %vm120_vm0, %v3100_v2, 0.0  ;;  %v3721_v3 = vsel %vm120_vm0, %v3101_v33, 0.0  ;;  %10841 = vst [vmem:[#allocation119_spill] sm:$0xff] %v9518_v24 }
 0x2b9   :  { %10840 = vst [vmem:[#allocation81_spill] sm:$0xff] %v9495_v57  ;;  %v3000_v37 = vadd.f32 %v9495_v57, %v10815_v23  ;;  %v3708_v4 = vrot.slane %v3707_v39, 4  ;;  %v3715_v26 = vrot.slane %v3714_v27, 4  ;;  %v3722_v41 = vrot.slane %v3721_v3, 4 }
 0x2ba   :  { %v3810_v32 = vrot.slane %v3809_v25, 1  ;;  %v3728_v9 = vsel %vm120_vm0, %v3102_v6, 0.0  ;;  %v9516_v7 = vadd.f32 %v3761_v47, %v3760_v48  ;;  %v6856_v33 = vadd.f32 %v8106_v42, %v296_v10 }
 0x2bb   :  { %v9514_v43 = vmax.f32 %v3000_v37, 0.0  ;;  %v3709_v50 = vadd.f32 %v3708_v4, %v3707_v39  ;;  %v3729_v62 = vrot.slane %v3728_v9, 4  ;;  %v3716_v2 = vadd.f32 %v3715_v26, %v3714_v27  ;;  %v9534_v27 = vpop.permute.xlu1 %2806 }
 0x2bc   :  { %v9520_v57 = vadd.f32 %v3810_v32, %v3809_v25  ;;  %v3723_v28 = vadd.f32 %v3722_v41, %v3721_v3  ;;  %v9528_v48 = vadd.f32 %v6856_v33, %v9391_v13  ;;  %v3818_v12 = vadd.f32 %v3817_v40, %v9490_v30 }
 0x2bd   :  { %v3710_v21 = vrot.slane %v3709_v50, 2  ;;  %v3730_v38 = vadd.f32 %v3729_v62, %v3728_v9  ;;  %v3123_v45 = vmul.f32 %v9514_v43, %v9436_v44  ;;  %v3124_v6 = vmul.f32 %v9514_v43, %v9470_v49 }
 0x2be   :  { %v3717_v39 = vrot.slane %v3716_v2, 2  ;;  %v3724_v37 = vrot.slane %v3723_v28, 2  ;;  %10842 = vst [vmem:[#allocation120_spill] sm:$0xff] %v9528_v48  ;;  %v3125_v47 = vmul.f32 %v9514_v43, %v9488_v53  ;;  %v2999_v41 = vadd.f32 %v9528_v48, %v10815_v23  ;;  %v9539_v53 = vpop.permute.xlu0 %2848 }
 0x2bf   :  { %v3711_v26 = vadd.f32 %v3710_v21, %v3709_v50  ;;  %v3731_v25 = vrot.slane %v3730_v38, 2  ;;  %v3875_v10 = vsel %vm120_vm0, %v3123_v45, 0.0  ;;  %v3882_v4 = vsel %vm120_vm0, %v3124_v6, 0.0  ;;  %10843 = vst [vmem:[#allocation121_spill] sm:$0xff] %v9539_v53  ;;  %v9546_v15 = vpop.permute.xlu1 %2813 }
 0x2c0   :  { %v3718_v3 = vadd.f32 %v3717_v39, %v3716_v2  ;;  %v3725_v32 = vadd.f32 %v3724_v37, %v3723_v28  ;;  %v3876_v9 = vrot.slane %v3875_v10, 4  ;;  %v3883_v33 = vrot.slane %v3882_v4, 4  ;;  %10844 = vst [vmem:[#allocation122_spill] sm:$0xff] %v9546_v15 }
 0x2c1   :  { %v3712_v62 = vrot.slane %v3711_v26, 1  ;;  %v3732_v13 = vadd.f32 %v3731_v25, %v3730_v38  ;;  %v3889_v49 = vsel %vm120_vm0, %v3125_v47, 0.0  ;;  %v9541_v45 = vmax.f32 %v2999_v41, 0.0 }
 0x2c2   :  { %v3719_v21 = vrot.slane %v3718_v3, 1  ;;  %v3726_v50 = vrot.slane %v3725_v32, 1  ;;  %v3877_v6 = vadd.f32 %v3876_v9, %v3875_v10  ;;  %v3884_v2 = vadd.f32 %v3883_v33, %v3882_v4 }
 0x2c3   :  { %v3713_v44 = vadd.f32 %v3712_v62, %v3711_v26  ;;  %v3733_v11 = vrot.slane %v3732_v13, 1  ;;  %v3890_v28 = vrot.slane %v3889_v49, 4  ;;  %v3119_v48 = vmul.f32 %v9541_v45, %v9479_v8  ;;  %v9554_v62 = vpop.permute.xlu0 %2855 }
 0x2c4   :  { %v3720_v39 = vadd.f32 %v3719_v21, %v3718_v3  ;;  %v3727_v37 = vadd.f32 %v3726_v50, %v3725_v32  ;;  %v3878_v38 = vrot.slane %v3877_v6, 2  ;;  %v3885_v34 = vrot.slane %v3884_v2, 2  ;;  %10845 = vst [vmem:[#allocation123_spill] sm:$0xff] %v9554_v62 }
 0x2c5   :  { %v3734_v25 = vadd.f32 %v3733_v11, %v3732_v13  ;;  %v3891_v47 = vadd.f32 %v3890_v28, %v3889_v49  ;;  %v3847_v26 = vsel %vm120_vm0, %v3119_v48, 0.0  ;;  %v4257_v4 = vsel %vm4175_vm3, %v9477_v31, %v9445_v18 }
 0x2c6   :  { %v4248_v41 = vsel %vm4171_vm1, %v3720_v39, %v3713_v44  ;;  %v3879_v10 = vadd.f32 %v3878_v38, %v3877_v6  ;;  %v3848_v32 = vrot.slane %v3847_v26, 4  ;;  %v3886_v9 = vadd.f32 %v3885_v34, %v3884_v2  ;;  %v9570_v39 = vpop.permute.xlu1 %2869 }
 0x2c7   :  { %v4249_v3 = vsel %vm4173_vm2, %v3727_v37, %v4248_v41  ;;  %v3892_v11 = vrot.slane %v3891_v47, 2  ;;  %v4258_v44 = vsel %vm4177_vm4, %v9485_v36, %v4257_v4  ;;  %v3120_v40 = vmul.f32 %v9541_v45, %v9511_v61  ;;  %10846 = vst [vmem:[#allocation124_spill] sm:$0xff] %v9570_v39  ;;  %v9581_v41 = vpop.permute.xlu0 %2862 }
 0x2c8   :  { %v4250_v49 = vsel %vm4175_vm3, %v3734_v25, %v4249_v3  ;;  %v3880_v30 = vrot.slane %v3879_v10, 1  ;;  %v3849_v18 = vadd.f32 %v3848_v32, %v3847_v26  ;;  %v3887_v31 = vrot.slane %v3886_v9, 1  ;;  %10847 = vst [vmem:[#allocation125_spill] sm:$0xff] %v9581_v41 }
 0x2c9   :  { %v4251_v48 = vsel %vm4177_vm4, %v9457_v56, %v4250_v49  ;;  %v3893_v13 = vadd.f32 %v3892_v11, %v3891_v47  ;;  %v4259_v21 = vsel %vm4179_vm5, %v9503_v51, %v4258_v44  ;;  %v3854_v50 = vsel %vm120_vm0, %v3120_v40, 0.0 }
 0x2ca   :  { %v4252_v34 = vsel %vm4179_vm5, %v9472_v58, %v4251_v48  ;;  %v3881_v33 = vadd.f32 %v3880_v30, %v3879_v10  ;;  %v3850_v6 = vrot.slane %v3849_v18, 2  ;;  %v3888_v2 = vadd.f32 %v3887_v31, %v3886_v9  ;;  %v9600_v31 = vpop.permute.xlu1 %2883 }
 0x2cb   :  { %v4253_v36 = vsel %vm4181_vm6, %v9483_v16, %v4252_v34  ;;  %v3894_v28 = vrot.slane %v3893_v13, 1  ;;  %v4260_v58 = vsel %vm4181_vm6, %v9520_v57, %v4259_v21  ;;  %v3855_v37 = vrot.slane %v3854_v50, 4  ;;  %10848 = vst [vmem:[#allocation126_spill] sm:$0xff] %v9600_v31 }
 0x2cc   :  { %v4254_v56 = vsel %vm4183_vm7, %v9516_v7, %v4253_v36  ;;  %v3126_v51 = vmul.f32 %v9514_v43, %v9518_v24  ;;  %v3851_v38 = vadd.f32 %v3850_v6, %v3849_v18  ;;  %v4269_v16 = vsel %vm4171_vm1, %v3888_v2, %v3881_v33 }
 0x2cd   :  { %6680 = vmatprep.mubr.msk.f32.mxu1 %vm120_vm0, %v4254_v56  ;;  %v3895_v25 = vadd.f32 %v3894_v28, %v3893_v13  ;;  %v4261_v47 = vsel %vm4183_vm7, %v3818_v12, %v4260_v58  ;;  %v3856_v7 = vadd.f32 %v3855_v37, %v3854_v50  ;;  %v3121_v57 = vmul.f32 %v9541_v45, %v9534_v27 }
 0x2ce   :  { %6681 = vmatmul.mubr.msk.f32.gmra.mrb[18].mxu1 %vm120_vm0, %v4261_v47  ;;  %v3896_v26 = vsel %vm120_vm0, %v3126_v51, 0.0  ;;  %v3127_v10 = vmul.f32 %v9514_v43, %v9539_v53  ;;  %v3852_v4 = vrot.slane %v3851_v38, 1  ;;  %v311_v12 = vadd.f32 %v9137_v17, %v8103_v5 }
 0x2cf   :  { %v9590_v3 = vsel %vm4173_vm2, %v3895_v25, %v4269_v16  ;;  %v3897_v32 = vrot.slane %v3896_v26, 4  ;;  %v3857_v9 = vrot.slane %v3856_v7, 2  ;;  %v3861_v11 = vsel %vm120_vm0, %v3121_v57, 0.0 }
 0x2d0   :  { %v3903_v49 = vsel %vm120_vm0, %v3127_v10, 0.0  ;;  %v306_v30 = vadd.f32 %v9141_v1, %v8103_v5  ;;  %v9598_v44 = vadd.f32 %v3852_v4, %v3851_v38  ;;  %v3862_v48 = vrot.slane %v3861_v11, 4  ;;  %v9608_v1 = vpop.permute.xlu0 %2876  ;;  %v9622_v4 = vpop.permute.xlu1 %2932 }
 0x2d1   :  { %v3898_v40 = vadd.f32 %v3897_v32, %v3896_v26  ;;  %v3904_v18 = vrot.slane %v3903_v49, 4  ;;  %v3858_v13 = vadd.f32 %v3857_v9, %v3856_v7  ;;  %v3122_v34 = vmul.f32 %v9541_v45, %v9546_v15  ;;  %10849 = vst [vmem:[#allocation127_spill] sm:$0xff] %v9608_v1  ;;  %10850 = vst [vmem:[#allocation128_spill] sm:$0xff] %v9622_v4 }
 0x2d2   :  { %v3128_v17 = vmul.f32 %v9514_v43, %v9554_v62  ;;  %v6859_v33 = vadd.f32 %v8106_v42, %v311_v12  ;;  %v3863_v50 = vadd.f32 %v3862_v48, %v3861_v11  ;;  %v6862_v5 = vadd.f32 %v8106_v42, %v306_v30 }
 0x2d3   :  { %v3899_v21 = vrot.slane %v3898_v40, 2  ;;  %v3905_v36 = vadd.f32 %v3904_v18, %v3903_v49  ;;  %v3859_v6 = vrot.slane %v3858_v13, 1  ;;  %v3868_v2 = vsel %vm120_vm0, %v3122_v34, 0.0 }
 0x2d4   :  { %v3910_v28 = vsel %vm120_vm0, %v3128_v17, 0.0  ;;  %v9613_v56 = vadd.f32 %v6859_v33, %v9455_v52  ;;  %v3864_v37 = vrot.slane %v3863_v50, 2  ;;  %v3869_v38 = vrot.slane %v3868_v2, 4 }
 0x2d5   :  { %v3900_v58 = vadd.f32 %v3899_v21, %v3898_v40  ;;  %v3906_v51 = vrot.slane %v3905_v36, 2  ;;  %v9615_v25 = vadd.f32 %v3859_v6, %v3858_v13  ;;  %v3911_v16 = vrot.slane %v3910_v28, 4  ;;  %v9632_v40 = vpop.permute.xlu0 %2890 }
 0x2d6   :  { %v3002_v42 = vadd.f32 %v9613_v56, %v10815_v23  ;;  %v9620_v47 = vadd.f32 %v6862_v5, %v9459_v22  ;;  %v3865_v26 = vadd.f32 %v3864_v37, %v3863_v50  ;;  %v3870_v10 = vadd.f32 %v3869_v38, %v3868_v2  ;;  %10851 = vst [vmem:[#allocation129_spill] sm:$0xff] %v9632_v40 }
 0x2d7   :  { %v3901_v7 = vrot.slane %v3900_v58, 1  ;;  %v3907_v57 = vadd.f32 %v3906_v51, %v3905_v36  ;;  %v3912_v52 = vadd.f32 %v3911_v16, %v3910_v28  ;;  %v3130_v9 = vmul.f32 %v9514_v43, %v9570_v39  ;;  %v9653_v51 = vpop.permute.xlu1 %2897 }
 0x2d8   :  { %v9624_v32 = vmax.f32 %v3002_v42, 0.0  ;;  %v3001_v12 = vadd.f32 %v9620_v47, %v10815_v23  ;;  %v3866_v49 = vrot.slane %v3865_v26, 1  ;;  %v3871_v30 = vrot.slane %v3870_v10, 2  ;;  %10852 = vst [vmem:[#allocation130_spill] sm:$0xff] %v9653_v51 }
 0x2d9   :  { %v9630_v11 = vadd.f32 %v3901_v7, %v3900_v58  ;;  %v3908_v22 = vrot.slane %v3907_v57, 1  ;;  %v3913_v48 = vrot.slane %v3912_v52, 2  ;;  %v3924_v13 = vsel %vm120_vm0, %v3130_v9, 0.0 }
 0x2da   :  { %v9634_v18 = vmax.f32 %v3001_v12, 0.0  ;;  %v3129_v34 = vmul.f32 %v9514_v43, %v9581_v41  ;;  %v9639_v17 = vadd.f32 %v3866_v49, %v3865_v26  ;;  %v9643_v21 = vadd.f32 %v3871_v30, %v3870_v10  ;;  %v9659_v12 = vpop.permute.xlu0 %2939 }
 0x2db   :  { %v9641_v33 = vadd.f32 %v3908_v22, %v3907_v57  ;;  %v3925_v50 = vrot.slane %v3924_v13, 4  ;;  %v3914_v36 = vadd.f32 %v3913_v48, %v3912_v52  ;;  %v3139_v37 = vmul.f32 %v9624_v32, %v9622_v4  ;;  %10853 = vst [vmem:[#allocation131_spill] sm:$0xff] %v9659_v12  ;;  %v9667_v48 = vpop.f32.mrb[8].mxu1  ;;  %v9680_v39 = vpop.permute.xlu1 %2904 }
 0x2dc   :  { %v3917_v5 = vsel %vm120_vm0, %v3129_v34, 0.0  ;;  %v3132_v6 = vmul.f32 %v9634_v18, %v9600_v31  ;;  %v3131_v2 = vmul.f32 %v9634_v18, %v9608_v1  ;;  %v3133_v7 = vmul.f32 %v9634_v18, %v9632_v40  ;;  %10854 = vst [vmem:[#allocation132_spill] sm:$0xff] %v9680_v39 }
 0x2dd   :  { %v3926_v58 = vadd.f32 %v3925_v50, %v3924_v13  ;;  %v3918_v43 = vrot.slane %v3917_v5, 4  ;;  %v3915_v38 = vrot.slane %v3914_v36, 1  ;;  %v3987_v49 = vsel %vm120_vm0, %v3139_v37, 0.0 }
 0x2de   :  { %v3938_v16 = vsel %vm120_vm0, %v3132_v6, 0.0  ;;  %v3931_v42 = vsel %vm120_vm0, %v3131_v2, 0.0  ;;  %v3945_v22 = vsel %vm120_vm0, %v3133_v7, 0.0  ;;  %v3134_v30 = vmul.f32 %v9634_v18, %v9653_v51  ;;  %v9671_v6 = vpop.f32.mrb[9].mxu1 }
 0x2df   :  { %v3927_v26 = vrot.slane %v3926_v58, 2  ;;  %v3919_v57 = vadd.f32 %v3918_v43, %v3917_v5  ;;  %v3939_v10 = vrot.slane %v3938_v16, 4  ;;  %v3932_v52 = vrot.slane %v3931_v42, 4 }
 0x2e0   :  { %v9661_v9 = vadd.f32 %v3915_v38, %v3914_v36  ;;  %v3988_v2 = vrot.slane %v3987_v49, 4  ;;  %v3946_v43 = vrot.slane %v3945_v22, 4  ;;  %v3952_v36 = vsel %vm120_vm0, %v3134_v30, 0.0 }
 0x2e1   :  { %v9669_v13 = vadd.f32 %v3927_v26, %v3926_v58  ;;  %v3920_v34 = vrot.slane %v3919_v57, 2  ;;  %v3940_v50 = vadd.f32 %v3939_v10, %v3938_v16  ;;  %v3933_v5 = vadd.f32 %v3932_v52, %v3931_v42 }
 0x2e2   :  { %v3140_v37 = vmul.f32 %v9624_v32, %v9659_v12  ;;  %v3989_v51 = vadd.f32 %v3988_v2, %v3987_v49  ;;  %v3947_v58 = vadd.f32 %v3946_v43, %v3945_v22  ;;  %v3953_v26 = vrot.slane %v3952_v36, 4 }
 0x2e3   :  { %v3921_v7 = vadd.f32 %v3920_v34, %v3919_v57  ;;  %v3941_v28 = vrot.slane %v3940_v50, 2  ;;  %v3934_v4 = vrot.slane %v3933_v5, 2  ;;  %v3115_v12 = vmul.f32 %v9541_v45, %v9418_v20  ;;  %v9682_v57 = vpop.permute.xlu0 %2946 }
 0x2e4   :  { %v3994_v16 = vsel %vm120_vm0, %v3140_v37, 0.0  ;;  %v3990_v31 = vrot.slane %v3989_v51, 2  ;;  %v3948_v1 = vrot.slane %v3947_v58, 2  ;;  %v3954_v30 = vadd.f32 %v3953_v26, %v3952_v36  ;;  %10855 = vst [vmem:[#allocation133_spill] sm:$0xff] %v9682_v57 }
 0x2e5   :  { %v3922_v42 = vrot.slane %v3921_v7, 1  ;;  %v3942_v10 = vadd.f32 %v3941_v28, %v3940_v50  ;;  %v3935_v52 = vadd.f32 %v3934_v4, %v3933_v5  ;;  %v3995_v40 = vrot.slane %v3994_v16, 4 }
 0x2e6   :  { %v3991_v43 = vadd.f32 %v3990_v31, %v3989_v51  ;;  %v3949_v37 = vadd.f32 %v3948_v1, %v3947_v58  ;;  %v3955_v28 = vrot.slane %v3954_v30, 2  ;;  %v3116_v4 = vmul.f32 %v9541_v45, %v9409_v54 }
 0x2e7   :  { %v9684_v34 = vadd.f32 %v3922_v42, %v3921_v7  ;;  %v3943_v49 = vrot.slane %v3942_v10, 1  ;;  %v3936_v22 = vrot.slane %v3935_v52, 1  ;;  %v3996_v2 = vadd.f32 %v3995_v40, %v3994_v16 }
 0x2e8   :  { %v3117_v26 = vmul.f32 %v9541_v45, %v9449_v63  ;;  %v3992_v38 = vrot.slane %v3991_v43, 1  ;;  %v3950_v41 = vrot.slane %v3949_v37, 1  ;;  %v3956_v62 = vadd.f32 %v3955_v28, %v3954_v30 }
 0x2e9   :  { %v3944_v50 = vadd.f32 %v3943_v49, %v3942_v10  ;;  %v3937_v5 = vadd.f32 %v3936_v22, %v3935_v52  ;;  %v3997_v36 = vrot.slane %v3996_v2, 2  ;;  %v3118_v7 = vmul.f32 %v9541_v45, %v9465_v55  ;;  %v9695_v52 = vpop.permute.xlu1 %2911  ;;  %v9697_v49 = vpop.permute.xlu0 %2953 }
 0x2ea   :  { %v3819_v1 = vsel %vm120_vm0, %v3115_v12, 0.0  ;;  %v3826_v51 = vsel %vm120_vm0, %v3116_v4, 0.0  ;;  %v3993_v58 = vadd.f32 %v3992_v38, %v3991_v43  ;;  %v3951_v16 = vadd.f32 %v3950_v41, %v3949_v37  ;;  %10856 = vst [vmem:[#allocation134_spill] sm:$0xff] %v9695_v52  ;;  %10857 = vst [vmem:[#allocation135_spill] sm:$0xff] %v9697_v49 }
 0x2eb   :  { %v4276_v40 = vsel %vm4171_vm1, %v3944_v50, %v3937_v5  ;;  %v3998_v31 = vadd.f32 %v3997_v36, %v3996_v2  ;;  %v3957_v42 = vrot.slane %v3956_v62, 1  ;;  %v3820_v10 = vrot.slane %v3819_v1, 4 }
 0x2ec   :  { %v3827_v30 = vrot.slane %v3826_v51, 4  ;;  %v3833_v28 = vsel %vm120_vm0, %v3117_v26, 0.0  ;;  %v3840_v45 = vsel %vm120_vm0, %v3118_v7, 0.0  ;;  %v9702_v2 = vsel %vm4173_vm2, %v3951_v16, %v4276_v40 }
 0x2ed   :  { %v3999_v22 = vrot.slane %v3998_v31, 1  ;;  %v9704_v12 = vadd.f32 %v3957_v42, %v3956_v62  ;;  %v3821_v4 = vadd.f32 %v3820_v10, %v3819_v1  ;;  %v3834_v38 = vrot.slane %v3833_v28, 4 }
 0x2ee   :  { %v3828_v43 = vadd.f32 %v3827_v30, %v3826_v51  ;;  %v3841_v37 = vrot.slane %v3840_v45, 4  ;;  %v10858_v50 = vrot.slane %v9643_v21, 1  ;;  %v3135_v26 = vmul.f32 %v9634_v18, %v9680_v39  ;;  %v9725_v30 = vpop.permute.xlu0 %2960 }
 0x2ef   :  { %v4000_v41 = vadd.f32 %v3999_v22, %v3998_v31  ;;  %v3822_v36 = vrot.slane %v3821_v4, 2  ;;  %v3835_v53 = vadd.f32 %v3834_v38, %v3833_v28  ;;  %v3141_v7 = vmul.f32 %v9624_v32, %v9682_v57  ;;  %v9723_v22 = vpop.permute.xlu1 %2918  ;;  %10861 = vst [vmem:[#allocation137_spill] sm:$0xff] %v9725_v30 }
 0x2f0   :  { %v9709_v5 = vadd.f32 %v10858_v50, %v9643_v21  ;;  %v3829_v40 = vrot.slane %v3828_v43, 2  ;;  %v3842_v31 = vadd.f32 %v3841_v37, %v3840_v45  ;;  %v10859_v1 = vrot.slane %v9669_v13, 1  ;;  %10860 = vst [vmem:[#allocation136_spill] sm:$0xff] %v9723_v22 }
 0x2f1   :  { %v9716_v62 = vsel %vm4171_vm1, %v4000_v41, %v3993_v58  ;;  %v3823_v16 = vadd.f32 %v3822_v36, %v3821_v4  ;;  %v3836_v21 = vrot.slane %v3835_v53, 2  ;;  %v3959_v42 = vsel %vm120_vm0, %v3135_v26, 0.0 }
 0x2f2   :  { %v3930_v51 = vadd.f32 %v10859_v1, %v9669_v13  ;;  %v4001_v10 = vsel %vm120_vm0, %v3141_v7, 0.0  ;;  %v3830_v28 = vadd.f32 %v3829_v40, %v3828_v43  ;;  %v3843_v38 = vrot.slane %v3842_v31, 2 }
 0x2f3   :  { %v3960_v58 = vrot.slane %v3959_v42, 4  ;;  %v4002_v41 = vrot.slane %v4001_v10, 4  ;;  %v3824_v50 = vrot.slane %v3823_v16, 1  ;;  %v3837_v45 = vadd.f32 %v3836_v21, %v3835_v53 }
 0x2f4   :  { %v4271_v13 = vsel %vm4175_vm3, %v9630_v11, %v9590_v3  ;;  %v3136_v4 = vmul.f32 %v9634_v18, %v9695_v52  ;;  %v3831_v37 = vrot.slane %v3830_v28, 1  ;;  %v3844_v36 = vadd.f32 %v3843_v38, %v3842_v31 }
 0x2f5   :  { %v3961_v26 = vadd.f32 %v3960_v58, %v3959_v42  ;;  %v4003_v7 = vadd.f32 %v4002_v41, %v4001_v10  ;;  %v3825_v1 = vadd.f32 %v3824_v50, %v3823_v16  ;;  %v3838_v57 = vrot.slane %v3837_v45, 1  ;;  %v9739_v42 = vpop.permute.xlu1 %2925  ;;  %v9741_v16 = vpop.permute.xlu0 %2967 }
 0x2f6   :  { %v4272_v43 = vsel %vm4177_vm4, %v9641_v33, %v4271_v13  ;;  %v3966_v40 = vsel %vm120_vm0, %v3136_v4, 0.0  ;;  %v3832_v39 = vadd.f32 %v3831_v37, %v3830_v28  ;;  %v3845_v53 = vrot.slane %v3844_v36, 1  ;;  %10862 = vst [vmem:[#allocation138_spill] sm:$0xff] %v9739_v42  ;;  %10863 = vst [vmem:[#allocation139_spill] sm:$0xff] %v9741_v16 }
 0x2f7   :  { %v3962_v21 = vrot.slane %v3961_v26, 2  ;;  %v4004_v24 = vrot.slane %v4003_v7, 2  ;;  %v3839_v15 = vadd.f32 %v3838_v57, %v3837_v45  ;;  %v4273_v3 = vsel %vm4179_vm5, %v9661_v9, %v4272_v43 }
 0x2f8   :  { %v3967_v11 = vrot.slane %v3966_v40, 4  ;;  %v3142_v31 = vmul.f32 %v9624_v32, %v9697_v49  ;;  %v3846_v10 = vadd.f32 %v3845_v53, %v3844_v36  ;;  %v4262_v33 = vsel %vm4171_vm1, %v3832_v39, %v3825_v1 }
 0x2f9   :  { %v3963_v38 = vadd.f32 %v3962_v21, %v3961_v26  ;;  %v4005_v28 = vadd.f32 %v4004_v24, %v4003_v7  ;;  %v4263_v58 = vsel %vm4173_vm2, %v3839_v15, %v4262_v33  ;;  %v4274_v57 = vsel %vm4181_vm6, %v9684_v34, %v4273_v3  ;;  %v9765_v53 = vpop.permute.xlu0 %2974 }
 0x2fa   :  { %v3968_v41 = vadd.f32 %v3967_v11, %v3966_v40  ;;  %v4008_v9 = vsel %vm120_vm0, %v3142_v31, 0.0  ;;  %v4264_v50 = vsel %vm4175_vm3, %v3846_v10, %v4263_v58  ;;  %v4275_v4 = vsel %vm4183_vm7, %v3930_v51, %v4274_v57  ;;  %v9763_v40 = vpop.permute.xlu1 %2981  ;;  %10865 = vst [vmem:[#allocation141_spill] sm:$0xff] %v9765_v53 }
 0x2fb   :  { %v3964_v45 = vrot.slane %v3963_v38, 1  ;;  %v4006_v13 = vrot.slane %v4005_v28, 1  ;;  %v4265_v37 = vsel %vm4177_vm4, %v9598_v44, %v4264_v50  ;;  %v4009_v36 = vrot.slane %v4008_v9, 4  ;;  %10864 = vst [vmem:[#allocation140_spill] sm:$0xff] %v9763_v40 }
 0x2fc   :  { %v3969_v39 = vrot.slane %v3968_v41, 2  ;;  %v3137_v15 = vmul.f32 %v9634_v18, %v9723_v22  ;;  %v4266_v24 = vsel %vm4179_vm5, %v9615_v25, %v4265_v37  ;;  %v3143_v7 = vmul.f32 %v9624_v32, %v9725_v30 }
 0x2fd   :  { %v9756_v34 = vadd.f32 %v3964_v45, %v3963_v38  ;;  %v4007_v26 = vadd.f32 %v4006_v13, %v4005_v28  ;;  %v4267_v51 = vsel %vm4181_vm6, %v9639_v17, %v4266_v24  ;;  %v4010_v43 = vadd.f32 %v4009_v36, %v4008_v9 }
 0x2fe   :  { %v3970_v1 = vadd.f32 %v3969_v39, %v3968_v41  ;;  %v3973_v44 = vsel %vm120_vm0, %v3137_v15, 0.0  ;;  %v4268_v25 = vsel %vm4183_vm7, %v9709_v5, %v4267_v51  ;;  %v4015_v11 = vsel %vm120_vm0, %v3143_v7, 0.0 }
 0x2ff   :  { %v4284_v21 = vsel %vm4173_vm2, %v4007_v26, %v9716_v62  ;;  %v3974_v3 = vrot.slane %v3973_v44, 4  ;;  %6683 = vmatprep.mubr.msk.f32.mxu1 %vm120_vm0, %v4268_v25  ;;  %v4011_v31 = vrot.slane %v4010_v43, 2  ;;  %v4016_v10 = vrot.slane %v4015_v11, 4 }
 0x300   :  { %v3971_v17 = vrot.slane %v3970_v1, 1  ;;  %v3138_v33 = vmul.f32 %v9634_v18, %v9739_v42  ;;  %6684 = vmatmul.mubr.msk.f32.gmra.mrb[20].mxu1 %vm120_vm0, %v4275_v4  ;;  %v3144_v5 = vmul.f32 %v9624_v32, %v9741_v16  ;;  %v3146_v62 = vmul.f32 %v9624_v32, %v9763_v40 }
 0x301   :  { %v3975_v38 = vadd.f32 %v3974_v3, %v3973_v44  ;;  %v3145_v28 = vmul.f32 %v9624_v32, %v9765_v53  ;;  %v4012_v57 = vadd.f32 %v4011_v31, %v4010_v43  ;;  %v4017_v41 = vadd.f32 %v4016_v10, %v4015_v11  ;;  %v10866_v11 = vld [vmem:[#allocation22_spill] sm:$0xff] }
 0x302   :  { %v3972_v58 = vadd.f32 %v3971_v17, %v3970_v1  ;;  %v3980_v9 = vsel %vm120_vm0, %v3138_v33, 0.0  ;;  %v4022_v18 = vsel %vm120_vm0, %v3144_v5, 0.0  ;;  %v4036_v13 = vsel %vm120_vm0, %v3146_v62, 0.0 }
 0x303   :  { %v3976_v50 = vrot.slane %v3975_v38, 2  ;;  %v3981_v45 = vrot.slane %v3980_v9, 4  ;;  %v4013_v4 = vrot.slane %v4012_v57, 1  ;;  %v4018_v37 = vrot.slane %v4017_v41, 2 }
 0x304   :  { %v4023_v39 = vrot.slane %v4022_v18, 4  ;;  %v4037_v36 = vrot.slane %v4036_v13, 4  ;;  %v4029_v26 = vsel %vm120_vm0, %v3145_v28, 0.0  ;;  %v4394_v32 = vadd.f32 %v9667_v48, %v10815_v23 }
 0x305   :  { %v3977_v15 = vadd.f32 %v3976_v50, %v3975_v38  ;;  %v3982_v24 = vadd.f32 %v3981_v45, %v3980_v9  ;;  %v4014_v7 = vadd.f32 %v4013_v4, %v4012_v57  ;;  %v4019_v51 = vadd.f32 %v4018_v37, %v4017_v41  ;;  %v10867_v50 = vld [vmem:[#allocation23_spill] sm:$0xff] }
 0x306   :  { %v4024_v1 = vadd.f32 %v4023_v39, %v4022_v18  ;;  %v4038_v43 = vadd.f32 %v4037_v36, %v4036_v13  ;;  %v4030_v3 = vrot.slane %v4029_v26, 4  ;;  %v4468_v17 = vadd.f32 %v10866_v11, %v4394_v32 }
 0x307   :  { %v3978_v44 = vrot.slane %v3977_v15, 1  ;;  %v3983_v25 = vrot.slane %v3982_v24, 2  ;;  %v4020_v31 = vrot.slane %v4019_v51, 1  ;;  %v4389_v38 = vadd.f32 %v9671_v6, %v10815_v23 }
 0x308   :  { %v4025_v10 = vrot.slane %v4024_v1, 2  ;;  %v4039_v33 = vrot.slane %v4038_v43, 2  ;;  %v4031_v28 = vadd.f32 %v4030_v3, %v4029_v26  ;;  %v9791_v9 = vmax.f32 %v4468_v17, 0.0  ;;  %v10870_v17 = vld [vmem:[#allocation19_spill] sm:$0xff] }
 0x309   :  { %v3979_v5 = vadd.f32 %v3978_v44, %v3977_v15  ;;  %v3984_v62 = vadd.f32 %v3983_v25, %v3982_v24  ;;  %v4021_v48 = vadd.f32 %v4020_v31, %v4019_v51  ;;  %v4467_v45 = vadd.f32 %v10867_v50, %v4389_v38  ;;  %v10868_v25 = vld [vmem:[#allocation17_spill] sm:$0xff] }
 0x30a   :  { %v4026_v57 = vadd.f32 %v4025_v10, %v4024_v1  ;;  %v4040_v41 = vadd.f32 %v4039_v33, %v4038_v43  ;;  %v4032_v13 = vrot.slane %v4031_v28, 2  ;;  %v4278_v4 = vsel %vm4175_vm3, %v9704_v12, %v9702_v2  ;;  %v10872_v33 = vld [vmem:[#allocation24_spill] sm:$0xff] }
 0x30b   :  { %v3985_v18 = vrot.slane %v3984_v62, 1  ;;  %v4285_v37 = vsel %vm4175_vm3, %v4014_v7, %v4284_v21  ;;  %v4483_v36 = vmax.f32 %v4467_v45, 0.0  ;;  %v4279_v15 = vsel %vm4177_vm4, %v9756_v34, %v4278_v4  ;;  %v10869_v7 = vld [vmem:[#allocation16_spill] sm:$0xff]  ;;  %v10875_v45 = vld [vmem:[#allocation30_spill] sm:$0xff] }
 0x30c   :  { %v4027_v39 = vrot.slane %v4026_v57, 1  ;;  %v4041_v6 = vrot.slane %v4040_v41, 1  ;;  %v4033_v24 = vadd.f32 %v4032_v13, %v4031_v28  ;;  %v4280_v32 = vsel %vm4179_vm5, %v3972_v58, %v4279_v15  ;;  %v10871_v58 = vld [vmem:[#allocation20_spill] sm:$0xff] }
 0x30d   :  { %v3986_v26 = vadd.f32 %v3985_v18, %v3984_v62  ;;  %v4286_v51 = vsel %vm4177_vm4, %v4021_v48, %v4285_v37  ;;  %v4281_v44 = vsel %vm4181_vm6, %v3979_v5, %v4280_v32  ;;  %v4499_v2 = vmul.f32 %v4483_v36, %v10868_v25  ;;  %v10873_v62 = vld [vmem:[#allocation26_spill] sm:$0xff] }
 0x30e   :  { %v4028_v1 = vadd.f32 %v4027_v39, %v4026_v57  ;;  %v4042_v43 = vadd.f32 %v4041_v6, %v4040_v41  ;;  %v4034_v12 = vrot.slane %v4033_v24, 1  ;;  %v4500_v3 = vmul.f32 %v4483_v36, %v10869_v7  ;;  %v10874_v57 = vld [vmem:[#allocation28_spill] sm:$0xff] }
 0x30f   :  { %v4282_v21 = vsel %vm4183_vm7, %v3986_v26, %v4281_v44  ;;  %v4501_v31 = vmul.f32 %v4483_v36, %v10870_v17  ;;  %v4502_v10 = vmul.f32 %v4483_v36, %v10871_v58  ;;  %v4503_v38 = vmul.f32 %v4483_v36, %v10872_v33  ;;  %v9812_v5 = vpop.f32.mrb[10].mxu1 }
 0x310   :  { %6686 = vmatprep.mubr.msk.f32.mxu1 %vm120_vm0, %v4282_v21  ;;  %v4287_v34 = vsel %vm4179_vm5, %v4028_v1, %v4286_v51  ;;  %v4504_v28 = vmul.f32 %v4483_v36, %v10873_v62  ;;  %v4035_v48 = vadd.f32 %v4034_v12, %v4033_v24  ;;  %v4505_v41 = vmul.f32 %v4483_v36, %v10874_v57  ;;  %v9817_v4 = vpop.f32.mrb[11].mxu1 }
 0x311   :  { %v4506_v18 = vmul.f32 %v4483_v36, %v10875_v45  ;;  %v4627_v13 = vsel %vm120_vm0, %v4499_v2, 0.0  ;;  %v4634_v39 = vsel %vm120_vm0, %v4500_v3, 0.0  ;;  %v4641_v6 = vsel %vm120_vm0, %v4501_v31, 0.0 }
 0x312   :  { %v4628_v37 = vrot.slane %v4627_v13, 4  ;;  %v4648_v15 = vsel %vm120_vm0, %v4502_v10, 0.0  ;;  %v4288_v26 = vsel %vm4181_vm6, %v4035_v48, %v4287_v34  ;;  %v4635_v32 = vrot.slane %v4634_v39, 4 }
 0x313   :  { %v4642_v51 = vrot.slane %v4641_v6, 4  ;;  %v4649_v24 = vrot.slane %v4648_v15, 4  ;;  %v4289_v1 = vsel %vm4183_vm7, %v4042_v43, %v4288_v26  ;;  %v4655_v36 = vsel %vm120_vm0, %v4503_v38, 0.0 }
 0x314   :  { %v4629_v44 = vadd.f32 %v4628_v37, %v4627_v13  ;;  %v4662_v25 = vsel %vm120_vm0, %v4504_v28, 0.0  ;;  %6687 = vmatmul.mubr.msk.f32.gmra.mrb[22].mxu1 %vm120_vm0, %v4289_v1  ;;  %v4636_v2 = vadd.f32 %v4635_v32, %v4634_v39  ;;  %v4656_v7 = vrot.slane %v4655_v36, 4 }
 0x315   :  { %v4643_v12 = vadd.f32 %v4642_v51, %v4641_v6  ;;  %v4650_v21 = vadd.f32 %v4649_v24, %v4648_v15  ;;  %v4663_v17 = vrot.slane %v4662_v25, 4  ;;  %v4669_v31 = vsel %vm120_vm0, %v4505_v41, 0.0 }
 0x316   :  { %v4630_v3 = vrot.slane %v4629_v44, 2  ;;  %v4676_v34 = vsel %vm120_vm0, %v4506_v18, 0.0  ;;  %v4637_v58 = vrot.slane %v4636_v2, 2  ;;  %v4657_v33 = vadd.f32 %v4656_v7, %v4655_v36 }
 0x317   :  { %v4644_v10 = vrot.slane %v4643_v12, 2  ;;  %v4651_v43 = vrot.slane %v4650_v21, 2  ;;  %v4664_v38 = vadd.f32 %v4663_v17, %v4662_v25  ;;  %v4670_v48 = vrot.slane %v4669_v31, 4  ;;  %v10876_v17 = vld [vmem:[#allocation18_spill] sm:$0xff] }
 0x318   :  { %v4631_v62 = vadd.f32 %v4630_v3, %v4629_v44  ;;  %v4677_v28 = vrot.slane %v4676_v34, 4  ;;  %v4638_v57 = vadd.f32 %v4637_v58, %v4636_v2  ;;  %v4658_v37 = vrot.slane %v4657_v33, 2 }
 0x319   :  { %v4645_v45 = vadd.f32 %v4644_v10, %v4643_v12  ;;  %v4652_v13 = vadd.f32 %v4651_v43, %v4650_v21  ;;  %v4665_v6 = vrot.slane %v4664_v38, 2  ;;  %v4671_v15 = vadd.f32 %v4670_v48, %v4669_v31  ;;  %v10877_v10 = vld [vmem:[#allocation21_spill] sm:$0xff] }
 0x31a   :  { %v4632_v39 = vrot.slane %v4631_v62, 1  ;;  %v4678_v26 = vadd.f32 %v4677_v28, %v4676_v34  ;;  %v4639_v32 = vrot.slane %v4638_v57, 1  ;;  %v4659_v18 = vadd.f32 %v4658_v37, %v4657_v33  ;;  %v10878_v33 = vld [vmem:[#allocation25_spill] sm:$0xff] }
 0x31b   :  { %v4646_v41 = vrot.slane %v4645_v45, 1  ;;  %v4653_v51 = vrot.slane %v4652_v13, 1  ;;  %v4666_v1 = vadd.f32 %v4665_v6, %v4664_v38  ;;  %v4672_v40 = vrot.slane %v4671_v15, 2  ;;  %v10880_v37 = vld [vmem:[#allocation29_spill] sm:$0xff]  ;;  %v10881_v6 = vld [vmem:[#allocation31_spill] sm:$0xff] }
 0x31c   :  { %v4633_v24 = vadd.f32 %v4632_v39, %v4631_v62  ;;  %v4679_v36 = vrot.slane %v4678_v26, 2  ;;  %v4640_v44 = vadd.f32 %v4639_v32, %v4638_v57  ;;  %v4660_v3 = vrot.slane %v4659_v18, 1 }
 0x31d   :  { %v4647_v25 = vadd.f32 %v4646_v41, %v4645_v45  ;;  %v4654_v7 = vadd.f32 %v4653_v51, %v4652_v13  ;;  %v4667_v2 = vrot.slane %v4666_v1, 1  ;;  %v4673_v12 = vadd.f32 %v4672_v40, %v4671_v15  ;;  %v10879_v45 = vld [vmem:[#allocation27_spill] sm:$0xff]  ;;  %v10882_v51 = vld [vmem:[#allocation33_spill] sm:$0xff] }
 0x31e   :  { %v4680_v21 = vadd.f32 %v4679_v36, %v4678_v26  ;;  %v4507_v58 = vmul.f32 %v9791_v9, %v10876_v17  ;;  %v4661_v31 = vadd.f32 %v4660_v3, %v4659_v18  ;;  %v5651_v34 = vsel %vm4171_vm1, %v4640_v44, %v4633_v24 }
 0x31f   :  { %v4508_v43 = vmul.f32 %v9791_v9, %v10877_v10  ;;  %v4509_v62 = vmul.f32 %v9791_v9, %v10878_v33  ;;  %v4668_v38 = vadd.f32 %v4667_v2, %v4666_v1  ;;  %v4674_v48 = vrot.slane %v4673_v12, 1  ;;  %v10883_v1 = vld [vmem:[#allocation32_spill] sm:$0xff] }
 0x320   :  { %v4681_v28 = vrot.slane %v4680_v21, 1  ;;  %v5652_v57 = vsel %vm4173_vm2, %v4647_v25, %v5651_v34  ;;  %v4510_v13 = vmul.f32 %v9791_v9, %v10879_v45  ;;  %v4511_v39 = vmul.f32 %v9791_v9, %v10880_v37 }
 0x321   :  { %v5653_v40 = vsel %vm4175_vm3, %v4654_v7, %v5652_v57  ;;  %v4512_v15 = vmul.f32 %v9791_v9, %v10881_v6  ;;  %v4675_v26 = vadd.f32 %v4674_v48, %v4673_v12  ;;  %v4513_v18 = vmul.f32 %v9791_v9, %v10882_v51 }
 0x322   :  { %v4682_v32 = vadd.f32 %v4681_v28, %v4680_v21  ;;  %v5654_v41 = vsel %vm4177_vm4, %v4661_v31, %v5653_v40  ;;  %v4514_v36 = vmul.f32 %v9791_v9, %v10883_v1  ;;  %v4683_v44 = vsel %vm120_vm0, %v4507_v58, 0.0 }
 0x323   :  { %v5655_v24 = vsel %vm4179_vm5, %v4668_v38, %v5654_v41  ;;  %v4690_v25 = vsel %vm120_vm0, %v4508_v43, 0.0  ;;  %v4684_v3 = vrot.slane %v4683_v44, 4  ;;  %v4697_v12 = vsel %vm120_vm0, %v4509_v62, 0.0 }
 0x324   :  { %v5656_v7 = vsel %vm4181_vm6, %v4675_v26, %v5655_v24  ;;  %v4691_v2 = vrot.slane %v4690_v25, 4  ;;  %v4698_v17 = vrot.slane %v4697_v12, 4  ;;  %v4704_v31 = vsel %vm120_vm0, %v4510_v13, 0.0 }
 0x325   :  { %v5657_v21 = vsel %vm4183_vm7, %v4682_v32, %v5656_v7  ;;  %v4711_v34 = vsel %vm120_vm0, %v4511_v39, 0.0  ;;  %v4685_v9 = vadd.f32 %v4684_v3, %v4683_v44  ;;  %v4705_v58 = vrot.slane %v4704_v31, 4 }
 0x326   :  { %6697 = vmatprep.mubr.msk.f32.mxu1 %vm120_vm0, %v5657_v21  ;;  %v4692_v10 = vadd.f32 %v4691_v2, %v4690_v25  ;;  %v4712_v33 = vrot.slane %v4711_v34, 4  ;;  %v4699_v43 = vadd.f32 %v4698_v17, %v4697_v12  ;;  %v4718_v38 = vsel %vm120_vm0, %v4512_v15, 0.0 }
 0x327   :  { %v4725_v48 = vsel %vm120_vm0, %v4513_v18, 0.0  ;;  %v4732_v62 = vsel %vm120_vm0, %v4514_v36, 0.0  ;;  %v4686_v28 = vrot.slane %v4685_v9, 2  ;;  %v4706_v40 = vadd.f32 %v4705_v58, %v4704_v31 }
 0x328   :  { %v4693_v57 = vrot.slane %v4692_v10, 2  ;;  %v4713_v45 = vadd.f32 %v4712_v33, %v4711_v34  ;;  %v4700_v13 = vrot.slane %v4699_v43, 2  ;;  %v4719_v37 = vrot.slane %v4718_v38, 4 }
 0x329   :  { %v4726_v39 = vrot.slane %v4725_v48, 4  ;;  %v4733_v6 = vrot.slane %v4732_v62, 4  ;;  %v4687_v26 = vadd.f32 %v4686_v28, %v4685_v9  ;;  %v4707_v41 = vrot.slane %v4706_v40, 2 }
 0x32a   :  { %v4694_v32 = vadd.f32 %v4693_v57, %v4692_v10  ;;  %v4714_v51 = vrot.slane %v4713_v45, 2  ;;  %v4701_v24 = vadd.f32 %v4700_v13, %v4699_v43  ;;  %v4720_v1 = vadd.f32 %v4719_v37, %v4718_v38  ;;  %v6673_v25 = vpop.f32.mrb[12].mxu1 }
 0x32b   :  { %v4727_v44 = vadd.f32 %v4726_v39, %v4725_v48  ;;  %v4734_v15 = vadd.f32 %v4733_v6, %v4732_v62  ;;  %v4688_v18 = vrot.slane %v4687_v26, 1  ;;  %v4708_v36 = vadd.f32 %v4707_v41, %v4706_v40  ;;  %v4408_v2 = vpop.f32.mrb[13].mxu1 }
 0x32c   :  { %v4695_v7 = vrot.slane %v4694_v32, 1  ;;  %v4715_v3 = vadd.f32 %v4714_v51, %v4713_v45  ;;  %v4702_v12 = vrot.slane %v4701_v24, 1  ;;  %v4721_v21 = vrot.slane %v4720_v1, 2 }
 0x32d   :  { %v4728_v17 = vrot.slane %v4727_v44, 2  ;;  %v4735_v31 = vrot.slane %v4734_v15, 2  ;;  %v4689_v34 = vadd.f32 %v4688_v18, %v4687_v26  ;;  %v4709_v9 = vrot.slane %v4708_v36, 1  ;;  %v10884_v26 = vld [vmem:[#allocation40_spill] sm:$0xff] }
 0x32e   :  { %v4696_v58 = vadd.f32 %v4695_v7, %v4694_v32  ;;  %v4716_v10 = vrot.slane %v4715_v3, 1  ;;  %v4703_v33 = vadd.f32 %v4702_v12, %v4701_v24  ;;  %v4722_v28 = vadd.f32 %v4721_v21, %v4720_v1 }
 0x32f   :  { %v4729_v43 = vadd.f32 %v4728_v17, %v4727_v44  ;;  %v4736_v38 = vadd.f32 %v4735_v31, %v4734_v15  ;;  %v4710_v48 = vadd.f32 %v4709_v9, %v4708_v36  ;;  %v4404_v40 = vadd.f32 %v9812_v5, %v10815_v23  ;;  %v10885_v5 = vld [vmem:[#allocation45_spill] sm:$0xff]  ;;  %v10887_v17 = vld [vmem:[#allocation36_spill] sm:$0xff] }
 0x330   :  { %v4717_v62 = vadd.f32 %v4716_v10, %v4715_v3  ;;  %v5658_v57 = vsel %vm4171_vm1, %v4696_v58, %v4689_v34  ;;  %v4723_v45 = vrot.slane %v4722_v28, 1  ;;  %v4399_v41 = vadd.f32 %v9817_v4, %v10815_v23  ;;  %v10886_v3 = vld [vmem:[#allocation60_spill] sm:$0xff]  ;;  %v10888_v34 = vld [vmem:[#allocation39_spill] sm:$0xff]  ;;  %v10889_v10 = vld [vmem:[#allocation42_spill] sm:$0xff] }
 0x331   :  { %v4730_v13 = vrot.slane %v4729_v43, 1  ;;  %v4737_v37 = vrot.slane %v4736_v38, 1  ;;  %v5659_v39 = vsel %vm4173_vm2, %v4703_v33, %v5658_v57  ;;  %v4470_v32 = vadd.f32 %v10884_v26, %v4404_v40  ;;  %v10893_v57 = vld [vmem:[#allocation34_spill] sm:$0xff] }
 0x332   :  { %v5660_v6 = vsel %vm4175_vm3, %v4710_v48, %v5659_v39  ;;  %v4414_v51 = vadd.f32 %v6673_v25, %v10815_v23  ;;  %v4724_v24 = vadd.f32 %v4723_v45, %v4722_v28  ;;  %v4469_v18 = vadd.f32 %v10885_v5, %v4399_v41  ;;  %v10890_v28 = vld [vmem:[#allocation44_spill] sm:$0xff]  ;;  %v10892_v48 = vld [vmem:[#allocation35_spill] sm:$0xff]  ;;  %v10894_v45 = vld [vmem:[#allocation37_spill] sm:$0xff] }
 0x333   :  { %v5661_v1 = vsel %vm4177_vm4, %v4717_v62, %v5660_v6  ;;  %v4731_v44 = vadd.f32 %v4730_v13, %v4729_v43  ;;  %v9871_v15 = vmax.f32 %v4470_v32, 0.0  ;;  %v4738_v7 = vadd.f32 %v4737_v37, %v4736_v38  ;;  %v10891_v43 = vld [vmem:[#allocation47_spill] sm:$0xff]  ;;  %v10895_v37 = vld [vmem:[#allocation38_spill] sm:$0xff]  ;;  %v10896_v6 = vld [vmem:[#allocation41_spill] sm:$0xff] }
 0x334   :  { %v5662_v36 = vsel %vm4179_vm5, %v4724_v24, %v5661_v1  ;;  %v9876_v12 = vadd.f32 %v10886_v3, %v4414_v51  ;;  %v9879_v21 = vadd.f32 %v4408_v2, %v10815_v23  ;;  %v4485_v25 = vmax.f32 %v4469_v18, 0.0  ;;  %v10897_v41 = vld [vmem:[#allocation43_spill] sm:$0xff]  ;;  %v10898_v24 = vld [vmem:[#allocation46_spill] sm:$0xff] }
 0x335   :  { %v5663_v4 = vsel %vm4181_vm6, %v4731_v44, %v5662_v36  ;;  %v9884_v31 = vmul.f32 %v9871_v15, %v10887_v17  ;;  %v9888_v58 = vmul.f32 %v9871_v15, %v10888_v34  ;;  %v9893_v33 = vmul.f32 %v9871_v15, %v10889_v10  ;;  %v10899_v44 = vld [vmem:[#allocation48_spill] sm:$0xff] }
 0x336   :  { %v5664_v9 = vsel %vm4183_vm7, %v4738_v7, %v5663_v4  ;;  %v9897_v2 = vmul.f32 %v9871_v15, %v10890_v28  ;;  %v9901_v38 = vmul.f32 %v9871_v15, %v10891_v43  ;;  %v4515_v62 = vmul.f32 %v4485_v25, %v10892_v48 }
 0x337   :  { %6698 = vmatmul.mubr.msk.f32.vlgmr.msra.gmra.mrb[24].mxu1 %vm120_vm0, %v5664_v9  ;;  %v4516_v40 = vmul.f32 %v4485_v25, %v10893_v57  ;;  %v4517_v13 = vmul.f32 %v4485_v25, %v10894_v45  ;;  %v4518_v39 = vmul.f32 %v4485_v25, %v10895_v37  ;;  %v4519_v32 = vmul.f32 %v4485_v25, %v10896_v6 }
 0x338   :  { %v4520_v51 = vmul.f32 %v4485_v25, %v10897_v41  ;;  %v4521_v1 = vmul.f32 %v4485_v25, %v10898_v24  ;;  %v4522_v18 = vmul.f32 %v4485_v25, %v10899_v44  ;;  %v4739_v7 = vsel %vm120_vm0, %v4515_v62, 0.0 }
 0x339   :  { %v4746_v36 = vsel %vm120_vm0, %v4516_v40, 0.0  ;;  %v4753_v4 = vsel %vm120_vm0, %v4517_v13, 0.0  ;;  %v4760_v17 = vsel %vm120_vm0, %v4518_v39, 0.0  ;;  %v4740_v34 = vrot.slane %v4739_v7, 4 }
 0x33a   :  { %v4747_v9 = vrot.slane %v4746_v36, 4  ;;  %v4754_v10 = vrot.slane %v4753_v4, 4  ;;  %v4761_v28 = vrot.slane %v4760_v17, 4  ;;  %v4767_v43 = vsel %vm120_vm0, %v4519_v32, 0.0 }
 0x33b   :  { %v4774_v48 = vsel %vm120_vm0, %v4520_v51, 0.0  ;;  %v4781_v57 = vsel %vm120_vm0, %v4521_v1, 0.0  ;;  %v4788_v25 = vsel %vm120_vm0, %v4522_v18, 0.0  ;;  %v4741_v45 = vadd.f32 %v4740_v34, %v4739_v7 }
 0x33c   :  { %v4748_v62 = vadd.f32 %v4747_v9, %v4746_v36  ;;  %v4755_v37 = vadd.f32 %v4754_v10, %v4753_v4  ;;  %v4762_v40 = vadd.f32 %v4761_v28, %v4760_v17  ;;  %v4768_v6 = vrot.slane %v4767_v43, 4 }
 0x33d   :  { %v4775_v13 = vrot.slane %v4774_v48, 4  ;;  %v4782_v41 = vrot.slane %v4781_v57, 4  ;;  %v4789_v39 = vrot.slane %v4788_v25, 4  ;;  %v4742_v24 = vrot.slane %v4741_v45, 2 }
 0x33e   :  { %v4749_v44 = vrot.slane %v4748_v62, 2  ;;  %v4756_v3 = vrot.slane %v4755_v37, 2  ;;  %v4763_v5 = vrot.slane %v4762_v40, 2  ;;  %v4769_v26 = vadd.f32 %v4768_v6, %v4767_v43 }
 0x33f   :  { %v4776_v32 = vadd.f32 %v4775_v13, %v4774_v48  ;;  %v4783_v53 = vadd.f32 %v4782_v41, %v4781_v57  ;;  %v4790_v51 = vadd.f32 %v4789_v39, %v4788_v25  ;;  %v4743_v16 = vadd.f32 %v4742_v24, %v4741_v45  ;;  %v10901_v13 = vld [vmem:[#allocation51_spill] sm:$0xff] }
 0x340   :  { %v4750_v1 = vadd.f32 %v4749_v44, %v4748_v62  ;;  %v4757_v30 = vadd.f32 %v4756_v3, %v4755_v37  ;;  %v4764_v18 = vadd.f32 %v4763_v5, %v4762_v40  ;;  %v4770_v7 = vrot.slane %v4769_v26, 2  ;;  %v10900_v40 = vld [vmem:[#allocation49_spill] sm:$0xff] }
 0x341   :  { %v4777_v36 = vrot.slane %v4776_v32, 2  ;;  %v4784_v4 = vrot.slane %v4783_v53, 2  ;;  %v4791_v17 = vrot.slane %v4790_v51, 2  ;;  %v4744_v34 = vrot.slane %v4743_v16, 1 }
 0x342   :  { %v4751_v9 = vrot.slane %v4750_v1, 1  ;;  %v4758_v10 = vrot.slane %v4757_v30, 1  ;;  %v4765_v28 = vrot.slane %v4764_v18, 1  ;;  %v4771_v49 = vadd.f32 %v4770_v7, %v4769_v26  ;;  %v10902_v26 = vld [vmem:[#allocation50_spill] sm:$0xff] }
 0x343   :  { %v4778_v42 = vadd.f32 %v4777_v36, %v4776_v32  ;;  %v4785_v22 = vadd.f32 %v4784_v4, %v4783_v53  ;;  %v4792_v52 = vadd.f32 %v4791_v17, %v4790_v51  ;;  %v4745_v43 = vadd.f32 %v4744_v34, %v4743_v16 }
 0x344   :  { %v4752_v48 = vadd.f32 %v4751_v9, %v4750_v1  ;;  %v4759_v57 = vadd.f32 %v4758_v10, %v4757_v30  ;;  %v4766_v25 = vadd.f32 %v4765_v28, %v4764_v18  ;;  %v4772_v45 = vrot.slane %v4771_v49, 1 }
 0x345   :  { %v4779_v62 = vrot.slane %v4778_v42, 1  ;;  %v4786_v3 = vrot.slane %v4785_v22, 1  ;;  %v4793_v5 = vrot.slane %v4792_v52, 1  ;;  %v4528_v6 = vmul.f32 %v9871_v15, %v10900_v40 }
 0x346   :  { %v5665_v37 = vsel %vm4171_vm1, %v4752_v48, %v4745_v43  ;;  %v4529_v41 = vmul.f32 %v9871_v15, %v10901_v13  ;;  %v4530_v53 = vmul.f32 %v9871_v15, %v10902_v26  ;;  %v4773_v39 = vadd.f32 %v4772_v45, %v4771_v49 }
 0x347   :  { %v4780_v16 = vadd.f32 %v4779_v62, %v4778_v42  ;;  %v4787_v24 = vadd.f32 %v4786_v3, %v4785_v22  ;;  %v4794_v30 = vadd.f32 %v4793_v5, %v4792_v52  ;;  %v5666_v44 = vsel %vm4173_vm2, %v4759_v57, %v5665_v37 }
 0x348   :  { %v4795_v32 = vsel %vm120_vm0, %v9884_v31, 0.0  ;;  %v4802_v51 = vsel %vm120_vm0, %v9888_v58, 0.0  ;;  %v4809_v1 = vsel %vm120_vm0, %v9893_v33, 0.0  ;;  %v5667_v18 = vsel %vm4175_vm3, %v4766_v25, %v5666_v44 }
 0x349   :  { %v4796_v7 = vrot.slane %v4795_v32, 4  ;;  %v4803_v36 = vrot.slane %v4802_v51, 4  ;;  %v4810_v15 = vrot.slane %v4809_v1, 4  ;;  %v5668_v49 = vsel %vm4177_vm4, %v4773_v39, %v5667_v18 }
 0x34a   :  { %v4816_v52 = vsel %vm120_vm0, %v9897_v2, 0.0  ;;  %v4823_v22 = vsel %vm120_vm0, %v9901_v38, 0.0  ;;  %v4830_v42 = vsel %vm120_vm0, %v4528_v6, 0.0  ;;  %v5669_v31 = vsel %vm4179_vm5, %v4780_v16, %v5668_v49 }
 0x34b   :  { %v4797_v58 = vadd.f32 %v4796_v7, %v4795_v32  ;;  %v4804_v4 = vadd.f32 %v4803_v36, %v4802_v51  ;;  %v4811_v33 = vadd.f32 %v4810_v15, %v4809_v1  ;;  %v5670_v17 = vsel %vm4181_vm6, %v4787_v24, %v5669_v31 }
 0x34c   :  { %v4817_v34 = vrot.slane %v4816_v52, 4  ;;  %v4824_v9 = vrot.slane %v4823_v22, 4  ;;  %v4831_v10 = vrot.slane %v4830_v42, 4  ;;  %v5671_v28 = vsel %vm4183_vm7, %v4794_v30, %v5670_v17 }
 0x34d   :  { %v4798_v43 = vrot.slane %v4797_v58, 2  ;;  %v4805_v48 = vrot.slane %v4804_v4, 2  ;;  %v4812_v2 = vrot.slane %v4811_v33, 2  ;;  %6700 = vmatprep.mubr.msk.f32.mxu1 %vm120_vm0, %v5671_v28  ;;  %v4837_v45 = vsel %vm120_vm0, %v4529_v41, 0.0 }
 0x34e   :  { %v4818_v38 = vadd.f32 %v4817_v34, %v4816_v52  ;;  %v4825_v57 = vadd.f32 %v4824_v9, %v4823_v22  ;;  %v4832_v25 = vadd.f32 %v4831_v10, %v4830_v42  ;;  %v4838_v37 = vrot.slane %v4837_v45, 4 }
 0x34f   :  { %v4799_v62 = vadd.f32 %v4798_v43, %v4797_v58  ;;  %v4806_v3 = vadd.f32 %v4805_v48, %v4804_v4  ;;  %v4813_v5 = vadd.f32 %v4812_v2, %v4811_v33  ;;  %v4844_v26 = vsel %vm120_vm0, %v4530_v53, 0.0  ;;  %v10903_v4 = vld [vmem:[#allocation63_spill] sm:$0xff] }
 0x350   :  { %v4819_v40 = vrot.slane %v4818_v38, 2  ;;  %v4826_v6 = vrot.slane %v4825_v57, 2  ;;  %v4833_v13 = vrot.slane %v4832_v25, 2  ;;  %v4839_v30 = vadd.f32 %v4838_v37, %v4837_v45  ;;  %v10905_v45 = vld [vmem:[#allocation58_spill] sm:$0xff] }
 0x351   :  { %v4800_v39 = vrot.slane %v4799_v62, 1  ;;  %v4807_v16 = vrot.slane %v4806_v3, 1  ;;  %v4814_v24 = vrot.slane %v4813_v5, 1  ;;  %v4845_v1 = vrot.slane %v4844_v26, 4 }
 0x352   :  { %v4820_v44 = vadd.f32 %v4819_v40, %v4818_v38  ;;  %v4827_v32 = vadd.f32 %v4826_v6, %v4825_v57  ;;  %v4834_v51 = vadd.f32 %v4833_v13, %v4832_v25  ;;  %v4840_v36 = vrot.slane %v4839_v30, 2  ;;  %v10904_v38 = vld [vmem:[#allocation54_spill] sm:$0xff]  ;;  %v10907_v40 = vld [vmem:[#allocation53_spill] sm:$0xff]  ;;  %v10908_v13 = vld [vmem:[#allocation52_spill] sm:$0xff] }
 0x353   :  { %v4801_v18 = vadd.f32 %v4800_v39, %v4799_v62  ;;  %v4808_v7 = vadd.f32 %v4807_v16, %v4806_v3  ;;  %v4815_v41 = vadd.f32 %v4814_v24, %v4813_v5  ;;  %v4846_v22 = vadd.f32 %v4845_v1, %v4844_v26  ;;  %v10906_v62 = vld [vmem:[#allocation62_spill] sm:$0xff]  ;;  %v10909_v24 = vld [vmem:[#allocation55_spill] sm:$0xff]  ;;  %v10911_v1 = vld [vmem:[#allocation61_spill] sm:$0xff] }
 0x354   :  { %v4821_v15 = vrot.slane %v4820_v44, 1  ;;  %v4828_v49 = vrot.slane %v4827_v32, 1  ;;  %v4835_v52 = vrot.slane %v4834_v51, 1  ;;  %v9947_v42 = vpop.f32.mrb[14].mxu1  ;;  %v4841_v31 = vadd.f32 %v4840_v36, %v4839_v30  ;;  %v10913_v36 = vld [vmem:[#allocation66_spill] sm:$0xff] }
 0x355   :  { %v5672_v53 = vsel %vm4171_vm1, %v4808_v7, %v4801_v18  ;;  %v9951_v58 = vmax.f32 %v9876_v12, 0.0  ;;  %v4471_v33 = vadd.f32 %v10903_v4, %v9879_v21  ;;  %v9955_v17 = vpop.f32.mrb[15].mxu1  ;;  %v4847_v28 = vrot.slane %v4846_v22, 2  ;;  %v10912_v7 = vld [vmem:[#allocation64_spill] sm:$0xff] }
 0x356   :  { %v4822_v34 = vadd.f32 %v4821_v15, %v4820_v44  ;;  %v4829_v9 = vadd.f32 %v4828_v49, %v4827_v32  ;;  %v4836_v10 = vadd.f32 %v4835_v52, %v4834_v51  ;;  %v4842_v43 = vrot.slane %v4841_v31, 1  ;;  %v10910_v44 = vld [vmem:[#allocation57_spill] sm:$0xff]  ;;  %v10914_v52 = vld [vmem:[#allocation68_spill] sm:$0xff] }
 0x357   :  { %v5673_v48 = vsel %vm4173_vm2, %v4815_v41, %v5672_v53  ;;  %v4487_v2 = vmax.f32 %v4471_v33, 0.0  ;;  %v9960_v57 = vmul.f32 %v9951_v58, %v10904_v38  ;;  %v4848_v25 = vadd.f32 %v4847_v28, %v4846_v22 }
 0x358   :  { %v5674_v12 = vsel %vm4175_vm3, %v4822_v34, %v5673_v48  ;;  %v9965_v21 = vmul.f32 %v9951_v58, %v10905_v45  ;;  %v9969_v3 = vmul.f32 %v9951_v58, %v10906_v62  ;;  %v4843_v5 = vadd.f32 %v4842_v43, %v4841_v31 }
 0x359   :  { %v5675_v37 = vsel %vm4177_vm4, %v4829_v9, %v5674_v12  ;;  %v4531_v6 = vmul.f32 %v4487_v2, %v10907_v40  ;;  %v4532_v26 = vmul.f32 %v4487_v2, %v10908_v13  ;;  %v4849_v39 = vrot.slane %v4848_v25, 1 }
 0x35a   :  { %v5676_v16 = vsel %vm4179_vm5, %v4836_v10, %v5675_v37  ;;  %v4533_v30 = vmul.f32 %v4487_v2, %v10909_v24  ;;  %v4534_v32 = vmul.f32 %v4487_v2, %v10910_v44  ;;  %v4535_v18 = vmul.f32 %v4487_v2, %v10911_v1 }
 0x35b   :  { %v5677_v51 = vsel %vm4181_vm6, %v4843_v5, %v5676_v16  ;;  %v4536_v41 = vmul.f32 %v4487_v2, %v10912_v7  ;;  %v4537_v15 = vmul.f32 %v4487_v2, %v10913_v36  ;;  %v4850_v49 = vadd.f32 %v4849_v39, %v4848_v25 }
 0x35c   :  { %v4538_v22 = vmul.f32 %v4487_v2, %v10914_v52  ;;  %v4851_v31 = vsel %vm120_vm0, %v4531_v6, 0.0  ;;  %v4858_v53 = vsel %vm120_vm0, %v4532_v26, 0.0  ;;  %v4865_v9 = vsel %vm120_vm0, %v4533_v30, 0.0 }
 0x35d   :  { %v4852_v33 = vrot.slane %v4851_v31, 4  ;;  %v4859_v34 = vrot.slane %v4858_v53, 4  ;;  %v4872_v10 = vsel %vm120_vm0, %v4534_v32, 0.0  ;;  %v5678_v28 = vsel %vm4183_vm7, %v4850_v49, %v5677_v51 }
 0x35e   :  { %v4866_v43 = vrot.slane %v4865_v9, 4  ;;  %v4873_v48 = vrot.slane %v4872_v10, 4  ;;  %v4879_v38 = vsel %vm120_vm0, %v4535_v18, 0.0  ;;  %6701 = vmatmul.mubr.msk.f32.gmra.mrb[26].mxu1 %vm120_vm0, %v5678_v28  ;;  %v4886_v45 = vsel %vm120_vm0, %v4536_v41, 0.0 }
 0x35f   :  { %v4853_v25 = vadd.f32 %v4852_v33, %v4851_v31  ;;  %v4860_v2 = vadd.f32 %v4859_v34, %v4858_v53  ;;  %v4880_v12 = vrot.slane %v4879_v38, 4  ;;  %v4887_v37 = vrot.slane %v4886_v45, 4 }
 0x360   :  { %v4867_v62 = vadd.f32 %v4866_v43, %v4865_v9  ;;  %v4874_v5 = vadd.f32 %v4873_v48, %v4872_v10  ;;  %v4893_v40 = vsel %vm120_vm0, %v4537_v15, 0.0  ;;  %v4900_v44 = vsel %vm120_vm0, %v4538_v22, 0.0 }
 0x361   :  { %v4854_v6 = vrot.slane %v4853_v25, 2  ;;  %v4861_v13 = vrot.slane %v4860_v2, 2  ;;  %v4881_v26 = vadd.f32 %v4880_v12, %v4879_v38  ;;  %v4894_v39 = vrot.slane %v4893_v40, 4 }
 0x362   :  { %v4868_v16 = vrot.slane %v4867_v62, 2  ;;  %v4875_v24 = vrot.slane %v4874_v5, 2  ;;  %v4888_v30 = vadd.f32 %v4887_v37, %v4886_v45  ;;  %v4901_v49 = vrot.slane %v4900_v44, 4  ;;  %v10915_v37 = vld [vmem:[#allocation65_spill] sm:$0xff] }
 0x363   :  { %v4855_v32 = vadd.f32 %v4854_v6, %v4853_v25  ;;  %v4862_v51 = vadd.f32 %v4861_v13, %v4860_v2  ;;  %v4882_v1 = vrot.slane %v4881_v26, 2  ;;  %v4895_v18 = vadd.f32 %v4894_v39, %v4893_v40  ;;  %v10916_v39 = vld [vmem:[#allocation67_spill] sm:$0xff] }
 0x364   :  { %v4869_v7 = vadd.f32 %v4868_v16, %v4867_v62  ;;  %v4876_v41 = vadd.f32 %v4875_v24, %v4874_v5  ;;  %v4889_v36 = vrot.slane %v4888_v30, 2  ;;  %v4902_v10 = vadd.f32 %v4901_v49, %v4900_v44  ;;  %v10917_v44 = vld [vmem:[#allocation69_spill] sm:$0xff] }
 0x365   :  { %v4856_v52 = vrot.slane %v4855_v32, 1  ;;  %v4863_v31 = vrot.slane %v4862_v51, 1  ;;  %v4883_v15 = vadd.f32 %v4882_v1, %v4881_v26  ;;  %v4896_v53 = vrot.slane %v4895_v18, 2 }
 0x366   :  { %v4870_v33 = vrot.slane %v4869_v7, 1  ;;  %v4877_v34 = vrot.slane %v4876_v41, 1  ;;  %v4890_v9 = vadd.f32 %v4889_v36, %v4888_v30  ;;  %v4903_v12 = vrot.slane %v4902_v10, 2 }
 0x367   :  { %v4857_v28 = vadd.f32 %v4856_v52, %v4855_v32  ;;  %v4864_v43 = vadd.f32 %v4863_v31, %v4862_v51  ;;  %v4884_v48 = vrot.slane %v4883_v15, 1  ;;  %v4897_v22 = vadd.f32 %v4896_v53, %v4895_v18  ;;  %v10918_v51 = vld [vmem:[#allocation71_spill] sm:$0xff] }
 0x368   :  { %v4871_v38 = vadd.f32 %v4870_v33, %v4869_v7  ;;  %v4878_v25 = vadd.f32 %v4877_v34, %v4876_v41  ;;  %v4891_v2 = vrot.slane %v4890_v9, 1  ;;  %v4542_v40 = vmul.f32 %v9951_v58, %v10915_v37  ;;  %v10919_v41 = vld [vmem:[#allocation70_spill] sm:$0xff] }
 0x369   :  { %v4885_v45 = vadd.f32 %v4884_v48, %v4883_v15  ;;  %v4898_v62 = vrot.slane %v4897_v22, 1  ;;  %v5679_v5 = vsel %vm4171_vm1, %v4864_v43, %v4857_v28  ;;  %v4904_v13 = vadd.f32 %v4903_v12, %v4902_v10 }
 0x36a   :  { %v4892_v6 = vadd.f32 %v4891_v2, %v4890_v9  ;;  %v5680_v26 = vsel %vm4173_vm2, %v4871_v38, %v5679_v5  ;;  %v4543_v16 = vmul.f32 %v9951_v58, %v10916_v39  ;;  %v4544_v32 = vmul.f32 %v9951_v58, %v10917_v44 }
 0x36b   :  { %v4899_v24 = vadd.f32 %v4898_v62, %v4897_v22  ;;  %v5681_v30 = vsel %vm4175_vm3, %v4878_v25, %v5680_v26  ;;  %v4545_v1 = vmul.f32 %v9951_v58, %v10918_v51  ;;  %v4905_v18 = vrot.slane %v4904_v13, 1 }
 0x36c   :  { %v5682_v7 = vsel %vm4177_vm4, %v4885_v45, %v5681_v30  ;;  %v4546_v36 = vmul.f32 %v9951_v58, %v10919_v41  ;;  %v4907_v49 = vsel %vm120_vm0, %v9960_v57, 0.0  ;;  %v4914_v15 = vsel %vm120_vm0, %v9965_v21, 0.0 }
 0x36d   :  { %v5683_v52 = vsel %vm4179_vm5, %v4892_v6, %v5682_v7  ;;  %v4908_v31 = vrot.slane %v4907_v49, 4  ;;  %v4921_v53 = vsel %vm120_vm0, %v9969_v3, 0.0  ;;  %v4906_v33 = vadd.f32 %v4905_v18, %v4904_v13 }
 0x36e   :  { %v5684_v34 = vsel %vm4181_vm6, %v4899_v24, %v5683_v52  ;;  %v4915_v9 = vrot.slane %v4914_v15, 4  ;;  %v4922_v10 = vrot.slane %v4921_v53, 4  ;;  %v4928_v58 = vsel %vm120_vm0, %v4542_v40, 0.0 }
 0x36f   :  { %v4909_v28 = vadd.f32 %v4908_v31, %v4907_v49  ;;  %v4935_v43 = vsel %vm120_vm0, %v4543_v16, 0.0  ;;  %v4942_v57 = vsel %vm120_vm0, %v4544_v32, 0.0  ;;  %v5685_v48 = vsel %vm4183_vm7, %v4906_v33, %v5684_v34 }
 0x370   :  { %v4916_v22 = vadd.f32 %v4915_v9, %v4914_v15  ;;  %v4923_v38 = vadd.f32 %v4922_v10, %v4921_v53  ;;  %v4929_v21 = vrot.slane %v4928_v58, 4  ;;  %6703 = vmatprep.mubr.msk.f32.mxu1 %vm120_vm0, %v5685_v48  ;;  %v4936_v25 = vrot.slane %v4935_v43, 4 }
 0x371   :  { %v4910_v3 = vrot.slane %v4909_v28, 2  ;;  %v4943_v2 = vrot.slane %v4942_v57, 4  ;;  %v4949_v12 = vsel %vm120_vm0, %v4545_v1, 0.0  ;;  %v4956_v26 = vsel %vm120_vm0, %v4546_v36, 0.0 }
 0x372   :  { %v4917_v45 = vrot.slane %v4916_v22, 2  ;;  %v4924_v62 = vrot.slane %v4923_v38, 2  ;;  %v4930_v5 = vadd.f32 %v4929_v21, %v4928_v58  ;;  %v4950_v37 = vrot.slane %v4949_v12, 4 }
 0x373   :  { %v4911_v40 = vadd.f32 %v4910_v3, %v4909_v28  ;;  %v4937_v6 = vadd.f32 %v4936_v25, %v4935_v43  ;;  %v4944_v13 = vadd.f32 %v4943_v2, %v4942_v57  ;;  %v4957_v18 = vrot.slane %v4956_v26, 4 }
 0x374   :  { %v4918_v39 = vadd.f32 %v4917_v45, %v4916_v22  ;;  %v4925_v16 = vadd.f32 %v4924_v62, %v4923_v38  ;;  %v4931_v24 = vrot.slane %v4930_v5, 2  ;;  %v4951_v30 = vadd.f32 %v4950_v37, %v4949_v12  ;;  %v10920_v37 = vld [vmem:[#allocation82_spill] sm:$0xff] }
 0x375   :  { %v4912_v44 = vrot.slane %v4911_v40, 1  ;;  %v4938_v32 = vrot.slane %v4937_v6, 2  ;;  %v4945_v51 = vrot.slane %v4944_v13, 2  ;;  %v4958_v53 = vadd.f32 %v4957_v18, %v4956_v26 }
 0x376   :  { %v4919_v7 = vrot.slane %v4918_v39, 1  ;;  %v4926_v41 = vrot.slane %v4925_v16, 1  ;;  %v4932_v1 = vadd.f32 %v4931_v24, %v4930_v5  ;;  %v4952_v49 = vrot.slane %v4951_v30, 2 }
 0x377   :  { %v4913_v52 = vadd.f32 %v4912_v44, %v4911_v40  ;;  %v4939_v31 = vadd.f32 %v4938_v32, %v4937_v6  ;;  %v4946_v15 = vadd.f32 %v4945_v51, %v4944_v13  ;;  %v4959_v58 = vrot.slane %v4958_v53, 2 }
 0x378   :  { %v4920_v33 = vadd.f32 %v4919_v7, %v4918_v39  ;;  %v4927_v34 = vadd.f32 %v4926_v41, %v4925_v16  ;;  %v4933_v9 = vrot.slane %v4932_v1, 1  ;;  %v4953_v36 = vadd.f32 %v4952_v49, %v4951_v30  ;;  %v10922_v49 = vld [vmem:[#allocation76_spill] sm:$0xff] }
 0x379   :  { %v4940_v10 = vrot.slane %v4939_v31, 1  ;;  %v4947_v28 = vrot.slane %v4946_v15, 1  ;;  %v4424_v43 = vadd.f32 %v9947_v42, %v10815_v23  ;;  %v4419_v38 = vadd.f32 %v9955_v17, %v10815_v23  ;;  %v10921_v42 = vld [vmem:[#allocation87_spill] sm:$0xff] }
 0x37a   :  { %v4934_v57 = vadd.f32 %v4933_v9, %v4932_v1  ;;  %v4954_v48 = vrot.slane %v4953_v36, 1  ;;  %v5686_v22 = vsel %vm4171_vm1, %v4920_v33, %v4913_v52  ;;  %v6679_v21 = vpop.f32.mrb[16].mxu1  ;;  %v4960_v2 = vadd.f32 %v4959_v58, %v4958_v53  ;;  %v10924_v33 = vld [vmem:[#allocation83_spill] sm:$0xff]  ;;  %v10925_v9 = vld [vmem:[#allocation85_spill] sm:$0xff] }
 0x37b   :  { %v4941_v3 = vadd.f32 %v4940_v10, %v4939_v31  ;;  %v4948_v25 = vadd.f32 %v4947_v28, %v4946_v15  ;;  %v5687_v12 = vsel %vm4173_vm2, %v4927_v34, %v5686_v22  ;;  %v4428_v45 = vpop.f32.mrb[17].mxu1  ;;  %v4474_v40 = vadd.f32 %v10920_v37, %v4424_v43  ;;  %v10923_v15 = vld [vmem:[#allocation78_spill] sm:$0xff]  ;;  %v10926_v10 = vld [vmem:[#allocation88_spill] sm:$0xff] }
 0x37c   :  { %v4955_v62 = vadd.f32 %v4954_v48, %v4953_v36  ;;  %v5688_v5 = vsel %vm4175_vm3, %v4934_v57, %v5687_v12  ;;  %v4473_v6 = vadd.f32 %v10921_v42, %v4419_v38  ;;  %v4961_v13 = vrot.slane %v4960_v2, 1 }
 0x37d   :  { %v5689_v26 = vsel %vm4177_vm4, %v4941_v3, %v5688_v5  ;;  %v4434_v39 = vadd.f32 %v6679_v21, %v10815_v23  ;;  %v4429_v17 = vadd.f32 %v4428_v45, %v10815_v23  ;;  %v10034_v24 = vmax.f32 %v4474_v40, 0.0 }
 0x37e   :  { %v5690_v16 = vsel %vm4179_vm5, %v4948_v25, %v5689_v26  ;;  %v4489_v30 = vmax.f32 %v4473_v6, 0.0  ;;  %v4962_v44 = vadd.f32 %v4961_v13, %v4960_v2 }
 0x37f   :  { %v5691_v32 = vsel %vm4181_vm6, %v4955_v62, %v5690_v16  ;;  %v10038_v51 = vadd.f32 %v9199_v46, %v4434_v39  ;;  %v10041_v18 = vadd.f32 %v9238_v35, %v4429_v17 }
 0x380   :  { %v4547_v7 = vmul.f32 %v4489_v30, %v10810_v60  ;;  %v4548_v41 = vmul.f32 %v4489_v30, %v10811_v59  ;;  %v4549_v1 = vmul.f32 %v4489_v30, %v10812_v19  ;;  %v4550_v52 = vmul.f32 %v4489_v30, %v10922_v49 }
 0x381   :  { %v5692_v31 = vsel %vm4183_vm7, %v4962_v44, %v5691_v32  ;;  %v4551_v53 = vmul.f32 %v4489_v30, %v10923_v15  ;;  %v4552_v34 = vmul.f32 %v4489_v30, %v10924_v33  ;;  %v4553_v36 = vmul.f32 %v4489_v30, %v10925_v9 }
 0x382   :  { %6704 = vmatmul.mubr.msk.f32.gmra.mrb[28].mxu1 %vm120_vm0, %v5692_v31  ;;  %v4554_v28 = vmul.f32 %v4489_v30, %v10926_v10  ;;  %v4963_v60 = vsel %vm120_vm0, %v4547_v7, 0.0  ;;  %v4970_v59 = vsel %vm120_vm0, %v4548_v41, 0.0  ;;  %v4977_v19 = vsel %vm120_vm0, %v4549_v1, 0.0 }
 0x383   :  { %v4964_v58 = vrot.slane %v4963_v60, 4  ;;  %v4971_v43 = vrot.slane %v4970_v59, 4  ;;  %v4978_v57 = vrot.slane %v4977_v19, 4  ;;  %v4984_v48 = vsel %vm120_vm0, %v4550_v52, 0.0 }
 0x384   :  { %v4985_v22 = vrot.slane %v4984_v48, 4  ;;  %v4991_v38 = vsel %vm120_vm0, %v4551_v53, 0.0  ;;  %v4998_v21 = vsel %vm120_vm0, %v4552_v34, 0.0  ;;  %v5005_v3 = vsel %vm120_vm0, %v4553_v36, 0.0 }
 0x385   :  { %v4965_v25 = vadd.f32 %v4964_v58, %v4963_v60  ;;  %v4972_v2 = vadd.f32 %v4971_v43, %v4970_v59  ;;  %v4979_v12 = vadd.f32 %v4978_v57, %v4977_v19  ;;  %v4992_v45 = vrot.slane %v4991_v38, 4 }
 0x386   :  { %v4986_v62 = vadd.f32 %v4985_v22, %v4984_v48  ;;  %v4999_v5 = vrot.slane %v4998_v21, 4  ;;  %v5006_v40 = vrot.slane %v5005_v3, 4  ;;  %v5012_v6 = vsel %vm120_vm0, %v4554_v28, 0.0 }
 0x387   :  { %v4966_v13 = vrot.slane %v4965_v25, 2  ;;  %v4973_v26 = vrot.slane %v4972_v2, 2  ;;  %v4980_v39 = vrot.slane %v4979_v12, 2  ;;  %v4993_v17 = vadd.f32 %v4992_v45, %v4991_v38  ;;  %v10928_v45 = vld [vmem:[#allocation77_spill] sm:$0xff] }
 0x388   :  { %v4987_v16 = vrot.slane %v4986_v62, 2  ;;  %v5000_v30 = vadd.f32 %v4999_v5, %v4998_v21  ;;  %v5007_v44 = vadd.f32 %v5006_v40, %v5005_v3  ;;  %v5013_v32 = vrot.slane %v5012_v6, 4 }
 0x389   :  { %v4967_v7 = vadd.f32 %v4966_v13, %v4965_v25  ;;  %v4974_v41 = vadd.f32 %v4973_v26, %v4972_v2  ;;  %v4981_v1 = vadd.f32 %v4980_v39, %v4979_v12  ;;  %v4994_v49 = vrot.slane %v4993_v17, 2  ;;  %v10927_v2 = vld [vmem:[#allocation74_spill] sm:$0xff]  ;;  %v10929_v39 = vld [vmem:[#allocation79_spill] sm:$0xff] }
 0x38a   :  { %v4988_v52 = vadd.f32 %v4987_v16, %v4986_v62  ;;  %v5001_v31 = vrot.slane %v5000_v30, 2  ;;  %v5008_v15 = vrot.slane %v5007_v44, 2  ;;  %v5014_v53 = vadd.f32 %v5013_v32, %v5012_v6  ;;  %v10930_v16 = vld [vmem:[#allocation84_spill] sm:$0xff] }
 0x38b   :  { %v4968_v33 = vrot.slane %v4967_v7, 1  ;;  %v4975_v34 = vrot.slane %v4974_v41, 1  ;;  %v4982_v9 = vrot.slane %v4981_v1, 1  ;;  %v4995_v36 = vadd.f32 %v4994_v49, %v4993_v17 }
 0x38c   :  { %v4989_v10 = vrot.slane %v4988_v52, 1  ;;  %v5002_v28 = vadd.f32 %v5001_v31, %v5000_v30  ;;  %v5009_v60 = vadd.f32 %v5008_v15, %v5007_v44  ;;  %v5015_v59 = vrot.slane %v5014_v53, 2  ;;  %v10931_v44 = vld [vmem:[#allocation86_spill] sm:$0xff] }
 0x38d   :  { %v4969_v19 = vadd.f32 %v4968_v33, %v4967_v7  ;;  %v4976_v58 = vadd.f32 %v4975_v34, %v4974_v41  ;;  %v4983_v43 = vadd.f32 %v4982_v9, %v4981_v1  ;;  %v4996_v57 = vrot.slane %v4995_v36, 1  ;;  %v10932_v1 = vld [vmem:[#allocation89_spill] sm:$0xff] }
 0x38e   :  { %v4990_v48 = vadd.f32 %v4989_v10, %v4988_v52  ;;  %v5003_v22 = vrot.slane %v5002_v28, 1  ;;  %v5010_v38 = vrot.slane %v5009_v60, 1  ;;  %v5016_v21 = vadd.f32 %v5015_v59, %v5014_v53  ;;  %v10933_v52 = vld [vmem:[#allocation91_spill] sm:$0xff]  ;;  %v10934_v53 = vld [vmem:[#allocation90_spill] sm:$0xff] }
 0x38f   :  { %v4997_v3 = vadd.f32 %v4996_v57, %v4995_v36  ;;  %v5693_v25 = vsel %vm4171_vm1, %v4976_v58, %v4969_v19  ;;  %v4555_v12 = vmul.f32 %v10034_v24, %v10927_v2  ;;  %v4556_v62 = vmul.f32 %v10034_v24, %v10928_v45 }
 0x390   :  { %v5004_v5 = vadd.f32 %v5003_v22, %v5002_v28  ;;  %v5011_v40 = vadd.f32 %v5010_v38, %v5009_v60  ;;  %v5017_v6 = vrot.slane %v5016_v21, 1  ;;  %v5694_v13 = vsel %vm4173_vm2, %v4983_v43, %v5693_v25 }
 0x391   :  { %v5695_v26 = vsel %vm4175_vm3, %v4990_v48, %v5694_v13  ;;  %v4557_v17 = vmul.f32 %v10034_v24, %v10929_v39  ;;  %v4558_v30 = vmul.f32 %v10034_v24, %v10930_v16  ;;  %v4559_v32 = vmul.f32 %v10034_v24, %v10931_v44 }
 0x392   :  { %v5018_v7 = vadd.f32 %v5017_v6, %v5016_v21  ;;  %v5696_v41 = vsel %vm4177_vm4, %v4997_v3, %v5695_v26  ;;  %v4560_v49 = vmul.f32 %v10034_v24, %v10932_v1  ;;  %v4561_v31 = vmul.f32 %v10034_v24, %v10933_v52 }
 0x393   :  { %v5697_v15 = vsel %vm4179_vm5, %v5004_v5, %v5696_v41  ;;  %v4562_v33 = vmul.f32 %v10034_v24, %v10934_v53  ;;  %v5019_v34 = vsel %vm120_vm0, %v4555_v12, 0.0  ;;  %v5026_v9 = vsel %vm120_vm0, %v4556_v62, 0.0 }
 0x394   :  { %v5698_v36 = vsel %vm4181_vm6, %v5011_v40, %v5697_v15  ;;  %v5020_v10 = vrot.slane %v5019_v34, 4  ;;  %v5027_v28 = vrot.slane %v5026_v9, 4  ;;  %v5033_v60 = vsel %vm120_vm0, %v4557_v17, 0.0 }
 0x395   :  { %v5699_v59 = vsel %vm4183_vm7, %v5018_v7, %v5698_v36  ;;  %v5034_v19 = vrot.slane %v5033_v60, 4  ;;  %v5040_v58 = vsel %vm120_vm0, %v4558_v30, 0.0  ;;  %v5047_v43 = vsel %vm120_vm0, %v4559_v32, 0.0 }
 0x396   :  { %6706 = vmatprep.mubr.msk.f32.mxu1 %vm120_vm0, %v5699_v59  ;;  %v5021_v24 = vadd.f32 %v5020_v10, %v5019_v34  ;;  %v5028_v57 = vadd.f32 %v5027_v28, %v5026_v9  ;;  %v5041_v48 = vrot.slane %v5040_v58, 4  ;;  %v5048_v22 = vrot.slane %v5047_v43, 4 }
 0x397   :  { %v5035_v38 = vadd.f32 %v5034_v19, %v5033_v60  ;;  %v5054_v21 = vsel %vm120_vm0, %v4560_v49, 0.0  ;;  %v5061_v3 = vsel %vm120_vm0, %v4561_v31, 0.0  ;;  %v5068_v25 = vsel %vm120_vm0, %v4562_v33, 0.0 }
 0x398   :  { %v5022_v2 = vrot.slane %v5021_v24, 2  ;;  %v5029_v12 = vrot.slane %v5028_v57, 2  ;;  %v5042_v45 = vadd.f32 %v5041_v48, %v5040_v58  ;;  %v5049_v62 = vadd.f32 %v5048_v22, %v5047_v43 }
 0x399   :  { %v5036_v5 = vrot.slane %v5035_v38, 2  ;;  %v5055_v40 = vrot.slane %v5054_v21, 4  ;;  %v5062_v6 = vrot.slane %v5061_v3, 4  ;;  %v5069_v13 = vrot.slane %v5068_v25, 4 }
 0x39a   :  { %v5023_v26 = vadd.f32 %v5022_v2, %v5021_v24  ;;  %v5030_v39 = vadd.f32 %v5029_v12, %v5028_v57  ;;  %v5043_v17 = vrot.slane %v5042_v45, 2  ;;  %v5050_v16 = vrot.slane %v5049_v62, 2 }
 0x39b   :  { %v5037_v30 = vadd.f32 %v5036_v5, %v5035_v38  ;;  %v5056_v44 = vadd.f32 %v5055_v40, %v5054_v21  ;;  %v5063_v32 = vadd.f32 %v5062_v6, %v5061_v3  ;;  %v5070_v7 = vadd.f32 %v5069_v13, %v5068_v25  ;;  %v10936_v5 = vld [vmem:[#allocation96_spill] sm:$0xff] }
 0x39c   :  { %v5024_v41 = vrot.slane %v5023_v26, 1  ;;  %v5031_v1 = vrot.slane %v5030_v39, 1  ;;  %v5044_v49 = vadd.f32 %v5043_v17, %v5042_v45  ;;  %v5051_v52 = vadd.f32 %v5050_v16, %v5049_v62  ;;  %v10935_v45 = vld [vmem:[#allocation93_spill] sm:$0xff]  ;;  %v10937_v17 = vld [vmem:[#allocation92_spill] sm:$0xff] }
 0x39d   :  { %v5038_v31 = vrot.slane %v5037_v30, 1  ;;  %v5057_v15 = vrot.slane %v5056_v44, 2  ;;  %v5064_v53 = vrot.slane %v5063_v32, 2  ;;  %v5071_v33 = vrot.slane %v5070_v7, 2 }
 0x39e   :  { %v5025_v34 = vadd.f32 %v5024_v41, %v5023_v26  ;;  %v5032_v9 = vadd.f32 %v5031_v1, %v5030_v39  ;;  %v5045_v36 = vrot.slane %v5044_v49, 1  ;;  %v5052_v10 = vrot.slane %v5051_v52, 1  ;;  %v10940_v41 = vld [vmem:[#allocation97_spill] sm:$0xff] }
 0x39f   :  { %v5039_v28 = vadd.f32 %v5038_v31, %v5037_v30  ;;  %v5058_v60 = vadd.f32 %v5057_v15, %v5056_v44  ;;  %v5065_v59 = vadd.f32 %v5064_v53, %v5063_v32  ;;  %v5072_v19 = vadd.f32 %v5071_v33, %v5070_v7  ;;  %v10938_v30 = vld [vmem:[#allocation94_spill] sm:$0xff]  ;;  %v10942_v31 = vld [vmem:[#allocation101_spill] sm:$0xff]  ;;  %v10943_v33 = vld [vmem:[#allocation103_spill] sm:$0xff] }
 0x3a0   :  { %v5046_v58 = vadd.f32 %v5045_v36, %v5044_v49  ;;  %v5053_v43 = vadd.f32 %v5052_v10, %v5051_v52  ;;  %v5700_v24 = vsel %vm4171_vm1, %v5032_v9, %v5025_v34  ;;  %v10095_v57 = vmax.f32 %v10038_v51, 0.0  ;;  %v10941_v49 = vld [vmem:[#allocation99_spill] sm:$0xff] }
 0x3a1   :  { %v10097_v48 = vpop.f32.mrb[18].mxu1  ;;  %v5059_v22 = vrot.slane %v5058_v60, 1  ;;  %v5066_v38 = vrot.slane %v5065_v59, 1  ;;  %v5073_v21 = vrot.slane %v5072_v19, 1  ;;  %v5701_v3 = vsel %vm4173_vm2, %v5039_v28, %v5700_v24 }
 0x3a2   :  { %v10100_v25 = vpop.f32.mrb[19].mxu1  ;;  %v5702_v2 = vsel %vm4175_vm3, %v5046_v58, %v5701_v3  ;;  %v4491_v12 = vmax.f32 %v10041_v18, 0.0  ;;  %v10106_v62 = vmul.f32 %v10095_v57, %v10935_v45  ;;  %v10110_v51 = vmul.f32 %v10095_v57, %v10936_v5  ;;  %v10939_v18 = vld [vmem:[#allocation95_spill] sm:$0xff] }
 0x3a3   :  { %v5060_v40 = vadd.f32 %v5059_v22, %v5058_v60  ;;  %v5067_v6 = vadd.f32 %v5066_v38, %v5065_v59  ;;  %v5074_v13 = vadd.f32 %v5073_v21, %v5072_v19  ;;  %v5703_v26 = vsel %vm4177_vm4, %v5053_v43, %v5702_v2 }
 0x3a4   :  { %v4563_v39 = vmul.f32 %v4491_v12, %v9066_v0  ;;  %v4564_v16 = vmul.f32 %v4491_v12, %v10937_v17  ;;  %v4565_v44 = vmul.f32 %v4491_v12, %v10938_v30  ;;  %v4566_v32 = vmul.f32 %v4491_v12, %v10939_v18 }
 0x3a5   :  { %v5704_v7 = vsel %vm4179_vm5, %v5060_v40, %v5703_v26  ;;  %v4567_v1 = vmul.f32 %v4491_v12, %v10940_v41  ;;  %v4568_v52 = vmul.f32 %v4491_v12, %v10941_v49  ;;  %v4569_v15 = vmul.f32 %v4491_v12, %v10942_v31 }
 0x3a6   :  { %v5705_v53 = vsel %vm4181_vm6, %v5067_v6, %v5704_v7  ;;  %v4570_v34 = vmul.f32 %v4491_v12, %v10943_v33  ;;  %v5075_v0 = vsel %vm120_vm0, %v4563_v39, 0.0  ;;  %v5082_v9 = vsel %vm120_vm0, %v4564_v16, 0.0 }
 0x3a7   :  { %v5706_v36 = vsel %vm4183_vm7, %v5074_v13, %v5705_v53  ;;  %v5076_v10 = vrot.slane %v5075_v0, 4  ;;  %v5083_v28 = vrot.slane %v5082_v9, 4  ;;  %v5089_v60 = vsel %vm120_vm0, %v4565_v44, 0.0 }
 0x3a8   :  { %6707 = vmatmul.mubr.msk.f32.gmra.mrb[30].mxu1 %vm120_vm0, %v5706_v36  ;;  %v5090_v59 = vrot.slane %v5089_v60, 4  ;;  %v5096_v19 = vsel %vm120_vm0, %v4566_v32, 0.0  ;;  %v5103_v58 = vsel %vm120_vm0, %v4567_v1, 0.0  ;;  %v5110_v43 = vsel %vm120_vm0, %v4568_v52, 0.0 }
 0x3a9   :  { %v5077_v24 = vadd.f32 %v5076_v10, %v5075_v0  ;;  %v5084_v22 = vadd.f32 %v5083_v28, %v5082_v9  ;;  %v5097_v38 = vrot.slane %v5096_v19, 4  ;;  %v5104_v21 = vrot.slane %v5103_v58, 4 }
 0x3aa   :  { %v5091_v3 = vadd.f32 %v5090_v59, %v5089_v60  ;;  %v5111_v2 = vrot.slane %v5110_v43, 4  ;;  %v5117_v12 = vsel %vm120_vm0, %v4569_v15, 0.0  ;;  %v5124_v45 = vsel %vm120_vm0, %v4570_v34, 0.0 }
 0x3ab   :  { %v5078_v5 = vrot.slane %v5077_v24, 2  ;;  %v5085_v40 = vrot.slane %v5084_v22, 2  ;;  %v5098_v6 = vadd.f32 %v5097_v38, %v5096_v19  ;;  %v5105_v13 = vadd.f32 %v5104_v21, %v5103_v58  ;;  %v10944_v21 = vld [vmem:[#allocation98_spill] sm:$0xff] }
 0x3ac   :  { %v5092_v26 = vrot.slane %v5091_v3, 2  ;;  %v5112_v39 = vadd.f32 %v5111_v2, %v5110_v43  ;;  %v5118_v17 = vrot.slane %v5117_v12, 4  ;;  %v5125_v16 = vrot.slane %v5124_v45, 4 }
 0x3ad   :  { %v5079_v30 = vadd.f32 %v5078_v5, %v5077_v24  ;;  %v5086_v44 = vadd.f32 %v5085_v40, %v5084_v22  ;;  %v5099_v18 = vrot.slane %v5098_v6, 2  ;;  %v5106_v32 = vrot.slane %v5105_v13, 2 }
 0x3ae   :  { %v5093_v7 = vadd.f32 %v5092_v26, %v5091_v3  ;;  %v5113_v41 = vrot.slane %v5112_v39, 2  ;;  %v5119_v1 = vadd.f32 %v5118_v17, %v5117_v12  ;;  %v5126_v49 = vadd.f32 %v5125_v16, %v5124_v45  ;;  %v10946_v26 = vld [vmem:[#allocation102_spill] sm:$0xff]  ;;  %v10947_v17 = vld [vmem:[#allocation104_spill] sm:$0xff] }
 0x3af   :  { %v5080_v52 = vrot.slane %v5079_v30, 1  ;;  %v5087_v31 = vrot.slane %v5086_v44, 1  ;;  %v5100_v15 = vadd.f32 %v5099_v18, %v5098_v6  ;;  %v5107_v53 = vadd.f32 %v5106_v32, %v5105_v13  ;;  %v10945_v6 = vld [vmem:[#allocation100_spill] sm:$0xff] }
 0x3b0   :  { %v5094_v33 = vrot.slane %v5093_v7, 1  ;;  %v5114_v34 = vadd.f32 %v5113_v41, %v5112_v39  ;;  %v5120_v0 = vrot.slane %v5119_v1, 2  ;;  %v5127_v9 = vrot.slane %v5126_v49, 2  ;;  %v10948_v32 = vld [vmem:[#allocation72_spill] sm:$0xff] }
 0x3b1   :  { %v5081_v36 = vadd.f32 %v5080_v52, %v5079_v30  ;;  %v5088_v10 = vadd.f32 %v5087_v31, %v5086_v44  ;;  %v5101_v28 = vrot.slane %v5100_v15, 1  ;;  %v5108_v60 = vrot.slane %v5107_v53, 1 }
 0x3b2   :  { %v5095_v59 = vadd.f32 %v5094_v33, %v5093_v7  ;;  %v5115_v19 = vrot.slane %v5114_v34, 1  ;;  %v5121_v58 = vadd.f32 %v5120_v0, %v5119_v1  ;;  %v5128_v43 = vadd.f32 %v5127_v9, %v5126_v49  ;;  %v10949_v1 = vld [vmem:[#allocation73_spill] sm:$0xff] }
 0x3b3   :  { %v5102_v24 = vadd.f32 %v5101_v28, %v5100_v15  ;;  %v5109_v22 = vadd.f32 %v5108_v60, %v5107_v53  ;;  %v5707_v38 = vsel %vm4171_vm1, %v5088_v10, %v5081_v36  ;;  %v4573_v3 = vmul.f32 %v10095_v57, %v10944_v21 }
 0x3b4   :  { %v5116_v2 = vadd.f32 %v5115_v19, %v5114_v34  ;;  %v5122_v12 = vrot.slane %v5121_v58, 1  ;;  %v5129_v45 = vrot.slane %v5128_v43, 1  ;;  %v5708_v5 = vsel %vm4173_vm2, %v5095_v59, %v5707_v38 }
 0x3b5   :  { %v5709_v40 = vsel %vm4175_vm3, %v5102_v24, %v5708_v5  ;;  %v4574_v13 = vmul.f32 %v10095_v57, %v10945_v6  ;;  %v4575_v39 = vmul.f32 %v10095_v57, %v10946_v26  ;;  %v4576_v16 = vmul.f32 %v10095_v57, %v10947_v17 }
 0x3b6   :  { %v5123_v30 = vadd.f32 %v5122_v12, %v5121_v58  ;;  %v5130_v44 = vadd.f32 %v5129_v45, %v5128_v43  ;;  %v5710_v18 = vsel %vm4177_vm4, %v5109_v22, %v5709_v40  ;;  %v4577_v7 = vmul.f32 %v10095_v57, %v10948_v32 }
 0x3b7   :  { %v5711_v41 = vsel %vm4179_vm5, %v5116_v2, %v5710_v18  ;;  %v4578_v49 = vmul.f32 %v10095_v57, %v10949_v1  ;;  %v5131_v52 = vsel %vm120_vm0, %v10106_v62, 0.0  ;;  %v5138_v31 = vsel %vm120_vm0, %v10110_v51, 0.0 }
 0x3b8   :  { %v5712_v15 = vsel %vm4181_vm6, %v5123_v30, %v5711_v41  ;;  %v5132_v53 = vrot.slane %v5131_v52, 4  ;;  %v5139_v33 = vrot.slane %v5138_v31, 4  ;;  %v5145_v34 = vsel %vm120_vm0, %v4573_v3, 0.0 }
 0x3b9   :  { %v5713_v0 = vsel %vm4183_vm7, %v5130_v44, %v5712_v15  ;;  %v5146_v9 = vrot.slane %v5145_v34, 4  ;;  %v5152_v36 = vsel %vm120_vm0, %v4574_v13, 0.0  ;;  %v5159_v10 = vsel %vm120_vm0, %v4575_v39, 0.0 }
 0x3ba   :  { %6709 = vmatprep.mubr.msk.f32.mxu1 %vm120_vm0, %v5713_v0  ;;  %v5133_v57 = vadd.f32 %v5132_v53, %v5131_v52  ;;  %v5140_v62 = vadd.f32 %v5139_v33, %v5138_v31  ;;  %v5153_v28 = vrot.slane %v5152_v36, 4  ;;  %v5160_v60 = vrot.slane %v5159_v10, 4 }
 0x3bb   :  { %v5147_v51 = vadd.f32 %v5146_v9, %v5145_v34  ;;  %v5166_v59 = vsel %vm120_vm0, %v4576_v16, 0.0  ;;  %v5173_v19 = vsel %vm120_vm0, %v4577_v7, 0.0  ;;  %v5180_v58 = vsel %vm120_vm0, %v4578_v49, 0.0 }
 0x3bc   :  { %v5134_v43 = vrot.slane %v5133_v57, 2  ;;  %v5141_v24 = vrot.slane %v5140_v62, 2  ;;  %v5154_v22 = vadd.f32 %v5153_v28, %v5152_v36  ;;  %v5161_v38 = vadd.f32 %v5160_v60, %v5159_v10 }
 0x3bd   :  { %v5148_v21 = vrot.slane %v5147_v51, 2  ;;  %v5167_v3 = vrot.slane %v5166_v59, 4  ;;  %v5174_v2 = vrot.slane %v5173_v19, 4  ;;  %v5181_v12 = vrot.slane %v5180_v58, 4 }
 0x3be   :  { %v5135_v45 = vadd.f32 %v5134_v43, %v5133_v57  ;;  %v5142_v5 = vadd.f32 %v5141_v24, %v5140_v62  ;;  %v5155_v40 = vrot.slane %v5154_v22, 2  ;;  %v5162_v6 = vrot.slane %v5161_v38, 2 }
 0x3bf   :  { %v5149_v13 = vadd.f32 %v5148_v21, %v5147_v51  ;;  %v5168_v26 = vadd.f32 %v5167_v3, %v5166_v59  ;;  %v5175_v39 = vadd.f32 %v5174_v2, %v5173_v19  ;;  %v5182_v17 = vadd.f32 %v5181_v12, %v5180_v58  ;;  %v10950_v19 = vld [vmem:[#allocation59_spill] sm:$0xff]  ;;  %v10951_v3 = vld [vmem:[#allocation114_spill] sm:$0xff] }
 0x3c0   :  { %v5136_v16 = vrot.slane %v5135_v45, 1  ;;  %v5143_v30 = vrot.slane %v5142_v5, 1  ;;  %v5156_v44 = vadd.f32 %v5155_v40, %v5154_v22  ;;  %v5163_v18 = vadd.f32 %v5162_v6, %v5161_v38  ;;  %v10952_v40 = vld [vmem:[#allocation105_spill] sm:$0xff] }
 0x3c1   :  { %v5150_v32 = vrot.slane %v5149_v13, 1  ;;  %v5169_v7 = vrot.slane %v5168_v26, 2  ;;  %v5176_v41 = vrot.slane %v5175_v39, 2  ;;  %v5183_v1 = vrot.slane %v5182_v17, 2 }
 0x3c2   :  { %v5137_v49 = vadd.f32 %v5136_v16, %v5135_v45  ;;  %v5144_v52 = vadd.f32 %v5143_v30, %v5142_v5  ;;  %v5157_v31 = vrot.slane %v5156_v44, 1  ;;  %v5164_v15 = vrot.slane %v5163_v18, 1 }
 0x3c3   :  { %v5151_v53 = vadd.f32 %v5150_v32, %v5149_v13  ;;  %v5170_v33 = vadd.f32 %v5169_v7, %v5168_v26  ;;  %v5177_v34 = vadd.f32 %v5176_v41, %v5175_v39  ;;  %v5184_v0 = vadd.f32 %v5183_v1, %v5182_v17  ;;  %v10953_v13 = vld [vmem:[#allocation108_spill] sm:$0xff]  ;;  %v10954_v39 = vld [vmem:[#allocation110_spill] sm:$0xff]  ;;  %v10956_v32 = vld [vmem:[#allocation75_spill] sm:$0xff] }
 0x3c4   :  { %v5158_v9 = vadd.f32 %v5157_v31, %v5156_v44  ;;  %v5165_v36 = vadd.f32 %v5164_v15, %v5163_v18  ;;  %v5714_v10 = vsel %vm4171_vm1, %v5144_v52, %v5137_v49  ;;  %v4444_v57 = vadd.f32 %v10097_v48, %v10815_v23  ;;  %v10955_v44 = vld [vmem:[#allocation15_spill] sm:$0xff]  ;;  %v10957_v41 = vld [vmem:[#allocation106_spill] sm:$0xff]  ;;  %v10959_v31 = vld [vmem:[#allocation109_spill] sm:$0xff] }
 0x3c5   :  { %v5171_v62 = vrot.slane %v5170_v33, 1  ;;  %v5178_v28 = vrot.slane %v5177_v34, 1  ;;  %v5185_v60 = vrot.slane %v5184_v0, 1  ;;  %v5715_v51 = vsel %vm4173_vm2, %v5151_v53, %v5714_v10  ;;  %v10958_v49 = vld [vmem:[#allocation107_spill] sm:$0xff] }
 0x3c6   :  { %v5716_v59 = vsel %vm4175_vm3, %v5158_v9, %v5715_v51  ;;  %v4478_v58 = vadd.f32 %v10950_v19, %v4444_v57  ;;  %v4439_v43 = vadd.f32 %v10100_v25, %v10815_v23  ;;  %v10960_v53 = vld [vmem:[#allocation111_spill] sm:$0xff] }
 0x3c7   :  { %v5172_v24 = vadd.f32 %v5171_v62, %v5170_v33  ;;  %v5717_v22 = vsel %vm4177_vm4, %v5165_v36, %v5716_v59  ;;  %v5179_v38 = vadd.f32 %v5178_v28, %v5177_v34  ;;  %v5186_v2 = vadd.f32 %v5185_v60, %v5184_v0  ;;  %v10962_v0 = vld [vmem:[#allocation112_spill] sm:$0xff] }
 0x3c8   :  { %v10172_v21 = vmax.f32 %v4478_v58, 0.0  ;;  %v4477_v48 = vadd.f32 %v10951_v3, %v4439_v43 }
 0x3c9   :  { %v5718_v12 = vsel %vm4179_vm5, %v5172_v24, %v5717_v22 }
 0x3ca   :  { %v5719_v45 = vsel %vm4181_vm6, %v5179_v38, %v5718_v12  ;;  %v4493_v5 = vmax.f32 %v4477_v48, 0.0  ;;  %v10179_v6 = vmul.f32 %v10172_v21, %v10952_v40  ;;  %v10183_v25 = vmul.f32 %v10172_v21, %v10953_v13 }
 0x3cb   :  { %v5720_v26 = vsel %vm4183_vm7, %v5186_v2, %v5719_v45  ;;  %v10188_v17 = vmul.f32 %v10172_v21, %v10954_v39  ;;  %v10192_v16 = vmul.f32 %v10172_v21, %v9326_v29  ;;  %v10196_v30 = vmul.f32 %v10172_v21, %v9355_v14  ;;  %v10961_v29 = vld [vmem:[#allocation56_spill] sm:$0xff] }
 0x3cc   :  { %6710 = vmatmul.mubr.msk.f32.gmra.mrb[32].mxu1 %vm120_vm0, %v5720_v26  ;;  %v4579_v18 = vmul.f32 %v4493_v5, %v10955_v44  ;;  %v4580_v7 = vmul.f32 %v4493_v5, %v10956_v32  ;;  %v4581_v1 = vmul.f32 %v4493_v5, %v10957_v41  ;;  %v4582_v52 = vmul.f32 %v4493_v5, %v10958_v49 }
 0x3cd   :  { %v4583_v15 = vmul.f32 %v4493_v5, %v10959_v31  ;;  %v4584_v33 = vmul.f32 %v4493_v5, %v10960_v53  ;;  %v4585_v34 = vmul.f32 %v4493_v5, %v10961_v29  ;;  %v4586_v9 = vmul.f32 %v4493_v5, %v10962_v0 }
 0x3ce   :  { %v5187_v14 = vsel %vm120_vm0, %v4579_v18, 0.0  ;;  %v5194_v36 = vsel %vm120_vm0, %v4580_v7, 0.0  ;;  %v5201_v10 = vsel %vm120_vm0, %v4581_v1, 0.0  ;;  %v5208_v57 = vsel %vm120_vm0, %v4582_v52, 0.0 }
 0x3cf   :  { %v5188_v62 = vrot.slane %v5187_v14, 4  ;;  %v5195_v28 = vrot.slane %v5194_v36, 4  ;;  %v5202_v60 = vrot.slane %v5201_v10, 4  ;;  %v5209_v51 = vrot.slane %v5208_v57, 4 }
 0x3d0   :  { %v5215_v59 = vsel %vm120_vm0, %v4583_v15, 0.0  ;;  %v5222_v58 = vsel %vm120_vm0, %v4584_v33, 0.0  ;;  %v5229_v43 = vsel %vm120_vm0, %v4585_v34, 0.0  ;;  %v5236_v24 = vsel %vm120_vm0, %v4586_v9, 0.0 }
 0x3d1   :  { %v5189_v22 = vadd.f32 %v5188_v62, %v5187_v14  ;;  %v5196_v38 = vadd.f32 %v5195_v28, %v5194_v36  ;;  %v5203_v48 = vadd.f32 %v5202_v60, %v5201_v10  ;;  %v5210_v2 = vadd.f32 %v5209_v51, %v5208_v57 }
 0x3d2   :  { %v5216_v12 = vrot.slane %v5215_v59, 4  ;;  %v5223_v45 = vrot.slane %v5222_v58, 4  ;;  %v5230_v5 = vrot.slane %v5229_v43, 4  ;;  %v5237_v40 = vrot.slane %v5236_v24, 4 }
 0x3d3   :  { %v5190_v13 = vrot.slane %v5189_v22, 2  ;;  %v5197_v26 = vrot.slane %v5196_v38, 2  ;;  %v5204_v39 = vrot.slane %v5203_v48, 2  ;;  %v5211_v44 = vrot.slane %v5210_v2, 2  ;;  %v10215_v18 = vpop.f32.mrb[20].mxu1 }
 0x3d4   :  { %v5217_v32 = vadd.f32 %v5216_v12, %v5215_v59  ;;  %v5224_v7 = vadd.f32 %v5223_v45, %v5222_v58  ;;  %v5231_v41 = vadd.f32 %v5230_v5, %v5229_v43  ;;  %v5238_v1 = vadd.f32 %v5237_v40, %v5236_v24  ;;  %v10217_v49 = vpop.f32.mrb[21].mxu1  ;;  %v10963_v12 = vld [vmem:[#allocation113_spill] sm:$0xff]  ;;  %v10964_v5 = vld [vmem:[#allocation116_spill] sm:$0xff] }
 0x3d5   :  { %v5191_v52 = vadd.f32 %v5190_v13, %v5189_v22  ;;  %v5198_v31 = vadd.f32 %v5197_v26, %v5196_v38  ;;  %v5205_v15 = vadd.f32 %v5204_v39, %v5203_v48  ;;  %v5212_v53 = vadd.f32 %v5211_v44, %v5210_v2  ;;  %v10965_v13 = vld [vmem:[#allocation115_spill] sm:$0xff] }
 0x3d6   :  { %v5218_v33 = vrot.slane %v5217_v32, 2  ;;  %v5225_v29 = vrot.slane %v5224_v7, 2  ;;  %v5232_v34 = vrot.slane %v5231_v41, 2  ;;  %v5239_v0 = vrot.slane %v5238_v1, 2 }
 0x3d7   :  { %v5192_v9 = vrot.slane %v5191_v52, 1  ;;  %v5199_v14 = vrot.slane %v5198_v31, 1  ;;  %v5206_v36 = vrot.slane %v5205_v15, 1  ;;  %v5213_v10 = vrot.slane %v5212_v53, 1 }
 0x3d8   :  { %v5219_v57 = vadd.f32 %v5218_v33, %v5217_v32  ;;  %v5226_v62 = vadd.f32 %v5225_v29, %v5224_v7  ;;  %v5233_v28 = vadd.f32 %v5232_v34, %v5231_v41  ;;  %v5240_v60 = vadd.f32 %v5239_v0, %v5238_v1 }
 0x3d9   :  { %v5193_v51 = vadd.f32 %v5192_v9, %v5191_v52  ;;  %v5200_v59 = vadd.f32 %v5199_v14, %v5198_v31  ;;  %v5207_v58 = vadd.f32 %v5206_v36, %v5205_v15  ;;  %v5214_v43 = vadd.f32 %v5213_v10, %v5212_v53 }
 0x3da   :  { %v5220_v24 = vrot.slane %v5219_v57, 1  ;;  %v5227_v22 = vrot.slane %v5226_v62, 1  ;;  %v5234_v38 = vrot.slane %v5233_v28, 1  ;;  %v5241_v48 = vrot.slane %v5240_v60, 1 }
 0x3db   :  { %v5721_v2 = vsel %vm4171_vm1, %v5200_v59, %v5193_v51  ;;  %v4592_v45 = vmul.f32 %v10172_v21, %v10963_v12  ;;  %v4593_v40 = vmul.f32 %v10172_v21, %v10964_v5  ;;  %v4594_v26 = vmul.f32 %v10172_v21, %v10965_v13 }
 0x3dc   :  { %v5221_v39 = vadd.f32 %v5220_v24, %v5219_v57  ;;  %v5228_v44 = vadd.f32 %v5227_v22, %v5226_v62  ;;  %v5235_v32 = vadd.f32 %v5234_v38, %v5233_v28  ;;  %v5242_v7 = vadd.f32 %v5241_v48, %v5240_v60 }
 0x3dd   :  { %v5722_v41 = vsel %vm4173_vm2, %v5207_v58, %v5721_v2  ;;  %v5243_v1 = vsel %vm120_vm0, %v10179_v6, 0.0  ;;  %v5250_v52 = vsel %vm120_vm0, %v10183_v25, 0.0  ;;  %v5257_v31 = vsel %vm120_vm0, %v10188_v17, 0.0 }
 0x3de   :  { %v5723_v15 = vsel %vm4175_vm3, %v5214_v43, %v5722_v41  ;;  %v5244_v53 = vrot.slane %v5243_v1, 4  ;;  %v5251_v33 = vrot.slane %v5250_v52, 4  ;;  %v5258_v21 = vrot.slane %v5257_v31, 4 }
 0x3df   :  { %v5724_v29 = vsel %vm4177_vm4, %v5221_v39, %v5723_v15  ;;  %v5264_v34 = vsel %vm120_vm0, %v10192_v16, 0.0  ;;  %v5271_v0 = vsel %vm120_vm0, %v10196_v30, 0.0  ;;  %v5278_v6 = vsel %vm120_vm0, %v4592_v45, 0.0 }
 0x3e0   :  { %v5725_v25 = vsel %vm4179_vm5, %v5228_v44, %v5724_v29  ;;  %v5245_v9 = vadd.f32 %v5244_v53, %v5243_v1  ;;  %v5252_v14 = vadd.f32 %v5251_v33, %v5250_v52  ;;  %v5259_v17 = vadd.f32 %v5258_v21, %v5257_v31 }
 0x3e1   :  { %v5726_v36 = vsel %vm4181_vm6, %v5235_v32, %v5725_v25  ;;  %v5265_v10 = vrot.slane %v5264_v34, 4  ;;  %v5272_v57 = vrot.slane %v5271_v0, 4  ;;  %v5279_v62 = vrot.slane %v5278_v6, 4 }
 0x3e2   :  { %v5727_v28 = vsel %vm4183_vm7, %v5242_v7, %v5726_v36  ;;  %v5246_v60 = vrot.slane %v5245_v9, 2  ;;  %v5253_v51 = vrot.slane %v5252_v14, 2  ;;  %v5260_v16 = vrot.slane %v5259_v17, 2 }
 0x3e3   :  { %6712 = vmatprep.mubr.msk.f32.mxu1 %vm120_vm0, %v5727_v28  ;;  %v5266_v30 = vadd.f32 %v5265_v10, %v5264_v34  ;;  %v5273_v59 = vadd.f32 %v5272_v57, %v5271_v0  ;;  %v5280_v58 = vadd.f32 %v5279_v62, %v5278_v6  ;;  %v5285_v43 = vsel %vm120_vm0, %v4593_v40, 0.0 }
 0x3e4   :  { %v5247_v24 = vadd.f32 %v5246_v60, %v5245_v9  ;;  %v5254_v22 = vadd.f32 %v5253_v51, %v5252_v14  ;;  %v5261_v38 = vadd.f32 %v5260_v16, %v5259_v17  ;;  %v5286_v48 = vrot.slane %v5285_v43, 4  ;;  %v10966_v60 = vld [vmem:[#allocation81_spill] sm:$0xff]  ;;  %v10967_v16 = vld [vmem:[#allocation120_spill] sm:$0xff] }
 0x3e5   :  { %v5267_v2 = vrot.slane %v5266_v30, 2  ;;  %v5274_v12 = vrot.slane %v5273_v59, 2  ;;  %v5281_v45 = vrot.slane %v5280_v58, 2  ;;  %v5292_v5 = vsel %vm120_vm0, %v4594_v26, 0.0 }
 0x3e6   :  { %v5248_v13 = vrot.slane %v5247_v24, 1  ;;  %v5255_v39 = vrot.slane %v5254_v22, 1  ;;  %v5262_v44 = vrot.slane %v5261_v38, 1  ;;  %v5287_v32 = vadd.f32 %v5286_v48, %v5285_v43 }
 0x3e7   :  { %v5268_v7 = vadd.f32 %v5267_v2, %v5266_v30  ;;  %v5275_v41 = vadd.f32 %v5274_v12, %v5273_v59  ;;  %v5282_v1 = vadd.f32 %v5281_v45, %v5280_v58  ;;  %v5293_v52 = vrot.slane %v5292_v5, 4  ;;  %v6688_v31 = vpop.f32.mrb[22].mxu1 }
 0x3e8   :  { %v5249_v15 = vadd.f32 %v5248_v13, %v5247_v24  ;;  %v5256_v40 = vadd.f32 %v5255_v39, %v5254_v22  ;;  %v5263_v53 = vadd.f32 %v5262_v44, %v5261_v38  ;;  %v5288_v33 = vrot.slane %v5287_v32, 2  ;;  %v4458_v21 = vpop.f32.mrb[23].mxu1 }
 0x3e9   :  { %v5269_v29 = vrot.slane %v5268_v7, 1  ;;  %v5276_v34 = vrot.slane %v5275_v41, 1  ;;  %v5283_v0 = vrot.slane %v5282_v1, 1  ;;  %v5294_v6 = vadd.f32 %v5293_v52, %v5292_v5 }
 0x3ea   :  { %v5289_v25 = vadd.f32 %v5288_v33, %v5287_v32  ;;  %v5728_v26 = vsel %vm4171_vm1, %v5256_v40, %v5249_v15  ;;  %v4454_v9 = vadd.f32 %v10215_v18, %v10815_v23  ;;  %v4449_v14 = vadd.f32 %v10217_v49, %v10815_v23 }
 0x3eb   :  { %v5270_v17 = vadd.f32 %v5269_v29, %v5268_v7  ;;  %v5277_v36 = vadd.f32 %v5276_v34, %v5275_v41  ;;  %v5284_v10 = vadd.f32 %v5283_v0, %v5282_v1  ;;  %v5295_v57 = vrot.slane %v5294_v6, 2 }
 0x3ec   :  { %v5290_v62 = vrot.slane %v5289_v25, 1  ;;  %v5729_v28 = vsel %vm4173_vm2, %v5263_v53, %v5728_v26  ;;  %v4480_v51 = vadd.f32 %v10966_v60, %v4454_v9  ;;  %v4479_v30 = vadd.f32 %v10967_v16, %v4449_v14 }
 0x3ed   :  { %v5296_v59 = vadd.f32 %v5295_v57, %v5294_v6  ;;  %v5730_v58 = vsel %vm4175_vm3, %v5270_v17, %v5729_v28  ;;  %v4464_v43 = vadd.f32 %v6688_v31, %v10815_v23  ;;  %v4459_v18 = vadd.f32 %v4458_v21, %v10815_v23  ;;  %v10968_v31 = vld [vmem:[#allocation122_spill] sm:$0xff] }
 0x3ee   :  { %v5291_v24 = vadd.f32 %v5290_v62, %v5289_v25  ;;  %v5731_v49 = vsel %vm4177_vm4, %v5277_v36, %v5730_v58  ;;  %v10258_v22 = vmax.f32 %v4480_v51, 0.0  ;;  %v4495_v38 = vmax.f32 %v4479_v30, 0.0 }
 0x3ef   :  { %v5297_v48 = vrot.slane %v5296_v59, 1  ;;  %v5732_v2 = vsel %vm4179_vm5, %v5284_v10, %v5731_v49  ;;  %v10262_v12 = vadd.f32 %v9613_v56, %v4464_v43  ;;  %v10265_v45 = vadd.f32 %v9620_v47, %v4459_v18 }
 0x3f0   :  { %v5733_v5 = vsel %vm4181_vm6, %v5291_v24, %v5732_v2  ;;  %v4595_v13 = vmul.f32 %v4495_v38, %v9418_v20  ;;  %v4596_v39 = vmul.f32 %v4495_v38, %v9409_v54  ;;  %v4597_v44 = vmul.f32 %v4495_v38, %v9449_v63 }
 0x3f1   :  { %v5298_v32 = vadd.f32 %v5297_v48, %v5296_v59  ;;  %v4598_v7 = vmul.f32 %v4495_v38, %v9465_v55  ;;  %v4599_v41 = vmul.f32 %v4495_v38, %v9479_v8  ;;  %v4600_v1 = vmul.f32 %v4495_v38, %v9511_v61 }
 0x3f2   :  { %v4601_v52 = vmul.f32 %v4495_v38, %v9534_v27  ;;  %v4602_v15 = vmul.f32 %v4495_v38, %v10968_v31  ;;  %v5299_v40 = vsel %vm120_vm0, %v4595_v13, 0.0  ;;  %v5306_v53 = vsel %vm120_vm0, %v4596_v39, 0.0 }
 0x3f3   :  { %v5734_v20 = vsel %vm4183_vm7, %v5298_v32, %v5733_v5  ;;  %v5300_v54 = vrot.slane %v5299_v40, 4  ;;  %v5307_v33 = vrot.slane %v5306_v53, 4  ;;  %v5313_v63 = vsel %vm120_vm0, %v4597_v44, 0.0 }
 0x3f4   :  { %6713 = vmatmul.mubr.msk.f32.gmra.mrb[34].mxu1 %vm120_vm0, %v5734_v20  ;;  %v5314_v55 = vrot.slane %v5313_v63, 4  ;;  %v5320_v8 = vsel %vm120_vm0, %v4598_v7, 0.0  ;;  %v5327_v61 = vsel %vm120_vm0, %v4599_v41, 0.0  ;;  %v5334_v27 = vsel %vm120_vm0, %v4600_v1, 0.0 }
 0x3f5   :  { %v5301_v21 = vadd.f32 %v5300_v54, %v5299_v40  ;;  %v5308_v29 = vadd.f32 %v5307_v33, %v5306_v53  ;;  %v5321_v34 = vrot.slane %v5320_v8, 4  ;;  %v5328_v0 = vrot.slane %v5327_v61, 4 }
 0x3f6   :  { %v5315_v6 = vadd.f32 %v5314_v55, %v5313_v63  ;;  %v5335_v25 = vrot.slane %v5334_v27, 4  ;;  %v5341_v26 = vsel %vm120_vm0, %v4601_v52, 0.0  ;;  %v5348_v9 = vsel %vm120_vm0, %v4602_v15, 0.0  ;;  %v10969_v55 = vld [vmem:[#allocation117_spill] sm:$0xff] }
 0x3f7   :  { %v5302_v14 = vrot.slane %v5301_v21, 2  ;;  %v5309_v17 = vrot.slane %v5308_v29, 2  ;;  %v5322_v36 = vadd.f32 %v5321_v34, %v5320_v8  ;;  %v5329_v10 = vadd.f32 %v5328_v0, %v5327_v61  ;;  %v10970_v0 = vld [vmem:[#allocation118_spill] sm:$0xff] }
 0x3f8   :  { %v5316_v57 = vrot.slane %v5315_v6, 2  ;;  %v5336_v62 = vadd.f32 %v5335_v25, %v5334_v27  ;;  %v5342_v28 = vrot.slane %v5341_v26, 4  ;;  %v5349_v51 = vrot.slane %v5348_v9, 4  ;;  %v10971_v25 = vld [vmem:[#allocation80_spill] sm:$0xff] }
 0x3f9   :  { %v5303_v30 = vadd.f32 %v5302_v14, %v5301_v21  ;;  %v5310_v59 = vadd.f32 %v5309_v17, %v5308_v29  ;;  %v5323_v58 = vrot.slane %v5322_v36, 2  ;;  %v5330_v43 = vrot.slane %v5329_v10, 2 }
 0x3fa   :  { %v5317_v18 = vadd.f32 %v5316_v57, %v5315_v6  ;;  %v5337_v24 = vrot.slane %v5336_v62, 2  ;;  %v5343_v49 = vadd.f32 %v5342_v28, %v5341_v26  ;;  %v5350_v38 = vadd.f32 %v5349_v51, %v5348_v9  ;;  %v10972_v9 = vld [vmem:[#allocation119_spill] sm:$0xff]  ;;  %v10973_v57 = vld [vmem:[#allocation121_spill] sm:$0xff] }
 0x3fb   :  { %v5304_v48 = vrot.slane %v5303_v30, 1  ;;  %v5311_v2 = vrot.slane %v5310_v59, 1  ;;  %v5324_v5 = vadd.f32 %v5323_v58, %v5322_v36  ;;  %v5331_v13 = vadd.f32 %v5330_v43, %v5329_v10  ;;  %v10974_v51 = vld [vmem:[#allocation123_spill] sm:$0xff]  ;;  %v10976_v43 = vld [vmem:[#allocation124_spill] sm:$0xff] }
 0x3fc   :  { %v5318_v39 = vrot.slane %v5317_v18, 1  ;;  %v5338_v44 = vadd.f32 %v5337_v24, %v5336_v62  ;;  %v5344_v32 = vrot.slane %v5343_v49, 2  ;;  %v5351_v7 = vrot.slane %v5350_v38, 2 }
 0x3fd   :  { %v5305_v41 = vadd.f32 %v5304_v48, %v5303_v30  ;;  %v5312_v1 = vadd.f32 %v5311_v2, %v5310_v59  ;;  %v5325_v52 = vrot.slane %v5324_v5, 1  ;;  %v5332_v31 = vrot.slane %v5331_v13, 1  ;;  %v10975_v59 = vld [vmem:[#allocation125_spill] sm:$0xff] }
 0x3fe   :  { %v5319_v15 = vadd.f32 %v5318_v39, %v5317_v18  ;;  %v5339_v40 = vrot.slane %v5338_v44, 1  ;;  %v5345_v53 = vadd.f32 %v5344_v32, %v5343_v49  ;;  %v5352_v20 = vadd.f32 %v5351_v7, %v5350_v38 }
 0x3ff   :  { %v5326_v54 = vadd.f32 %v5325_v52, %v5324_v5  ;;  %v5333_v33 = vadd.f32 %v5332_v31, %v5331_v13  ;;  %v5735_v63 = vsel %vm4171_vm1, %v5312_v1, %v5305_v41  ;;  %v4603_v8 = vmul.f32 %v10258_v22, %v10969_v55 }
 0x400   :  { %v5340_v61 = vadd.f32 %v5339_v40, %v5338_v44  ;;  %v5346_v27 = vrot.slane %v5345_v53, 1  ;;  %v5353_v21 = vrot.slane %v5352_v20, 1  ;;  %v5736_v29 = vsel %vm4173_vm2, %v5319_v15, %v5735_v63 }
 0x401   :  { %v5737_v34 = vsel %vm4175_vm3, %v5326_v54, %v5736_v29  ;;  %v4604_v6 = vmul.f32 %v10258_v22, %v10970_v0  ;;  %v4605_v26 = vmul.f32 %v10258_v22, %v10971_v25  ;;  %v4606_v14 = vmul.f32 %v10258_v22, %v10972_v9 }
 0x402   :  { %v5347_v17 = vadd.f32 %v5346_v27, %v5345_v53  ;;  %v5354_v36 = vadd.f32 %v5353_v21, %v5352_v20  ;;  %v5738_v10 = vsel %vm4177_vm4, %v5333_v33, %v5737_v34  ;;  %v4607_v62 = vmul.f32 %v10258_v22, %v10973_v57 }
 0x403   :  { %v5739_v28 = vsel %vm4179_vm5, %v5340_v61, %v5738_v10  ;;  %v4608_v30 = vmul.f32 %v10258_v22, %v10974_v51  ;;  %v4609_v58 = vmul.f32 %v10258_v22, %v10975_v59  ;;  %v4610_v18 = vmul.f32 %v10258_v22, %v10976_v43 }
 0x404   :  { %v5740_v24 = vsel %vm4181_vm6, %v5347_v17, %v5739_v28  ;;  %v5355_v49 = vsel %vm120_vm0, %v4603_v8, 0.0  ;;  %v5362_v38 = vsel %vm120_vm0, %v4604_v6, 0.0  ;;  %v5369_v48 = vsel %vm120_vm0, %v4605_v26, 0.0 }
 0x405   :  { %v5741_v2 = vsel %vm4183_vm7, %v5354_v36, %v5740_v24  ;;  %v5356_v5 = vrot.slane %v5355_v49, 4  ;;  %v5363_v13 = vrot.slane %v5362_v38, 4  ;;  %v5370_v39 = vrot.slane %v5369_v48, 4 }
 0x406   :  { %6715 = vmatprep.mubr.msk.f32.mxu1 %vm120_vm0, %v5741_v2  ;;  %v5376_v44 = vsel %vm120_vm0, %v4606_v14, 0.0  ;;  %v5383_v32 = vsel %vm120_vm0, %v4607_v62, 0.0  ;;  %v5390_v22 = vsel %vm120_vm0, %v4608_v30, 0.0  ;;  %v5397_v7 = vsel %vm120_vm0, %v4609_v58, 0.0 }
 0x407   :  { %v5357_v41 = vadd.f32 %v5356_v5, %v5355_v49  ;;  %v5364_v1 = vadd.f32 %v5363_v13, %v5362_v38  ;;  %v5371_v52 = vadd.f32 %v5370_v39, %v5369_v48  ;;  %v5377_v31 = vrot.slane %v5376_v44, 4 }
 0x408   :  { %v5384_v15 = vrot.slane %v5383_v32, 4  ;;  %v5391_v40 = vrot.slane %v5390_v22, 4  ;;  %v5398_v53 = vrot.slane %v5397_v7, 4  ;;  %v5404_v20 = vsel %vm120_vm0, %v4610_v18, 0.0 }
 0x409   :  { %v5358_v54 = vrot.slane %v5357_v41, 2  ;;  %v5365_v33 = vrot.slane %v5364_v1, 2  ;;  %v5372_v63 = vrot.slane %v5371_v52, 2  ;;  %v5378_v55 = vadd.f32 %v5377_v31, %v5376_v44 }
 0x40a   :  { %v5385_v8 = vadd.f32 %v5384_v15, %v5383_v32  ;;  %v5392_v61 = vadd.f32 %v5391_v40, %v5390_v22  ;;  %v5399_v27 = vadd.f32 %v5398_v53, %v5397_v7  ;;  %v5405_v21 = vrot.slane %v5404_v20, 4  ;;  %v6699_v29 = vpop.f32.mrb[24].mxu1  ;;  %v10977_v40 = vld [vmem:[#allocation127_spill] sm:$0xff] }
 0x40b   :  { %v5359_v34 = vadd.f32 %v5358_v54, %v5357_v41  ;;  %v5366_v0 = vadd.f32 %v5365_v33, %v5364_v1  ;;  %v5373_v6 = vadd.f32 %v5372_v63, %v5371_v52  ;;  %v5379_v25 = vrot.slane %v5378_v55, 2  ;;  %v5861_v26 = vpop.f32.mrb[25].mxu1  ;;  %v10978_v33 = vld [vmem:[#allocation126_spill] sm:$0xff]  ;;  %v10979_v63 = vld [vmem:[#allocation129_spill] sm:$0xff] }
 0x40c   :  { %v5386_v9 = vrot.slane %v5385_v8, 2  ;;  %v5393_v14 = vrot.slane %v5392_v61, 2  ;;  %v5400_v17 = vrot.slane %v5399_v27, 2  ;;  %v5406_v36 = vadd.f32 %v5405_v21, %v5404_v20 }
 0x40d   :  { %v5360_v10 = vrot.slane %v5359_v34, 1  ;;  %v5367_v57 = vrot.slane %v5366_v0, 1  ;;  %v5374_v62 = vrot.slane %v5373_v6, 1  ;;  %v5380_v28 = vadd.f32 %v5379_v25, %v5378_v55 }
 0x40e   :  { %v5387_v51 = vadd.f32 %v5386_v9, %v5385_v8  ;;  %v5394_v30 = vadd.f32 %v5393_v14, %v5392_v61  ;;  %v5401_v59 = vadd.f32 %v5400_v17, %v5399_v27  ;;  %v5407_v58 = vrot.slane %v5406_v36, 2  ;;  %v10980_v27 = vld [vmem:[#allocation130_spill] sm:$0xff] }
 0x40f   :  { %v5361_v43 = vadd.f32 %v5360_v10, %v5359_v34  ;;  %v5368_v18 = vadd.f32 %v5367_v57, %v5366_v0  ;;  %v5375_v24 = vadd.f32 %v5374_v62, %v5373_v6  ;;  %v5381_v49 = vrot.slane %v5380_v28, 1  ;;  %v10981_v34 = vld [vmem:[#allocation132_spill] sm:$0xff]  ;;  %v10982_v6 = vld [vmem:[#allocation134_spill] sm:$0xff] }
 0x410   :  { %v5388_v38 = vrot.slane %v5387_v51, 1  ;;  %v5395_v48 = vrot.slane %v5394_v30, 1  ;;  %v5402_v2 = vrot.slane %v5401_v59, 1  ;;  %v5408_v5 = vadd.f32 %v5407_v58, %v5406_v36  ;;  %v10984_v36 = vld [vmem:[#allocation138_spill] sm:$0xff] }
 0x411   :  { %v5382_v13 = vadd.f32 %v5381_v49, %v5380_v28  ;;  %v5742_v39 = vsel %vm4171_vm1, %v5368_v18, %v5361_v43  ;;  %v10320_v44 = vmax.f32 %v10262_v12, 0.0  ;;  %v4497_v32 = vmax.f32 %v10265_v45, 0.0 }
 0x412   :  { %v5389_v22 = vadd.f32 %v5388_v38, %v5387_v51  ;;  %v5396_v7 = vadd.f32 %v5395_v48, %v5394_v30  ;;  %v5403_v41 = vadd.f32 %v5402_v2, %v5401_v59  ;;  %v5409_v1 = vrot.slane %v5408_v5, 1 }
 0x413   :  { %v5743_v52 = vsel %vm4173_vm2, %v5375_v24, %v5742_v39  ;;  %v5867_v31 = vadd.f32 %v6699_v29, %v10815_v23  ;;  %v5862_v15 = vadd.f32 %v5861_v26, %v10815_v23  ;;  %v4611_v53 = vmul.f32 %v4497_v32, %v10977_v40  ;;  %v10983_v26 = vld [vmem:[#allocation136_spill] sm:$0xff] }
 0x414   :  { %v5410_v20 = vadd.f32 %v5409_v1, %v5408_v5  ;;  %v5744_v54 = vsel %vm4175_vm3, %v5382_v13, %v5743_v52  ;;  %v4612_v12 = vmul.f32 %v4497_v32, %v10978_v33  ;;  %v4613_v55 = vmul.f32 %v4497_v32, %v10979_v63 }
 0x415   :  { %v5745_v45 = vsel %vm4177_vm4, %v5389_v22, %v5744_v54  ;;  %v10332_v8 = vadd.f32 %v10866_v11, %v5867_v31  ;;  %v10335_v61 = vadd.f32 %v10867_v50, %v5862_v15  ;;  %v4614_v21 = vmul.f32 %v4497_v32, %v10980_v27 }
 0x416   :  { %v5746_v29 = vsel %vm4179_vm5, %v5396_v7, %v5745_v45  ;;  %v4615_v0 = vmul.f32 %v4497_v32, %v10981_v34  ;;  %v4616_v25 = vmul.f32 %v4497_v32, %v10982_v6  ;;  %v4617_v9 = vmul.f32 %v4497_v32, %v10983_v26 }
 0x417   :  { %v5747_v14 = vsel %vm4181_vm6, %v5403_v41, %v5746_v29  ;;  %v5957_v17 = vmax.f32 %v10332_v8, 0.0  ;;  %v5956_v11 = vmax.f32 %v10335_v61, 0.0  ;;  %v4618_v10 = vmul.f32 %v4497_v32, %v10984_v36 }
 0x418   :  { %v5748_v50 = vsel %vm4183_vm7, %v5410_v20, %v5747_v14  ;;  %v5411_v57 = vsel %vm120_vm0, %v4611_v53, 0.0  ;;  %v5418_v62 = vsel %vm120_vm0, %v4612_v12, 0.0  ;;  %v5425_v28 = vsel %vm120_vm0, %v4613_v55, 0.0 }
 0x419   :  { %6716 = vmatmul.mubr.msk.f32.gmra.mrb[36].mxu1 %vm120_vm0, %v5748_v50  ;;  %v5979_v51 = vsel %vm120_vm0, %v5957_v17, -inf  ;;  %v5972_v30 = vsel %vm120_vm0, %v5956_v11, -inf  ;;  %v5412_v59 = vrot.slane %v5411_v57, 4  ;;  %v5419_v58 = vrot.slane %v5418_v62, 4 }
 0x41a   :  { %v5980_v43 = vrot.slane %v5979_v51, 4  ;;  %v5973_v18 = vrot.slane %v5972_v30, 4  ;;  %v5426_v24 = vrot.slane %v5425_v28, 4  ;;  %v5432_v49 = vsel %vm120_vm0, %v4614_v21, 0.0 }
 0x41b   :  { %v5413_v38 = vadd.f32 %v5412_v59, %v5411_v57  ;;  %v5420_v48 = vadd.f32 %v5419_v58, %v5418_v62  ;;  %v5433_v2 = vrot.slane %v5432_v49, 4  ;;  %v5439_v5 = vsel %vm120_vm0, %v4615_v0, 0.0 }
 0x41c   :  { %v5981_v13 = vmax.f32 %v5979_v51, %v5980_v43  ;;  %v5974_v39 = vmax.f32 %v5972_v30, %v5973_v18  ;;  %v5427_v32 = vadd.f32 %v5426_v24, %v5425_v28  ;;  %v5440_v22 = vrot.slane %v5439_v5, 4 }
 0x41d   :  { %v5414_v7 = vrot.slane %v5413_v38, 2  ;;  %v5421_v41 = vrot.slane %v5420_v48, 2  ;;  %v5434_v1 = vadd.f32 %v5433_v2, %v5432_v49  ;;  %v5446_v52 = vsel %vm120_vm0, %v4616_v25, 0.0 }
 0x41e   :  { %v5982_v31 = vrot.slane %v5981_v13, 2  ;;  %v5975_v15 = vrot.slane %v5974_v39, 2  ;;  %v5428_v40 = vrot.slane %v5427_v32, 2  ;;  %v5441_v53 = vadd.f32 %v5440_v22, %v5439_v5 }
 0x41f   :  { %v5415_v20 = vadd.f32 %v5414_v7, %v5413_v38  ;;  %v5422_v54 = vadd.f32 %v5421_v41, %v5420_v48  ;;  %v5435_v33 = vrot.slane %v5434_v1, 2  ;;  %v5447_v12 = vrot.slane %v5446_v52, 4 }
 0x420   :  { %v5983_v63 = vmax.f32 %v5981_v13, %v5982_v31  ;;  %v5976_v55 = vmax.f32 %v5974_v39, %v5975_v15  ;;  %v5429_v45 = vadd.f32 %v5428_v40, %v5427_v32  ;;  %v5442_v8 = vrot.slane %v5441_v53, 2  ;;  %v10985_v13 = vld [vmem:[#allocation128_spill] sm:$0xff]  ;;  %v10987_v15 = vld [vmem:[#allocation133_spill] sm:$0xff] }
 0x421   :  { %v5416_v61 = vrot.slane %v5415_v20, 1  ;;  %v5423_v27 = vrot.slane %v5422_v54, 1  ;;  %v5436_v21 = vadd.f32 %v5435_v33, %v5434_v1  ;;  %v5448_v29 = vadd.f32 %v5447_v12, %v5446_v52 }
 0x422   :  { %v5984_v34 = vrot.slane %v5983_v63, 1  ;;  %v5977_v0 = vrot.slane %v5976_v55, 1  ;;  %v5430_v6 = vrot.slane %v5429_v45, 1  ;;  %v5443_v25 = vadd.f32 %v5442_v8, %v5441_v53 }
 0x423   :  { %v5417_v26 = vadd.f32 %v5416_v61, %v5415_v20  ;;  %v5424_v14 = vadd.f32 %v5423_v27, %v5422_v54  ;;  %v5437_v36 = vrot.slane %v5436_v21, 1  ;;  %v5449_v50 = vrot.slane %v5448_v29, 2  ;;  %v10988_v54 = vld [vmem:[#allocation135_spill] sm:$0xff]  ;;  %v10991_v61 = vld [vmem:[#allocation141_spill] sm:$0xff] }
 0x424   :  { %v5985_v57 = vmax.f32 %v5983_v63, %v5984_v34  ;;  %v5978_v62 = vmax.f32 %v5976_v55, %v5977_v0  ;;  %v5431_v28 = vadd.f32 %v5430_v6, %v5429_v45  ;;  %v5444_v51 = vrot.slane %v5443_v25, 1  ;;  %v10989_v63 = vld [vmem:[#allocation137_spill] sm:$0xff]  ;;  %v10990_v45 = vld [vmem:[#allocation139_spill] sm:$0xff] }
 0x425   :  { %v5438_v30 = vadd.f32 %v5437_v36, %v5436_v21  ;;  %v5450_v59 = vadd.f32 %v5449_v50, %v5448_v29  ;;  %v5453_v58 = vsel %vm120_vm0, %v4617_v9, 0.0  ;;  %v5460_v43 = vsel %vm120_vm0, %v4618_v10, 0.0  ;;  %v10992_v29 = vld [vmem:[#allocation140_spill] sm:$0xff] }
 0x426   :  { %v6085_v18 = vsub.f32 %v5957_v17, %v5985_v57  ;;  %v6084_v24 = vsub.f32 %v5956_v11, %v5978_v62  ;;  %v5445_v49 = vadd.f32 %v5444_v51, %v5443_v25  ;;  %v5454_v38 = vrot.slane %v5453_v58, 4  ;;  %v10986_v17 = vld [vmem:[#allocation131_spill] sm:$0xff] }
 0x427   :  { %v5451_v48 = vrot.slane %v5450_v59, 1  ;;  %v5461_v2 = vrot.slane %v5460_v43, 4  ;;  %v5749_v5 = vsel %vm4171_vm1, %v5424_v14, %v5417_v26  ;;  %v4619_v39 = vmul.f32 %v10320_v44, %v10985_v13 }
 0x428   :  { %v6102_v32 = vmul.f32 1.442695, %v6085_v18  ;;  %v6100_v22 = vmul.f32 1.442695, %v6084_v24  ;;  %v5455_v7 = vadd.f32 %v5454_v38, %v5453_v58  ;;  %v5750_v41 = vsel %vm4173_vm2, %v5431_v28, %v5749_v5 }
 0x429   :  { %v5452_v1 = vadd.f32 %v5451_v48, %v5450_v59  ;;  %v5462_v9 = vadd.f32 %v5461_v2, %v5460_v43  ;;  %v5751_v10 = vsel %vm4175_vm3, %v5438_v30, %v5750_v41  ;;  %v4620_v11 = vmul.f32 %v10320_v44, %v10986_v17 }
 0x42a   :  { %6883 = vpow2.f32 %v6102_v32  ;;  %v5456_v52 = vrot.slane %v5455_v7, 2  ;;  %v5752_v31 = vsel %vm4177_vm4, %v5445_v49, %v5751_v10  ;;  %v4621_v40 = vmul.f32 %v10320_v44, %v10987_v15 }
 0x42b   :  { %6885 = vpow2.f32 %v6100_v22  ;;  %v5463_v53 = vrot.slane %v5462_v9, 2  ;;  %v5753_v20 = vsel %vm4179_vm5, %v5452_v1, %v5752_v31  ;;  %v4622_v33 = vmul.f32 %v10320_v44, %v10988_v54 }
 0x42c   :  { %v5457_v12 = vadd.f32 %v5456_v52, %v5455_v7  ;;  %v4623_v55 = vmul.f32 %v10320_v44, %v10989_v63  ;;  %v4624_v8 = vmul.f32 %v10320_v44, %v10990_v45  ;;  %v4625_v27 = vmul.f32 %v10320_v44, %v10991_v61 }
 0x42d   :  { %v5464_v21 = vadd.f32 %v5463_v53, %v5462_v9  ;;  %v4626_v34 = vmul.f32 %v10320_v44, %v10992_v29  ;;  %v5467_v0 = vsel %vm120_vm0, %v4619_v39, 0.0  ;;  %v5474_v6 = vsel %vm120_vm0, %v4620_v11, 0.0 }
 0x42e   :  { %v5458_v25 = vrot.slane %v5457_v12, 1  ;;  %v5468_v26 = vrot.slane %v5467_v0, 4  ;;  %v5475_v14 = vrot.slane %v5474_v6, 4  ;;  %v5481_v36 = vsel %vm120_vm0, %v4621_v40, 0.0 }
 0x42f   :  { %v5465_v50 = vrot.slane %v5464_v21, 1  ;;  %v5482_v57 = vrot.slane %v5481_v36, 4  ;;  %v5488_v62 = vsel %vm120_vm0, %v4622_v33, 0.0  ;;  %v5495_v28 = vsel %vm120_vm0, %v4623_v55, 0.0 }
 0x430   :  { %v5459_v51 = vadd.f32 %v5458_v25, %v5457_v12  ;;  %v5469_v30 = vadd.f32 %v5468_v26, %v5467_v0  ;;  %v5476_v59 = vadd.f32 %v5475_v14, %v5474_v6  ;;  %v5489_v58 = vrot.slane %v5488_v62, 4 }
 0x431   :  { %v5466_v44 = vadd.f32 %v5465_v50, %v5464_v21  ;;  %v5483_v43 = vadd.f32 %v5482_v57, %v5481_v36  ;;  %v5496_v18 = vrot.slane %v5495_v28, 4  ;;  %v5502_v24 = vsel %vm120_vm0, %v4624_v8, 0.0  ;;  %v6702_v5 = vpop.f32.mrb[26].mxu1 }
 0x432   :  { %v5754_v49 = vsel %vm4181_vm6, %v5459_v51, %v5753_v20  ;;  %v5470_v38 = vrot.slane %v5469_v30, 2  ;;  %v5477_v48 = vrot.slane %v5476_v59, 2  ;;  %v5490_v2 = vadd.f32 %v5489_v58, %v5488_v62  ;;  %v5871_v7 = vpop.f32.mrb[27].mxu1 }
 0x433   :  { %v5755_v13 = vsel %vm4183_vm7, %v5466_v44, %v5754_v49  ;;  %v5484_v39 = vrot.slane %v5483_v43, 2  ;;  %v5497_v32 = vadd.f32 %v5496_v18, %v5495_v28  ;;  %v5503_v22 = vrot.slane %v5502_v24, 4 }
 0x434   :  { %v10387_v41 = vpop.eup %6883  ;;  %6718 = vmatprep.mubr.msk.f32.mxu1 %vm120_vm0, %v5755_v13  ;;  %v5471_v1 = vadd.f32 %v5470_v38, %v5469_v30  ;;  %v5478_v9 = vadd.f32 %v5477_v48, %v5476_v59  ;;  %v5491_v10 = vrot.slane %v5490_v2, 2  ;;  %v5509_v17 = vsel %vm120_vm0, %v4625_v27, 0.0 }
 0x435   :  { %v10391_v11 = vpop.eup %6885  ;;  %v6139_v52 = vsel %vm120_vm0, %v10387_v41, 0.0  ;;  %v5485_v31 = vadd.f32 %v5484_v39, %v5483_v43  ;;  %v5498_v15 = vrot.slane %v5497_v32, 2  ;;  %v5504_v40 = vadd.f32 %v5503_v22, %v5502_v24 }
 0x436   :  { %v6140_v53 = vrot.slane %v6139_v52, 4  ;;  %v6132_v20 = vsel %vm120_vm0, %v10391_v11, 0.0  ;;  %v5472_v54 = vrot.slane %v5471_v1, 1  ;;  %v5479_v33 = vrot.slane %v5478_v9, 1 }
 0x437   :  { %v6133_v12 = vrot.slane %v6132_v20, 4  ;;  %v5486_v63 = vrot.slane %v5485_v31, 1  ;;  %v5492_v55 = vadd.f32 %v5491_v10, %v5490_v2  ;;  %v5499_v45 = vadd.f32 %v5498_v15, %v5497_v32  ;;  %v10993_v32 = vld [vmem:[#allocation40_spill] sm:$0xff] }
 0x438   :  { %v6141_v8 = vadd.f32 %v6140_v53, %v6139_v52  ;;  %v5473_v61 = vadd.f32 %v5472_v54, %v5471_v1  ;;  %v5480_v27 = vadd.f32 %v5479_v33, %v5478_v9  ;;  %v5505_v21 = vrot.slane %v5504_v40, 2 }
 0x439   :  { %v6134_v29 = vadd.f32 %v6133_v12, %v6132_v20  ;;  %v5487_v0 = vadd.f32 %v5486_v63, %v5485_v31  ;;  %v5493_v6 = vrot.slane %v5492_v55, 1  ;;  %v5500_v25 = vrot.slane %v5499_v45, 1 }
 0x43a   :  { %v6142_v26 = vrot.slane %v6141_v8, 2  ;;  %v5506_v14 = vadd.f32 %v5505_v21, %v5504_v40  ;;  %v5510_v36 = vrot.slane %v5509_v17, 4  ;;  %v5516_v50 = vsel %vm120_vm0, %v4626_v34, 0.0  ;;  %v10994_v40 = vld [vmem:[#allocation45_spill] sm:$0xff] }
 0x43b   :  { %v6135_v57 = vrot.slane %v6134_v29, 2  ;;  %v5494_v62 = vadd.f32 %v5493_v6, %v5492_v55  ;;  %v5517_v28 = vrot.slane %v5516_v50, 4  ;;  %v5756_v58 = vsel %vm4171_vm1, %v5480_v27, %v5473_v61 }
 0x43c   :  { %v6143_v51 = vadd.f32 %v6142_v26, %v6141_v8  ;;  %v5507_v30 = vrot.slane %v5506_v14, 1  ;;  %v5511_v59 = vadd.f32 %v5510_v36, %v5509_v17  ;;  %v5757_v18 = vsel %vm4173_vm2, %v5487_v0, %v5756_v58 }
 0x43d   :  { %v6136_v44 = vadd.f32 %v6135_v57, %v6134_v29  ;;  %v5518_v43 = vadd.f32 %v5517_v28, %v5516_v50  ;;  %v5877_v24 = vadd.f32 %v6702_v5, %v10815_v23  ;;  %v5501_v38 = vadd.f32 %v5500_v25, %v5499_v45 }
 0x43e   :  { %v6144_v49 = vrot.slane %v6143_v51, 1  ;;  %v5512_v48 = vrot.slane %v5511_v59, 2  ;;  %v5758_v2 = vsel %vm4175_vm3, %v5494_v62, %v5757_v18  ;;  %v5508_v13 = vadd.f32 %v5507_v30, %v5506_v14 }
 0x43f   :  { %v6137_v34 = vrot.slane %v6136_v44, 1  ;;  %v5519_v39 = vrot.slane %v5518_v43, 2  ;;  %v5943_v22 = vadd.f32 %v10993_v32, %v5877_v24  ;;  %v5759_v10 = vsel %vm4177_vm4, %v5501_v38, %v5758_v2  ;;  %v10997_v2 = vld [vmem:[#allocation60_spill] sm:$0xff] }
 0x440   :  { %v6145_v1 = vadd.f32 %v6144_v49, %v6143_v51  ;;  %v5513_v9 = vadd.f32 %v5512_v48, %v5511_v59  ;;  %v5872_v17 = vadd.f32 %v5871_v7, %v10815_v23  ;;  %v7089_v20 = vmov 0.0|0.0  }
 0x441   :  { %v6138_v52 = vadd.f32 %v6137_v34, %v6136_v44  ;;  %v5520_v31 = vadd.f32 %v5519_v39, %v5518_v43  ;;  %v5959_v15 = vmax.f32 %v5943_v22, 0.0  ;;  %6788 = vmatprep.subr.bf16.mxu0 %v7089_v20  ;;  %v5760_v33 = vsel %vm4179_vm5, %v5508_v13, %v5759_v10 }
 0x442   :  { %6887 = vrcp.f32 %v6145_v1  ;;  %v5514_v5 = vrot.slane %v5513_v9, 1  ;;  %v5942_v53 = vadd.f32 %v10994_v40, %v5872_v17 }
 0x443   :  { %6889 = vrcp.f32 %v6138_v52  ;;  %v5521_v54 = vrot.slane %v5520_v31, 1  ;;  %v5993_v12 = vsel %vm120_vm0, %v5959_v15, -inf }
 0x444   :  { %v5515_v63 = vadd.f32 %v5514_v5, %v5513_v9  ;;  %v5994_v55 = vrot.slane %v5993_v12, 4  ;;  %v5958_v45 = vmax.f32 %v5942_v53, 0.0 }
 0x445   :  { %v5522_v7 = vadd.f32 %v5521_v54, %v5520_v31 }
 0x446   :  { %v5761_v8 = vsel %vm4181_vm6, %v5515_v63, %v5760_v33  ;;  %v5995_v61 = vmax.f32 %v5993_v12, %v5994_v55  ;;  %v5986_v27 = vsel %vm120_vm0, %v5958_v45, -inf }
 0x447   :  { %v5762_v21 = vsel %vm4183_vm7, %v5522_v7, %v5761_v8  ;;  %v5987_v29 = vrot.slane %v5986_v27, 4 }
 0x448   :  { %6719 = vmatmul.mubr.msk.f32.gmra.mrb[38].mxu1 %vm120_vm0, %v5762_v21  ;;  %v5996_v0 = vrot.slane %v5995_v61, 2 }
 0x449   :  { %v5988_v6 = vmax.f32 %v5986_v27, %v5987_v29 }
 0x44a   :  { %v5997_v25 = vmax.f32 %v5995_v61, %v5996_v0 }
 0x44b   :  { %v5989_v26 = vrot.slane %v5988_v6, 2 }
 0x44c   :  { %v6888_v14 = vpop.eup %6887  ;;  %v5998_v36 = vrot.slane %v5997_v25, 1 }
 0x44d   :  { %v6890_v50 = vpop.eup %6889  ;;  %v5990_v57 = vmax.f32 %v5988_v6, %v5989_v26  ;;  %v6261_v62 = vmul.f32 %v6888_v14, %v10387_v41 }
 0x44e   :  { %v5999_v28 = vmax.f32 %v5997_v25, %v5998_v36  ;;  %v6260_v51 = vmul.f32 %v6890_v50, %v10391_v11 }
 0x44f   :  { %v5991_v30 = vrot.slane %v5990_v57, 1 }
 0x450   :  { %v6087_v58 = vsub.f32 %v5959_v15, %v5999_v28  ;;  %v6789_v44 = vpack.c.bf16 %v6261_v62, %v6260_v51 }
 0x451   :  { %v5992_v43 = vmax.f32 %v5990_v57, %v5991_v30 }
 0x452   :  { %v6106_v18 = vmul.f32 1.442695, %v6087_v58  ;;  %6791 = vmatpush3.bf16.xpose.msk.msra.mxu0 %vm10417_vm9, %v6789_v44 }
 0x453   :  { %v6086_v24 = vsub.f32 %v5958_v45, %v5992_v43  ;;  %6792 = vmatprep.subr.bf16.mxu0 %v7089_v20 }
 0x454   :  { %6891 = vpow2.f32 %v6106_v18 }
 0x455   :  { %v6104_v41 = vmul.f32 1.442695, %v6086_v24  ;;  %v6705_v11 = vpop.f32.mrb[28].mxu1 }
 0x456   :  { %v5887_v49 = vadd.f32 %v6705_v11, %v10815_v23  ;;  %v5881_v38 = vpop.f32.mrb[29].mxu1 }
 0x457   :  { %6893 = vpow2.f32 %v6104_v41  ;;  %v5882_v48 = vadd.f32 %v5881_v38, %v10815_v23 }
 0x458   :  { %v5945_v34 = vadd.f32 %v10997_v2, %v5887_v49 }
 0x459   :  { %v5944_v13 = vadd.f32 %v10903_v4, %v5882_v48 }
 0x45a   :  { %v5961_v39 = vmax.f32 %v5945_v34, 0.0 }
 0x45b   :  { %v5960_v32 = vmax.f32 %v5944_v13, 0.0 }
 0x45c   :  { %v6007_v22 = vsel %vm120_vm0, %v5961_v39, -inf }
 0x45d   :  { %v6008_v1 = vrot.slane %v6007_v22, 4  ;;  %v6000_v9 = vsel %vm120_vm0, %v5960_v32, -inf }
 0x45e   :  { %v6892_v10 = vpop.eup %6891  ;;  %v6001_v17 = vrot.slane %v6000_v9, 4 }
 0x45f   :  { %v6153_v52 = vsel %vm120_vm0, %v6892_v10, 0.0  ;;  %v6009_v31 = vmax.f32 %v6007_v22, %v6008_v1 }
 0x460   :  { %v6154_v15 = vrot.slane %v6153_v52, 4  ;;  %v6002_v5 = vmax.f32 %v6000_v9, %v6001_v17 }
 0x461   :  { %v6894_v40 = vpop.eup %6893  ;;  %v6010_v53 = vrot.slane %v6009_v31, 2 }
 0x462   :  { %v6155_v54 = vadd.f32 %v6154_v15, %v6153_v52  ;;  %v6146_v33 = vsel %vm120_vm0, %v6894_v40, 0.0  ;;  %v6003_v4 = vrot.slane %v6002_v5, 2 }
 0x463   :  { %v6147_v12 = vrot.slane %v6146_v33, 4  ;;  %v6011_v63 = vmax.f32 %v6009_v31, %v6010_v53 }
 0x464   :  { %v6156_v55 = vrot.slane %v6155_v54, 2  ;;  %v6004_v45 = vmax.f32 %v6002_v5, %v6003_v4 }
 0x465   :  { %v6148_v7 = vadd.f32 %v6147_v12, %v6146_v33  ;;  %v6012_v8 = vrot.slane %v6011_v63, 1 }
 0x466   :  { %v6157_v61 = vadd.f32 %v6156_v55, %v6155_v54  ;;  %v6005_v27 = vrot.slane %v6004_v45, 1 }
 0x467   :  { %v6149_v21 = vrot.slane %v6148_v7, 2  ;;  %v6013_v29 = vmax.f32 %v6011_v63, %v6012_v8 }
 0x468   :  { %v6158_v0 = vrot.slane %v6157_v61, 1  ;;  %v6006_v6 = vmax.f32 %v6004_v45, %v6005_v27 }
 0x469   :  { %v6150_v25 = vadd.f32 %v6149_v21, %v6148_v7  ;;  %v6089_v26 = vsub.f32 %v5961_v39, %v6013_v29 }
 0x46a   :  { %v6159_v14 = vadd.f32 %v6158_v0, %v6157_v61  ;;  %v6088_v36 = vsub.f32 %v5960_v32, %v6006_v6 }
 0x46b   :  { %v6151_v50 = vrot.slane %v6150_v25, 1  ;;  %v6110_v57 = vmul.f32 1.442695, %v6089_v26 }
 0x46c   :  { %6895 = vrcp.f32 %v6159_v14  ;;  %v6108_v62 = vmul.f32 1.442695, %v6088_v36 }
 0x46d   :  { %v6152_v28 = vadd.f32 %v6151_v50, %v6150_v25  ;;  %6897 = vpow2.f32 %v6110_v57 }
 0x46e   :  { %6899 = vpow2.f32 %v6108_v62 }
 0x46f   :  { %6901 = vrcp.f32 %v6152_v28 }
 0x476   :  { %v6896_v51 = vpop.eup %6895 }
 0x477   :  { %v6898_v30 = vpop.eup %6897  ;;  %v6263_v43 = vmul.f32 %v6896_v51, %v6892_v10 }
 0x478   :  { %v6900_v58 = vpop.eup %6899  ;;  %v6167_v44 = vsel %vm120_vm0, %v6898_v30, 0.0 }
 0x479   :  { %v6902_v18 = vpop.eup %6901  ;;  %v6168_v24 = vrot.slane %v6167_v44, 4  ;;  %v6160_v41 = vsel %vm120_vm0, %v6900_v58, 0.0 }
 0x47a   :  { %v6161_v11 = vrot.slane %v6160_v41, 4  ;;  %v6262_v49 = vmul.f32 %v6902_v18, %v6894_v40 }
 0x47b   :  { %v6169_v38 = vadd.f32 %v6168_v24, %v6167_v44  ;;  %v6708_v48 = vpop.f32.mrb[30].mxu1 }
 0x47c   :  { %v6162_v2 = vadd.f32 %v6161_v11, %v6160_v41  ;;  %v5897_v34 = vadd.f32 %v6708_v48, %v10815_v23  ;;  %v6793_v13 = vpack.c.bf16 %v6263_v43, %v6262_v49  ;;  %v5891_v39 = vpop.f32.mrb[31].mxu1 }
 0x47d   :  { %v6170_v32 = vrot.slane %v6169_v38, 2  ;;  %v5892_v22 = vadd.f32 %v5891_v39, %v10815_v23 }
 0x47e   :  { %v6163_v1 = vrot.slane %v6162_v2, 2  ;;  %v5947_v9 = vadd.f32 %v10920_v37, %v5897_v34  ;;  %6795 = vmatpush3.bf16.xpose.msk.msra.mxu0 %vm10417_vm9, %v6793_v13 }
 0x47f   :  { %v6171_v10 = vadd.f32 %v6170_v32, %v6169_v38  ;;  %v5946_v17 = vadd.f32 %v10921_v42, %v5892_v22  ;;  %6796 = vmatprep.subr.bf16.mxu0 %v7089_v20 }
 0x480   :  { %v6164_v52 = vadd.f32 %v6163_v1, %v6162_v2  ;;  %v5963_v31 = vmax.f32 %v5947_v9, 0.0 }
 0x481   :  { %v6172_v15 = vrot.slane %v6171_v10, 1  ;;  %v5962_v5 = vmax.f32 %v5946_v17, 0.0 }
 0x482   :  { %v6165_v40 = vrot.slane %v6164_v52, 1  ;;  %v6021_v53 = vsel %vm120_vm0, %v5963_v31, -inf }
 0x483   :  { %v6173_v54 = vadd.f32 %v6172_v15, %v6171_v10  ;;  %v6022_v33 = vrot.slane %v6021_v53, 4  ;;  %v6014_v4 = vsel %vm120_vm0, %v5962_v5, -inf }
 0x484   :  { %v6166_v37 = vadd.f32 %v6165_v40, %v6164_v52  ;;  %v6015_v12 = vrot.slane %v6014_v4, 4 }
 0x485   :  { %6903 = vrcp.f32 %v6173_v54  ;;  %v6023_v63 = vmax.f32 %v6021_v53, %v6022_v33 }
 0x486   :  { %6905 = vrcp.f32 %v6166_v37  ;;  %v6016_v55 = vmax.f32 %v6014_v4, %v6015_v12 }
 0x487   :  { %v6024_v42 = vrot.slane %v6023_v63, 2 }
 0x488   :  { %v6017_v45 = vrot.slane %v6016_v55, 2 }
 0x489   :  { %v6025_v7 = vmax.f32 %v6023_v63, %v6024_v42 }
 0x48a   :  { %v6018_v8 = vmax.f32 %v6016_v55, %v6017_v45 }
 0x48b   :  { %v6026_v61 = vrot.slane %v6025_v7, 1 }
 0x48c   :  { %v6019_v27 = vrot.slane %v6018_v8, 1 }
 0x48d   :  { %v6027_v21 = vmax.f32 %v6025_v7, %v6026_v61 }
 0x48e   :  { %v6020_v29 = vmax.f32 %v6018_v8, %v6019_v27 }
 0x48f   :  { %v6904_v0 = vpop.eup %6903  ;;  %v6091_v6 = vsub.f32 %v5963_v31, %v6027_v21 }
 0x490   :  { %v6906_v25 = vpop.eup %6905  ;;  %v6090_v26 = vsub.f32 %v5962_v5, %v6020_v29  ;;  %v6265_v14 = vmul.f32 %v6904_v0, %v6898_v30 }
 0x491   :  { %v6114_v36 = vmul.f32 1.442695, %v6091_v6  ;;  %v6264_v50 = vmul.f32 %v6906_v25, %v6900_v58 }
 0x492   :  { %v6112_v57 = vmul.f32 1.442695, %v6090_v26 }
 0x493   :  { %6907 = vpow2.f32 %v6114_v36  ;;  %v6797_v62 = vpack.c.bf16 %v6265_v14, %v6264_v50 }
 0x494   :  { %6909 = vpow2.f32 %v6112_v57 }
 0x495   :  { %6799 = vmatpush3.bf16.xpose.msk.msra.mxu0 %vm10417_vm9, %v6797_v62 }
 0x496   :  { %6800 = vmatprep.subr.bf16.mxu0 %v7089_v20 }
 0x49d   :  { %v6908_v28 = vpop.eup %6907 }
 0x49e   :  { %v6910_v51 = vpop.eup %6909  ;;  %v6181_v44 = vsel %vm120_vm0, %v6908_v28, 0.0 }
 0x49f   :  { %v6182_v43 = vrot.slane %v6181_v44, 4  ;;  %v6174_v18 = vsel %vm120_vm0, %v6910_v51, 0.0  ;;  %v6711_v24 = vpop.f32.mrb[32].mxu1 }
 0x4a0   :  { %v6175_v30 = vrot.slane %v6174_v18, 4  ;;  %v5907_v58 = vadd.f32 %v6711_v24, %v10815_v23  ;;  %v5901_v41 = vpop.f32.mrb[33].mxu1 }
 0x4a1   :  { %v6183_v11 = vadd.f32 %v6182_v43, %v6181_v44  ;;  %v5902_v49 = vadd.f32 %v5901_v41, %v10815_v23 }
 0x4a2   :  { %v6176_v38 = vadd.f32 %v6175_v30, %v6174_v18  ;;  %v5949_v48 = vadd.f32 %v9199_v46, %v5907_v58 }
 0x4a3   :  { %v6184_v2 = vrot.slane %v6183_v11, 2  ;;  %v5948_v34 = vadd.f32 %v9238_v35, %v5902_v49 }
 0x4a4   :  { %v6177_v13 = vrot.slane %v6176_v38, 2  ;;  %v5965_v39 = vmax.f32 %v5949_v48, 0.0 }
 0x4a5   :  { %v6185_v32 = vadd.f32 %v6184_v2, %v6183_v11  ;;  %v5964_v22 = vmax.f32 %v5948_v34, 0.0 }
 0x4a6   :  { %v6178_v1 = vadd.f32 %v6177_v13, %v6176_v38  ;;  %v6035_v9 = vsel %vm120_vm0, %v5965_v39, -inf }
 0x4a7   :  { %v6186_v10 = vrot.slane %v6185_v32, 1  ;;  %v6036_v17 = vrot.slane %v6035_v9, 4  ;;  %v6028_v52 = vsel %vm120_vm0, %v5964_v22, -inf }
 0x4a8   :  { %v6179_v31 = vrot.slane %v6178_v1, 1  ;;  %v6029_v15 = vrot.slane %v6028_v52, 4 }
 0x4a9   :  { %v6187_v5 = vadd.f32 %v6186_v10, %v6185_v32  ;;  %v6037_v40 = vmax.f32 %v6035_v9, %v6036_v17 }
 0x4aa   :  { %v6180_v53 = vadd.f32 %v6179_v31, %v6178_v1  ;;  %v6030_v46 = vmax.f32 %v6028_v52, %v6029_v15 }
 0x4ab   :  { %6911 = vrcp.f32 %v6187_v5  ;;  %v6038_v54 = vrot.slane %v6037_v40, 2 }
 0x4ac   :  { %6913 = vrcp.f32 %v6180_v53  ;;  %v6031_v35 = vrot.slane %v6030_v46, 2 }
 0x4ad   :  { %v6039_v33 = vmax.f32 %v6037_v40, %v6038_v54 }
 0x4ae   :  { %v6032_v4 = vmax.f32 %v6030_v46, %v6031_v35 }
 0x4af   :  { %v6040_v37 = vrot.slane %v6039_v33, 1 }
 0x4b0   :  { %v6033_v12 = vrot.slane %v6032_v4, 1 }
 0x4b1   :  { %v6041_v63 = vmax.f32 %v6039_v33, %v6040_v37  ;;  %v10998_v37 = vmov 0.0  }
 0x4b2   :  { %v6034_v55 = vmax.f32 %v6032_v4, %v6033_v12  ;;  %6753 = vmatprep.mubr.msk.f32.mxu0 %vm7090_vm10, %v10998_v37 }
 0x4b3   :  { %v6093_v42 = vsub.f32 %v5965_v39, %v6041_v63 }
 0x4b4   :  { %v6092_v45 = vsub.f32 %v5964_v22, %v6034_v55 }
 0x4b5   :  { %v6912_v7 = vpop.eup %6911  ;;  %v6118_v8 = vmul.f32 1.442695, %v6093_v42 }
 0x4b6   :  { %v6914_v61 = vpop.eup %6913  ;;  %v6116_v27 = vmul.f32 1.442695, %v6092_v45  ;;  %v6267_v21 = vmul.f32 %v6912_v7, %v6908_v28 }
 0x4b7   :  { %6915 = vpow2.f32 %v6118_v8  ;;  %v6266_v29 = vmul.f32 %v6914_v61, %v6910_v51 }
 0x4b8   :  { %6917 = vpow2.f32 %v6116_v27 }
 0x4b9   :  { %v6801_v0 = vpack.c.bf16 %v6267_v21, %v6266_v29 }
 0x4bb   :  { %6803 = vmatpush3.bf16.xpose.msk.msra.mxu0 %vm10417_vm9, %v6801_v0 }
 0x4bc   :  { %6804 = vmatprep.subr.bf16.mxu0 %v7089_v20 }
 0x4c1   :  { %v6916_v6 = vpop.eup %6915 }
 0x4c2   :  { %v6918_v25 = vpop.eup %6917  ;;  %v6195_v26 = vsel %vm120_vm0, %v6916_v6, 0.0 }
 0x4c3   :  { %v6196_v14 = vrot.slane %v6195_v26, 4  ;;  %v6188_v36 = vsel %vm120_vm0, %v6918_v25, 0.0 }
 0x4c4   :  { %v6189_v50 = vrot.slane %v6188_v36, 4 }
 0x4c5   :  { %v6197_v57 = vadd.f32 %v6196_v14, %v6195_v26 }
 0x4c6   :  { %v6190_v62 = vadd.f32 %v6189_v50, %v6188_v36 }
 0x4c7   :  { %v6198_v28 = vrot.slane %v6197_v57, 2  ;;  %v6714_v44 = vpop.f32.mrb[34].mxu1 }
 0x4c8   :  { %v6191_v51 = vrot.slane %v6190_v62, 2  ;;  %v5917_v43 = vadd.f32 %v6714_v44, %v10815_v23  ;;  %v5911_v18 = vpop.f32.mrb[35].mxu1 }
 0x4c9   :  { %v6199_v24 = vadd.f32 %v6198_v28, %v6197_v57  ;;  %v5912_v30 = vadd.f32 %v5911_v18, %v10815_v23 }
 0x4ca   :  { %v6192_v58 = vadd.f32 %v6191_v51, %v6190_v62  ;;  %v5951_v41 = vadd.f32 %v10950_v19, %v5917_v43 }
 0x4cb   :  { %v6200_v11 = vrot.slane %v6199_v24, 1  ;;  %v5950_v49 = vadd.f32 %v10951_v3, %v5912_v30 }
 0x4cc   :  { %v6193_v38 = vrot.slane %v6192_v58, 1  ;;  %v5967_v48 = vmax.f32 %v5951_v41, 0.0 }
 0x4cd   :  { %v6201_v2 = vadd.f32 %v6200_v11, %v6199_v24  ;;  %v5966_v34 = vmax.f32 %v5950_v49, 0.0 }
 0x4ce   :  { %v6194_v13 = vadd.f32 %v6193_v38, %v6192_v58  ;;  %v6049_v39 = vsel %vm120_vm0, %v5967_v48, -inf }
 0x4cf   :  { %6919 = vrcp.f32 %v6201_v2  ;;  %v6050_v32 = vrot.slane %v6049_v39, 4  ;;  %v6042_v22 = vsel %vm120_vm0, %v5966_v34, -inf }
 0x4d0   :  { %6921 = vrcp.f32 %v6194_v13  ;;  %v6043_v1 = vrot.slane %v6042_v22, 4 }
 0x4d1   :  { %v6051_v9 = vmax.f32 %v6049_v39, %v6050_v32 }
 0x4d2   :  { %v6044_v10 = vmax.f32 %v6042_v22, %v6043_v1 }
 0x4d3   :  { %v6052_v17 = vrot.slane %v6051_v9, 2 }
 0x4d4   :  { %v6045_v19 = vrot.slane %v6044_v10, 2 }
 0x4d5   :  { %v6053_v52 = vmax.f32 %v6051_v9, %v6052_v17 }
 0x4d6   :  { %v6046_v31 = vmax.f32 %v6044_v10, %v6045_v19 }
 0x4d7   :  { %v6054_v3 = vrot.slane %v6053_v52, 1 }
 0x4d8   :  { %v6047_v15 = vrot.slane %v6046_v31, 1 }
 0x4d9   :  { %v6920_v5 = vpop.eup %6919  ;;  %v6055_v40 = vmax.f32 %v6053_v52, %v6054_v3 }
 0x4da   :  { %v6922_v53 = vpop.eup %6921  ;;  %v6048_v46 = vmax.f32 %v6046_v31, %v6047_v15  ;;  %v6269_v54 = vmul.f32 %v6920_v5, %v6916_v6 }
 0x4db   :  { %v6095_v35 = vsub.f32 %v5967_v48, %v6055_v40  ;;  %v6268_v33 = vmul.f32 %v6922_v53, %v6918_v25 }
 0x4dc   :  { %v6094_v4 = vsub.f32 %v5966_v34, %v6048_v46 }
 0x4dd   :  { %v6122_v12 = vmul.f32 1.442695, %v6095_v35  ;;  %v6805_v63 = vpack.c.bf16 %v6269_v54, %v6268_v33 }
 0x4de   :  { %v6120_v55 = vmul.f32 1.442695, %v6094_v4 }
 0x4df   :  { %6923 = vpow2.f32 %v6122_v12  ;;  %6807 = vmatpush3.bf16.xpose.msk.msra.mxu0 %vm10417_vm9, %v6805_v63 }
 0x4e0   :  { %6925 = vpow2.f32 %v6120_v55  ;;  %6808 = vmatprep.subr.bf16.mxu0 %v7089_v20 }
 0x4e9   :  { %v6924_v42 = vpop.eup %6923 }
 0x4ea   :  { %v6926_v45 = vpop.eup %6925  ;;  %v6209_v7 = vsel %vm120_vm0, %v6924_v42, 0.0 }
 0x4eb   :  { %v6210_v8 = vrot.slane %v6209_v7, 4  ;;  %v6202_v61 = vsel %vm120_vm0, %v6926_v45, 0.0 }
 0x4ec   :  { %v6203_v27 = vrot.slane %v6202_v61, 4  ;;  %v6717_v21 = vpop.f32.mrb[36].mxu1 }
 0x4ed   :  { %v6211_v29 = vadd.f32 %v6210_v8, %v6209_v7  ;;  %v5927_v0 = vadd.f32 %v6717_v21, %v10815_v23  ;;  %v5921_v6 = vpop.f32.mrb[37].mxu1 }
 0x4ee   :  { %v6204_v25 = vadd.f32 %v6203_v27, %v6202_v61  ;;  %v5922_v26 = vadd.f32 %v5921_v6, %v10815_v23 }
 0x4ef   :  { %v6212_v14 = vrot.slane %v6211_v29, 2  ;;  %v5953_v36 = vadd.f32 %v10966_v60, %v5927_v0 }
 0x4f0   :  { %v6205_v50 = vrot.slane %v6204_v25, 2  ;;  %v5952_v57 = vadd.f32 %v10967_v16, %v5922_v26 }
 0x4f1   :  { %v6213_v62 = vadd.f32 %v6212_v14, %v6211_v29  ;;  %v5969_v28 = vmax.f32 %v5953_v36, 0.0 }
 0x4f2   :  { %v6206_v44 = vadd.f32 %v6205_v50, %v6204_v25  ;;  %v5968_v51 = vmax.f32 %v5952_v57, 0.0 }
 0x4f3   :  { %v6214_v43 = vrot.slane %v6213_v62, 1  ;;  %v6063_v18 = vsel %vm120_vm0, %v5969_v28, -inf }
 0x4f4   :  { %v6207_v24 = vrot.slane %v6206_v44, 1  ;;  %v6064_v30 = vrot.slane %v6063_v18, 4  ;;  %v6056_v58 = vsel %vm120_vm0, %v5968_v51, -inf }
 0x4f5   :  { %v6215_v41 = vadd.f32 %v6214_v43, %v6213_v62  ;;  %v6057_v11 = vrot.slane %v6056_v58, 4 }
 0x4f6   :  { %v6208_v49 = vadd.f32 %v6207_v24, %v6206_v44  ;;  %v6065_v38 = vmax.f32 %v6063_v18, %v6064_v30 }
 0x4f7   :  { %6927 = vrcp.f32 %v6215_v41  ;;  %v6058_v60 = vmax.f32 %v6056_v58, %v6057_v11 }
 0x4f8   :  { %6929 = vrcp.f32 %v6208_v49  ;;  %v6066_v48 = vrot.slane %v6065_v38, 2 }
 0x4f9   :  { %v6059_v16 = vrot.slane %v6058_v60, 2 }
 0x4fa   :  { %v6067_v2 = vmax.f32 %v6065_v38, %v6066_v48 }
 0x4fb   :  { %v6060_v34 = vmax.f32 %v6058_v60, %v6059_v16 }
 0x4fc   :  { %v6068_v13 = vrot.slane %v6067_v2, 1 }
 0x4fd   :  { %v6061_v39 = vrot.slane %v6060_v34, 1 }
 0x4fe   :  { %v6069_v32 = vmax.f32 %v6067_v2, %v6068_v13 }
 0x4ff   :  { %v6062_v22 = vmax.f32 %v6060_v34, %v6061_v39 }
 0x500   :  { %v6097_v1 = vsub.f32 %v5969_v28, %v6069_v32 }
 0x501   :  { %v6928_v9 = vpop.eup %6927  ;;  %v6096_v10 = vsub.f32 %v5968_v51, %v6062_v22 }
 0x502   :  { %v6930_v17 = vpop.eup %6929  ;;  %v6126_v19 = vmul.f32 1.442695, %v6097_v1  ;;  %v6271_v52 = vmul.f32 %v6928_v9, %v6924_v42 }
 0x503   :  { %v6124_v31 = vmul.f32 1.442695, %v6096_v10  ;;  %v6270_v3 = vmul.f32 %v6930_v17, %v6926_v45 }
 0x504   :  { %6931 = vpow2.f32 %v6126_v19 }
 0x505   :  { %6933 = vpow2.f32 %v6124_v31  ;;  %v6809_v15 = vpack.c.bf16 %v6271_v52, %v6270_v3 }
 0x507   :  { %6811 = vmatpush3.bf16.xpose.msk.msra.mxu0 %vm10417_vm9, %v6809_v15 }
 0x508   :  { %6812 = vmatprep.subr.bf16.mxu0 %v7089_v20 }
 0x50e   :  { %v6932_v5 = vpop.eup %6931 }
 0x50f   :  { %v6934_v40 = vpop.eup %6933  ;;  %v6223_v53 = vsel %vm120_vm0, %v6932_v5, 0.0 }
 0x510   :  { %v6224_v46 = vrot.slane %v6223_v53, 4  ;;  %v6216_v54 = vsel %vm120_vm0, %v6934_v40, 0.0 }
 0x511   :  { %v6217_v35 = vrot.slane %v6216_v54, 4 }
 0x512   :  { %v6225_v33 = vadd.f32 %v6224_v46, %v6223_v53 }
 0x513   :  { %v6218_v4 = vadd.f32 %v6217_v35, %v6216_v54  ;;  %v7091_v35 = vmov 1.0  }
 0x514   :  { %v6226_v37 = vrot.slane %v6225_v33, 2 }
 0x515   :  { %v6219_v12 = vrot.slane %v6218_v4, 2 }
 0x516   :  { %v6227_v63 = vadd.f32 %v6226_v37, %v6225_v33 }
 0x517   :  { %v6220_v55 = vadd.f32 %v6219_v12, %v6218_v4 }
 0x518   :  { %v6228_v42 = vrot.slane %v6227_v63, 1 }
 0x519   :  { %v6221_v45 = vrot.slane %v6220_v55, 1 }
 0x51a   :  { %v6229_v7 = vadd.f32 %v6228_v42, %v6227_v63 }
 0x51b   :  { %v6222_v8 = vadd.f32 %v6221_v45, %v6220_v55  ;;  %v6720_v61 = vpop.f32.mrb[38].mxu1 }
 0x51c   :  { %6935 = vrcp.f32 %v6229_v7  ;;  %v5937_v27 = vadd.f32 %v6720_v61, %v10815_v23  ;;  %v5931_v21 = vpop.f32.mrb[39].mxu1 }
 0x51d   :  { %6937 = vrcp.f32 %v6222_v8  ;;  %v5932_v29 = vadd.f32 %v5931_v21, %v10815_v23 }
 0x51e   :  { %v5955_v0 = vadd.f32 %v9613_v56, %v5937_v27 }
 0x51f   :  { %v5954_v6 = vadd.f32 %v9620_v47, %v5932_v29 }
 0x520   :  { %v5971_v25 = vmax.f32 %v5955_v0, 0.0 }
 0x521   :  { %v5970_v26 = vmax.f32 %v5954_v6, 0.0 }
 0x522   :  { %v6077_v14 = vsel %vm120_vm0, %v5971_v25, -inf }
 0x523   :  { %v6078_v36 = vrot.slane %v6077_v14, 4  ;;  %v6070_v50 = vsel %vm120_vm0, %v5970_v26, -inf }
 0x524   :  { %v6071_v57 = vrot.slane %v6070_v50, 4 }
 0x525   :  { %v6079_v62 = vmax.f32 %v6077_v14, %v6078_v36 }
 0x526   :  { %v6936_v28 = vpop.eup %6935  ;;  %v6072_v44 = vmax.f32 %v6070_v50, %v6071_v57 }
 0x527   :  { %v6938_v51 = vpop.eup %6937  ;;  %v6080_v43 = vrot.slane %v6079_v62, 2  ;;  %v6273_v18 = vmul.f32 %v6936_v28, %v6932_v5 }
 0x528   :  { %v6073_v24 = vrot.slane %v6072_v44, 2  ;;  %v6272_v23 = vmul.f32 %v6938_v51, %v6934_v40 }
 0x529   :  { %v6081_v30 = vmax.f32 %v6079_v62, %v6080_v43 }
 0x52a   :  { %v6074_v56 = vmax.f32 %v6072_v44, %v6073_v24  ;;  %v6813_v58 = vpack.c.bf16 %v6273_v18, %v6272_v23 }
 0x52b   :  { %v6082_v47 = vrot.slane %v6081_v30, 1 }
 0x52c   :  { %v6075_v41 = vrot.slane %v6074_v56, 1  ;;  %6815 = vmatpush3.bf16.xpose.msk.msra.mxu0 %vm10417_vm9, %v6813_v58 }
 0x52d   :  { %v6083_v11 = vmax.f32 %v6081_v30, %v6082_v47  ;;  %6816 = vmatprep.subr.bf16.mxu0 %v7089_v20 }
 0x52e   :  { %v6076_v49 = vmax.f32 %v6074_v56, %v6075_v41 }
 0x52f   :  { %v6099_v38 = vsub.f32 %v5971_v25, %v6083_v11 }
 0x530   :  { %v6098_v60 = vsub.f32 %v5970_v26, %v6076_v49 }
 0x531   :  { %v6130_v48 = vmul.f32 1.442695, %v6099_v38 }
 0x532   :  { %v6128_v16 = vmul.f32 1.442695, %v6098_v60 }
 0x533   :  { %6939 = vpow2.f32 %v6130_v48 }
 0x534   :  { %6941 = vpow2.f32 %v6128_v16 }
 0x53d   :  { %v6940_v2 = vpop.eup %6939 }
 0x53e   :  { %v6942_v34 = vpop.eup %6941  ;;  %v6237_v13 = vsel %vm120_vm0, %v6940_v2, 0.0 }
 0x53f   :  { %v6238_v39 = vrot.slane %v6237_v13, 4  ;;  %v6230_v32 = vsel %vm120_vm0, %v6942_v34, 0.0 }
 0x540   :  { %v6231_v22 = vrot.slane %v6230_v32, 4 }
 0x541   :  { %v6239_v1 = vadd.f32 %v6238_v39, %v6237_v13 }
 0x542   :  { %v6232_v9 = vadd.f32 %v6231_v22, %v6230_v32 }
 0x543   :  { %v6240_v10 = vrot.slane %v6239_v1, 2 }
 0x544   :  { %v6233_v17 = vrot.slane %v6232_v9, 2 }
 0x545   :  { %v6241_v20 = vadd.f32 %v6240_v10, %v6239_v1 }
 0x546   :  { %v6234_v19 = vadd.f32 %v6233_v17, %v6232_v9 }
 0x547   :  { %v6242_v52 = vrot.slane %v6241_v20, 1 }
 0x548   :  { %v6235_v31 = vrot.slane %v6234_v19, 1 }
 0x549   :  { %v6243_v3 = vadd.f32 %v6242_v52, %v6241_v20 }
 0x54a   :  { %v6236_v15 = vadd.f32 %v6235_v31, %v6234_v19 }
 0x54b   :  { %6943 = vrcp.f32 %v6243_v3 }
 0x54c   :  { %6945 = vrcp.f32 %v6236_v15 }
 0x555   :  { %v6944_v5 = vpop.eup %6943 }
 0x556   :  { %v6946_v40 = vpop.eup %6945  ;;  %v6275_v53 = vmul.f32 %v6944_v5, %v6940_v2 }
 0x557   :  { %v6274_v46 = vmul.f32 %v6946_v40, %v6942_v34 }
 0x559   :  { %v6817_v54 = vpack.c.bf16 %v6275_v53, %v6274_v46 }
 0x55b   :  { %6819 = vmatpush3.bf16.xpose.msk.msra.mxu0 %vm10417_vm9, %v6817_v54 }
 0x562   :  { %6754 = vmatmul.mubr.msk.f32.vlgmr.msra.gmra.mrb[16].mxu0 %vm120_vm0, %v7091_v35 }
 0x635   :  { %v6393_v33 = vpop.f32.mrb[16].mxu0 }
 0x636   :  { %6397 = vst [vmem:[#allocation10] sm:$0x1] %v6393_v33  ;;  %v6755_v4 = vpop.f32.mrb[17].mxu0 }
 0x637   :  { %7063 = shalt.err (!%p7060_p8)
}
 0x638   :  { %s7064_s14 = scalar_lea.hbm %s10512_s4, 16 }
 0x639   :  { %p7065_p9 = scmp.ne.s32.totalorder %s10512_s4, %s7064_s14  ;;  %p7068_p10 = scmp.lt.u32.totalorder %s7064_s14, %s10512_s4 }
 0x63b   :  { %p7070_p11 = pnand %p7068_p10, %p7065_p9 }
 0x63d   :  { %7073 = shalt.err (!%p7070_p11)
}
 0x63e   :  { %6407 = dma.vmem_to_hbm [thread:$0]  %s6405_s28, 16, %s10512_s4, [#allocation4]  }
 0x63f   :  { %7080 = dma.done.wait [#allocation4], 16  }
 0x640   :  { %7081 = vsyncadd [#allocation4], 4294967280 }
 0x641   :  { %6411 = vsyncpa [#allocation3], 1 }
 0x642   :  { %6412 = vsyncpa [#allocation6], 1 }
 0x643   :  { %6413 = vsyncpa [#allocation9], 1 }
 0x644   :  { %6414 = vsyncpa [#allocation4], 1 }

</bundles_post_ra>
